<compile_context>
chip_gen: v6e
topology: v6e:2x2x1
jax: 0.10.0
libtpu: 0.0.40
codegen_flags: <defaults>
</compile_context>

<pallas_src>
import math
import jax
import jax.numpy as jnp
from jax.experimental import pallas as pl
from jax.experimental.pallas import tpu as pltpu

TIME_STEPS = 48  # hard-coded in the reference module


def _round_up(n, m):
    return ((n + m - 1) // m) * m


def beta_attention_kernel(params_ref, btime_ref, x_ref, x2_ref, w_ref, v_ref, a_ref):
    # params_ref: SMEM f32[3] = [sigmoid(rate2), 1 + sigmoid(rate2), rate * 48]
    # btime_ref:  VMEM (1, T)      = (47 - t)/48 + 0.01
    # x_ref:      VMEM (TB, T, D)  f32   input block
    # x2_ref:     VMEM (TB, T)     f32   input2 block
    # w_ref:      VMEM (D, 2H)     bf16  = [Wx | Wt]
    # v_ref:      VMEM (TB, D)     f32
    # a_ref:      VMEM (TB, T)     f32
    sr2 = params_ref[0]
    one_plus_sr2 = params_ref[1]
    rate48 = params_ref[2]

    x = x_ref[...]                        # (TB, T, D)
    x2 = x2_ref[...]                      # (TB, T)
    b_time = btime_ref[...]               # (1, T)
    TB, T, D = x.shape
    H2 = w_ref.shape[1]
    H = H2 // 2

    # --- fused projection: one bf16 MXU matmul over the whole batch block ------
    xb = x.reshape(TB * T, D).astype(jnp.bfloat16)
    kq = jnp.dot(xb, w_ref[...], preferred_element_type=jnp.float32)  # (TB*T, 2H)
    kq = kq.reshape(TB, T, H2)
    k = kq[:, :, :H]                      # (TB, T, H)  == input @ Wx
    q = kq[:, T - 1:T, H:]                # (TB, 1, H)  == input[:, -1, :] @ Wt

    # dot_product = q @ k^T, as VPU broadcast-multiply + reduce over H.
    dot = jnp.sum(q * k, axis=-1)         # (TB, T)

    # b_value_decays = sigmoid(input2) / sigmoid(max(|input2|, axis=time))
    sig_x2 = jax.nn.sigmoid(x2)
    max_abs = jnp.max(jnp.abs(x2), axis=-1, keepdims=True)            # (TB, 1)
    b_val = sig_x2 * pl.reciprocal(jax.nn.sigmoid(max_abs), approx=True)

    f_beta = (one_plus_sr2 * b_time * b_val) * pl.reciprocal(
        sr2 * b_time + b_val, approx=True)

    sig_dot = jax.nn.sigmoid(dot)
    denom = rate48 * jnp.log(2.72 + (1.0 - sig_dot)) * f_beta
    e = jnp.maximum(sig_dot * pl.reciprocal(denom, approx=True), 0.0)  # ReLU

    # softmax over the time axis (PyTorch nn.Softmax() -> dim=1 for 2-D input)
    e_max = jnp.max(e, axis=-1, keepdims=True)
    ex = jnp.exp(e - e_max)
    a = ex * pl.reciprocal(jnp.sum(ex, axis=-1, keepdims=True), approx=True)

    # v = a @ input, as VPU multiply + reduce over T (keeps x in f32).
    v = jnp.sum(a[:, :, None] * x, axis=1)                            # (TB, D)

    a_ref[...] = a.astype(a_ref.dtype)
    v_ref[...] = v.astype(v_ref.dtype)


def beta_attention(x, x2, wt, wx, rate, rate2, *, block_b=256):
    B, T, D = x.shape
    H = wt.shape[1]
    assert T == TIME_STEPS, "BetaAttention hard-codes 48 time steps"

    # Batch block: a multiple of 8 (sublanes) so blocks tile cleanly; pad B up to it.
    TB = _round_up(min(block_b, _round_up(B, 8)), 8)
    Bp = _round_up(B, TB)
    if Bp != B:
        x = jnp.pad(x, ((0, Bp - B), (0, 0), (0, 0)))
        x2 = jnp.pad(x2, ((0, Bp - B), (0, 0)))

    # Hoisted scalars (SMEM) and constants (VMEM).
    rate = jnp.asarray(rate, jnp.float32)
    rate2 = jnp.asarray(rate2, jnp.float32)
    sr2 = jax.nn.sigmoid(rate2)
    params = jnp.stack([sr2, 1.0 + sr2, rate * jnp.float32(T)]).astype(jnp.float32)
    b_time = ((jnp.arange(T - 1, -1, -1, dtype=jnp.float32) / jnp.float32(T))
              + 0.01)[None, :]                                        # (1, T)
    w = jnp.concatenate([wx, wt], axis=1).astype(jnp.bfloat16)        # (D, 2H)

    grid_spec = pltpu.PrefetchScalarGridSpec(
        num_scalar_prefetch=0,
        grid=(Bp // TB,),
        in_specs=[
            pl.BlockSpec(memory_space=pltpu.MemorySpace.SMEM),        # scalar params
            pl.BlockSpec((1, T), lambda b: (0, 0)),                   # b_time_decays
            pl.BlockSpec((TB, T, D), lambda b: (b, 0, 0)),            # input
            pl.BlockSpec((TB, T), lambda b: (b, 0)),                  # input2
            pl.BlockSpec((D, 2 * H), lambda b: (0, 0)),               # [Wx | Wt]
        ],
        out_specs=[
            pl.BlockSpec((TB, D), lambda b: (b, 0)),                  # v
            pl.BlockSpec((TB, T), lambda b: (b, 0)),                  # a
        ],
    )

    v, a = pl.pallas_call(
        beta_attention_kernel,
        out_shape=(jax.ShapeDtypeStruct((Bp, D), jnp.float32),
                   jax.ShapeDtypeStruct((Bp, T), jnp.float32)),
        grid_spec=grid_spec,
        compiler_params=pltpu.CompilerParams(dimension_semantics=("parallel",)),
    )(params, b_time, x, x2, w)
    return v[:B], a[:B]


def beta_attention_ref(x, x2, wt, wx, rate, rate2):
    """Pure-JAX reference mirroring the PyTorch forward (for sanity checking)."""
    B, T, D = x.shape
    hp = jax.lax.Precision.HIGHEST
    b_time = (jnp.arange(47, -1, -1, dtype=jnp.float32) / 48.0)[None, :] + 0.01   # (1, 48)
    q = jnp.matmul(x[:, -1, :], wt, precision=hp)[:, None, :]                     # (B,1,H)
    k = jnp.matmul(x, wx, precision=hp)                                           # (B,T,H)
    dot = jnp.matmul(q, jnp.swapaxes(k, 1, 2), precision=hp)[:, 0, :]             # (B,T)
    b_val = jax.nn.sigmoid(x2) / jax.nn.sigmoid(jnp.max(jnp.abs(x2), axis=1, keepdims=True))
    sr2 = jax.nn.sigmoid(jnp.float32(rate2))
    f_beta = (1.0 + sr2) * b_time * b_val / (sr2 * b_time + b_val)
    sig_dot = jax.nn.sigmoid(dot)
    denom = jnp.float32(rate) * (jnp.log(2.72 + (1.0 - sig_dot)) * f_beta) * 48.0
    e = jnp.maximum(sig_dot / denom, 0.0)
    a = jax.nn.softmax(e, axis=1)
    v = jnp.matmul(a[:, None, :], x, precision=hp)[:, 0, :]
    return v, a


if __name__ == "__main__":
    B, T = 12, TIME_STEPS   # B not a multiple of 8 -> exercises the batch padding path
    D = 16                  # attention_input_dim
    H = 32                  # attention_hidden_dim

    key = jax.random.PRNGKey(0)
    kx, kx2, kwt, kwx = jax.random.split(key, 4)

    x = jax.random.normal(kx, (B, T, D), dtype=jnp.float32)
    x2 = jax.random.normal(kx2, (B, T), dtype=jnp.float32)

    # kaiming_uniform_(a=sqrt(5)) on a (D, H) matrix: bound = 1/sqrt(fan_in) = 1/sqrt(H)
    bound = 1.0 / math.sqrt(H)
    wt = jax.random.uniform(kwt, (D, H), jnp.float32, -bound, bound)
    wx = jax.random.uniform(kwx, (D, H), jnp.float32, -bound, bound)
    rate, rate2 = 0.8, 0.1

    v, a = beta_attention(x, x2, wt, wx, rate, rate2)
    jax.block_until_ready((v, a))

    v_ref, a_ref = beta_attention_ref(x, x2, wt, wx, rate, rate2)
    assert v.shape == (B, D) and a.shape == (B, T)
    assert jnp.allclose(v, v_ref, rtol=5e-3, atol=5e-3), float(jnp.max(jnp.abs(v - v_ref)))
    assert jnp.allclose(a, a_ref, rtol=5e-3, atol=5e-3), float(jnp.max(jnp.abs(a - a_ref)))

    print("KERNEL_OK")
</pallas_src>

<mosaic_0001>
module attributes {stable_mosaic.version = 11 : i64} {
  func.func @beta_attention_kernel(%arg0: i32, %arg1: memref<3xf32, #tpu.memory_space<smem>>, %arg2: memref<1x48xf32, #tpu.memory_space<vmem>>, %arg3: memref<16x48x16xf32, #tpu.memory_space<vmem>>, %arg4: memref<16x48xf32, #tpu.memory_space<vmem>>, %arg5: memref<16x64xbf16, #tpu.memory_space<vmem>>, %arg6: memref<16x16xf32, #tpu.memory_space<vmem>>, %arg7: memref<16x48xf32, #tpu.memory_space<vmem>>) attributes {dimension_semantics = [#tpu.dimension_semantics<parallel>], iteration_bounds = array<i64: 1>, scalar_prefetch = 0 : i64, scratch_operands = 0 : i64, tpu.core_type = #tpu.core_type<tc>, window_params = [{transform_indices = @transform_0, window_bounds = array<i64: 3>}, {pipeline_mode = #tpu.pipeline_mode<synchronous>, transform_indices = @transform_1, window_bounds = array<i64: 1, 48>}, {transform_indices = @transform_2, window_bounds = array<i64: 16, 48, 16>}, {transform_indices = @transform_3, window_bounds = array<i64: 16, 48>}, {pipeline_mode = #tpu.pipeline_mode<synchronous>, transform_indices = @transform_4, window_bounds = array<i64: 16, 64>}, {transform_indices = @transform_5, window_bounds = array<i64: 16, 16>}, {transform_indices = @transform_6, window_bounds = array<i64: 16, 48>}]} {
    %c0 = arith.constant 0 : index
    %0 = memref.load %arg1[%c0] : memref<3xf32, #tpu.memory_space<smem>>
    %c1 = arith.constant 1 : index
    %1 = memref.load %arg1[%c1] : memref<3xf32, #tpu.memory_space<smem>>
    %c2 = arith.constant 2 : index
    %2 = memref.load %arg1[%c2] : memref<3xf32, #tpu.memory_space<smem>>
    %c0_0 = arith.constant 0 : index
    %c0_1 = arith.constant 0 : index
    %c0_2 = arith.constant 0 : index
    %3 = vector.load %arg3[%c0_0, %c0_1, %c0_2] : memref<16x48x16xf32, #tpu.memory_space<vmem>>, vector<16x48x16xf32>
    %c0_3 = arith.constant 0 : index
    %c0_4 = arith.constant 0 : index
    %4 = vector.load %arg4[%c0_3, %c0_4] : memref<16x48xf32, #tpu.memory_space<vmem>>, vector<16x48xf32>
    %c0_5 = arith.constant 0 : index
    %c0_6 = arith.constant 0 : index
    %5 = vector.load %arg2[%c0_5, %c0_6] : memref<1x48xf32, #tpu.memory_space<vmem>>, vector<1x48xf32>
    %6 = vector.shape_cast %3 : vector<16x48x16xf32> to vector<768x16xf32>
    %7 = arith.truncf %6 : vector<768x16xf32> to vector<768x16xbf16>
    %c0_7 = arith.constant 0 : index
    %c0_8 = arith.constant 0 : index
    %8 = vector.load %arg5[%c0_7, %c0_8] : memref<16x64xbf16, #tpu.memory_space<vmem>>, vector<16x64xbf16>
    %cst = arith.constant dense<0.000000e+00> : vector<768x64xf32>
    %9 = tpu.matmul %7, %8, %cst {dimension_numbers = #tpu.dot_dimension_numbers<[1], [0], [0], [1], [0, 0, 1, 1], [], []>} : vector<768x16xbf16>, vector<16x64xbf16>, vector<768x64xf32> -> vector<768x64xf32>
    %10 = vector.shape_cast %9 : vector<768x64xf32> to vector<16x48x64xf32>
    %11 = vector.extract_strided_slice %10 {offsets = [0, 0, 0], sizes = [16, 48, 32], strides = [1, 1, 1]} : vector<16x48x64xf32> to vector<16x48x32xf32>
    %12 = vector.extract_strided_slice %10 {offsets = [0, 47, 32], sizes = [16, 1, 32], strides = [1, 1, 1]} : vector<16x48x64xf32> to vector<16x1x32xf32>
    %13 = vector.broadcast %12 : vector<16x1x32xf32> to vector<16x48x32xf32>
    %14 = arith.mulf %13, %11 : vector<16x48x32xf32>
    %cst_9 = arith.constant dense<0.000000e+00> : vector<16x48xf32>
    %15 = vector.multi_reduction <add>, %14, %cst_9 [2] : vector<16x48x32xf32> to vector<16x48xf32>
    %16 = arith.negf %4 : vector<16x48xf32>
    %17 = math.exp %16 : vector<16x48xf32>
    %cst_10 = arith.constant 1.000000e+00 : f32
    %18 = vector.broadcast %cst_10 : f32 to vector<16x48xf32>
    %19 = arith.addf %18, %17 : vector<16x48xf32>
    %20 = arith.divf %18, %19 : vector<16x48xf32>
    %21 = math.absf %4 : vector<16x48xf32>
    %cst_11 = arith.constant dense<0xFF800000> : vector<16xf32>
    %22 = vector.multi_reduction <maximumf>, %21, %cst_11 [1] : vector<16x48xf32> to vector<16xf32>
    %23 = vector.shape_cast %22 : vector<16xf32> to vector<16x1xf32>
    %24 = arith.negf %23 : vector<16x1xf32>
    %25 = math.exp %24 : vector<16x1xf32>
    %cst_12 = arith.constant 1.000000e+00 : f32
    %26 = vector.broadcast %cst_12 : f32 to vector<16x1xf32>
    %27 = arith.addf %26, %25 : vector<16x1xf32>
    %28 = arith.divf %26, %27 : vector<16x1xf32>
    %29 = tpu.reciprocal %28 {approx = true} : vector<16x1xf32> -> vector<16x1xf32>
    %30 = vector.broadcast %29 : vector<16x1xf32> to vector<16x48xf32>
    %31 = arith.mulf %20, %30 : vector<16x48xf32>
    %32 = vector.broadcast %1 : f32 to vector<1x48xf32>
    %33 = arith.mulf %32, %5 : vector<1x48xf32>
    %34 = vector.broadcast %33 : vector<1x48xf32> to vector<16x48xf32>
    %35 = arith.mulf %34, %31 : vector<16x48xf32>
    %36 = vector.broadcast %0 : f32 to vector<1x48xf32>
    %37 = arith.mulf %36, %5 : vector<1x48xf32>
    %38 = vector.broadcast %37 : vector<1x48xf32> to vector<16x48xf32>
    %39 = arith.addf %38, %31 : vector<16x48xf32>
    %40 = tpu.reciprocal %39 {approx = true} : vector<16x48xf32> -> vector<16x48xf32>
    %41 = arith.mulf %35, %40 : vector<16x48xf32>
    %42 = arith.negf %15 : vector<16x48xf32>
    %43 = math.exp %42 : vector<16x48xf32>
    %cst_13 = arith.constant 1.000000e+00 : f32
    %44 = vector.broadcast %cst_13 : f32 to vector<16x48xf32>
    %45 = arith.addf %44, %43 : vector<16x48xf32>
    %46 = arith.divf %44, %45 : vector<16x48xf32>
    %cst_14 = arith.constant 1.000000e+00 : f32
    %47 = vector.broadcast %cst_14 : f32 to vector<16x48xf32>
    %48 = arith.subf %47, %46 : vector<16x48xf32>
    %cst_15 = arith.constant 2.720000e+00 : f32
    %49 = vector.broadcast %cst_15 : f32 to vector<16x48xf32>
    %50 = arith.addf %49, %48 : vector<16x48xf32>
    %51 = math.log %50 : vector<16x48xf32>
    %52 = vector.broadcast %2 : f32 to vector<16x48xf32>
    %53 = arith.mulf %52, %51 : vector<16x48xf32>
    %54 = arith.mulf %53, %41 : vector<16x48xf32>
    %55 = tpu.reciprocal %54 {approx = true} : vector<16x48xf32> -> vector<16x48xf32>
    %56 = arith.mulf %46, %55 : vector<16x48xf32>
    %cst_16 = arith.constant 0.000000e+00 : f32
    %57 = vector.broadcast %cst_16 : f32 to vector<16x48xf32>
    %58 = arith.maximumf %56, %57 : vector<16x48xf32>
    %cst_17 = arith.constant dense<0xFF800000> : vector<16xf32>
    %59 = vector.multi_reduction <maximumf>, %58, %cst_17 [1] : vector<16x48xf32> to vector<16xf32>
    %60 = vector.shape_cast %59 : vector<16xf32> to vector<16x1xf32>
    %61 = vector.broadcast %60 : vector<16x1xf32> to vector<16x48xf32>
    %62 = arith.subf %58, %61 : vector<16x48xf32>
    %63 = math.exp %62 : vector<16x48xf32>
    %cst_18 = arith.constant dense<0.000000e+00> : vector<16xf32>
    %64 = vector.multi_reduction <add>, %63, %cst_18 [1] : vector<16x48xf32> to vector<16xf32>
    %65 = vector.shape_cast %64 : vector<16xf32> to vector<16x1xf32>
    %66 = tpu.reciprocal %65 {approx = true} : vector<16x1xf32> -> vector<16x1xf32>
    %67 = vector.broadcast %66 : vector<16x1xf32> to vector<16x48xf32>
    %68 = arith.mulf %63, %67 : vector<16x48xf32>
    %69 = vector.shape_cast %68 : vector<16x48xf32> to vector<16x48x1xf32>
    %70 = vector.broadcast %69 : vector<16x48x1xf32> to vector<16x48x16xf32>
    %71 = arith.mulf %70, %3 : vector<16x48x16xf32>
    %cst_19 = arith.constant dense<0.000000e+00> : vector<16x16xf32>
    %72 = vector.multi_reduction <add>, %71, %cst_19 [1] : vector<16x48x16xf32> to vector<16x16xf32>
    %c0_20 = arith.constant 0 : index
    %c0_21 = arith.constant 0 : index
    %73 = vector.load %arg7[%c0_20, %c0_21] : memref<16x48xf32, #tpu.memory_space<vmem>>, vector<16x48xf32>
    tpu.vector_store %arg7[%c0_20, %c0_21], %68 {strides = array<i32>} : memref<16x48xf32, #tpu.memory_space<vmem>>, vector<16x48xf32>,
    %c0_22 = arith.constant 0 : index
    %c0_23 = arith.constant 0 : index
    %74 = vector.load %arg6[%c0_22, %c0_23] : memref<16x16xf32, #tpu.memory_space<vmem>>, vector<16x16xf32>
    tpu.vector_store %arg6[%c0_22, %c0_23], %72 {strides = array<i32>} : memref<16x16xf32, #tpu.memory_space<vmem>>, vector<16x16xf32>,
    return
  }
  func.func @transform_0(%arg0: i32) -> i32 {
    %c0_i32 = arith.constant 0 : i32
    %c0_i32_0 = arith.constant 0 : i32
    return %c0_i32 : i32
  }
  func.func @transform_1(%arg0: i32) -> (i32, i32) {
    %c0_i32 = arith.constant 0 : i32
    %c0_i32_0 = arith.constant 0 : i32
    %c0_i32_1 = arith.constant 0 : i32
    return %c0_i32, %c0_i32_0 : i32, i32
  }
  func.func @transform_2(%arg0: i32) -> (i32, i32, i32) {
    %c0_i32 = arith.constant 0 : i32
    %c0_i32_0 = arith.constant 0 : i32
    %c0_i32_1 = arith.constant 0 : i32
    return %arg0, %c0_i32, %c0_i32_0 : i32, i32, i32
  }
  func.func @transform_3(%arg0: i32) -> (i32, i32) {
    %c0_i32 = arith.constant 0 : i32
    %c0_i32_0 = arith.constant 0 : i32
    return %arg0, %c0_i32 : i32, i32
  }
  func.func @transform_4(%arg0: i32) -> (i32, i32) {
    %c0_i32 = arith.constant 0 : i32
    %c0_i32_0 = arith.constant 0 : i32
    %c0_i32_1 = arith.constant 0 : i32
    return %c0_i32, %c0_i32_0 : i32, i32
  }
  func.func @transform_5(%arg0: i32) -> (i32, i32) {
    %c0_i32 = arith.constant 0 : i32
    %c0_i32_0 = arith.constant 0 : i32
    return %arg0, %c0_i32 : i32, i32
  }
  func.func @transform_6(%arg0: i32) -> (i32, i32) {
    %c0_i32 = arith.constant 0 : i32
    %c0_i32_0 = arith.constant 0 : i32
    return %arg0, %c0_i32 : i32, i32
  }
}

</mosaic_0001>

<bundles_post_ra>
// kernel: tpu_custom_call.1
= control target key start
LH: loop header
LB: loop body
LE: loop exit
PB: predicated region body
PF: predicated region fallthrough
CT: control target
= control target key end

     0   :  { %12 = vsyncpa [#allocation4], 0  ;;  %s15097_s0 = inlined_call_operand.vmem [shape: f32[3], index: 0, kind: input, shape index: {}]   ;;  %s15098_s1 = inlined_call_operand.vmem [shape: f32[1,48], index: 1, kind: input, shape index: {}]   ;;  %s15099_s2 = inlined_call_operand.vmem [shape: f32[16,48,16], index: 2, kind: input, shape index: {}]   ;;  %s15100_s3 = inlined_call_operand.vmem [shape: f32[16,48], index: 3, kind: input, shape index: {}]   ;;  %s15101_s4 = inlined_call_operand.vmem [shape: bf16[16,64], index: 4, kind: input, shape index: {}]   ;;  %s15102_s5 = inlined_call_operand.hbm [shape: f32[16,16], index: 5, kind: output, shape index: {0}]   ;;  %s15103_s6 = inlined_call_operand.hbm [shape: f32[16,48], index: 6, kind: output, shape index: {1}]  }
   0x1   :  { %13 = vsyncpa [#allocation3], 0 }
   0x2   :  { %14 = vsyncpa [#allocation7], 0  ;;  %s21_s23 = sshll.u32 %s15097_s0, 4  ;;  %s22_s23 = int_to_ptr.vmem [resolvable:$true] %s21_s23 }
   0x3   :  { %s9108_s24 = scalar_lea.vmem %s22_s23, 16  ;;  %p9113_p1 = scmp.lt.s32.totalorder %s22_s23, %s22_s23 }
   0x4   :  { %p9109_p0 = scmp.ne.s32.totalorder %s22_s23, %s9108_s24  ;;  %p9114_p2 = scmp.lt.s32.totalorder %s9108_s24, %s9108_s24 }
   0x6   :  { %p9115_p3 = por %p9114_p2, %p9113_p1 }
   0x8   :  { %p9116_p4 = pnand %p9115_p3, %p9109_p0 }
   0xa   :  { %9119 = shalt.err (!%p9116_p4)
}
   0xb   :  { %s9166_s25 = smov [#allocation2]  }
   0xc   :  { %24 = dma.vmem_to_smem %s22_s23, 16, %s9166_s25, [#allocation4]  }
   0xd   :  { %9160 = dma.done.wait [#allocation4], 16  }
   0xe   :  { %9161 = vsyncadd [#allocation4], 4294967280 }
   0xf   :  { %36 = sfence }
  0x10   :  { %v8023_v0 = vld [vmem:[%s15101_s4] sm:$0xff]   ;;  %v42_v2 = vld [vmem:[%s15099_s2 + $0x8] sm:$0xff]  ;;  %vm196_vm0 = vcmask 130048   ;;  %v43_v6 = vld [vmem:[%s15099_s2 + $0x10] sm:$0xff]  ;;  %s9167_s12 = smov 32   ;;  %s9168_s13 = smov 96  }
  0x11   :  { %v41_v1 = vld [vmem:[%s15099_s2] sm:$0xff]  ;;  %7913 = vmatprep.subr.bf16.mxu0 %v8023_v0  ;;  %8011 = vmatprep.subr.bf16.mxu1 %v8023_v0  ;;  %v90_v5 = vld [vmem:[%s15099_s2 + $0x188] sm:$0xff]  ;;  %v44_v7 = vld [vmem:[%s15099_s2 + $0x18] sm:$0xff]  ;;  %vm1686_vm1 = vcmask 261120   ;;  %vm1989_vm2 = vcmask 392192   ;;  %s7713_s18 = sld [smem:[#allocation2 + $0x1]] }
  0x12   :  { %v89_v3 = vld [vmem:[%s15099_s2 + $0x180] sm:$0xff]  ;;  %v140_v4 = vpack.c.bf16 %v42_v2, %v41_v1  ;;  %7914 = vmatpush3.bf16.msra.mxu0 %v8023_v0  ;;  %8012 = vmatpush3.bf16.msra.mxu1 %v8023_v0  ;;  %v141_v9 = vpack.c.bf16 %v44_v7, %v43_v6  ;;  %v91_v10 = vld [vmem:[%s15099_s2 + $0x190] sm:$0xff]  ;;  %v92_v11 = vld [vmem:[%s15099_s2 + $0x198] sm:$0xff]  ;;  %vm4402_vm3 = vcmask 130112   ;;  %vm4409_vm4 = vcmask 195712  }
  0x13   :  { %v164_v8 = vpack.c.bf16 %v90_v5, %v89_v3  ;;  %v45_v12 = vld [vmem:[%s15099_s2 + $0x20] sm:$0xff]  ;;  %v165_v13 = vpack.c.bf16 %v92_v11, %v91_v10  ;;  %v46_v14 = vld [vmem:[%s15099_s2 + $0x28] sm:$0xff]  ;;  %v47_v18 = vld [vmem:[%s15099_s2 + $0x30] sm:$0xff]  ;;  %vm4416_vm5 = vcmask 261312   ;;  %vm4423_vm6 = vcmask 326912  }
  0x14   :  { %7915 = vmatprep.mubr.msk.bf16.mxu0 %vm196_vm0, %v140_v4  ;;  %v142_v15 = vpack.c.bf16 %v46_v14, %v45_v12  ;;  %v93_v16 = vld [vmem:[%s15099_s2 + $0x1a0] sm:$0xff]  ;;  %v94_v17 = vld [vmem:[%s15099_s2 + $0x1a8] sm:$0xff]  ;;  %v48_v19 = vld [vmem:[%s15099_s2 + $0x38] sm:$0xff]  ;;  %vm4430_vm7 = vcmask 392512   ;;  %vm4867_vm8 = vcmask 1041409   ;;  %vm4869_vm9 = vcmask 1042434  }
  0x15   :  { %7963 = vmatprep.mubr.msk.bf16.mxu1 %vm196_vm0, %v164_v8  ;;  %7916 = vmatmul.mubr.msk.bf16.vlgmr.msra.gmra.mxu0 %vm196_vm0, %v141_v9  ;;  %v166_v20 = vpack.c.bf16 %v94_v17, %v93_v16  ;;  %v95_v21 = vld [vmem:[%s15099_s2 + $0x1b0] sm:$0xff]  ;;  %v96_v22 = vld [vmem:[%s15099_s2 + $0x1b8] sm:$0xff]  ;;  %v49_v23 = vld [vmem:[%s15099_s2 + $0x40] sm:$0xff]  ;;  %v143_v27 = vpack.c.bf16 %v48_v19, %v47_v18  ;;  %vm4871_vm10 = vcmask 1043459   ;;  %vm4873_vm11 = vcmask 1044484  }
  0x16   :  { %7964 = vmatmul.mubr.msk.bf16.vlgmr.msra.gmra.mxu1 %vm196_vm0, %v165_v13  ;;  %7919 = vmatprep.mubr.msk.bf16.mxu0 %vm196_vm0, %v142_v15  ;;  %v50_v24 = vld [vmem:[%s15099_s2 + $0x48] sm:$0xff]  ;;  %v97_v25 = vld [vmem:[%s15099_s2 + $0x1c0] sm:$0xff]  ;;  %v167_v28 = vpack.c.bf16 %v96_v22, %v95_v21  ;;  %v51_v31 = vld [vmem:[%s15099_s2 + $0x50] sm:$0xff]  ;;  %vm4875_vm12 = vcmask 1045509   ;;  %vm4877_vm13 = vcmask 1046534   ;;  %vm4879_vm14 = vcmask 1047559  }
  0x17   :  { %7967 = vmatprep.mubr.msk.bf16.mxu1 %vm196_vm0, %v166_v20  ;;  %v98_v26 = vld [vmem:[%s15099_s2 + $0x1c8] sm:$0xff]  ;;  %v144_v29 = vpack.c.bf16 %v50_v24, %v49_v23  ;;  %v52_v32 = vld [vmem:[%s15099_s2 + $0x58] sm:$0xff]  ;;  %v99_v33 = vld [vmem:[%s15099_s2 + $0x1d0] sm:$0xff] }
  0x18   :  { %v168_v30 = vpack.c.bf16 %v98_v26, %v97_v25  ;;  %v100_v34 = vld [vmem:[%s15099_s2 + $0x1d8] sm:$0xff]  ;;  %v53_v35 = vld [vmem:[%s15099_s2 + $0x60] sm:$0xff]  ;;  %v54_v36 = vld [vmem:[%s15099_s2 + $0x68] sm:$0xff]  ;;  %v145_v39 = vpack.c.bf16 %v52_v32, %v51_v31 }
  0x19   :  { %v101_v37 = vld [vmem:[%s15099_s2 + $0x1e0] sm:$0xff]  ;;  %v102_v38 = vld [vmem:[%s15099_s2 + $0x1e8] sm:$0xff]  ;;  %v169_v40 = vpack.c.bf16 %v100_v34, %v99_v33  ;;  %v146_v41 = vpack.c.bf16 %v54_v36, %v53_v35  ;;  %v55_v43 = vld [vmem:[%s15099_s2 + $0x70] sm:$0xff] }
  0x1a   :  { %v170_v42 = vpack.c.bf16 %v102_v38, %v101_v37  ;;  %v56_v44 = vld [vmem:[%s15099_s2 + $0x78] sm:$0xff]  ;;  %v103_v45 = vld [vmem:[%s15099_s2 + $0x1f0] sm:$0xff]  ;;  %v57_v47 = vld [vmem:[%s15099_s2 + $0x80] sm:$0xff] }
  0x1b   :  { %v104_v46 = vld [vmem:[%s15099_s2 + $0x1f8] sm:$0xff]  ;;  %v58_v48 = vld [vmem:[%s15099_s2 + $0x88] sm:$0xff]  ;;  %v105_v49 = vld [vmem:[%s15099_s2 + $0x200] sm:$0xff]  ;;  %v147_v51 = vpack.c.bf16 %v56_v44, %v55_v43 }
  0x1c   :  { %v106_v50 = vld [vmem:[%s15099_s2 + $0x208] sm:$0xff]  ;;  %v171_v52 = vpack.c.bf16 %v104_v46, %v103_v45  ;;  %v148_v53 = vpack.c.bf16 %v58_v48, %v57_v47  ;;  %v59_v55 = vld [vmem:[%s15099_s2 + $0x90] sm:$0xff]  ;;  %v60_v56 = vld [vmem:[%s15099_s2 + $0x98] sm:$0xff] }
  0x1d   :  { %7920 = vmatmul.mubr.msk.bf16.gmra.mxu0 %vm196_vm0, %v143_v27  ;;  %v172_v54 = vpack.c.bf16 %v106_v50, %v105_v49  ;;  %v107_v57 = vld [vmem:[%s15099_s2 + $0x210] sm:$0xff]  ;;  %v108_v58 = vld [vmem:[%s15099_s2 + $0x218] sm:$0xff]  ;;  %v61_v59 = vld [vmem:[%s15099_s2 + $0xa0] sm:$0xff]  ;;  %v149_v63 = vpack.c.bf16 %v60_v56, %v59_v55 }
  0x1e   :  { %7968 = vmatmul.mubr.msk.bf16.gmra.mxu1 %vm196_vm0, %v167_v28  ;;  %7923 = vmatprep.mubr.msk.bf16.mxu0 %vm196_vm0, %v144_v29  ;;  %v62_v60 = vld [vmem:[%s15099_s2 + $0xa8] sm:$0xff]  ;;  %v109_v61 = vld [vmem:[%s15099_s2 + $0x220] sm:$0xff]  ;;  %v173_v0 = vpack.c.bf16 %v108_v58, %v107_v57  ;;  %v63_v3 = vld [vmem:[%s15099_s2 + $0xb0] sm:$0xff] }
  0x1f   :  { %7971 = vmatprep.mubr.msk.bf16.mxu1 %vm196_vm0, %v168_v30  ;;  %v110_v62 = vld [vmem:[%s15099_s2 + $0x228] sm:$0xff]  ;;  %v150_v1 = vpack.c.bf16 %v62_v60, %v61_v59  ;;  %v64_v4 = vld [vmem:[%s15099_s2 + $0xb8] sm:$0xff]  ;;  %v111_v5 = vld [vmem:[%s15099_s2 + $0x230] sm:$0xff] }
  0x20   :  { %v174_v2 = vpack.c.bf16 %v110_v62, %v109_v61  ;;  %v112_v6 = vld [vmem:[%s15099_s2 + $0x238] sm:$0xff]  ;;  %v65_v7 = vld [vmem:[%s15099_s2 + $0xc0] sm:$0xff]  ;;  %v66_v8 = vld [vmem:[%s15099_s2 + $0xc8] sm:$0xff]  ;;  %v151_v11 = vpack.c.bf16 %v64_v4, %v63_v3 }
  0x21   :  { %v113_v9 = vld [vmem:[%s15099_s2 + $0x240] sm:$0xff]  ;;  %v114_v10 = vld [vmem:[%s15099_s2 + $0x248] sm:$0xff]  ;;  %v175_v12 = vpack.c.bf16 %v112_v6, %v111_v5  ;;  %v152_v13 = vpack.c.bf16 %v66_v8, %v65_v7  ;;  %v67_v15 = vld [vmem:[%s15099_s2 + $0xd0] sm:$0xff] }
  0x22   :  { %v176_v14 = vpack.c.bf16 %v114_v10, %v113_v9  ;;  %v68_v16 = vld [vmem:[%s15099_s2 + $0xd8] sm:$0xff]  ;;  %v115_v17 = vld [vmem:[%s15099_s2 + $0x250] sm:$0xff]  ;;  %v69_v19 = vld [vmem:[%s15099_s2 + $0xe0] sm:$0xff] }
  0x23   :  { %v116_v18 = vld [vmem:[%s15099_s2 + $0x258] sm:$0xff]  ;;  %v70_v20 = vld [vmem:[%s15099_s2 + $0xe8] sm:$0xff]  ;;  %v117_v21 = vld [vmem:[%s15099_s2 + $0x260] sm:$0xff]  ;;  %v153_v23 = vpack.c.bf16 %v68_v16, %v67_v15 }
  0x24   :  { %v118_v22 = vld [vmem:[%s15099_s2 + $0x268] sm:$0xff]  ;;  %v177_v24 = vpack.c.bf16 %v116_v18, %v115_v17  ;;  %v154_v25 = vpack.c.bf16 %v70_v20, %v69_v19  ;;  %v71_v27 = vld [vmem:[%s15099_s2 + $0xf0] sm:$0xff]  ;;  %v72_v28 = vld [vmem:[%s15099_s2 + $0xf8] sm:$0xff] }
  0x25   :  { %7924 = vmatmul.mubr.msk.bf16.gmra.mxu0 %vm196_vm0, %v145_v39  ;;  %v178_v26 = vpack.c.bf16 %v118_v22, %v117_v21  ;;  %v119_v29 = vld [vmem:[%s15099_s2 + $0x270] sm:$0xff]  ;;  %v120_v30 = vld [vmem:[%s15099_s2 + $0x278] sm:$0xff]  ;;  %v73_v31 = vld [vmem:[%s15099_s2 + $0x100] sm:$0xff]  ;;  %v155_v35 = vpack.c.bf16 %v72_v28, %v71_v27 }
  0x26   :  { %7972 = vmatmul.mubr.msk.bf16.gmra.mxu1 %vm196_vm0, %v169_v40  ;;  %7927 = vmatprep.mubr.msk.bf16.mxu0 %vm196_vm0, %v146_v41  ;;  %v74_v32 = vld [vmem:[%s15099_s2 + $0x108] sm:$0xff]  ;;  %v121_v33 = vld [vmem:[%s15099_s2 + $0x280] sm:$0xff]  ;;  %v179_v36 = vpack.c.bf16 %v120_v30, %v119_v29  ;;  %v75_v39 = vld [vmem:[%s15099_s2 + $0x110] sm:$0xff] }
  0x27   :  { %7975 = vmatprep.mubr.msk.bf16.mxu1 %vm196_vm0, %v170_v42  ;;  %v122_v34 = vld [vmem:[%s15099_s2 + $0x288] sm:$0xff]  ;;  %v156_v37 = vpack.c.bf16 %v74_v32, %v73_v31  ;;  %v76_v40 = vld [vmem:[%s15099_s2 + $0x118] sm:$0xff]  ;;  %v123_v41 = vld [vmem:[%s15099_s2 + $0x290] sm:$0xff] }
  0x28   :  { %v180_v38 = vpack.c.bf16 %v122_v34, %v121_v33  ;;  %v124_v42 = vld [vmem:[%s15099_s2 + $0x298] sm:$0xff]  ;;  %v77_v43 = vld [vmem:[%s15099_s2 + $0x120] sm:$0xff]  ;;  %v78_v44 = vld [vmem:[%s15099_s2 + $0x128] sm:$0xff]  ;;  %v157_v47 = vpack.c.bf16 %v76_v40, %v75_v39 }
  0x29   :  { %v125_v45 = vld [vmem:[%s15099_s2 + $0x2a0] sm:$0xff]  ;;  %v126_v46 = vld [vmem:[%s15099_s2 + $0x2a8] sm:$0xff]  ;;  %v181_v48 = vpack.c.bf16 %v124_v42, %v123_v41  ;;  %v158_v49 = vpack.c.bf16 %v78_v44, %v77_v43 }
  0x2a   :  { %v182_v50 = vpack.c.bf16 %v126_v46, %v125_v45  ;;  %v81_v55 = vld [vmem:[%s15099_s2 + $0x140] sm:$0xff]  ;;  %v82_v56 = vld [vmem:[%s15099_s2 + $0x148] sm:$0xff] }
  0x2b   :  { %v129_v57 = vld [vmem:[%s15099_s2 + $0x2c0] sm:$0xff]  ;;  %v130_v58 = vld [vmem:[%s15099_s2 + $0x2c8] sm:$0xff]  ;;  %v160_v61 = vpack.c.bf16 %v82_v56, %v81_v55 }
  0x2c   :  { %v184_v62 = vpack.c.bf16 %v130_v58, %v129_v57  ;;  %v85_v3 = vld [vmem:[%s15099_s2 + $0x160] sm:$0xff]  ;;  %v86_v4 = vld [vmem:[%s15099_s2 + $0x168] sm:$0xff] }
  0x2d   :  { %7928 = vmatmul.mubr.msk.bf16.gmra.mxu0 %vm196_vm0, %v147_v51  ;;  %v79_v51 = vld [vmem:[%s15099_s2 + $0x130] sm:$0xff]  ;;  %v133_v5 = vld [vmem:[%s15099_s2 + $0x2e0] sm:$0xff]  ;;  %v134_v6 = vld [vmem:[%s15099_s2 + $0x2e8] sm:$0xff]  ;;  %v162_v9 = vpack.c.bf16 %v86_v4, %v85_v3 }
  0x2e   :  { %7976 = vmatmul.mubr.msk.bf16.gmra.mxu1 %vm196_vm0, %v171_v52  ;;  %7931 = vmatprep.mubr.msk.bf16.mxu0 %vm196_vm0, %v148_v53  ;;  %v80_v52 = vld [vmem:[%s15099_s2 + $0x138] sm:$0xff]  ;;  %v127_v53 = vld [vmem:[%s15099_s2 + $0x2b0] sm:$0xff]  ;;  %v186_v10 = vpack.c.bf16 %v134_v6, %v133_v5 }
  0x2f   :  { %7979 = vmatprep.mubr.msk.bf16.mxu1 %vm196_vm0, %v172_v54  ;;  %v128_v54 = vld [vmem:[%s15099_s2 + $0x2b8] sm:$0xff]  ;;  %v159_v59 = vpack.c.bf16 %v80_v52, %v79_v51 }
  0x30   :  { %v183_v60 = vpack.c.bf16 %v128_v54, %v127_v53 }
  0x35   :  { %7932 = vmatmul.mubr.msk.bf16.gmra.mxu0 %vm196_vm0, %v149_v63  ;;  %v83_v63 = vld [vmem:[%s15099_s2 + $0x150] sm:$0xff] }
  0x36   :  { %7980 = vmatmul.mubr.msk.bf16.gmra.mxu1 %vm196_vm0, %v173_v0  ;;  %7935 = vmatprep.mubr.msk.bf16.mxu0 %vm196_vm0, %v150_v1  ;;  %v84_v0 = vld [vmem:[%s15099_s2 + $0x158] sm:$0xff]  ;;  %v131_v1 = vld [vmem:[%s15099_s2 + $0x2d0] sm:$0xff] }
  0x37   :  { %7983 = vmatprep.mubr.msk.bf16.mxu1 %vm196_vm0, %v174_v2  ;;  %v132_v2 = vld [vmem:[%s15099_s2 + $0x2d8] sm:$0xff]  ;;  %v161_v7 = vpack.c.bf16 %v84_v0, %v83_v63 }
  0x38   :  { %v185_v8 = vpack.c.bf16 %v132_v2, %v131_v1 }
  0x3d   :  { %7936 = vmatmul.mubr.msk.bf16.gmra.mxu0 %vm196_vm0, %v151_v11  ;;  %v87_v11 = vld [vmem:[%s15099_s2 + $0x170] sm:$0xff] }
  0x3e   :  { %7984 = vmatmul.mubr.msk.bf16.gmra.mxu1 %vm196_vm0, %v175_v12  ;;  %7939 = vmatprep.mubr.msk.bf16.mxu0 %vm196_vm0, %v152_v13  ;;  %v88_v12 = vld [vmem:[%s15099_s2 + $0x178] sm:$0xff]  ;;  %v135_v13 = vld [vmem:[%s15099_s2 + $0x2f0] sm:$0xff] }
  0x3f   :  { %7987 = vmatprep.mubr.msk.bf16.mxu1 %vm196_vm0, %v176_v14  ;;  %v136_v14 = vld [vmem:[%s15099_s2 + $0x2f8] sm:$0xff]  ;;  %v163_v15 = vpack.c.bf16 %v88_v12, %v87_v11 }
  0x40   :  { %v187_v16 = vpack.c.bf16 %v136_v14, %v135_v13 }
  0x45   :  { %7940 = vmatmul.mubr.msk.bf16.gmra.mxu0 %vm196_vm0, %v153_v23 }
  0x46   :  { %7988 = vmatmul.mubr.msk.bf16.gmra.mxu1 %vm196_vm0, %v177_v24  ;;  %7943 = vmatprep.mubr.msk.bf16.mxu0 %vm196_vm0, %v154_v25 }
  0x47   :  { %7991 = vmatprep.mubr.msk.bf16.mxu1 %vm196_vm0, %v178_v26 }
  0x4d   :  { %7944 = vmatmul.mubr.msk.bf16.gmra.mxu0 %vm196_vm0, %v155_v35 }
  0x4e   :  { %7992 = vmatmul.mubr.msk.bf16.gmra.mxu1 %vm196_vm0, %v179_v36  ;;  %7947 = vmatprep.mubr.msk.bf16.mxu0 %vm196_vm0, %v156_v37 }
  0x4f   :  { %7995 = vmatprep.mubr.msk.bf16.mxu1 %vm196_vm0, %v180_v38 }
  0x55   :  { %7948 = vmatmul.mubr.msk.bf16.gmra.mxu0 %vm196_vm0, %v157_v47 }
  0x56   :  { %7996 = vmatmul.mubr.msk.bf16.gmra.mxu1 %vm196_vm0, %v181_v48  ;;  %7951 = vmatprep.mubr.msk.bf16.mxu0 %vm196_vm0, %v158_v49 }
  0x57   :  { %7999 = vmatprep.mubr.msk.bf16.mxu1 %vm196_vm0, %v182_v50 }
  0x5d   :  { %7952 = vmatmul.mubr.msk.bf16.gmra.mxu0 %vm196_vm0, %v159_v59 }
  0x5e   :  { %8000 = vmatmul.mubr.msk.bf16.gmra.mxu1 %vm196_vm0, %v183_v60  ;;  %7955 = vmatprep.mubr.msk.bf16.mxu0 %vm196_vm0, %v160_v61 }
  0x5f   :  { %8003 = vmatprep.mubr.msk.bf16.mxu1 %vm196_vm0, %v184_v62 }
  0x65   :  { %7956 = vmatmul.mubr.msk.bf16.gmra.mxu0 %vm196_vm0, %v161_v7 }
  0x66   :  { %8004 = vmatmul.mubr.msk.bf16.gmra.mxu1 %vm196_vm0, %v185_v8  ;;  %7959 = vmatprep.mubr.msk.bf16.mxu0 %vm196_vm0, %v162_v9 }
  0x67   :  { %8007 = vmatprep.mubr.msk.bf16.mxu1 %vm196_vm0, %v186_v10 }
  0x6d   :  { %7960 = vmatmul.mubr.msk.bf16.gmra.mxu0 %vm196_vm0, %v163_v15 }
  0x6e   :  { %8008 = vmatmul.mubr.msk.bf16.gmra.mxu1 %vm196_vm0, %v187_v16 }
  0xd5   :  { %v7917_v17 = vpop.f32.mrf.mxu0 }
  0xd6   :  { %v7965_v18 = vpop.f32.mrf.mxu1  ;;  %922 = vrot.lane.b32.xlu1 %v7917_v17, %s9167_s12 }
  0xd7   :  { %1018 = vrot.lane.b32.xlu0 %v7965_v18, %s9167_s12  ;;  %v375_v19 = vpop.f32.mrf.mxu0 }
  0xd8   :  { %v567_v20 = vpop.f32.mrf.mxu1 }
  0xd9   :  { %v7918_v21 = vpop.f32.mrf.mxu0 }
  0xda   :  { %924 = vrot.lane.b32.xlu1 %v7918_v21, %s9167_s12  ;;  %v7966_v22 = vpop.f32.mrf.mxu1 }
  0xdb   :  { %918 = vrot.lane.b32.xlu0 %v375_v19, %s9167_s12  ;;  %v378_v23 = vpop.f32.mrf.mxu0 }
  0xdc   :  { %v570_v25 = vpop.f32.mrf.mxu1 }
  0xdd   :  { %v7921_v24 = vpop.f32.mrf.mxu0 }
  0xde   :  { %1020 = vrot.lane.b32.xlu1 %v7966_v22, %s9167_s12  ;;  %v7969_v27 = vpop.f32.mrf.mxu1 }
  0xdf   :  { %1014 = vrot.lane.b32.xlu0 %v567_v20, %s9167_s12  ;;  %v391_v26 = vpop.f32.mrf.mxu0 }
  0xe0   :  { %v583_v29 = vpop.f32.mrf.mxu1 }
  0xe1   :  { %v7922_v28 = vpop.f32.mrf.mxu0 }
  0xe2   :  { %1016 = vrot.lane.b32.xlu1 %v570_v25, %s9167_s12  ;;  %v7970_v30 = vpop.f32.mrf.mxu1 }
  0xe3   :  { %920 = vrot.lane.b32.xlu0 %v378_v23, %s9167_s12  ;;  %v9563_v31 = vpop.f32.mrf.mxu0 }
  0xe4   :  { %v9568_v33 = vpop.f32.mrf.mxu1 }
  0xe5   :  { %v7925_v32 = vpop.f32.mrf.mxu0 }
  0xe6   :  { %932 = vrot.lane.b32.xlu1 %v7922_v28, %s9167_s12  ;;  %v7973_v35 = vpop.f32.mrf.mxu1 }
  0xe7   :  { %930 = vrot.lane.b32.xlu0 %v7921_v24, %s9167_s12  ;;  %v407_v34 = vpop.f32.mrf.mxu0 }
  0xe8   :  { %v599_v37 = vpop.f32.mrf.mxu1 }
  0xe9   :  { %v9573_v36 = vpop.f32.mrf.mxu0 }
  0xea   :  { %1028 = vrot.lane.b32.xlu1 %v7970_v30, %s9167_s12  ;;  %v9578_v38 = vpop.f32.mrf.mxu1 }
  0xeb   :  { %1026 = vrot.lane.b32.xlu0 %v7969_v27, %s9167_s12  ;;  %v410_v39 = vpop.f32.mrf.mxu0 }
  0xec   :  { %v602_v41 = vpop.f32.mrf.mxu1 }
  0xed   :  { %v7929_v40 = vpop.f32.mrf.mxu0 }
  0xee   :  { %928 = vrot.lane.b32.xlu1 %v9563_v31, %s9167_s12  ;;  %v7977_v43 = vpop.f32.mrf.mxu1 }
  0xef   :  { %926 = vrot.lane.b32.xlu0 %v391_v26, %s9167_s12  ;;  %v423_v42 = vpop.f32.mrf.mxu0 }
  0xf0   :  { %v615_v45 = vpop.f32.mrf.mxu1 }
  0xf1   :  { %v7930_v44 = vpop.f32.mrf.mxu0 }
  0xf2   :  { %1024 = vrot.lane.b32.xlu1 %v9568_v33, %s9167_s12  ;;  %v7978_v46 = vpop.f32.mrf.mxu1 }
  0xf3   :  { %1022 = vrot.lane.b32.xlu0 %v583_v29, %s9167_s12  ;;  %v426_v47 = vpop.f32.mrf.mxu0 }
  0xf4   :  { %v618_v49 = vpop.f32.mrf.mxu1 }
  0xf5   :  { %v7933_v48 = vpop.f32.mrf.mxu0 }
  0xf6   :  { %940 = vrot.lane.b32.xlu1 %v9573_v36, %s9167_s12  ;;  %v7981_v51 = vpop.f32.mrf.mxu1 }
  0xf7   :  { %938 = vrot.lane.b32.xlu0 %v7925_v32, %s9167_s12  ;;  %v439_v50 = vpop.f32.mrf.mxu0 }
  0xf8   :  { %v631_v53 = vpop.f32.mrf.mxu1 }
  0xf9   :  { %v7934_v52 = vpop.f32.mrf.mxu0 }
  0xfa   :  { %1036 = vrot.lane.b32.xlu1 %v9578_v38, %s9167_s12  ;;  %v7982_v54 = vpop.f32.mrf.mxu1 }
  0xfb   :  { %1034 = vrot.lane.b32.xlu0 %v7973_v35, %s9167_s12  ;;  %v9599_v55 = vpop.f32.mrf.mxu0 }
  0xfc   :  { %v9604_v57 = vpop.f32.mrf.mxu1 }
  0xfd   :  { %v7937_v56 = vpop.f32.mrf.mxu0 }
  0xfe   :  { %936 = vrot.lane.b32.xlu1 %v410_v39, %s9167_s12  ;;  %v7985_v59 = vpop.f32.mrf.mxu1 }
  0xff   :  { %934 = vrot.lane.b32.xlu0 %v407_v34, %s9167_s12  ;;  %v455_v58 = vpop.f32.mrf.mxu0 }
 0x100   :  { %v647_v61 = vpop.f32.mrf.mxu1 }
 0x101   :  { %v9609_v60 = vpop.f32.mrf.mxu0 }
 0x102   :  { %1032 = vrot.lane.b32.xlu1 %v602_v41, %s9167_s12  ;;  %v9614_v62 = vpop.f32.mrf.mxu1 }
 0x103   :  { %1030 = vrot.lane.b32.xlu0 %v599_v37, %s9167_s12  ;;  %v458_v63 = vpop.f32.mrf.mxu0 }
 0x104   :  { %v650_v1 = vpop.f32.mrf.mxu1 }
 0x105   :  { %v7941_v0 = vpop.f32.mrf.mxu0 }
 0x106   :  { %948 = vrot.lane.b32.xlu1 %v7930_v44, %s9167_s12  ;;  %v7989_v3 = vpop.f32.mrf.mxu1 }
 0x107   :  { %946 = vrot.lane.b32.xlu0 %v7929_v40, %s9167_s12  ;;  %v471_v2 = vpop.f32.mrf.mxu0 }
 0x108   :  { %v663_v5 = vpop.f32.mrf.mxu1 }
 0x109   :  { %v7942_v4 = vpop.f32.mrf.mxu0 }
 0x10a   :  { %1044 = vrot.lane.b32.xlu1 %v7978_v46, %s9167_s12  ;;  %v7990_v6 = vpop.f32.mrf.mxu1 }
 0x10b   :  { %1042 = vrot.lane.b32.xlu0 %v7977_v43, %s9167_s12  ;;  %v474_v7 = vpop.f32.mrf.mxu0 }
 0x10c   :  { %v666_v9 = vpop.f32.mrf.mxu1 }
 0x10d   :  { %v7945_v8 = vpop.f32.mrf.mxu0 }
 0x10e   :  { %944 = vrot.lane.b32.xlu1 %v426_v47, %s9167_s12  ;;  %v7993_v11 = vpop.f32.mrf.mxu1 }
 0x10f   :  { %942 = vrot.lane.b32.xlu0 %v423_v42, %s9167_s12  ;;  %v487_v10 = vpop.f32.mrf.mxu0 }
 0x110   :  { %v679_v13 = vpop.f32.mrf.mxu1 }
 0x111   :  { %v7946_v12 = vpop.f32.mrf.mxu0 }
 0x112   :  { %1040 = vrot.lane.b32.xlu1 %v618_v49, %s9167_s12  ;;  %v7994_v16 = vpop.f32.mrf.mxu1 }
 0x113   :  { %1038 = vrot.lane.b32.xlu0 %v615_v45, %s9167_s12  ;;  %v9639_v17 = vpop.f32.mrf.mxu0 }
 0x114   :  { %v9648_v21 = vpop.f32.mrf.mxu1 }
 0x115   :  { %v7949_v20 = vpop.f32.mrf.mxu0 }
 0x116   :  { %956 = vrot.lane.b32.xlu1 %v7934_v52, %s9167_s12  ;;  %v7997_v25 = vpop.f32.mrf.mxu1 }
 0x117   :  { %954 = vrot.lane.b32.xlu0 %v7933_v48, %s9167_s12  ;;  %v503_v24 = vpop.f32.mrf.mxu0 }
 0x118   :  { %v695_v29 = vpop.f32.mrf.mxu1 }
 0x119   :  { %v9661_v28 = vpop.f32.mrf.mxu0 }
 0x11a   :  { %1052 = vrot.lane.b32.xlu1 %v7982_v54, %s9167_s12  ;;  %v9670_v34 = vpop.f32.mrf.mxu1 }
 0x11b   :  { %1050 = vrot.lane.b32.xlu0 %v7981_v51, %s9167_s12  ;;  %v506_v35 = vpop.f32.mrf.mxu0 }
 0x11c   :  { %v698_v41 = vpop.f32.mrf.mxu1 }
 0x11d   :  { %v7953_v40 = vpop.f32.mrf.mxu0 }
 0x11e   :  { %952 = vrot.lane.b32.xlu1 %v9599_v55, %s9167_s12  ;;  %v8001_v45 = vpop.f32.mrf.mxu1 }
 0x11f   :  { %950 = vrot.lane.b32.xlu0 %v439_v50, %s9167_s12  ;;  %v519_v44 = vpop.f32.mrf.mxu0 }
 0x120   :  { %v711_v49 = vpop.f32.mrf.mxu1 }
 0x121   :  { %v7954_v48 = vpop.f32.mrf.mxu0 }
 0x122   :  { %1048 = vrot.lane.b32.xlu1 %v9604_v57, %s9167_s12  ;;  %v8002_v52 = vpop.f32.mrf.mxu1 }
 0x123   :  { %1046 = vrot.lane.b32.xlu0 %v631_v53, %s9167_s12  ;;  %v522_v53 = vpop.f32.mrf.mxu0 }
 0x126   :  { %964 = vrot.lane.b32.xlu1 %v9609_v60, %s9167_s12 }
 0x127   :  { %962 = vrot.lane.b32.xlu0 %v7937_v56, %s9167_s12 }
 0x12a   :  { %1060 = vrot.lane.b32.xlu1 %v9614_v62, %s9167_s12 }
 0x12b   :  { %1058 = vrot.lane.b32.xlu0 %v7985_v59, %s9167_s12  ;;  %v714_v59 = vpop.f32.mrf.mxu1 }
 0x12e   :  { %960 = vrot.lane.b32.xlu1 %v458_v63, %s9167_s12 }
 0x12f   :  { %958 = vrot.lane.b32.xlu0 %v455_v58, %s9167_s12  ;;  %v7957_v58 = vpop.f32.mrf.mxu0 }
 0x132   :  { %1056 = vrot.lane.b32.xlu1 %v650_v1, %s9167_s12  ;;  %v8005_v1 = vpop.f32.mrf.mxu1 }
 0x133   :  { %1054 = vrot.lane.b32.xlu0 %v647_v61, %s9167_s12 }
 0x136   :  { %972 = vrot.lane.b32.xlu1 %v7942_v4, %s9167_s12 }
 0x137   :  { %970 = vrot.lane.b32.xlu0 %v7941_v0, %s9167_s12  ;;  %v535_v0 = vpop.f32.mrf.mxu0 }
 0x139   :  { %v7958_v4 = vpop.f32.mrf.mxu0 }
 0x13a   :  { %1068 = vrot.lane.b32.xlu1 %v7990_v6, %s9167_s12 }
 0x13b   :  { %1066 = vrot.lane.b32.xlu0 %v7989_v3, %s9167_s12 }
 0x13e   :  { %968 = vrot.lane.b32.xlu1 %v474_v7, %s9167_s12 }
 0x13f   :  { %966 = vrot.lane.b32.xlu0 %v471_v2, %s9167_s12 }
 0x142   :  { %1064 = vrot.lane.b32.xlu1 %v666_v9, %s9167_s12  ;;  %v9723_v9 = vpop.f32.mrf.mxu0 }
 0x143   :  { %1062 = vrot.lane.b32.xlu0 %v663_v5, %s9167_s12  ;;  %v727_v5 = vpop.f32.mrf.mxu1 }
 0x146   :  { %980 = vrot.lane.b32.xlu1 %v7946_v12, %s9167_s12  ;;  %v7961_v12 = vpop.f32.mrf.mxu0 }
 0x147   :  { %978 = vrot.lane.b32.xlu0 %v7945_v8, %s9167_s12  ;;  %v8006_v8 = vpop.f32.mrf.mxu1 }
 0x148   :  { %v9635_v15 = vpop.permute.xlu1 %922 }
 0x149   :  { %v9633_v14 = vpop.permute.xlu0 %1018 }
 0x14a   :  { %1076 = vrot.lane.b32.xlu1 %v7994_v16, %s9167_s12 }
 0x14b   :  { %1074 = vrot.lane.b32.xlu0 %v7993_v11, %s9167_s12 }
 0x14c   :  { %v9643_v19 = vpop.permute.xlu1 %924 }
 0x14d   :  { %v9641_v18 = vpop.permute.xlu0 %918 }
 0x14e   :  { %976 = vrot.lane.b32.xlu1 %v9639_v17, %s9167_s12 }
 0x14f   :  { %974 = vrot.lane.b32.xlu0 %v487_v10, %s9167_s12 }
 0x150   :  { %v9652_v23 = vpop.permute.xlu1 %1020 }
 0x151   :  { %v9650_v22 = vpop.permute.xlu0 %1014 }
 0x152   :  { %1072 = vrot.lane.b32.xlu1 %v9648_v21, %s9167_s12 }
 0x153   :  { %1070 = vrot.lane.b32.xlu0 %v679_v13, %s9167_s12  ;;  %v9732_v13 = vpop.f32.mrf.mxu1 }
 0x154   :  { %v9657_v26 = vpop.permute.xlu1 %1016 }
 0x155   :  { %v9659_v27 = vpop.permute.xlu0 %920 }
 0x156   :  { %988 = vrot.lane.b32.xlu1 %v9661_v28, %s9167_s12 }
 0x157   :  { %986 = vrot.lane.b32.xlu0 %v7949_v20, %s9167_s12 }
 0x158   :  { %v9668_v32 = vpop.permute.xlu1 %932 }
 0x159   :  { %v9666_v30 = vpop.permute.xlu0 %930 }
 0x15a   :  { %1084 = vrot.lane.b32.xlu1 %v9670_v34, %s9167_s12 }
 0x15b   :  { %1082 = vrot.lane.b32.xlu0 %v7997_v25, %s9167_s12  ;;  %v8009_v25 = vpop.f32.mrf.mxu1 }
 0x15c   :  { %v9677_v39 = vpop.permute.xlu1 %1028 }
 0x15d   :  { %v9675_v37 = vpop.permute.xlu0 %1026 }
 0x15e   :  { %984 = vrot.lane.b32.xlu1 %v506_v35, %s9167_s12 }
 0x15f   :  { %982 = vrot.lane.b32.xlu0 %v503_v24, %s9167_s12  ;;  %v551_v24 = vpop.f32.mrf.mxu0 }
 0x160   :  { %v9683_v43 = vpop.permute.xlu1 %928 }
 0x161   :  { %v9681_v42 = vpop.permute.xlu0 %926 }
 0x162   :  { %1080 = vrot.lane.b32.xlu1 %v698_v41, %s9167_s12  ;;  %v743_v41 = vpop.f32.mrf.mxu1 }
 0x163   :  { %1078 = vrot.lane.b32.xlu0 %v695_v29, %s9167_s12 }
 0x164   :  { %v9689_v47 = vpop.permute.xlu1 %1024 }
 0x165   :  { %v9687_v46 = vpop.permute.xlu0 %1022 }
 0x166   :  { %996 = vrot.lane.b32.xlu1 %v7954_v48, %s9167_s12 }
 0x167   :  { %994 = vrot.lane.b32.xlu0 %v7953_v40, %s9167_s12  ;;  %v9745_v40 = vpop.f32.mrf.mxu0 }
 0x168   :  { %v9695_v51 = vpop.permute.xlu1 %940 }
 0x169   :  { %v9693_v50 = vpop.permute.xlu0 %938 }
 0x16a   :  { %1092 = vrot.lane.b32.xlu1 %v8002_v52, %s9167_s12 }
 0x16b   :  { %1090 = vrot.lane.b32.xlu0 %v8001_v45, %s9167_s12 }
 0x16c   :  { %v9701_v56 = vpop.permute.xlu1 %1036 }
 0x16d   :  { %v9699_v54 = vpop.permute.xlu0 %1034 }
 0x16e   :  { %992 = vrot.lane.b32.xlu1 %v522_v53, %s9167_s12 }
 0x16f   :  { %990 = vrot.lane.b32.xlu0 %v519_v44, %s9167_s12  ;;  %v15104_v44 = vlaneseq }
 0x170   :  { %v9707_v63 = vpop.permute.xlu1 %936 }
 0x171   :  { %v9705_v61 = vpop.permute.xlu0 %934  ;;  %v9757_v52 = vshrl.u32 %v15104_v44, 7 }
 0x172   :  { %1088 = vrot.lane.b32.xlu1 %v714_v59, %s9167_s12  ;;  %v554_v59 = vpop.f32.mrf.mxu0 }
 0x173   :  { %1086 = vrot.lane.b32.xlu0 %v711_v49, %s9167_s12  ;;  %v9754_v49 = vpop.f32.mrf.mxu1  ;;  %15470 = vst [vmem:[#allocation11_spill] sm:$0xff] %v9757_v52 }
 0x174   :  { %v9713_v3 = vpop.permute.xlu1 %1032 }
 0x175   :  { %v9711_v2 = vpop.permute.xlu0 %1030 }
 0x176   :  { %1004 = vrot.lane.b32.xlu1 %v7958_v4, %s9167_s12 }
 0x177   :  { %1002 = vrot.lane.b32.xlu0 %v7957_v58, %s9167_s12 }
 0x178   :  { %v9719_v7 = vpop.permute.xlu1 %948 }
 0x179   :  { %v9717_v6 = vpop.permute.xlu0 %946 }
 0x17a   :  { %1100 = vrot.lane.b32.xlu1 %v8006_v8, %s9167_s12 }
 0x17b   :  { %1098 = vrot.lane.b32.xlu0 %v8005_v1, %s9167_s12 }
 0x17c   :  { %v9727_v11 = vpop.permute.xlu1 %1044 }
 0x17d   :  { %v9725_v10 = vpop.permute.xlu0 %1042 }
 0x17e   :  { %1000 = vrot.lane.b32.xlu1 %v9723_v9, %s9167_s12 }
 0x17f   :  { %998 = vrot.lane.b32.xlu0 %v535_v0, %s9167_s12  ;;  %v9767_v0 = vsub.s32 7, %v9757_v52 }
 0x180   :  { %v9736_v20 = vpop.permute.xlu1 %944 }
 0x181   :  { %v9734_v16 = vpop.permute.xlu0 %942  ;;  %15471 = vst [vmem:[#allocation12_spill] sm:$0xff] %v9767_v0  ;;  %v761_v8 = vrot.slane %v9563_v31, %v9767_v0 }
 0x182   :  { %1096 = vrot.lane.b32.xlu1 %v9732_v13, %s9167_s12 }
 0x183   :  { %1094 = vrot.lane.b32.xlu0 %v727_v5, %s9167_s12  ;;  %v746_v5 = vpop.f32.mrf.mxu1 }
 0x184   :  { %v9743_v35 = vpop.permute.xlu1 %1040 }
 0x185   :  { %v9741_v29 = vpop.permute.xlu0 %1038 }
 0x186   :  { %1012 = vrot.lane.b32.xlu1 %v9745_v40, %s9167_s12 }
 0x187   :  { %1010 = vrot.lane.b32.xlu0 %v7961_v12, %s9167_s12  ;;  %v1208_v12 = vmul.f32 %v9635_v15, %v761_v8 }
 0x188   :  { %v9752_v48 = vpop.permute.xlu1 %956 }
 0x189   :  { %v9750_v45 = vpop.permute.xlu0 %954 }
 0x18a   :  { %1108 = vrot.lane.b32.xlu1 %v9754_v49, %s9167_s12 }
 0x18b   :  { %1106 = vrot.lane.b32.xlu0 %v8009_v25, %s9167_s12  ;;  %v1209_v25 = vmul.f32 %v9643_v19, %v761_v8  ;;  %v1206_v19 = vmul.f32 %v9641_v18, %v761_v8  ;;  %v765_v18 = vrot.slane %v9573_v36, %v9767_v0 }
 0x18c   :  { %v9764_v58 = vpop.permute.xlu1 %1052 }
 0x18d   :  { %v9762_v53 = vpop.permute.xlu0 %1050 }
 0x18e   :  { %1008 = vrot.lane.b32.xlu1 %v554_v59, %s9167_s12  ;;  %v793_v59 = vrot.slane %v9568_v33, %v9767_v0  ;;  %v1207_v33 = vmul.f32 %v9659_v27, %v761_v8  ;;  %v1212_v27 = vmul.f32 %v9666_v30, %v765_v18 }
 0x18f   :  { %1006 = vrot.lane.b32.xlu0 %v551_v24, %s9167_s12 }
 0x190   :  { %v9773_v4 = vpop.permute.xlu1 %952  ;;  %v1256_v31 = vmul.f32 %v9633_v14, %v793_v59  ;;  %v1254_v14 = vmul.f32 %v9650_v22, %v793_v59 }
 0x191   :  { %v9771_v1 = vpop.permute.xlu0 %950 }
 0x192   :  { %1104 = vrot.lane.b32.xlu1 %v746_v5, %s9167_s12 }
 0x193   :  { %1102 = vrot.lane.b32.xlu0 %v743_v41, %s9167_s12  ;;  %v1257_v41 = vmul.f32 %v9652_v23, %v793_v59  ;;  %v1255_v23 = vmul.f32 %v9657_v26, %v793_v59  ;;  %v797_v26 = vrot.slane %v9578_v38, %v9767_v0  ;;  %v1211_v38 = vmul.f32 %v9683_v43, %v761_v8 }
 0x194   :  { %v9783_v24 = vpop.permute.xlu1 %1048  ;;  %v1217_v43 = vmul.f32 %v9695_v51, %v765_v18  ;;  %v1215_v51 = vmul.f32 %v9707_v63, %v765_v18 }
 0x195   :  { %v9781_v44 = vpop.permute.xlu0 %1046  ;;  %v1260_v36 = vmul.f32 %v9675_v37, %v797_v26  ;;  %v1258_v37 = vmul.f32 %v9687_v46, %v793_v59  ;;  %v1264_v46 = vmul.f32 %v9699_v54, %v797_v26  ;;  %v1262_v54 = vmul.f32 %v9711_v2, %v797_v26 }
 0x196   :  { %1404 = vrot.lane.b32.xlu1 %v1209_v25, %s9168_s13 }
 0x197   :  { %1402 = vrot.lane.b32.xlu0 %v1208_v12, %s9168_s13 }
 0x198   :  { %v9793_v15 = vpop.permute.xlu1 %964 }
 0x199   :  { %v9791_v5 = vpop.permute.xlu0 %962 }
 0x19a   :  { %1500 = vrot.lane.b32.xlu1 %v1257_v41, %s9168_s13  ;;  %v1213_v41 = vmul.f32 %v9668_v32, %v765_v18  ;;  %v1210_v32 = vmul.f32 %v9681_v42, %v761_v8  ;;  %v1216_v42 = vmul.f32 %v9693_v50, %v765_v18  ;;  %v1214_v50 = vmul.f32 %v9705_v61, %v765_v18 }
 0x19b   :  { %1498 = vrot.lane.b32.xlu0 %v1256_v31, %s9168_s13  ;;  %v769_v61 = vrot.slane %v9599_v55, %v9767_v0 }
 0x19c   :  { %v9801_v12 = vpop.permute.xlu1 %1060 }
 0x19d   :  { %v9799_v52 = vpop.permute.xlu0 %1058  ;;  %v1220_v63 = vmul.f32 %v9717_v6, %v769_v61  ;;  %v1221_v18 = vmul.f32 %v9719_v7, %v769_v61  ;;  %v1218_v7 = vmul.f32 %v9734_v16, %v769_v61  ;;  %v773_v16 = vrot.slane %v9609_v60, %v9767_v0 }
 0x19e   :  { %1400 = vrot.lane.b32.xlu1 %v1207_v33, %s9168_s13  ;;  %v1261_v33 = vmul.f32 %v9677_v39, %v797_v26  ;;  %v1259_v39 = vmul.f32 %v9689_v47, %v793_v59  ;;  %v1265_v47 = vmul.f32 %v9701_v56, %v797_v26  ;;  %v1263_v56 = vmul.f32 %v9713_v3, %v797_v26 }
 0x19f   :  { %1398 = vrot.lane.b32.xlu0 %v1206_v19, %s9168_s13  ;;  %v801_v3 = vrot.slane %v9604_v57, %v9767_v0  ;;  %v1219_v57 = vmul.f32 %v9736_v20, %v769_v61  ;;  %v1224_v20 = vmul.f32 %v9750_v45, %v773_v16 }
 0x1a0   :  { %v9809_v31 = vpop.permute.xlu1 %960 }
 0x1a1   :  { %v9807_v25 = vpop.permute.xlu0 %958  ;;  %v1268_v55 = vmul.f32 %v9725_v10, %v801_v3  ;;  %v1269_v26 = vmul.f32 %v9727_v11, %v801_v3  ;;  %v1266_v10 = vmul.f32 %v9741_v29, %v801_v3  ;;  %v1267_v11 = vmul.f32 %v9743_v35, %v801_v3 }
 0x1a2   :  { %1496 = vrot.lane.b32.xlu1 %v1255_v23, %s9168_s13  ;;  %v805_v35 = vrot.slane %v9614_v62, %v9767_v0  ;;  %v1223_v62 = vmul.f32 %v9773_v4, %v769_v61  ;;  %v1229_v4 = vmul.f32 %v9793_v15, %v773_v16  ;;  %v1227_v15 = vmul.f32 %v9809_v31, %v773_v16 }
 0x1a3   :  { %1494 = vrot.lane.b32.xlu0 %v1254_v14, %s9168_s13 }
 0x1a4   :  { %v9819_v22 = vpop.permute.xlu1 %1056  ;;  %v1272_v60 = vmul.f32 %v9762_v53, %v805_v35  ;;  %v1270_v53 = vmul.f32 %v9781_v44, %v801_v3  ;;  %v1276_v44 = vmul.f32 %v9799_v52, %v805_v35 }
 0x1a5   :  { %v9817_v19 = vpop.permute.xlu0 %1054 }
 0x1a6   :  { %1412 = vrot.lane.b32.xlu1 %v1213_v41, %s9168_s13  ;;  %v1274_v52 = vmul.f32 %v9817_v19, %v805_v35 }
 0x1a7   :  { %1410 = vrot.lane.b32.xlu0 %v1212_v27, %s9168_s13 }
 0x1a8   :  { %v9829_v30 = vpop.permute.xlu1 %972 }
 0x1a9   :  { %v9827_v14 = vpop.permute.xlu0 %970 }
 0x1aa   :  { %1508 = vrot.lane.b32.xlu1 %v1261_v33, %s9168_s13 }
 0x1ab   :  { %1506 = vrot.lane.b32.xlu0 %v1260_v36, %s9168_s13 }
 0x1ac   :  { %v9837_v27 = vpop.permute.xlu1 %1068 }
 0x1ad   :  { %v9835_v23 = vpop.permute.xlu0 %1066 }
 0x1ae   :  { %1408 = vrot.lane.b32.xlu1 %v1211_v38, %s9168_s13 }
 0x1af   :  { %1406 = vrot.lane.b32.xlu0 %v1210_v32, %s9168_s13 }
 0x1b0   :  { %v9845_v36 = vpop.permute.xlu1 %968 }
 0x1b1   :  { %v9843_v41 = vpop.permute.xlu0 %966 }
 0x1b2   :  { %1504 = vrot.lane.b32.xlu1 %v1259_v39, %s9168_s13 }
 0x1b3   :  { %1502 = vrot.lane.b32.xlu0 %v1258_v37, %s9168_s13 }
 0x1b4   :  { %v9853_v33 = vpop.permute.xlu1 %1064 }
 0x1b5   :  { %v9851_v8 = vpop.permute.xlu0 %1062 }
 0x1b6   :  { %1420 = vrot.lane.b32.xlu1 %v1217_v43, %s9168_s13 }
 0x1b7   :  { %1418 = vrot.lane.b32.xlu0 %v1216_v42, %s9168_s13 }
 0x1b8   :  { %v9861_v32 = vpop.permute.xlu1 %980 }
 0x1b9   :  { %v9859_v59 = vpop.permute.xlu0 %978 }
 0x1ba   :  { %1516 = vrot.lane.b32.xlu1 %v1265_v47, %s9168_s13 }
 0x1bb   :  { %1514 = vrot.lane.b32.xlu0 %v1264_v46, %s9168_s13 }
 0x1bc   :  { %v9869_v37 = vpop.permute.xlu1 %1076 }
 0x1bd   :  { %v9867_v38 = vpop.permute.xlu0 %1074 }
 0x1be   :  { %1416 = vrot.lane.b32.xlu1 %v1215_v51, %s9168_s13 }
 0x1bf   :  { %1414 = vrot.lane.b32.xlu0 %v1214_v50, %s9168_s13 }
 0x1c0   :  { %v9877_v42 = vpop.permute.xlu1 %976 }
 0x1c1   :  { %v9875_v39 = vpop.permute.xlu0 %974 }
 0x1c2   :  { %1512 = vrot.lane.b32.xlu1 %v1263_v56, %s9168_s13  ;;  %v1225_v56 = vmul.f32 %v9752_v48, %v773_v16  ;;  %v1222_v48 = vmul.f32 %v9771_v1, %v769_v61  ;;  %v1228_v1 = vmul.f32 %v9791_v5, %v773_v16  ;;  %v1226_v5 = vmul.f32 %v9807_v25, %v773_v16 }
 0x1c3   :  { %1510 = vrot.lane.b32.xlu0 %v1262_v54, %s9168_s13  ;;  %v777_v25 = vrot.slane %v9639_v17, %v9767_v0 }
 0x1c4   :  { %v9887_v2 = vpop.permute.xlu1 %1072 }
 0x1c5   :  { %v9885_v43 = vpop.permute.xlu0 %1070  ;;  %v1232_v31 = vmul.f32 %v9827_v14, %v777_v25  ;;  %v1233_v16 = vmul.f32 %v9829_v30, %v777_v25  ;;  %v1230_v30 = vmul.f32 %v9843_v41, %v777_v25  ;;  %v781_v41 = vrot.slane %v9661_v28, %v9767_v0 }
 0x1c6   :  { %1428 = vrot.lane.b32.xlu1 %v1221_v18, %s9168_s13  ;;  %v1273_v18 = vmul.f32 %v9764_v58, %v805_v35  ;;  %v1271_v58 = vmul.f32 %v9783_v24, %v801_v3  ;;  %v1277_v24 = vmul.f32 %v9801_v12, %v805_v35  ;;  %v1275_v12 = vmul.f32 %v9819_v22, %v805_v35 }
 0x1c7   :  { %1426 = vrot.lane.b32.xlu0 %v1220_v63, %s9168_s13  ;;  %v809_v22 = vrot.slane %v9648_v21, %v9767_v0  ;;  %v1231_v21 = vmul.f32 %v9845_v36, %v777_v25  ;;  %v1236_v36 = vmul.f32 %v9859_v59, %v781_v41 }
 0x1c8   :  { %v9897_v6 = vpop.permute.xlu1 %988 }
 0x1c9   :  { %v9895_v46 = vpop.permute.xlu0 %986  ;;  %v1280_v17 = vmul.f32 %v9835_v23, %v809_v22  ;;  %v1281_v35 = vmul.f32 %v9837_v27, %v809_v22  ;;  %v1278_v23 = vmul.f32 %v9851_v8, %v809_v22  ;;  %v1279_v27 = vmul.f32 %v9853_v33, %v809_v22 }
 0x1ca   :  { %1524 = vrot.lane.b32.xlu1 %v1269_v26, %s9168_s13  ;;  %v813_v33 = vrot.slane %v9670_v34, %v9767_v0  ;;  %v1235_v34 = vmul.f32 %v9877_v42, %v777_v25  ;;  %v1241_v42 = vmul.f32 %v9897_v6, %v781_v41 }
 0x1cb   :  { %1522 = vrot.lane.b32.xlu0 %v1268_v55, %s9168_s13 }
 0x1cc   :  { %v9905_v50 = vpop.permute.xlu1 %1084  ;;  %v1284_v28 = vmul.f32 %v9867_v38, %v813_v33  ;;  %v1282_v38 = vmul.f32 %v9885_v43, %v809_v22 }
 0x1cd   :  { %v9903_v47 = vpop.permute.xlu0 %1082 }
 0x1ce   :  { %1424 = vrot.lane.b32.xlu1 %v1219_v57, %s9168_s13  ;;  %v1288_v43 = vmul.f32 %v9903_v47, %v813_v33 }
 0x1cf   :  { %1422 = vrot.lane.b32.xlu0 %v1218_v7, %s9168_s13 }
 0x1d0   :  { %v9913_v54 = vpop.permute.xlu1 %984 }
 0x1d1   :  { %v9911_v51 = vpop.permute.xlu0 %982  ;;  %v1239_v6 = vmul.f32 %v9913_v54, %v781_v41 }
 0x1d2   :  { %1520 = vrot.lane.b32.xlu1 %v1267_v11, %s9168_s13 }
 0x1d3   :  { %1518 = vrot.lane.b32.xlu0 %v1266_v10, %s9168_s13 }
 0x1d4   :  { %v9923_v29 = vpop.permute.xlu1 %1080 }
 0x1d5   :  { %v9921_v63 = vpop.permute.xlu0 %1078 }
 0x1d6   :  { %1436 = vrot.lane.b32.xlu1 %v1225_v56, %s9168_s13  ;;  %v1286_v47 = vmul.f32 %v9921_v63, %v813_v33 }
 0x1d7   :  { %1434 = vrot.lane.b32.xlu0 %v1224_v20, %s9168_s13 }
 0x1d8   :  { %v9933_v45 = vpop.permute.xlu1 %996 }
 0x1d9   :  { %v9931_v55 = vpop.permute.xlu0 %994 }
 0x1da   :  { %1532 = vrot.lane.b32.xlu1 %v1273_v18, %s9168_s13 }
 0x1db   :  { %1530 = vrot.lane.b32.xlu0 %v1272_v60, %s9168_s13 }
 0x1dc   :  { %v9941_v7 = vpop.permute.xlu1 %1092 }
 0x1dd   :  { %v9939_v26 = vpop.permute.xlu0 %1090 }
 0x1de   :  { %1432 = vrot.lane.b32.xlu1 %v1223_v62, %s9168_s13 }
 0x1df   :  { %1430 = vrot.lane.b32.xlu0 %v1222_v48, %s9168_s13 }
 0x1e0   :  { %v9949_v10 = vpop.permute.xlu1 %992 }
 0x1e1   :  { %v9947_v57 = vpop.permute.xlu0 %990 }
 0x1e2   :  { %1528 = vrot.lane.b32.xlu1 %v1271_v58, %s9168_s13 }
 0x1e3   :  { %1526 = vrot.lane.b32.xlu0 %v1270_v53, %s9168_s13 }
 0x1e4   :  { %v9957_v11 = vpop.permute.xlu1 %1088 }
 0x1e5   :  { %v9955_v61 = vpop.permute.xlu0 %1086 }
 0x1e6   :  { %1444 = vrot.lane.b32.xlu1 %v1229_v4, %s9168_s13 }
 0x1e7   :  { %1442 = vrot.lane.b32.xlu0 %v1228_v1, %s9168_s13 }
 0x1e8   :  { %v9965_v20 = vpop.permute.xlu1 %1004 }
 0x1e9   :  { %v9963_v3 = vpop.permute.xlu0 %1002 }
 0x1ea   :  { %1540 = vrot.lane.b32.xlu1 %v1277_v24, %s9168_s13  ;;  %v1237_v24 = vmul.f32 %v9861_v32, %v781_v41  ;;  %v1234_v32 = vmul.f32 %v9875_v39, %v777_v25  ;;  %v1240_v39 = vmul.f32 %v9895_v46, %v781_v41  ;;  %v1238_v46 = vmul.f32 %v9911_v51, %v781_v41 }
 0x1eb   :  { %1538 = vrot.lane.b32.xlu0 %v1276_v44, %s9168_s13  ;;  %v785_v51 = vrot.slane %v9723_v9, %v9767_v0 }
 0x1ec   :  { %v9973_v60 = vpop.permute.xlu1 %1100 }
 0x1ed   :  { %v9971_v56 = vpop.permute.xlu0 %1098  ;;  %v1244_v54 = vmul.f32 %v9931_v55, %v785_v51  ;;  %v1245_v41 = vmul.f32 %v9933_v45, %v785_v51  ;;  %v1242_v45 = vmul.f32 %v9947_v57, %v785_v51  ;;  %v789_v57 = vrot.slane %v9745_v40, %v9767_v0 }
 0x1ee   :  { %1440 = vrot.lane.b32.xlu1 %v1227_v15, %s9168_s13  ;;  %v1285_v15 = vmul.f32 %v9869_v37, %v813_v33  ;;  %v1283_v37 = vmul.f32 %v9887_v2, %v809_v22  ;;  %v1289_v2 = vmul.f32 %v9905_v50, %v813_v33  ;;  %v1287_v50 = vmul.f32 %v9923_v29, %v813_v33 }
 0x1ef   :  { %1438 = vrot.lane.b32.xlu0 %v1226_v5, %s9168_s13  ;;  %v817_v29 = vrot.slane %v9732_v13, %v9767_v0  ;;  %v1243_v13 = vmul.f32 %v9949_v10, %v785_v51  ;;  %v1248_v10 = vmul.f32 %v9963_v3, %v789_v57 }
 0x1f0   :  { %v9981_v48 = vpop.permute.xlu1 %1000 }
 0x1f1   :  { %v9979_v18 = vpop.permute.xlu0 %998  ;;  %v1292_v9 = vmul.f32 %v9939_v26, %v817_v29  ;;  %v1293_v33 = vmul.f32 %v9941_v7, %v817_v29  ;;  %v1290_v26 = vmul.f32 %v9955_v61, %v817_v29  ;;  %v1291_v7 = vmul.f32 %v9957_v11, %v817_v29 }
 0x1f2   :  { %1536 = vrot.lane.b32.xlu1 %v1275_v12, %s9168_s13  ;;  %v821_v11 = vrot.slane %v9754_v49, %v9767_v0  ;;  %v1247_v49 = vmul.f32 %v9981_v48, %v785_v51 }
 0x1f3   :  { %1534 = vrot.lane.b32.xlu0 %v1274_v52, %s9168_s13 }
 0x1f4   :  { %v9991_v19 = vpop.permute.xlu1 %1096  ;;  %v1296_v40 = vmul.f32 %v9971_v56, %v821_v11 }
 0x1f5   :  { %v9989_v62 = vpop.permute.xlu0 %1094 }
 0x1f6   :  { %1452 = vrot.lane.b32.xlu1 %v1233_v16, %s9168_s13  ;;  %v1294_v56 = vmul.f32 %v9989_v62, %v817_v29 }
 0x1f7   :  { %1450 = vrot.lane.b32.xlu0 %v1232_v31, %s9168_s13 }
 0x1f8   :  { %v10001_v14 = vpop.permute.xlu1 %1012 }
 0x1f9   :  { %v9999_v53 = vpop.permute.xlu0 %1010  ;;  %v1253_v48 = vmul.f32 %v10001_v14, %v789_v57 }
 0x1fa   :  { %1548 = vrot.lane.b32.xlu1 %v1281_v35, %s9168_s13 }
 0x1fb   :  { %1546 = vrot.lane.b32.xlu0 %v1280_v17, %s9168_s13 }
 0x1fc   :  { %v10009_v1 = vpop.permute.xlu1 %1108 }
 0x1fd   :  { %v10007_v58 = vpop.permute.xlu0 %1106 }
 0x1fe   :  { %1448 = vrot.lane.b32.xlu1 %v1231_v21, %s9168_s13  ;;  %v1300_v62 = vmul.f32 %v10007_v58, %v821_v11 }
 0x1ff   :  { %1446 = vrot.lane.b32.xlu0 %v1230_v30, %s9168_s13 }
 0x200   :  { %v10017_v44 = vpop.permute.xlu1 %1008 }
 0x201   :  { %v10015_v4 = vpop.permute.xlu0 %1006  ;;  %v1251_v14 = vmul.f32 %v10017_v44, %v789_v57 }
 0x202   :  { %1544 = vrot.lane.b32.xlu1 %v1279_v27, %s9168_s13 }
 0x203   :  { %1542 = vrot.lane.b32.xlu0 %v1278_v23, %s9168_s13 }
 0x204   :  { %v10027_v8 = vpop.permute.xlu1 %1104 }
 0x205   :  { %v10025_v5 = vpop.permute.xlu0 %1102 }
 0x206   :  { %1460 = vrot.lane.b32.xlu1 %v1237_v24, %s9168_s13  ;;  %v1298_v58 = vmul.f32 %v10025_v5, %v821_v11 }
 0x207   :  { %1458 = vrot.lane.b32.xlu0 %v1236_v36, %s9168_s13 }
 0x208   :  { %v10037_v59 = vpop.permute.xlu1 %1404 }
 0x209   :  { %v10035_v52 = vpop.permute.xlu0 %1402 }
 0x20a   :  { %1556 = vrot.lane.b32.xlu1 %v1285_v15, %s9168_s13 }
 0x20b   :  { %1554 = vrot.lane.b32.xlu0 %v1284_v28, %s9168_s13 }
 0x20c   :  { %v10045_v31 = vpop.permute.xlu1 %1500 }
 0x20d   :  { %v10043_v12 = vpop.permute.xlu0 %1498 }
 0x20e   :  { %1456 = vrot.lane.b32.xlu1 %v1235_v34, %s9168_s13 }
 0x20f   :  { %1454 = vrot.lane.b32.xlu0 %v1234_v32, %s9168_s13 }
 0x210   :  { %v10053_v17 = vpop.permute.xlu1 %1400 }
 0x211   :  { %v10051_v16 = vpop.permute.xlu0 %1398 }
 0x212   :  { %1552 = vrot.lane.b32.xlu1 %v1283_v37, %s9168_s13  ;;  %v1249_v37 = vmul.f32 %v9965_v20, %v789_v57  ;;  %v1246_v20 = vmul.f32 %v9979_v18, %v785_v51  ;;  %v1252_v18 = vmul.f32 %v9999_v53, %v789_v57  ;;  %v1250_v53 = vmul.f32 %v10015_v4, %v789_v57 }
 0x213   :  { %1550 = vrot.lane.b32.xlu0 %v1282_v38, %s9168_s13 }
 0x214   :  { %v10061_v35 = vpop.permute.xlu1 %1496 }
 0x215   :  { %v10059_v25 = vpop.permute.xlu0 %1494 }
 0x216   :  { %1468 = vrot.lane.b32.xlu1 %v1241_v42, %s9168_s13  ;;  %v1297_v42 = vmul.f32 %v9973_v60, %v821_v11  ;;  %v1295_v60 = vmul.f32 %v9991_v19, %v817_v29  ;;  %v1301_v19 = vmul.f32 %v10009_v1, %v821_v11  ;;  %v1299_v1 = vmul.f32 %v10027_v8, %v821_v11 }
 0x217   :  { %1466 = vrot.lane.b32.xlu0 %v1240_v39, %s9168_s13 }
 0x218   :  { %v10069_v30 = vpop.permute.xlu1 %1412 }
 0x219   :  { %v10067_v22 = vpop.permute.xlu0 %1410 }
 0x21a   :  { %1564 = vrot.lane.b32.xlu1 %v1289_v2, %s9168_s13 }
 0x21b   :  { %1562 = vrot.lane.b32.xlu0 %v1288_v43, %s9168_s13 }
 0x21c   :  { %v10077_v23 = vpop.permute.xlu1 %1508 }
 0x21d   :  { %v10075_v21 = vpop.permute.xlu0 %1506 }
 0x21e   :  { %1464 = vrot.lane.b32.xlu1 %v1239_v6, %s9168_s13 }
 0x21f   :  { %1462 = vrot.lane.b32.xlu0 %v1238_v46, %s9168_s13 }
 0x220   :  { %v10085_v36 = vpop.permute.xlu1 %1408 }
 0x221   :  { %v10083_v27 = vpop.permute.xlu0 %1406 }
 0x222   :  { %1560 = vrot.lane.b32.xlu1 %v1287_v50, %s9168_s13 }
 0x223   :  { %1558 = vrot.lane.b32.xlu0 %v1286_v47, %s9168_s13 }
 0x224   :  { %v10095_v63 = vpop.permute.xlu1 %1504 }
 0x225   :  { %v10093_v24 = vpop.permute.xlu0 %1502 }
 0x226   :  { %1476 = vrot.lane.b32.xlu1 %v1245_v41, %s9168_s13 }
 0x227   :  { %1474 = vrot.lane.b32.xlu0 %v1244_v54, %s9168_s13 }
 0x228   :  { %v10105_v55 = vpop.permute.xlu1 %1420 }
 0x229   :  { %v10103_v28 = vpop.permute.xlu0 %1418 }
 0x22a   :  { %1572 = vrot.lane.b32.xlu1 %v1293_v33, %s9168_s13 }
 0x22b   :  { %1570 = vrot.lane.b32.xlu0 %v1292_v9, %s9168_s13 }
 0x22c   :  { %v10113_v32 = vpop.permute.xlu1 %1516 }
 0x22d   :  { %v10111_v15 = vpop.permute.xlu0 %1514 }
 0x22e   :  { %1472 = vrot.lane.b32.xlu1 %v1243_v13, %s9168_s13 }
 0x22f   :  { %1470 = vrot.lane.b32.xlu0 %v1242_v45, %s9168_s13 }
 0x230   :  { %v10121_v38 = vpop.permute.xlu1 %1416 }
 0x231   :  { %v10119_v34 = vpop.permute.xlu0 %1414 }
 0x232   :  { %1568 = vrot.lane.b32.xlu1 %v1291_v7, %s9168_s13 }
 0x233   :  { %1566 = vrot.lane.b32.xlu0 %v1290_v26, %s9168_s13 }
 0x234   :  { %v10131_v61 = vpop.permute.xlu1 %1512 }
 0x235   :  { %v10129_v39 = vpop.permute.xlu0 %1510 }
 0x236   :  { %1484 = vrot.lane.b32.xlu1 %v1249_v37, %s9168_s13 }
 0x237   :  { %1482 = vrot.lane.b32.xlu0 %v1248_v10, %s9168_s13 }
 0x238   :  { %v10141_v3 = vpop.permute.xlu1 %1428 }
 0x239   :  { %v10139_v43 = vpop.permute.xlu0 %1426 }
 0x23a   :  { %1580 = vrot.lane.b32.xlu1 %v1297_v42, %s9168_s13 }
 0x23b   :  { %1578 = vrot.lane.b32.xlu0 %v1296_v40, %s9168_s13 }
 0x23c   :  { %v10149_v46 = vpop.permute.xlu1 %1524 }
 0x23d   :  { %v10147_v2 = vpop.permute.xlu0 %1522 }
 0x23e   :  { %1480 = vrot.lane.b32.xlu1 %v1247_v49, %s9168_s13 }
 0x23f   :  { %1478 = vrot.lane.b32.xlu0 %v1246_v20, %s9168_s13 }
 0x240   :  { %v10157_v47 = vpop.permute.xlu1 %1424 }
 0x241   :  { %v10155_v6 = vpop.permute.xlu0 %1422 }
 0x242   :  { %1576 = vrot.lane.b32.xlu1 %v1295_v60, %s9168_s13  ;;  %v1693_v60 = vsel %vm1686_vm1, %v10035_v52, 0.0  ;;  %v1696_v52 = vsel %vm1686_vm1, %v10037_v59, 0.0  ;;  %v1834_v59 = vsel %vm1686_vm1, %v10061_v35, 0.0 }
 0x243   :  { %1574 = vrot.lane.b32.xlu0 %v1294_v56, %s9168_s13 }
 0x244   :  { %v10165_v51 = vpop.permute.xlu1 %1520 }
 0x245   :  { %v10163_v50 = vpop.permute.xlu0 %1518 }
 0x246   :  { %1492 = vrot.lane.b32.xlu1 %v1253_v48, %s9168_s13 }
 0x247   :  { %1490 = vrot.lane.b32.xlu0 %v1252_v18, %s9168_s13 }
 0x248   :  { %v10173_v41 = vpop.permute.xlu1 %1436 }
 0x249   :  { %v10171_v54 = vpop.permute.xlu0 %1434 }
 0x24a   :  { %1588 = vrot.lane.b32.xlu1 %v1301_v19, %s9168_s13  ;;  %v1837_v19 = vsel %vm1686_vm1, %v10043_v12, 0.0  ;;  %v1840_v12 = vsel %vm1686_vm1, %v10045_v31, 0.0  ;;  %v1708_v31 = vsel %vm1686_vm1, %v10069_v30, 0.0  ;;  %v1702_v30 = vsel %vm1686_vm1, %v10085_v36, 0.0 }
 0x24b   :  { %1586 = vrot.lane.b32.xlu0 %v1300_v62, %s9168_s13  ;;  %v1687_v62 = vsel %vm1686_vm1, %v10051_v16, 0.0  ;;  %v1720_v36 = vsel %vm1686_vm1, %v10105_v55, 0.0  ;;  %v1732_v55 = vsel %vm1686_vm1, %v10141_v3, 0.0  ;;  %v1744_v3 = vsel %vm1686_vm1, %v10173_v41, 0.0 }
 0x24c   :  { %v10181_v9 = vpop.permute.xlu1 %1532 }
 0x24d   :  { %v10179_v29 = vpop.permute.xlu0 %1530 }
 0x24e   :  { %1488 = vrot.lane.b32.xlu1 %v1251_v14, %s9168_s13 }
 0x24f   :  { %1486 = vrot.lane.b32.xlu0 %v1250_v53, %s9168_s13 }
 0x250   :  { %v10189_v45 = vpop.permute.xlu1 %1432 }
 0x251   :  { %v10187_v33 = vpop.permute.xlu0 %1430 }
 0x252   :  { %1584 = vrot.lane.b32.xlu1 %v1299_v1, %s9168_s13 }
 0x253   :  { %1582 = vrot.lane.b32.xlu0 %v1298_v58, %s9168_s13  ;;  %v1831_v58 = vsel %vm1686_vm1, %v10059_v25, 0.0  ;;  %v1705_v25 = vsel %vm1686_vm1, %v10067_v22, 0.0  ;;  %v1699_v22 = vsel %vm1686_vm1, %v10083_v27, 0.0  ;;  %v1717_v27 = vsel %vm1686_vm1, %v10103_v28, 0.0 }
 0x254   :  { %v10195_v44 = vpop.permute.xlu1 %1528  ;;  %v1729_v28 = vsel %vm1686_vm1, %v10139_v43, 0.0 }
 0x255   :  { %v10193_v4 = vpop.permute.xlu0 %1526 }
 0x258   :  { %v10199_v26 = vpop.permute.xlu1 %1444 }
 0x259   :  { %v10197_v13 = vpop.permute.xlu0 %1442  ;;  %v1756_v41 = vsel %vm1686_vm1, %v10199_v26, 0.0 }
 0x25c   :  { %v10203_v5 = vpop.permute.xlu1 %1540 }
 0x25d   :  { %v10201_v7 = vpop.permute.xlu0 %1538 }
 0x260   :  { %v10207_v57 = vpop.permute.xlu1 %1440 }
 0x261   :  { %v10205_v8 = vpop.permute.xlu0 %1438 }
 0x264   :  { %v10211_v37 = vpop.permute.xlu1 %1536 }
 0x265   :  { %v10209_v10 = vpop.permute.xlu0 %1534 }
 0x268   :  { %v10215_v40 = vpop.permute.xlu1 %1452 }
 0x269   :  { %v10213_v11 = vpop.permute.xlu0 %1450 }
 0x26c   :  { %v10219_v20 = vpop.permute.xlu1 %1548 }
 0x26d   :  { %v10217_v42 = vpop.permute.xlu0 %1546 }
 0x270   :  { %v10223_v56 = vpop.permute.xlu1 %1448 }
 0x271   :  { %v10221_v49 = vpop.permute.xlu0 %1446 }
 0x272   :  { %1694 = vadd.xlane.f32.xlu0 %v1693_v60  ;;  %v1690_v60 = vsel %vm1686_vm1, %v10053_v17, 0.0  ;;  %v1849_v17 = vsel %vm1686_vm1, %v10075_v21, 0.0  ;;  %v1843_v21 = vsel %vm1686_vm1, %v10093_v24, 0.0  ;;  %v1711_v24 = vsel %vm1686_vm1, %v10119_v34, 0.0 }
 0x273   :  { %v1723_v34 = vsel %vm1686_vm1, %v10155_v6, 0.0  ;;  %v1735_v6 = vsel %vm1686_vm1, %v10187_v33, 0.0  ;;  %v1759_v26 = vsel %vm1686_vm1, %v10221_v49, 0.0 }
 0x274   :  { %v10229_v48 = vpop.permute.xlu1 %1544 }
 0x275   :  { %v10227_v18 = vpop.permute.xlu0 %1542 }
 0x276   :  { %1688 = vadd.xlane.f32.xlu0 %v1687_v62  ;;  %1838 = vadd.xlane.f32.xlu1 %v1837_v19 }
 0x278   :  { %v10237_v14 = vpop.permute.xlu1 %1460 }
 0x279   :  { %v10235_v53 = vpop.permute.xlu0 %1458 }
 0x27a   :  { %1697 = vadd.xlane.f32.xlu0 %v1696_v52  ;;  %1832 = vadd.xlane.f32.xlu1 %v1831_v58 }
 0x27c   :  { %v10245_v16 = vpop.permute.xlu1 %1556 }
 0x27d   :  { %v10243_v1 = vpop.permute.xlu0 %1554 }
 0x27e   :  { %1841 = vadd.xlane.f32.xlu0 %v1840_v12  ;;  %1691 = vadd.xlane.f32.xlu1 %v1690_v60  ;;  %v1852_v12 = vsel %vm1686_vm1, %v10077_v23, 0.0  ;;  %v1846_v23 = vsel %vm1686_vm1, %v10095_v63, 0.0  ;;  %v1714_v63 = vsel %vm1686_vm1, %v10121_v38, 0.0  ;;  %v1726_v38 = vsel %vm1686_vm1, %v10157_v47, 0.0 }
 0x27f   :  { %v1753_v47 = vsel %vm1686_vm1, %v10197_v13, 0.0  ;;  %v1765_v13 = vsel %vm1686_vm1, %v10213_v11, 0.0 }
 0x280   :  { %v10255_v19 = vpop.permute.xlu1 %1456 }
 0x281   :  { %v10251_v62 = vpop.permute.xlu0 %1454 }
 0x282   :  { %1835 = vadd.xlane.f32.xlu0 %v1834_v59  ;;  %1706 = vadd.xlane.f32.xlu1 %v1705_v25  ;;  %v1771_v49 = vsel %vm1686_vm1, %v10251_v62, 0.0 }
 0x284   :  { %v10265_v58 = vpop.permute.xlu1 %1552 }
 0x285   :  { %v10259_v52 = vpop.permute.xlu0 %1550 }
 0x286   :  { %1709 = vadd.xlane.f32.xlu0 %v1708_v31  ;;  %1850 = vadd.xlane.f32.xlu1 %v1849_v17 }
 0x288   :  { %v10277_v59 = vpop.permute.xlu1 %1468 }
 0x289   :  { %v10267_v35 = vpop.permute.xlu0 %1466 }
 0x28a   :  { %1853 = vadd.xlane.f32.xlu0 %v1852_v12  ;;  %1700 = vadd.xlane.f32.xlu1 %v1699_v22 }
 0x28c   :  { %v10287_v31 = vpop.permute.xlu1 %1564 }
 0x28d   :  { %v10273_v60 = vpop.permute.xlu0 %1562 }
 0x28e   :  { %1703 = vadd.xlane.f32.xlu0 %v1702_v30  ;;  %1844 = vadd.xlane.f32.xlu1 %v1843_v21  ;;  %v1741_v21 = vsel %vm1686_vm1, %v10171_v54, 0.0 }
 0x290   :  { %v10297_v12 = vpop.permute.xlu1 %1464 }
 0x291   :  { %v10285_v25 = vpop.permute.xlu0 %1462 }
 0x292   :  { %1847 = vadd.xlane.f32.xlu0 %v1846_v23  ;;  %1718 = vadd.xlane.f32.xlu1 %v1717_v27  ;;  %v1738_v27 = vsel %vm1686_vm1, %v10189_v45, 0.0  ;;  %v1750_v45 = vsel %vm1686_vm1, %v10207_v57, 0.0  ;;  %v1762_v57 = vsel %vm1686_vm1, %v10223_v56, 0.0  ;;  %v1789_v56 = vsel %vm1686_vm1, %v10267_v35, 0.0 }
 0x294   :  { %v10305_v30 = vpop.permute.xlu1 %1560 }
 0x295   :  { %v10293_v17 = vpop.permute.xlu0 %1558 }
 0x296   :  { %1721 = vadd.xlane.f32.xlu0 %v1720_v36  ;;  %1712 = vadd.xlane.f32.xlu1 %v1711_v24  ;;  %v1747_v24 = vsel %vm1686_vm1, %v10205_v8, 0.0 }
 0x298   :  { %v1477_v23 = vpop.permute.xlu1 %1476 }
 0x299   :  { %v1475_v22 = vpop.permute.xlu0 %1474 }
 0x29a   :  { %1715 = vadd.xlane.f32.xlu0 %v1714_v63  ;;  %1730 = vadd.xlane.f32.xlu1 %v1729_v28  ;;  %v1768_v28 = vsel %vm1686_vm1, %v10215_v40, 0.0  ;;  %v1780_v40 = vsel %vm1686_vm1, %v10237_v14, 0.0  ;;  %v1792_v14 = vsel %vm1686_vm1, %v10277_v59, 0.0  ;;  %v1801_v35 = vsel %vm1686_vm1, %v1475_v22, 0.0 }
 0x29c   :  { %v10321_v36 = vpop.permute.xlu1 %1572 }
 0x29d   :  { %v10311_v43 = vpop.permute.xlu0 %1570 }
 0x29e   :  { %1733 = vadd.xlane.f32.xlu0 %v1732_v55  ;;  %1724 = vadd.xlane.f32.xlu1 %v1723_v34  ;;  %v1777_v34 = vsel %vm1686_vm1, %v10235_v53, 0.0 }
 0x2a0   :  { %v1473_v63 = vpop.permute.xlu1 %1472 }
 0x2a1   :  { %v1471_v54 = vpop.permute.xlu0 %1470 }
 0x2a2   :  { %1727 = vadd.xlane.f32.xlu0 %v1726_v38  ;;  %1742 = vadd.xlane.f32.xlu1 %v1741_v21  ;;  %v1774_v21 = vsel %vm1686_vm1, %v10255_v19, 0.0  ;;  %v1786_v19 = vsel %vm1686_vm1, %v10297_v12, 0.0  ;;  %v1795_v59 = vsel %vm1686_vm1, %v1471_v54, 0.0 }
 0x2a4   :  { %v10337_v55 = vpop.permute.xlu1 %1568 }
 0x2a5   :  { %v10327_v33 = vpop.permute.xlu0 %1566 }
 0x2a6   :  { %1745 = vadd.xlane.f32.xlu0 %v1744_v3  ;;  %1736 = vadd.xlane.f32.xlu1 %v1735_v6  ;;  %v1783_v6 = vsel %vm1686_vm1, %v10285_v25, 0.0  ;;  %v1798_v25 = vsel %vm1686_vm1, %v1473_v63, 0.0 }
 0x2a8   :  { %v1485_v38 = vpop.permute.xlu1 %1484 }
 0x2a9   :  { %v1483_v8 = vpop.permute.xlu0 %1482  ;;  %v1816_v22 = vsel %vm1686_vm1, %v1485_v38, 0.0  ;;  %v1855_v38 = vsel %vm1686_vm1, %v10129_v39, 0.0  ;;  %v1873_v39 = vsel %vm1686_vm1, %v10147_v2, 0.0  ;;  %v1888_v2 = vsel %vm1686_vm1, %v10181_v9, 0.0 }
 0x2aa   :  { %1739 = vadd.xlane.f32.xlu0 %v1738_v27  ;;  %1754 = vadd.xlane.f32.xlu1 %v1753_v47  ;;  %v1804_v47 = vsel %vm1686_vm1, %v1477_v23, 0.0 }
 0x2ac   :  { %v10353_v3 = vpop.permute.xlu1 %1580 }
 0x2ad   :  { %v10343_v11 = vpop.permute.xlu0 %1578 }
 0x2ae   :  { %1757 = vadd.xlane.f32.xlu0 %v1756_v41  ;;  %1748 = vadd.xlane.f32.xlu1 %v1747_v24 }
 0x2b0   :  { %v1481_v27 = vpop.permute.xlu1 %1480 }
 0x2b1   :  { %v1479_v53 = vpop.permute.xlu0 %1478  ;;  %v1810_v54 = vsel %vm1686_vm1, %v1481_v27, 0.0  ;;  %v1903_v27 = vsel %vm1686_vm1, %v10227_v18, 0.0  ;;  %v1912_v18 = vsel %vm1686_vm1, %v10219_v20, 0.0 }
 0x2b2   :  { %1751 = vadd.xlane.f32.xlu0 %v1750_v45  ;;  %1766 = vadd.xlane.f32.xlu1 %v1765_v13  ;;  %v1813_v45 = vsel %vm1686_vm1, %v1483_v8, 0.0  ;;  %v1807_v23 = vsel %vm1686_vm1, %v1479_v53, 0.0  ;;  %v1858_v8 = vsel %vm1686_vm1, %v10131_v61, 0.0  ;;  %v1864_v61 = vsel %vm1686_vm1, %v10113_v32, 0.0 }
 0x2b3   :  { %v1870_v53 = vsel %vm1686_vm1, %v10165_v51, 0.0  ;;  %v1879_v32 = vsel %vm1686_vm1, %v10193_v4, 0.0  ;;  %v1885_v51 = vsel %vm1686_vm1, %v10179_v29, 0.0  ;;  %v1897_v29 = vsel %vm1686_vm1, %v10201_v7, 0.0 }
 0x2b4   :  { %v10366_v24 = vpop.permute.xlu1 %1576  ;;  %v1906_v7 = vsel %vm1686_vm1, %v10229_v48, 0.0 }
 0x2b5   :  { %v10359_v62 = vpop.permute.xlu0 %1574 }
 0x2b6   :  { %1769 = vadd.xlane.f32.xlu0 %v1768_v28  ;;  %1760 = vadd.xlane.f32.xlu1 %v1759_v26 }
 0x2b8   :  { %v1493_v13 = vpop.permute.xlu1 %1492 }
 0x2b9   :  { %v1491_v41 = vpop.permute.xlu0 %1490 }
 0x2ba   :  { %1763 = vadd.xlane.f32.xlu0 %v1762_v57  ;;  %1778 = vadd.xlane.f32.xlu1 %v1777_v34  ;;  %v1825_v28 = vsel %vm1686_vm1, %v1491_v41, 0.0  ;;  %v1828_v34 = vsel %vm1686_vm1, %v1493_v13, 0.0  ;;  %v1915_v41 = vsel %vm1686_vm1, %v10259_v52, 0.0  ;;  %v1924_v52 = vsel %vm1686_vm1, %v10245_v16, 0.0 }
 0x2bb   :  { %v1927_v13 = vsel %vm1686_vm1, %v10293_v17, 0.0  ;;  %v1936_v17 = vsel %vm1686_vm1, %v10287_v31, 0.0 }
 0x2bc   :  { %v10376_v63 = vpop.permute.xlu1 %1588 }
 0x2bd   :  { %v10370_v12 = vpop.permute.xlu0 %1586 }
 0x2be   :  { %1781 = vadd.xlane.f32.xlu0 %v1780_v40  ;;  %1772 = vadd.xlane.f32.xlu1 %v1771_v49 }
 0x2c0   :  { %v1489_v40 = vpop.permute.xlu1 %1488 }
 0x2c1   :  { %v1487_v26 = vpop.permute.xlu0 %1486  ;;  %v1822_v49 = vsel %vm1686_vm1, %v1489_v40, 0.0  ;;  %v1951_v40 = vsel %vm1686_vm1, %v10359_v62, 0.0  ;;  %v1960_v62 = vsel %vm1686_vm1, %v10353_v3, 0.0  ;;  %v10518_v3 = vld [vmem:[%s15100_s3 + $0x8] sm:$0xff] }
 0x2c2   :  { %1775 = vadd.xlane.f32.xlu0 %v1774_v21  ;;  %1790 = vadd.xlane.f32.xlu1 %v1789_v56  ;;  %v1819_v57 = vsel %vm1686_vm1, %v1487_v26, 0.0  ;;  %v1861_v21 = vsel %vm1686_vm1, %v10111_v15, 0.0  ;;  %v1867_v56 = vsel %vm1686_vm1, %v10163_v50, 0.0  ;;  %v1876_v15 = vsel %vm1686_vm1, %v10149_v46, 0.0 }
 0x2c3   :  { %v1882_v50 = vsel %vm1686_vm1, %v10195_v44, 0.0  ;;  %v1891_v46 = vsel %vm1686_vm1, %v10209_v10, 0.0  ;;  %v1894_v44 = vsel %vm1686_vm1, %v10211_v37, 0.0  ;;  %v1900_v10 = vsel %vm1686_vm1, %v10203_v5, 0.0 }
 0x2c4   :  { %v10411_v4 = vpop.permute.xlu1 %1584  ;;  %v1939_v26 = vsel %vm1686_vm1, %v10327_v33, 0.0  ;;  %v1948_v33 = vsel %vm1686_vm1, %v10321_v36, 0.0 }
 0x2c6   :  { %1793 = vadd.xlane.f32.xlu0 %v1792_v14  ;;  %1784 = vadd.xlane.f32.xlu1 %v1783_v6  ;;  %v10403_v14 = vpop.permute.xlu0 %1582 }
 0x2ca   :  { %1787 = vadd.xlane.f32.xlu0 %v1786_v19  ;;  %1802 = vadd.xlane.f32.xlu1 %v1801_v35 }
 0x2ce   :  { %1805 = vadd.xlane.f32.xlu0 %v1804_v47  ;;  %1796 = vadd.xlane.f32.xlu1 %v1795_v59  ;;  %v1909_v47 = vsel %vm1686_vm1, %v10217_v42, 0.0  ;;  %v1918_v42 = vsel %vm1686_vm1, %v10265_v58, 0.0 }
 0x2d2   :  { %1799 = vadd.xlane.f32.xlu0 %v1798_v25  ;;  %1814 = vadd.xlane.f32.xlu1 %v1813_v45  ;;  %v1921_v45 = vsel %vm1686_vm1, %v10243_v1, 0.0  ;;  %v1930_v1 = vsel %vm1686_vm1, %v10305_v30, 0.0 }
 0x2d6   :  { %1817 = vadd.xlane.f32.xlu0 %v1816_v22  ;;  %1808 = vadd.xlane.f32.xlu1 %v1807_v23 }
 0x2da   :  { %1811 = vadd.xlane.f32.xlu0 %v1810_v54  ;;  %1826 = vadd.xlane.f32.xlu1 %v1825_v28  ;;  %v1933_v54 = vsel %vm1686_vm1, %v10273_v60, 0.0  ;;  %v1942_v60 = vsel %vm1686_vm1, %v10337_v55, 0.0 }
 0x2de   :  { %1859 = vadd.xlane.f32.xlu0 %v1858_v8  ;;  %1820 = vadd.xlane.f32.xlu1 %v1819_v57  ;;  %v1945_v57 = vsel %vm1686_vm1, %v10311_v43, 0.0  ;;  %v1954_v43 = vsel %vm1686_vm1, %v10366_v24, 0.0  ;;  %v1963_v24 = vsel %vm1686_vm1, %v10403_v14, 0.0 }
 0x2e2   :  { %1829 = vadd.xlane.f32.xlu0 %v1828_v34  ;;  %1856 = vadd.xlane.f32.xlu1 %v1855_v38 }
 0x2e6   :  { %1823 = vadd.xlane.f32.xlu0 %v1822_v49  ;;  %1862 = vadd.xlane.f32.xlu1 %v1861_v21  ;;  %v1957_v49 = vsel %vm1686_vm1, %v10343_v11, 0.0 }
 0x2ea   :  { %1865 = vadd.xlane.f32.xlu0 %v1864_v61  ;;  %1868 = vadd.xlane.f32.xlu1 %v1867_v56  ;;  %v10506_v61 = vld [vmem:[%s15100_s3] sm:$0xff]  ;;  %s38_s3 = sld [smem:[#allocation2]] }
 0x2ee   :  { %1871 = vadd.xlane.f32.xlu0 %v1870_v53  ;;  %1874 = vadd.xlane.f32.xlu1 %v1873_v39  ;;  %v1987_v53 = vand.u32 2147483647, %v10506_v61  ;;  %v1966_v39 = vsel %vm1686_vm1, %v10411_v4, 0.0 }
 0x2f0   :  { %v1990_v14 = vsel %vm1989_vm2, %v1987_v53, -inf }
 0x2f2   :  { %1877 = vadd.xlane.f32.xlu0 %v1876_v15  ;;  %1880 = vadd.xlane.f32.xlu1 %v1879_v32  ;;  %v1969_v15 = vsel %vm1686_vm1, %v10370_v12, 0.0 }
 0x2f6   :  { %1883 = vadd.xlane.f32.xlu0 %v1882_v50  ;;  %1886 = vadd.xlane.f32.xlu1 %v1885_v51  ;;  %v1988_v50 = vand.u32 2147483647, %v10518_v3 }
 0x2f8   :  { %v1993_v4 = vsel %vm1989_vm2, %v1988_v50, -inf }
 0x2fa   :  { %1889 = vadd.xlane.f32.xlu0 %v1888_v2  ;;  %1892 = vadd.xlane.f32.xlu1 %v1891_v46  ;;  %v1972_v2 = vsel %vm1686_vm1, %v10376_v63, 0.0 }
 0x2fb   :  { %v10409_v6 = vpop.xlane.xlu0 %1694 }
 0x2fe   :  { %1895 = vadd.xlane.f32.xlu0 %v1894_v44  ;;  %1898 = vadd.xlane.f32.xlu1 %v1897_v29 }
 0x2ff   :  { %v10417_v19 = vpop.xlane.xlu0 %1688  ;;  %v10419_v9 = vpop.xlane.xlu1 %1838 }
 0x300   :  { %15472 = vst [vmem:[#allocation13_spill] sm:$0xff] %v10419_v9 }
 0x302   :  { %1901 = vadd.xlane.f32.xlu0 %v1900_v10  ;;  %1904 = vadd.xlane.f32.xlu1 %v1903_v27 }
 0x303   :  { %v10425_v35 = vpop.xlane.xlu0 %1697  ;;  %v10427_v37 = vpop.xlane.xlu1 %1832 }
 0x304   :  { %15473 = vst [vmem:[#allocation14_spill] sm:$0xff] %v10427_v37 }
 0x306   :  { %1907 = vadd.xlane.f32.xlu0 %v1906_v7  ;;  %1910 = vadd.xlane.f32.xlu1 %v1909_v47 }
 0x307   :  { %v10433_v59 = vpop.xlane.xlu0 %1841  ;;  %v10435_v5 = vpop.xlane.xlu1 %1691 }
 0x30a   :  { %1913 = vadd.xlane.f32.xlu0 %v1912_v18  ;;  %1916 = vadd.xlane.f32.xlu1 %v1915_v41 }
 0x30b   :  { %v10441_v25 = vpop.xlane.xlu0 %1835  ;;  %v10443_v48 = vpop.xlane.xlu1 %1706 }
 0x30e   :  { %1919 = vadd.xlane.f32.xlu0 %v1918_v42  ;;  %1922 = vadd.xlane.f32.xlu1 %v1921_v45 }
 0x30f   :  { %v10449_v22 = vpop.xlane.xlu0 %1709  ;;  %v10451_v20 = vpop.xlane.xlu1 %1850 }
 0x310   :  { %15474 = vst [vmem:[#allocation15_spill] sm:$0xff] %v10451_v20 }
 0x312   :  { %1925 = vadd.xlane.f32.xlu0 %v1924_v52  ;;  %1928 = vadd.xlane.f32.xlu1 %v1927_v13 }
 0x313   :  { %v10457_v23 = vpop.xlane.xlu0 %1853  ;;  %v10459_v58 = vpop.xlane.xlu1 %1700 }
 0x316   :  { %1931 = vadd.xlane.f32.xlu0 %v1930_v1  ;;  %1934 = vadd.xlane.f32.xlu1 %v1933_v54 }
 0x317   :  { %v10465_v28 = vpop.xlane.xlu0 %1703  ;;  %v10467_v16 = vpop.xlane.xlu1 %1844 }
 0x318   :  { %15475 = vst [vmem:[#allocation16_spill] sm:$0xff] %v10467_v16 }
 0x31a   :  { %1937 = vadd.xlane.f32.xlu0 %v1936_v17  ;;  %1940 = vadd.xlane.f32.xlu1 %v1939_v26 }
 0x31b   :  { %v10473_v8 = vpop.xlane.xlu0 %1847  ;;  %v10475_v30 = vpop.xlane.xlu1 %1718 }
 0x31e   :  { %1943 = vadd.xlane.f32.xlu0 %v1942_v60  ;;  %1946 = vadd.xlane.f32.xlu1 %v1945_v57 }
 0x31f   :  { %v10481_v34 = vpop.xlane.xlu0 %1721  ;;  %v10483_v31 = vpop.xlane.xlu1 %1712 }
 0x322   :  { %1949 = vadd.xlane.f32.xlu0 %v1948_v33  ;;  %1952 = vadd.xlane.f32.xlu1 %v1951_v40 }
 0x323   :  { %v10489_v38 = vpop.xlane.xlu0 %1715  ;;  %v10491_v55 = vpop.xlane.xlu1 %1730 }
 0x326   :  { %1955 = vadd.xlane.f32.xlu0 %v1954_v43  ;;  %1958 = vadd.xlane.f32.xlu1 %v1957_v49 }
 0x327   :  { %v10497_v21 = vpop.xlane.xlu0 %1733  ;;  %v10499_v36 = vpop.xlane.xlu1 %1724 }
 0x32a   :  { %1961 = vadd.xlane.f32.xlu0 %v1960_v62  ;;  %1964 = vadd.xlane.f32.xlu1 %v1963_v24 }
 0x32b   :  { %v10510_v56 = vpop.xlane.xlu0 %1727  ;;  %v10512_v11 = vpop.xlane.xlu1 %1742 }
 0x32e   :  { %1967 = vadd.xlane.f32.xlu0 %v1966_v39  ;;  %1970 = vadd.xlane.f32.xlu1 %v1969_v15 }
 0x32f   :  { %v10524_v32 = vpop.xlane.xlu0 %1745  ;;  %v10527_v51 = vpop.xlane.xlu1 %1736 }
 0x332   :  { %1973 = vadd.xlane.f32.xlu0 %v1972_v2  ;;  %1991 = vmax.xlane.f32.xlu1 %v1990_v14 }
 0x333   :  { %v10532_v46 = vpop.xlane.xlu0 %1739  ;;  %v10535_v44 = vpop.xlane.xlu1 %1754 }
 0x336   :  { %1994 = vmax.xlane.f32.xlu0 %v1993_v4 }
 0x337   :  { %v10537_v12 = vpop.xlane.xlu0 %1757  ;;  %v10539_v29 = vpop.xlane.xlu1 %1748 }
 0x33b   :  { %v10541_v10 = vpop.xlane.xlu0 %1751  ;;  %v10543_v27 = vpop.xlane.xlu1 %1766 }
 0x33f   :  { %v10545_v7 = vpop.xlane.xlu0 %1769  ;;  %v10547_v63 = vpop.xlane.xlu1 %1760 }
 0x343   :  { %v10549_v47 = vpop.xlane.xlu0 %1763  ;;  %v10551_v18 = vpop.xlane.xlu1 %1778 }
 0x347   :  { %v10553_v41 = vpop.xlane.xlu0 %1781  ;;  %v10555_v42 = vpop.xlane.xlu1 %1772 }
 0x34b   :  { %v10557_v45 = vpop.xlane.xlu0 %1775  ;;  %v10559_v52 = vpop.xlane.xlu1 %1790 }
 0x34f   :  { %v10561_v13 = vpop.xlane.xlu0 %1793  ;;  %v10563_v1 = vpop.xlane.xlu1 %1784 }
 0x353   :  { %v10565_v54 = vpop.xlane.xlu0 %1787  ;;  %v10567_v17 = vpop.xlane.xlu1 %1802 }
 0x357   :  { %v10569_v26 = vpop.xlane.xlu0 %1805  ;;  %v10571_v60 = vpop.xlane.xlu1 %1796 }
 0x358   :  { %15476 = vst [vmem:[#allocation17_spill] sm:$0xff] %v10571_v60 }
 0x35b   :  { %v10573_v57 = vpop.xlane.xlu0 %1799  ;;  %v10575_v33 = vpop.xlane.xlu1 %1814 }
 0x35c   :  { %15477 = vst [vmem:[#allocation18_spill] sm:$0xff] %v10573_v57  ;;  %15478 = vst [vmem:[#allocation19_spill] sm:$0xff] %v10575_v33 }
 0x35f   :  { %v10577_v40 = vpop.xlane.xlu0 %1817  ;;  %v10579_v43 = vpop.xlane.xlu1 %1808 }
 0x360   :  { %15479 = vst [vmem:[#allocation20_spill] sm:$0xff] %v10577_v40  ;;  %15480 = vst [vmem:[#allocation21_spill] sm:$0xff] %v10579_v43 }
 0x363   :  { %v10581_v49 = vpop.xlane.xlu0 %1811  ;;  %v10583_v62 = vpop.xlane.xlu1 %1826 }
 0x364   :  { %15481 = vst [vmem:[#allocation22_spill] sm:$0xff] %v10581_v49  ;;  %15482 = vst [vmem:[#allocation23_spill] sm:$0xff] %v10583_v62 }
 0x367   :  { %v10585_v24 = vpop.xlane.xlu0 %1859  ;;  %v10587_v53 = vpop.xlane.xlu1 %1820 }
 0x368   :  { %15483 = vst [vmem:[#allocation24_spill] sm:$0xff] %v10585_v24  ;;  %15484 = vst [vmem:[#allocation25_spill] sm:$0xff] %v10587_v53 }
 0x36b   :  { %v10589_v39 = vpop.xlane.xlu0 %1829  ;;  %v10591_v15 = vpop.xlane.xlu1 %1856 }
 0x36c   :  { %15485 = vst [vmem:[#allocation26_spill] sm:$0xff] %v10589_v39  ;;  %15486 = vst [vmem:[#allocation27_spill] sm:$0xff] %v10591_v15 }
 0x36f   :  { %v10593_v50 = vpop.xlane.xlu0 %1823  ;;  %v10595_v14 = vpop.xlane.xlu1 %1862 }
 0x370   :  { %15487 = vst [vmem:[#allocation28_spill] sm:$0xff] %v10593_v50  ;;  %15488 = vst [vmem:[#allocation29_spill] sm:$0xff] %v10595_v14 }
 0x373   :  { %v10597_v2 = vpop.xlane.xlu0 %1865  ;;  %v10599_v4 = vpop.xlane.xlu1 %1868 }
 0x374   :  { %15489 = vst [vmem:[#allocation30_spill] sm:$0xff] %v10597_v2  ;;  %15490 = vst [vmem:[#allocation31_spill] sm:$0xff] %v10599_v4 }
 0x377   :  { %v10601_v20 = vpop.xlane.xlu0 %1871  ;;  %v10603_v16 = vpop.xlane.xlu1 %1874 }
 0x378   :  { %15491 = vst [vmem:[#allocation32_spill] sm:$0xff] %v10601_v20  ;;  %15492 = vst [vmem:[#allocation33_spill] sm:$0xff] %v10603_v16 }
 0x37b   :  { %v10605_v9 = vpop.xlane.xlu0 %1877  ;;  %v10607_v37 = vpop.xlane.xlu1 %1880 }
 0x37c   :  { %15493 = vst [vmem:[#allocation34_spill] sm:$0xff] %v10605_v9  ;;  %15494 = vst [vmem:[#allocation35_spill] sm:$0xff] %v10607_v37 }
 0x37f   :  { %v10609_v53 = vpop.xlane.xlu0 %1883  ;;  %v10611_v39 = vpop.xlane.xlu1 %1886 }
 0x380   :  { %15495 = vst [vmem:[#allocation36_spill] sm:$0xff] %v10609_v53  ;;  %15496 = vst [vmem:[#allocation37_spill] sm:$0xff] %v10611_v39 }
 0x383   :  { %v10613_v15 = vpop.xlane.xlu0 %1889  ;;  %v10615_v50 = vpop.xlane.xlu1 %1892 }
 0x384   :  { %15497 = vst [vmem:[#allocation38_spill] sm:$0xff] %v10613_v15  ;;  %15498 = vst [vmem:[#allocation39_spill] sm:$0xff] %v10615_v50 }
 0x387   :  { %v10617_v14 = vpop.xlane.xlu0 %1895  ;;  %v10619_v2 = vpop.xlane.xlu1 %1898 }
 0x388   :  { %15499 = vst [vmem:[#allocation40_spill] sm:$0xff] %v10617_v14  ;;  %15500 = vst [vmem:[#allocation41_spill] sm:$0xff] %v10619_v2 }
 0x38b   :  { %v10621_v4 = vpop.xlane.xlu0 %1901  ;;  %v10623_v20 = vpop.xlane.xlu1 %1904 }
 0x38c   :  { %15501 = vst [vmem:[#allocation42_spill] sm:$0xff] %v10621_v4  ;;  %15502 = vst [vmem:[#allocation43_spill] sm:$0xff] %v10623_v20 }
 0x38f   :  { %v10625_v16 = vpop.xlane.xlu0 %1907  ;;  %v10627_v9 = vpop.xlane.xlu1 %1910 }
 0x390   :  { %15503 = vst [vmem:[#allocation44_spill] sm:$0xff] %v10625_v16  ;;  %15504 = vst [vmem:[#allocation45_spill] sm:$0xff] %v10627_v9 }
 0x393   :  { %v10629_v37 = vpop.xlane.xlu0 %1913  ;;  %v10631_v53 = vpop.xlane.xlu1 %1916 }
 0x394   :  { %15505 = vst [vmem:[#allocation46_spill] sm:$0xff] %v10629_v37  ;;  %15506 = vst [vmem:[#allocation47_spill] sm:$0xff] %v10631_v53 }
 0x397   :  { %v10633_v39 = vpop.xlane.xlu0 %1919  ;;  %v10635_v15 = vpop.xlane.xlu1 %1922 }
 0x398   :  { %15507 = vst [vmem:[#allocation48_spill] sm:$0xff] %v10633_v39  ;;  %15508 = vst [vmem:[#allocation49_spill] sm:$0xff] %v10635_v15 }
 0x39b   :  { %v10637_v50 = vpop.xlane.xlu0 %1925  ;;  %v10639_v14 = vpop.xlane.xlu1 %1928 }
 0x39c   :  { %15509 = vst [vmem:[#allocation50_spill] sm:$0xff] %v10637_v50  ;;  %15510 = vst [vmem:[#allocation51_spill] sm:$0xff] %v10639_v14 }
 0x39f   :  { %v10641_v2 = vpop.xlane.xlu0 %1931  ;;  %v10643_v4 = vpop.xlane.xlu1 %1934 }
 0x3a0   :  { %15511 = vst [vmem:[#allocation52_spill] sm:$0xff] %v10641_v2  ;;  %15512 = vst [vmem:[#allocation53_spill] sm:$0xff] %v10643_v4 }
 0x3a3   :  { %v10645_v20 = vpop.xlane.xlu0 %1937  ;;  %v10647_v16 = vpop.xlane.xlu1 %1940 }
 0x3a4   :  { %15513 = vst [vmem:[#allocation54_spill] sm:$0xff] %v10645_v20  ;;  %15514 = vst [vmem:[#allocation55_spill] sm:$0xff] %v10647_v16 }
 0x3a7   :  { %v10649_v9 = vpop.xlane.xlu0 %1943  ;;  %v10651_v37 = vpop.xlane.xlu1 %1946 }
 0x3a8   :  { %15515 = vst [vmem:[#allocation56_spill] sm:$0xff] %v10649_v9  ;;  %15516 = vst [vmem:[#allocation57_spill] sm:$0xff] %v10651_v37 }
 0x3ab   :  { %v10653_v53 = vpop.xlane.xlu0 %1949  ;;  %v10655_v39 = vpop.xlane.xlu1 %1952 }
 0x3ac   :  { %15517 = vst [vmem:[#allocation58_spill] sm:$0xff] %v10653_v53  ;;  %15518 = vst [vmem:[#allocation59_spill] sm:$0xff] %v10655_v39  ;;  %v7764_v39 = vmul.f32 -1.442695, %v10506_v61  ;;  %v139_v61 = vld [vmem:[%s15098_s1] sm:$0x1] }
 0x3ad   :  { %s10987_s1 = sld [smem:[#allocation2 + $0x2]] }
 0x3af   :  { %v10657_v15 = vpop.xlane.xlu0 %1955  ;;  %v10659_v50 = vpop.xlane.xlu1 %1958 }
 0x3b0   :  { %15519 = vst [vmem:[#allocation60_spill] sm:$0xff] %v10657_v15  ;;  %15520 = vst [vmem:[#allocation61_spill] sm:$0xff] %v10659_v50  ;;  %v7765_v50 = vmul.f32 -1.442695, %v10518_v3  ;;  %v2022_v3 = vstv %s38_s3 }
 0x3b3   :  { %v10661_v14 = vpop.xlane.xlu0 %1961  ;;  %v10663_v2 = vpop.xlane.xlu1 %1964 }
 0x3b4   :  { %15521 = vst [vmem:[#allocation62_spill] sm:$0xff] %v10661_v14  ;;  %15522 = vst [vmem:[#allocation63_spill] sm:$0xff] %v10663_v2 }
 0x3b7   :  { %v10665_v4 = vpop.xlane.xlu0 %1967  ;;  %v10667_v20 = vpop.xlane.xlu1 %1970 }
 0x3b8   :  { %15523 = vst [vmem:[#allocation64_spill] sm:$0xff] %v10665_v4  ;;  %15524 = vst [vmem:[#allocation65_spill] sm:$0xff] %v10667_v20 }
 0x3bb   :  { %v10669_v16 = vpop.xlane.xlu0 %1973  ;;  %v1992_v9 = vpop.xlane.xlu1 %1991 }
 0x3bc   :  { %15525 = vst [vmem:[#allocation66_spill] sm:$0xff] %v10669_v16  ;;  %v7766_v37 = vmul.f32 -1.442695, %v1992_v9 }
 0x3be   :  { %8024 = vpow2.f32 %v7766_v37 }
 0x3bf   :  { %v1995_v24 = vpop.xlane.xlu0 %1994 }
 0x3c0   :  { %v7767_v53 = vmul.f32 -1.442695, %v1995_v24 }
 0x3c2   :  { %8026 = vpow2.f32 %v7767_v53  ;;  %v15526_v53 = vld [vmem:[#allocation11_spill] sm:$0xff] }
 0x3c3   :  { %8028 = vpow2.f32 %v7764_v39  ;;  %v10677_v39 = vsub.s32 0, %v15526_v53 }
 0x3c4   :  { %8030 = vpow2.f32 %v7765_v50  ;;  %v2023_v50 = vmul.f32 %v2022_v3, %v139_v61 }
 0x3c5   :  { %15527 = vst [vmem:[#allocation67_spill] sm:$0xff] %v10677_v39 }
 0x3cb   :  { %v8025_v14 = vpop.eup %8024 }
 0x3cc   :  { %v2002_v15 = vadd.f32 1.0, %v8025_v14 }
 0x3ce   :  { %8032 = vrcp.f32 %v2002_v15  ;;  %v2012_v15 = vstv %s7713_s18  ;;  %s9170_s18 = smov [#allocation6]  }
 0x3cf   :  { %v8027_v2 = vpop.eup %8026  ;;  %s7697_s19 = sshll.u32 %s9170_s18, 4  ;;  %s7698_s19 = int_to_ptr.vmem [resolvable:$true] %s7697_s19 }
 0x3d0   :  { %v2003_v4 = vadd.f32 1.0, %v8027_v2  ;;  %v8029_v20 = vpop.eup %8028  ;;  %p9125_p6 = scmp.lt.s32.totalorder %s7698_s19, %s7698_s19 }
 0x3d1   :  { %v8031_v16 = vpop.eup %8030  ;;  %v1981_v62 = vadd.f32 1.0, %v8029_v20 }
 0x3d2   :  { %8034 = vrcp.f32 %v2003_v4  ;;  %v1982_v9 = vadd.f32 1.0, %v8031_v16  ;;  %v2013_v16 = vmul.f32 %v2012_v15, %v139_v61 }
 0x3d3   :  { %8036 = vrcp.f32 %v1981_v62  ;;  %v2028_v62 = vrot.slane %v2023_v50, %v10677_v39  ;;  %v10688_v50 = vsub.s32 1, %v15526_v53 }
 0x3d4   :  { %8038 = vrcp.f32 %v1982_v9 }
 0x3d5   :  { %15528 = vst [vmem:[#allocation68_spill] sm:$0xff] %v10688_v50 }
 0x3db   :  { %v8033_v37 = vpop.eup %8032 }
 0x3dc   :  { %8040 = vrcp.f32 %v8033_v37  ;;  %v2018_v37 = vrot.slane %v2013_v16, %v10677_v39  ;;  %v10702_v16 = vsub.s32 3, %v15526_v53 }
 0x3de   :  { %15530 = vst [vmem:[#allocation70_spill] sm:$0xff] %v10702_v16 }
 0x3df   :  { %v8035_v24 = vpop.eup %8034 }
 0x3e0   :  { %8042 = vrcp.f32 %v8035_v24  ;;  %v8037_v20 = vpop.eup %8036 }
 0x3e1   :  { %v8039_v14 = vpop.eup %8038 }
 0x3e9   :  { %v8041_v2 = vpop.eup %8040 }
 0x3ea   :  { %v2010_v9 = vmul.f32 %v8041_v2, %v8037_v20  ;;  %v7819_v20 = vmul.f32 -1.442695, %v10433_v59  ;;  %v7775_v59 = vmul.f32 -1.442695, %v10449_v22 }
 0x3ec   :  { %v2030_v49 = vadd.f32 %v2028_v62, %v2010_v9  ;;  %v2020_v33 = vmul.f32 %v2018_v37, %v2010_v9  ;;  %v10715_v9 = vsub.s32 4, %v15526_v53 }
 0x3ed   :  { %v8043_v4 = vpop.eup %8042 }
 0x3ee   :  { %v2011_v24 = vmul.f32 %v8043_v4, %v8039_v14  ;;  %8044 = vrcp.f32 %v2030_v49  ;;  %v7771_v49 = vmul.f32 -1.442695, %v10425_v35  ;;  %v7817_v14 = vmul.f32 -1.442695, %v10441_v25  ;;  %15531 = vst [vmem:[#allocation71_spill] sm:$0xff] %v10715_v9 }
 0x3ef   :  { %v7773_v25 = vmul.f32 -1.442695, %v10465_v28  ;;  %v7821_v4 = vmul.f32 -1.442695, %v10473_v8  ;;  %v7779_v28 = vmul.f32 -1.442695, %v10481_v34 }
 0x3f0   :  { %v2021_v43 = vmul.f32 %v2018_v37, %v2011_v24  ;;  %v2031_v40 = vadd.f32 %v2028_v62, %v2011_v24  ;;  %v7823_v62 = vmul.f32 -1.442695, %v10457_v23  ;;  %v7778_v23 = vmul.f32 -1.442695, %v10475_v30 }
 0x3f1   :  { %v7782_v34 = vmul.f32 -1.442695, %v10491_v55 }
 0x3f2   :  { %8046 = vrcp.f32 %v2031_v40 }
 0x3fb   :  { %v8045_v57 = vpop.eup %8044 }
 0x3fc   :  { %v10681_v3 = vmul.f32 %v8045_v57, %v2020_v33  ;;  %v7770_v57 = vmul.f32 -1.442695, %v10409_v6  ;;  %v7769_v6 = vmul.f32 -1.442695, %v10435_v5  ;;  %v7772_v5 = vmul.f32 -1.442695, %v10459_v58 }
 0x3fe   :  { %v3098_v15 = vrot.slane %v10681_v3, %v10677_v39  ;;  %v3125_v40 = vrot.slane %v10681_v3, %v10688_v50  ;;  %8048 = vpow2.f32 %v7770_v57  ;;  %v3179_v35 = vrot.slane %v10681_v3, %v10702_v16 }
 0x3ff   :  { %v8047_v60 = vpop.eup %8046  ;;  %v3206_v8 = vrot.slane %v10681_v3, %v10715_v9 }
 0x400   :  { %v10683_v61 = vmul.f32 %v8047_v60, %v2021_v43  ;;  %3104 = vbcast.lane.b32.xlu0 %v3098_v15, 264  ;;  %3100 = vbcast.lane.b32.xlu1 %v3098_v15, 256  ;;  %v10693_v60 = vsub.s32 2, %v15526_v53  ;;  %v7768_v43 = vmul.f32 -1.442695, %v10417_v19 }
 0x401   :  { %v7774_v19 = vmul.f32 -1.442695, %v10443_v48 }
 0x402   :  { %15529 = vst [vmem:[#allocation69_spill] sm:$0xff] %v10693_v60  ;;  %v3152_v33 = vrot.slane %v10681_v3, %v10693_v60  ;;  %8050 = vpow2.f32 %v7768_v43  ;;  %v7777_v43 = vmul.f32 -1.442695, %v10489_v38  ;;  %v10726_v38 = vsub.s32 5, %v15526_v53 }
 0x403   :  { %8052 = vpow2.f32 %v7771_v49 }
 0x404   :  { %3116 = vbcast.lane.b32.xlu0 %v3098_v15, 288  ;;  %3108 = vbcast.lane.b32.xlu1 %v3098_v15, 272  ;;  %8054 = vpow2.f32 %v7819_v20  ;;  %15532 = vst [vmem:[#allocation72_spill] sm:$0xff] %v10726_v38 }
 0x405   :  { %8056 = vpow2.f32 %v7769_v6 }
 0x406   :  { %8058 = vpow2.f32 %v7817_v14 }
 0x407   :  { %8060 = vpow2.f32 %v7774_v19 }
 0x408   :  { %3127 = vbcast.lane.b32.xlu0 %v3125_v40, 256  ;;  %3112 = vbcast.lane.b32.xlu1 %v3098_v15, 280  ;;  %8062 = vpow2.f32 %v7775_v59 }
 0x409   :  { %8064 = vpow2.f32 %v7823_v62  ;;  %v7783_v62 = vmul.f32 -1.442695, %v10497_v21 }
 0x40a   :  { %8066 = vpow2.f32 %v7772_v5 }
 0x40b   :  { %v8049_v2 = vpop.eup %8048  ;;  %8068 = vpow2.f32 %v7773_v25 }
 0x40c   :  { %3135 = vbcast.lane.b32.xlu0 %v3125_v40, 272  ;;  %3120 = vbcast.lane.b32.xlu1 %v3098_v15, 296  ;;  %v2326_v22 = vadd.f32 1.0, %v8049_v2  ;;  %8070 = vpow2.f32 %v7821_v4  ;;  %v7776_v15 = vmul.f32 -1.442695, %v10483_v31  ;;  %v10731_v4 = vrot.slane %v10681_v3, %v10726_v38 }
 0x40e   :  { %8072 = vrcp.f32 %v2326_v22 }
 0x40f   :  { %v8051_v48 = vpop.eup %8050  ;;  %8074 = vpow2.f32 %v7778_v23 }
 0x410   :  { %3143 = vbcast.lane.b32.xlu0 %v3125_v40, 288  ;;  %3131 = vbcast.lane.b32.xlu1 %v3125_v40, 264  ;;  %v8053_v37 = vpop.eup %8052  ;;  %v2324_v58 = vadd.f32 1.0, %v8051_v48  ;;  %v7780_v48 = vmul.f32 -1.442695, %v10499_v36 }
 0x411   :  { %v8055_v24 = vpop.eup %8054 }
 0x412   :  { %v8057_v57 = vpop.eup %8056  ;;  %8076 = vrcp.f32 %v2324_v58 }
 0x413   :  { %v8059_v30 = vpop.eup %8058  ;;  %8078 = vpow2.f32 %v7779_v28  ;;  %v2325_v31 = vadd.f32 1.0, %v8057_v57  ;;  %v7786_v28 = vmul.f32 -1.442695, %v10512_v11  ;;  %v10747_v11 = vsub.s32 6, %v15526_v53  ;;  %v15578_v53 = vld [vmem:[#allocation36_spill] sm:$0xff] }
 0x414   :  { %3154 = vbcast.lane.b32.xlu0 %v3152_v33, 256  ;;  %3139 = vbcast.lane.b32.xlu1 %v3125_v40, 280  ;;  %v8061_v49 = vpop.eup %8060  ;;  %8080 = vpow2.f32 %v7776_v15  ;;  %v2373_v6 = vadd.f32 1.0, %v8059_v30 }
 0x415   :  { %v8063_v20 = vpop.eup %8062  ;;  %v2330_v19 = vadd.f32 1.0, %v8061_v49  ;;  %15536 = vst [vmem:[#allocation76_spill] sm:$0xff] %v10747_v11 }
 0x416   :  { %v8065_v14 = vpop.eup %8064  ;;  %v2331_v5 = vadd.f32 1.0, %v8063_v20  ;;  %v9169_v20 = vmov 0  }
 0x417   :  { %v8067_v59 = vpop.eup %8066  ;;  %v2379_v2 = vadd.f32 1.0, %v8065_v14  ;;  %8021 = vset.pattern.permute.xlu0 %v9169_v20  ;;  %8022 = vset.pattern.permute.xlu1 %v9169_v20 }
 0x418   :  { %3162 = vbcast.lane.b32.xlu0 %v3152_v33, 272  ;;  %3147 = vbcast.lane.b32.xlu1 %v3125_v40, 296  ;;  %v2327_v40 = vadd.f32 1.0, %v8053_v37  ;;  %v8069_v55 = vpop.eup %8068  ;;  %v2328_v25 = vadd.f32 1.0, %v8067_v59  ;;  %v7781_v37 = vmul.f32 -1.442695, %v10510_v56  ;;  %v10761_v59 = vrot.slane %v10681_v3, %v10747_v11 }
 0x419   :  { %v2329_v22 = vadd.f32 1.0, %v8069_v55  ;;  %v7791_v55 = vmul.f32 -1.442695, %v10537_v12  ;;  %v7794_v12 = vmul.f32 -1.442695, %v10543_v27 }
 0x41a   :  { %8082 = vrcp.f32 %v2327_v40 }
 0x41c   :  { %3170 = vbcast.lane.b32.xlu0 %v3152_v33, 288  ;;  %3158 = vbcast.lane.b32.xlu1 %v3152_v33, 264 }
 0x420   :  { %3181 = vbcast.lane.b32.xlu0 %v3179_v35, 256  ;;  %3166 = vbcast.lane.b32.xlu1 %v3152_v33, 280 }
 0x424   :  { %3189 = vbcast.lane.b32.xlu0 %v3179_v35, 272  ;;  %3174 = vbcast.lane.b32.xlu1 %v3152_v33, 296  ;;  %v2375_v33 = vadd.f32 1.0, %v8055_v24 }
 0x426   :  { %8084 = vrcp.f32 %v2375_v33  ;;  %v7787_v33 = vmul.f32 -1.442695, %v10524_v32 }
 0x427   :  { %8086 = vpow2.f32 %v7777_v43 }
 0x428   :  { %3197 = vbcast.lane.b32.xlu0 %v3179_v35, 288  ;;  %3185 = vbcast.lane.b32.xlu1 %v3179_v35, 264  ;;  %8088 = vpow2.f32 %v7782_v34 }
 0x429   :  { %8090 = vrcp.f32 %v2325_v31  ;;  %v7784_v31 = vmul.f32 -1.442695, %v10527_v51 }
 0x42a   :  { %8092 = vrcp.f32 %v2373_v6 }
 0x42b   :  { %8094 = vrcp.f32 %v2330_v19 }
 0x42c   :  { %3208 = vbcast.lane.b32.xlu0 %v3206_v8, 256  ;;  %3193 = vbcast.lane.b32.xlu1 %v3179_v35, 280  ;;  %8096 = vpow2.f32 %v7783_v62 }
 0x42d   :  { %8098 = vrcp.f32 %v2331_v5 }
 0x42e   :  { %8100 = vrcp.f32 %v2379_v2 }
 0x430   :  { %3216 = vbcast.lane.b32.xlu0 %v3206_v8, 272  ;;  %3201 = vbcast.lane.b32.xlu1 %v3179_v35, 296  ;;  %v8071_v35 = vpop.eup %8070  ;;  %8102 = vrcp.f32 %v2328_v25  ;;  %v7788_v25 = vmul.f32 -1.442695, %v10539_v29  ;;  %v7795_v29 = vmul.f32 -1.442695, %v10545_v7 }
 0x431   :  { %v10733_v21 = vpop.eup %8072  ;;  %v2377_v24 = vadd.f32 1.0, %v8071_v35  ;;  %8104 = vpow2.f32 %v7780_v48  ;;  %v7793_v7 = vmul.f32 -1.442695, %v10549_v47 }
 0x432   :  { %v8075_v23 = vpop.eup %8074  ;;  %8106 = vrcp.f32 %v2329_v22 }
 0x433   :  { %v10737_v58 = vpop.eup %8076  ;;  %v2334_v40 = vadd.f32 1.0, %v8075_v23  ;;  %8108 = vpow2.f32 %v7781_v37 }
 0x434   :  { %3224 = vbcast.lane.b32.xlu0 %v3206_v8, 288  ;;  %3212 = vbcast.lane.b32.xlu1 %v3206_v8, 264  ;;  %15533 = vst [vmem:[#allocation73_spill] sm:$0xff] %v10737_v58  ;;  %v8079_v36 = vpop.eup %8078  ;;  %8110 = vrcp.f32 %v2377_v24 }
 0x435   :  { %v8081_v15 = vpop.eup %8080  ;;  %v2335_v30 = vadd.f32 1.0, %v8079_v36  ;;  %8112 = vpow2.f32 %v7786_v28 }
 0x436   :  { %v10740_v57 = vpop.eup %8082  ;;  %v2332_v49 = vadd.f32 1.0, %v8081_v15  ;;  %8114 = vrcp.f32 %v2334_v40 }
 0x437   :  { %15534 = vst [vmem:[#allocation74_spill] sm:$0xff] %v10740_v57  ;;  %v10744_v56 = vpop.eup %8084  ;;  %8116 = vpow2.f32 %v7787_v33 }
 0x438   :  { %3235 = vbcast.lane.b32.xlu0 %v10731_v4, 256  ;;  %3220 = vbcast.lane.b32.xlu1 %v3206_v8, 280  ;;  %15535 = vst [vmem:[#allocation75_spill] sm:$0xff] %v10744_v56  ;;  %v8087_v43 = vpop.eup %8086  ;;  %8118 = vrcp.f32 %v2335_v30  ;;  %v10793_v30 = vrot.slane %v10681_v3, %v9767_v0  ;;  %v7796_v3 = vmul.f32 -1.442695, %v10555_v42 }
 0x439   :  { %v8089_v34 = vpop.eup %8088  ;;  %v2333_v14 = vadd.f32 1.0, %v8087_v43  ;;  %8120 = vrcp.f32 %v2332_v49  ;;  %v7798_v43 = vmul.f32 -1.442695, %v10551_v18 }
 0x43a   :  { %v10750_v32 = vpop.eup %8090  ;;  %v2338_v51 = vadd.f32 1.0, %v8089_v34  ;;  %8122 = vpow2.f32 %v7784_v31  ;;  %v7799_v31 = vmul.f32 -1.442695, %v10553_v41  ;;  %v7797_v41 = vmul.f32 -1.442695, %v10557_v45 }
 0x43b   :  { %15537 = vst [vmem:[#allocation77_spill] sm:$0xff] %v10750_v32  ;;  %v10755_v6 = vpop.eup %8092  ;;  %v7803_v45 = vmul.f32 -1.442695, %v10561_v13 }
 0x43c   :  { %3243 = vbcast.lane.b32.xlu0 %v10731_v4, 272  ;;  %3228 = vbcast.lane.b32.xlu1 %v3206_v8, 296  ;;  %v7785_v8 = vmul.f32 -1.442695, %v10532_v46  ;;  %15538 = vst [vmem:[#allocation78_spill] sm:$0xff] %v10755_v6  ;;  %v10757_v19 = vpop.eup %8094 }
 0x43d   :  { %15539 = vst [vmem:[#allocation79_spill] sm:$0xff] %v10757_v19  ;;  %v8097_v62 = vpop.eup %8096  ;;  %v7790_v46 = vmul.f32 -1.442695, %v10535_v44  ;;  %v7789_v44 = vmul.f32 -1.442695, %v10541_v10 }
 0x43e   :  { %v10764_v5 = vpop.eup %8098  ;;  %8124 = vpow2.f32 %v7785_v8  ;;  %v2339_v48 = vadd.f32 1.0, %v8097_v62  ;;  %v7792_v10 = vmul.f32 -1.442695, %v10547_v63 }
 0x43f   :  { %v10769_v2 = vpop.eup %8100  ;;  %8126 = vrcp.f32 %v2333_v14 }
 0x440   :  { %3251 = vbcast.lane.b32.xlu0 %v10731_v4, 288  ;;  %3239 = vbcast.lane.b32.xlu1 %v10731_v4, 264  ;;  %15540 = vst [vmem:[#allocation80_spill] sm:$0xff] %v10769_v2  ;;  %v10772_v35 = vpop.eup %8102  ;;  %8128 = vrcp.f32 %v2338_v51 }
 0x441   :  { %v8105_v22 = vpop.eup %8104  ;;  %8130 = vpow2.f32 %v7790_v46 }
 0x442   :  { %v10775_v23 = vpop.eup %8106  ;;  %8132 = vpow2.f32 %v7791_v55  ;;  %v2336_v36 = vadd.f32 1.0, %v8105_v22  ;;  %v7802_v55 = vmul.f32 -1.442695, %v10559_v52  ;;  %v10817_v52 = vrot.slane %v10683_v61, %v10677_v39 }
 0x443   :  { %15541 = vst [vmem:[#allocation81_spill] sm:$0xff] %v10775_v23  ;;  %v8109_v37 = vpop.eup %8108  ;;  %8134 = vpow2.f32 %v7788_v25 }
 0x444   :  { %3262 = vbcast.lane.b32.xlu0 %v10761_v59, 256  ;;  %3247 = vbcast.lane.b32.xlu1 %v10731_v4, 280  ;;  %v10781_v24 = vpop.eup %8110  ;;  %8136 = vrcp.f32 %v2339_v48  ;;  %v2337_v40 = vadd.f32 1.0, %v8109_v37 }
 0x445   :  { %15542 = vst [vmem:[#allocation82_spill] sm:$0xff] %v10781_v24  ;;  %v8113_v28 = vpop.eup %8112  ;;  %8138 = vpow2.f32 %v7789_v44  ;;  %v7833_v24 = vmul.f32 -1.442695, %v15578_v53 }
 0x446   :  { %v10784_v15 = vpop.eup %8114  ;;  %8140 = vpow2.f32 %v7794_v12  ;;  %v2342_v33 = vadd.f32 1.0, %v8113_v28 }
 0x447   :  { %15543 = vst [vmem:[#allocation83_spill] sm:$0xff] %v10784_v15  ;;  %v8117_v27 = vpop.eup %8116  ;;  %8142 = vpow2.f32 %v7795_v29 }
 0x448   :  { %3270 = vbcast.lane.b32.xlu0 %v10761_v59, 272  ;;  %3255 = vbcast.lane.b32.xlu1 %v10731_v4, 296  ;;  %v10789_v4 = vpop.eup %8118  ;;  %8144 = vrcp.f32 %v2336_v36  ;;  %v2343_v34 = vadd.f32 1.0, %v8117_v27  ;;  %v7800_v27 = vmul.f32 -1.442695, %v10563_v1 }
 0x449   :  { %15544 = vst [vmem:[#allocation84_spill] sm:$0xff] %v10789_v4  ;;  %v10795_v63 = vpop.eup %8120  ;;  %8146 = vpow2.f32 %v7792_v10  ;;  %v7806_v1 = vmul.f32 -1.442695, %v10567_v17  ;;  %v10843_v17 = vrot.slane %v10683_v61, %v10688_v50 }
 0x44a   :  { %15545 = vst [vmem:[#allocation85_spill] sm:$0xff] %v10795_v63  ;;  %v8123_v49 = vpop.eup %8122  ;;  %8148 = vrcp.f32 %v2337_v40 }
 0x44b   :  { %v8125_v47 = vpop.eup %8124  ;;  %8150 = vpow2.f32 %v7793_v7  ;;  %v2340_v14 = vadd.f32 1.0, %v8123_v49  ;;  %v7801_v49 = vmul.f32 -1.442695, %v10565_v54  ;;  %v7807_v54 = vmul.f32 -1.442695, %v10569_v26 }
 0x44c   :  { %3278 = vbcast.lane.b32.xlu0 %v10761_v59, 288  ;;  %3266 = vbcast.lane.b32.xlu1 %v10761_v59, 264  ;;  %v10801_v20 = vpop.eup %8126  ;;  %8152 = vrcp.f32 %v2342_v33  ;;  %v2341_v51 = vadd.f32 1.0, %v8125_v47 }
 0x44d   :  { %v10804_v8 = vpop.eup %8128  ;;  %8154 = vpow2.f32 %v7798_v43 }
 0x44e   :  { %15546 = vst [vmem:[#allocation86_spill] sm:$0xff] %v10804_v8  ;;  %v8131_v18 = vpop.eup %8130  ;;  %8156 = vrcp.f32 %v2343_v34 }
 0x44f   :  { %v8133_v62 = vpop.eup %8132  ;;  %8158 = vpow2.f32 %v7799_v31  ;;  %v2346_v25 = vadd.f32 1.0, %v8131_v18 }
 0x450   :  { %3289 = vbcast.lane.b32.xlu0 %v10793_v30, 256  ;;  %3274 = vbcast.lane.b32.xlu1 %v10761_v59, 280  ;;  %v8135_v46 = vpop.eup %8134  ;;  %8160 = vpow2.f32 %v7796_v3  ;;  %v2347_v22 = vadd.f32 1.0, %v8133_v62 }
 0x451   :  { %v10810_v42 = vpop.eup %8136  ;;  %8162 = vrcp.f32 %v2340_v14  ;;  %v2344_v44 = vadd.f32 1.0, %v8135_v46 }
 0x452   :  { %15547 = vst [vmem:[#allocation87_spill] sm:$0xff] %v10810_v42  ;;  %v8139_v48 = vpop.eup %8138  ;;  %8164 = vrcp.f32 %v2341_v51 }
 0x453   :  { %8166 = vpow2.f32 %v7797_v41  ;;  %v2345_v29 = vadd.f32 1.0, %v8139_v48  ;;  %v15555_v48 = vld [vmem:[#allocation18_spill] sm:$0xff] }
 0x454   :  { %3297 = vbcast.lane.b32.xlu0 %v10793_v30, 272  ;;  %3282 = vbcast.lane.b32.xlu1 %v10761_v59, 296  ;;  %v8141_v59 = vpop.eup %8140  ;;  %8168 = vpow2.f32 %v7802_v55  ;;  %v15553_v55 = vld [vmem:[#allocation17_spill] sm:$0xff] }
 0x455   :  { %v8143_v12 = vpop.eup %8142  ;;  %8170 = vrcp.f32 %v2346_v25  ;;  %v2350_v28 = vadd.f32 1.0, %v8141_v59  ;;  %v7804_v25 = vmul.f32 -1.442695, %v15553_v55 }
 0x456   :  { %v10819_v37 = vpop.eup %8144  ;;  %8172 = vrcp.f32 %v2347_v22  ;;  %v2351_v40 = vadd.f32 1.0, %v8143_v12  ;;  %v7805_v22 = vmul.f32 -1.442695, %v15555_v48 }
 0x457   :  { %15548 = vst [vmem:[#allocation88_spill] sm:$0xff] %v10819_v37  ;;  %v8147_v36 = vpop.eup %8146  ;;  %8174 = vrcp.f32 %v2344_v44 }
 0x458   :  { %3305 = vbcast.lane.b32.xlu0 %v10793_v30, 288  ;;  %3293 = vbcast.lane.b32.xlu1 %v10793_v30, 264  ;;  %v10823_v10 = vpop.eup %8148  ;;  %8176 = vpow2.f32 %v7803_v45  ;;  %v2348_v33 = vadd.f32 1.0, %v8147_v36  ;;  %v15558_v36 = vld [vmem:[#allocation19_spill] sm:$0xff] }
 0x459   :  { %15549 = vst [vmem:[#allocation89_spill] sm:$0xff] %v10823_v10  ;;  %v8151_v13 = vpop.eup %8150  ;;  %8178 = vrcp.f32 %v2345_v29 }
 0x45a   :  { %v10826_v7 = vpop.eup %8152  ;;  %8180 = vrcp.f32 %v2350_v28  ;;  %v2349_v47 = vadd.f32 1.0, %v8151_v13  ;;  %v7810_v28 = vmul.f32 -1.442695, %v15558_v36  ;;  %v15560_v13 = vld [vmem:[#allocation20_spill] sm:$0xff] }
 0x45b   :  { %15550 = vst [vmem:[#allocation90_spill] sm:$0xff] %v10826_v7  ;;  %v8155_v43 = vpop.eup %8154  ;;  %8182 = vrcp.f32 %v2351_v40 }
 0x45c   :  { %3316 = vbcast.lane.b32.xlu0 %v10817_v52, 256  ;;  %3301 = vbcast.lane.b32.xlu1 %v10793_v30, 280  ;;  %v10831_v34 = vpop.eup %8156  ;;  %8184 = vpow2.f32 %v7800_v27  ;;  %v2354_v14 = vadd.f32 1.0, %v8155_v43  ;;  %v7811_v27 = vmul.f32 -1.442695, %v15560_v13  ;;  %v15562_v43 = vld [vmem:[#allocation21_spill] sm:$0xff] }
 0x45d   :  { %15551 = vst [vmem:[#allocation91_spill] sm:$0xff] %v10831_v34  ;;  %v8159_v31 = vpop.eup %8158  ;;  %8186 = vrcp.f32 %v2348_v33 }
 0x45e   :  { %v8161_v3 = vpop.eup %8160  ;;  %8188 = vpow2.f32 %v7801_v49  ;;  %v2355_v51 = vadd.f32 1.0, %v8159_v31  ;;  %v7808_v49 = vmul.f32 -1.442695, %v15562_v43  ;;  %v15568_v43 = vld [vmem:[#allocation26_spill] sm:$0xff] }
 0x45f   :  { %v10834_v18 = vpop.eup %8162  ;;  %8190 = vrcp.f32 %v2349_v47  ;;  %v2352_v41 = vadd.f32 1.0, %v8161_v3  ;;  %v15563_v3 = vld [vmem:[#allocation22_spill] sm:$0xff] }
 0x460   :  { %3324 = vbcast.lane.b32.xlu0 %v10817_v52, 272  ;;  %3309 = vbcast.lane.b32.xlu1 %v10793_v30, 296  ;;  %15552 = vst [vmem:[#allocation92_spill] sm:$0xff] %v10834_v18  ;;  %v10839_v30 = vpop.eup %8164  ;;  %8192 = vpow2.f32 %v7806_v1 }
 0x461   :  { %v8167_v62 = vpop.eup %8166  ;;  %8194 = vrcp.f32 %v2354_v14  ;;  %v7809_v14 = vmul.f32 -1.442695, %v15563_v3 }
 0x462   :  { %v8169_v46 = vpop.eup %8168  ;;  %8196 = vpow2.f32 %v7807_v54  ;;  %v2353_v44 = vadd.f32 1.0, %v8167_v62 }
 0x463   :  { %v10846_v26 = vpop.eup %8170  ;;  %8198 = vrcp.f32 %v2355_v51  ;;  %v2358_v45 = vadd.f32 1.0, %v8169_v46  ;;  %v15564_v51 = vld [vmem:[#allocation23_spill] sm:$0xff] }
 0x464   :  { %3332 = vbcast.lane.b32.xlu0 %v10817_v52, 288  ;;  %3320 = vbcast.lane.b32.xlu1 %v10817_v52, 264  ;;  %15554 = vst [vmem:[#allocation17_spill] sm:$0xff] %v10846_v26  ;;  %v10851_v59 = vpop.eup %8172  ;;  %8200 = vrcp.f32 %v2352_v41  ;;  %v7814_v62 = vmul.f32 -1.442695, %v15564_v51  ;;  %v15565_v41 = vld [vmem:[#allocation24_spill] sm:$0xff] }
 0x465   :  { %15556 = vst [vmem:[#allocation18_spill] sm:$0xff] %v10851_v59  ;;  %v10853_v12 = vpop.eup %8174  ;;  %8202 = vpow2.f32 %v7804_v25  ;;  %v7825_v46 = vmul.f32 -1.442695, %v15565_v41 }
 0x466   :  { %15557 = vst [vmem:[#allocation93_spill] sm:$0xff] %v10853_v12  ;;  %v8177_v29 = vpop.eup %8176  ;;  %8204 = vpow2.f32 %v7805_v22 }
 0x467   :  { %v10856_v40 = vpop.eup %8178  ;;  %8206 = vrcp.f32 %v2353_v44  ;;  %v2359_v31 = vadd.f32 1.0, %v8177_v29  ;;  %v10881_v44 = vrot.slane %v10683_v61, %v10693_v60  ;;  %v15566_v29 = vld [vmem:[#allocation25_spill] sm:$0xff]  ;;  %v15574_v60 = vld [vmem:[#allocation32_spill] sm:$0xff] }
 0x468   :  { %3343 = vbcast.lane.b32.xlu0 %v10843_v17, 256  ;;  %3328 = vbcast.lane.b32.xlu1 %v10817_v52, 280  ;;  %15559 = vst [vmem:[#allocation19_spill] sm:$0xff] %v10856_v40  ;;  %v10861_v33 = vpop.eup %8180  ;;  %8208 = vrcp.f32 %v2358_v45  ;;  %v7812_v36 = vmul.f32 -1.442695, %v15566_v29 }
 0x469   :  { %15561 = vst [vmem:[#allocation20_spill] sm:$0xff] %v10861_v33  ;;  %v10864_v47 = vpop.eup %8182  ;;  %8210 = vpow2.f32 %v7810_v28  ;;  %v7829_v50 = vmul.f32 -1.442695, %v15574_v60 }
 0x46a   :  { %v8185_v1 = vpop.eup %8184  ;;  %8212 = vpow2.f32 %v7811_v27 }
 0x46b   :  { %v10867_v54 = vpop.eup %8186  ;;  %8214 = vpow2.f32 %v7808_v49  ;;  %v2356_v25 = vadd.f32 1.0, %v8185_v1  ;;  %v7815_v49 = vmul.f32 -1.442695, %v15568_v43 }
 0x46c   :  { %3351 = vbcast.lane.b32.xlu0 %v10843_v17, 272  ;;  %3336 = vbcast.lane.b32.xlu1 %v10817_v52, 296  ;;  %v8189_v52 = vpop.eup %8188  ;;  %8216 = vrcp.f32 %v2359_v31 }
 0x46d   :  { %v10873_v55 = vpop.eup %8190  ;;  %8218 = vpow2.f32 %v7809_v14  ;;  %v2357_v13 = vadd.f32 1.0, %v8189_v52 }
 0x46e   :  { %v8193_v45 = vpop.eup %8192  ;;  %8220 = vpow2.f32 %v7814_v62  ;;  %v15572_v62 = vld [vmem:[#allocation28_spill] sm:$0xff] }
 0x46f   :  { %v10884_v28 = vpop.eup %8194  ;;  %8222 = vpow2.f32 %v7825_v46  ;;  %v2362_v1 = vadd.f32 1.0, %v8193_v45  ;;  %v7813_v52 = vmul.f32 -1.442695, %v15572_v62 }
 0x470   :  { %3359 = vbcast.lane.b32.xlu0 %v10843_v17, 288  ;;  %3347 = vbcast.lane.b32.xlu1 %v10843_v17, 264  ;;  %15567 = vst [vmem:[#allocation21_spill] sm:$0xff] %v10884_v28  ;;  %v8197_v27 = vpop.eup %8196  ;;  %8224 = vrcp.f32 %v2356_v25  ;;  %v15573_v25 = vld [vmem:[#allocation30_spill] sm:$0xff] }
 0x471   :  { %v10889_v31 = vpop.eup %8198  ;;  %8226 = vpow2.f32 %v7812_v36  ;;  %v2363_v29 = vadd.f32 1.0, %v8197_v27  ;;  %v7827_v45 = vmul.f32 -1.442695, %v15573_v25 }
 0x472   :  { %v10875_v48 = vpop.permute.xlu0 %3104  ;;  %v10877_v22 = vpop.permute.xlu1 %3100  ;;  %15569 = vst [vmem:[#allocation22_spill] sm:$0xff] %v10889_v31  ;;  %8228 = vrcp.f32 %v2357_v13 }
 0x473   :  { %v10895_v51 = vpop.eup %8200  ;;  %8230 = vpow2.f32 %v7815_v49 }
 0x474   :  { %3370 = vbcast.lane.b32.xlu0 %v10881_v44, 256  ;;  %3355 = vbcast.lane.b32.xlu1 %v10843_v17, 280  ;;  %15571 = vst [vmem:[#allocation24_spill] sm:$0xff] %v10895_v51  ;;  %v8203_v41 = vpop.eup %8202  ;;  %8232 = vrcp.f32 %v2362_v1  ;;  %v15577_v1 = vld [vmem:[#allocation34_spill] sm:$0xff] }
 0x475   :  { %v8205_v46 = vpop.eup %8204  ;;  %v2360_v13 = vadd.f32 1.0, %v8203_v41  ;;  %8234 = vpow2.f32 %v7813_v52  ;;  %v7831_v25 = vmul.f32 -1.442695, %v15577_v1  ;;  %v10920_v52 = vrot.slane %v10683_v61, %v10702_v16 }
 0x476   :  { %v10891_v3 = vpop.permute.xlu0 %3116  ;;  %v10893_v14 = vpop.permute.xlu1 %3108  ;;  %8236 = vrcp.f32 %v2363_v29 }
 0x477   :  { %15570 = vst [vmem:[#allocation23_spill] sm:$0xff] %v10891_v3  ;;  %v10901_v43 = vpop.eup %8206  ;;  %8238 = vpow2.f32 %v7827_v45 }
 0x478   :  { %3378 = vbcast.lane.b32.xlu0 %v10881_v44, 272  ;;  %3363 = vbcast.lane.b32.xlu1 %v10843_v17, 296  ;;  %v10908_v62 = vpop.eup %8208  ;;  %v2361_v17 = vadd.f32 1.0, %v8205_v46  ;;  %8240 = vpow2.f32 %v7829_v50 }
 0x479   :  { %15576 = vst [vmem:[#allocation26_spill] sm:$0xff] %v10908_v62  ;;  %v8211_v27 = vpop.eup %8210  ;;  %8242 = vrcp.f32 %v2360_v13 }
 0x47a   :  { %v10904_v39 = vpop.permute.xlu0 %3127  ;;  %v10906_v36 = vpop.permute.xlu1 %3112  ;;  %v2366_v29 = vadd.f32 1.0, %v8211_v27 }
 0x47b   :  { %15575 = vst [vmem:[#allocation25_spill] sm:$0xff] %v10904_v39  ;;  %v8213_v49 = vpop.eup %8212  ;;  %8244 = vrcp.f32 %v2361_v17 }
 0x47c   :  { %3386 = vbcast.lane.b32.xlu0 %v10881_v44, 288  ;;  %3374 = vbcast.lane.b32.xlu1 %v10881_v44, 264  ;;  %v8215_v60 = vpop.eup %8214  ;;  %v2367_v45 = vadd.f32 1.0, %v8213_v49  ;;  %8246 = vpow2.f32 %v7831_v25 }
 0x47d   :  { %v10922_v41 = vpop.eup %8216  ;;  %v2364_v50 = vadd.f32 1.0, %v8215_v60  ;;  %8248 = vpow2.f32 %v7833_v24  ;;  %v15585_v60 = vld [vmem:[#allocation40_spill] sm:$0xff] }
 0x47e   :  { %v10914_v39 = vpop.permute.xlu0 %3135  ;;  %v10916_v2 = vpop.permute.xlu1 %3120  ;;  %15580 = vst [vmem:[#allocation30_spill] sm:$0xff] %v10922_v41  ;;  %v2612_v41 = vsub.f32 1.0, %v10737_v58 }
 0x47f   :  { %15579 = vst [vmem:[#allocation28_spill] sm:$0xff] %v10914_v39  ;;  %v8219_v46 = vpop.eup %8218  ;;  %v15581_v39 = vld [vmem:[#allocation38_spill] sm:$0xff]  ;;  %8250 = vrcp.f32 %v2366_v29 }
 0x480   :  { %3397 = vbcast.lane.b32.xlu0 %v10920_v52, 256  ;;  %3382 = vbcast.lane.b32.xlu1 %v10881_v44, 280  ;;  %v8221_v53 = vpop.eup %8220  ;;  %v7835_v62 = vmul.f32 -1.442695, %v15581_v39  ;;  %v2365_v27 = vadd.f32 1.0, %v8219_v46  ;;  %8252 = vrcp.f32 %v2367_v45 }
 0x481   :  { %v8223_v1 = vpop.eup %8222  ;;  %v2370_v49 = vadd.f32 1.0, %v8221_v53  ;;  %8254 = vrcp.f32 %v2364_v50  ;;  %v2708_v58 = vadd.f32 2.72, %v2612_v41  ;;  %v10957_v41 = vrot.slane %v10683_v61, %v10715_v9 }
 0x482   :  { %v10927_v16 = vpop.permute.xlu0 %3143  ;;  %v10929_v3 = vpop.permute.xlu1 %3131  ;;  %v2381_v39 = vadd.f32 1.0, %v8223_v1 }
 0x483   :  { %15582 = vst [vmem:[#allocation32_spill] sm:$0xff] %v10927_v16  ;;  %v10931_v13 = vpop.eup %8224  ;;  %8256 = vpow2.f32 %v7835_v62  ;;  %v7837_v16 = vmul.f32 -1.442695, %v15585_v60  ;;  %v15589_v60 = vld [vmem:[#allocation42_spill] sm:$0xff] }
 0x484   :  { %15583 = vst [vmem:[#allocation34_spill] sm:$0xff] %v10931_v13  ;;  %v8227_v17 = vpop.eup %8226  ;;  %3405 = vbcast.lane.b32.xlu0 %v10920_v52, 272  ;;  %3390 = vbcast.lane.b32.xlu1 %v10881_v44, 296  ;;  %8258 = vrcp.f32 %v2365_v27  ;;  %v2615_v44 = vsub.f32 1.0, %v10740_v57  ;;  %v2613_v57 = vsub.f32 1.0, %v10750_v32 }
 0x485   :  { %v10936_v24 = vpop.eup %8228  ;;  %v2368_v45 = vadd.f32 1.0, %v8227_v17  ;;  %8260 = vrcp.f32 %v2370_v49 }
 0x486   :  { %15584 = vst [vmem:[#allocation36_spill] sm:$0xff] %v10936_v24  ;;  %v8231_v25 = vpop.eup %8230  ;;  %v10939_v13 = vpop.permute.xlu0 %3154  ;;  %8262 = vrcp.f32 %v2381_v39  ;;  %v2711_v39 = vadd.f32 2.72, %v2615_v44  ;;  %v2614_v44 = vsub.f32 1.0, %v10733_v21 }
 0x487   :  { %15586 = vst [vmem:[#allocation38_spill] sm:$0xff] %v10939_v13  ;;  %v10941_v29 = vpop.permute.xlu1 %3139  ;;  %v10943_v46 = vpop.eup %8232  ;;  %v2371_v50 = vadd.f32 1.0, %v8231_v25  ;;  %8264 = vpow2.f32 %v7837_v16  ;;  %v7839_v13 = vmul.f32 -1.442695, %v15589_v60  ;;  %v2617_v16 = vsub.f32 1.0, %v10775_v23 }
 0x488   :  { %15587 = vst [vmem:[#allocation40_spill] sm:$0xff] %v10943_v46  ;;  %v8235_v53 = vpop.eup %8234  ;;  %3413 = vbcast.lane.b32.xlu0 %v10920_v52, 288  ;;  %3401 = vbcast.lane.b32.xlu1 %v10920_v52, 264  ;;  %8266 = vrcp.f32 %v2368_v45 }
 0x489   :  { %v10948_v62 = vpop.eup %8236  ;;  %v2369_v49 = vadd.f32 1.0, %v8235_v53  ;;  %8268 = vlog2.f32 %v2708_v58  ;;  %v2709_v58 = vadd.f32 2.72, %v2613_v57  ;;  %v2713_v32 = vadd.f32 2.72, %v2617_v16 }
 0x48a   :  { %15588 = vst [vmem:[#allocation94_spill] sm:$0xff] %v10948_v62  ;;  %v8239_v1 = vpop.eup %8238  ;;  %v10951_v46 = vpop.permute.xlu0 %3162  ;;  %8270 = vrcp.f32 %v2371_v50  ;;  %v2618_v57 = vsub.f32 1.0, %v10757_v19 }
 0x48b   :  { %15590 = vst [vmem:[#allocation42_spill] sm:$0xff] %v10951_v46  ;;  %v10953_v27 = vpop.permute.xlu1 %3147  ;;  %v8241_v17 = vpop.eup %8240  ;;  %v2383_v60 = vadd.f32 1.0, %v8239_v1  ;;  %8272 = vpow2.f32 %v7839_v13  ;;  %v2616_v1 = vsub.f32 1.0, %v10772_v35 }
 0x48c   :  { %v10960_v62 = vpop.eup %8242  ;;  %3424 = vbcast.lane.b32.xlu0 %v10957_v41, 256  ;;  %3409 = vbcast.lane.b32.xlu1 %v10920_v52, 280  ;;  %v2385_v46 = vadd.f32 1.0, %v8241_v17  ;;  %8274 = vrcp.f32 %v2369_v49 }
 0x48d   :  { %15591 = vst [vmem:[#allocation95_spill] sm:$0xff] %v10960_v62  ;;  %v10965_v25 = vpop.eup %8244  ;;  %8276 = vlog2.f32 %v2711_v39 }
 0x48e   :  { %15592 = vst [vmem:[#allocation96_spill] sm:$0xff] %v10965_v25  ;;  %v8247_v9 = vpop.eup %8246  ;;  %v10967_v45 = vpop.permute.xlu0 %3170  ;;  %v2619_v25 = vsub.f32 1.0, %v10764_v5  ;;  %8278 = vrcp.f32 %v2383_v60  ;;  %v2622_v60 = vsub.f32 1.0, %v10784_v15 }
 0x48f   :  { %15593 = vst [vmem:[#allocation97_spill] sm:$0xff] %v10967_v45  ;;  %v10969_v53 = vpop.permute.xlu1 %3158  ;;  %v8249_v62 = vpop.eup %8248  ;;  %v2387_v50 = vadd.f32 1.0, %v8247_v9  ;;  %8280 = vrcp.f32 %v2385_v46  ;;  %v2621_v46 = vsub.f32 1.0, %v10801_v20 }
 0x490   :  { %v10972_v23 = vpop.eup %8250  ;;  %3432 = vbcast.lane.b32.xlu0 %v10957_v41, 272  ;;  %3417 = vbcast.lane.b32.xlu1 %v10920_v52, 296  ;;  %v2389_v49 = vadd.f32 1.0, %v8249_v62  ;;  %8282 = vlog2.f32 %v2709_v58  ;;  %v2710_v52 = vadd.f32 2.72, %v2614_v44 }
 0x491   :  { %15594 = vst [vmem:[#allocation98_spill] sm:$0xff] %v10972_v23  ;;  %v10977_v13 = vpop.eup %8252  ;;  %8284 = vlog2.f32 %v2713_v32  ;;  %v2715_v19 = vadd.f32 2.72, %v2619_v25  ;;  %v2712_v44 = vadd.f32 2.72, %v2616_v1  ;;  %v2623_v32 = vsub.f32 1.0, %v10789_v4 }
 0x492   :  { %15595 = vst [vmem:[#allocation99_spill] sm:$0xff] %v10977_v13  ;;  %v10981_v17 = vpop.eup %8254  ;;  %v10983_v39 = vpop.permute.xlu0 %3181  ;;  %v2620_v13 = vsub.f32 1.0, %v10795_v63  ;;  %8286 = vrcp.f32 %v2387_v50  ;;  %v11008_v23 = vrot.slane %v10683_v61, %v10726_v38  ;;  %v11010_v50 = vadd.f32 2.72, %v2622_v60 }
 0x493   :  { %15596 = vst [vmem:[#allocation100_spill] sm:$0xff] %v10981_v17  ;;  %15597 = vst [vmem:[#allocation101_spill] sm:$0xff] %v10983_v39  ;;  %v10985_v16 = vpop.permute.xlu1 %3166  ;;  %v8257_v45 = vpop.eup %8256  ;;  %v15600_v17 = vld [vmem:[#allocation44_spill] sm:$0xff]  ;;  %v2714_v39 = vadd.f32 2.72, %v2618_v57  ;;  %8288 = vrcp.f32 %v2389_v49  ;;  %v2624_v1 = vsub.f32 1.0, %v10819_v37 }
 0x494   :  { %v10990_v9 = vpop.eup %8258  ;;  %3440 = vbcast.lane.b32.xlu0 %v10957_v41, 288  ;;  %3428 = vbcast.lane.b32.xlu1 %v10957_v41, 264  ;;  %v7841_v58 = vmul.f32 -1.442695, %v15600_v17  ;;  %8290 = vlog2.f32 %v2710_v52  ;;  %v2626_v57 = vsub.f32 1.0, %v10804_v8  ;;  %v2625_v60 = vsub.f32 1.0, %v10823_v10 }
 0x495   :  { %15598 = vst [vmem:[#allocation102_spill] sm:$0xff] %v10990_v9  ;;  %v10996_v62 = vpop.eup %8260  ;;  %v2391_v9 = vadd.f32 1.0, %v8257_v45  ;;  %v11016_v45 = vadd.f32 2.72, %v2620_v13  ;;  %8292 = vlog2.f32 %v2715_v19  ;;  %v2717_v49 = vadd.f32 2.72, %v2621_v46 }
 0x496   :  { %15599 = vst [vmem:[#allocation103_spill] sm:$0xff] %v10996_v62  ;;  %v10999_v15 = vpop.eup %8262  ;;  %v11002_v25 = vpop.permute.xlu0 %3189  ;;  %8294 = vpow2.f32 %v7841_v58  ;;  %v2627_v37 = vsub.f32 1.0, %v10810_v42  ;;  %v2630_v19 = vsub.f32 1.0, %v10826_v7  ;;  %v11030_v58 = vadd.f32 2.72, %v2624_v1 }
 0x497   :  { %15601 = vst [vmem:[#allocation44_spill] sm:$0xff] %v10999_v15  ;;  %15602 = vst [vmem:[#allocation104_spill] sm:$0xff] %v11002_v25  ;;  %v11004_v63 = vpop.permute.xlu1 %3174  ;;  %v8265_v62 = vpop.eup %8264  ;;  %v15604_v15 = vld [vmem:[#allocation46_spill] sm:$0xff]  ;;  %8296 = vrcp.f32 %v2391_v9  ;;  %v2631_v10 = vsub.f32 1.0, %v10831_v34 }
 0x498   :  { %v11014_v17 = vpop.eup %8266  ;;  %3451 = vbcast.lane.b32.xlu0 %v11008_v23, 256  ;;  %3436 = vbcast.lane.b32.xlu1 %v10957_v41, 280  ;;  %v7843_v52 = vmul.f32 -1.442695, %v15604_v15  ;;  %v2393_v13 = vadd.f32 1.0, %v8265_v62  ;;  %8298 = vlog2.f32 %v2712_v44  ;;  %v2628_v62 = vsub.f32 1.0, %v10834_v18 }
 0x499   :  { %15603 = vst [vmem:[#allocation105_spill] sm:$0xff] %v11014_v17  ;;  %v8269_v38 = vpop.eup %8268  ;;  %v2719_v17 = vadd.f32 2.72, %v2623_v32  ;;  %v11032_v15 = vadd.f32 2.72, %v2626_v57  ;;  %8300 = vlog2.f32 %v2717_v49  ;;  %v15608_v44 = vld [vmem:[#allocation48_spill] sm:$0xff] }
 0x49a   :  { %v11023_v8 = vpop.eup %8270  ;;  %v11026_v46 = vpop.permute.xlu0 %3197  ;;  %v2805_v9 = vmul.f32 0.6931472, %v8269_v38  ;;  %8302 = vpow2.f32 %v7843_v52  ;;  %v7845_v1 = vmul.f32 -1.442695, %v15608_v44  ;;  %v2721_v57 = vadd.f32 2.72, %v2625_v60 }
 0x49b   :  { %15605 = vst [vmem:[#allocation46_spill] sm:$0xff] %v11023_v8  ;;  %15606 = vst [vmem:[#allocation106_spill] sm:$0xff] %v11026_v46  ;;  %v11028_v25 = vpop.permute.xlu1 %3185  ;;  %v8273_v4 = vpop.eup %8272  ;;  %v11038_v8 = vstv %s10987_s1  ;;  %v11044_v7 = vadd.f32 2.72, %v2627_v37  ;;  %8304 = vrcp.f32 %v2393_v13  ;;  %v11048_v46 = vadd.f32 2.72, %v2630_v19 }
 0x49c   :  { %v11035_v42 = vpop.eup %8274  ;;  %3459 = vbcast.lane.b32.xlu0 %v11008_v23, 272  ;;  %3444 = vbcast.lane.b32.xlu1 %v10957_v41, 296  ;;  %v2629_v38 = vsub.f32 1.0, %v10839_v30  ;;  %8306 = vlog2.f32 %v2714_v39  ;;  %v2632_v52 = vsub.f32 1.0, %v10853_v12  ;;  %v2634_v37 = vsub.f32 1.0, %v10846_v26  ;;  %v15612_v39 = vld [vmem:[#allocation50_spill] sm:$0xff] }
 0x49d   :  { %15607 = vst [vmem:[#allocation107_spill] sm:$0xff] %v11035_v42  ;;  %v8277_v32 = vpop.eup %8276  ;;  %v2395_v42 = vadd.f32 1.0, %v8273_v4  ;;  %v11059_v60 = vadd.f32 2.72, %v2631_v10  ;;  %v2997_v4 = vmul.f32 %v11038_v8, %v2805_v9  ;;  %8308 = vlog2.f32 %v2719_v17 }
 0x49e   :  { %v11046_v34 = vpop.eup %8278  ;;  %v11051_v49 = vpop.permute.xlu0 %3208  ;;  %v2811_v13 = vmul.f32 0.6931472, %v8277_v32  ;;  %v11062_v19 = vadd.f32 2.72, %v2628_v62  ;;  %8310 = vpow2.f32 %v7845_v1  ;;  %v2633_v12 = vsub.f32 1.0, %v10856_v40 }
 0x49f   :  { %15609 = vst [vmem:[#allocation48_spill] sm:$0xff] %v11046_v34  ;;  %15610 = vst [vmem:[#allocation108_spill] sm:$0xff] %v11051_v49  ;;  %v11053_v18 = vpop.permute.xlu1 %3193  ;;  %v11055_v41 = vpop.eup %8280  ;;  %v2635_v10 = vsub.f32 1.0, %v10851_v59  ;;  %8312 = vrcp.f32 %v2395_v42  ;;  %v3623_v9 = vmul.f32 %v10877_v22, %v2997_v4  ;;  %v2725_v17 = vadd.f32 2.72, %v2629_v38 }
 0x4a0   :  { %15611 = vst [vmem:[#allocation109_spill] sm:$0xff] %v11055_v41  ;;  %v8283_v44 = vpop.eup %8282  ;;  %3467 = vbcast.lane.b32.xlu0 %v11008_v23, 288  ;;  %3455 = vbcast.lane.b32.xlu1 %v11008_v23, 264  ;;  %v7847_v41 = vmul.f32 -1.442695, %v15612_v39  ;;  %v11078_v49 = vrot.slane %v10683_v61, %v10747_v11  ;;  %8314 = vlog2.f32 %v11016_v45  ;;  %v3000_v22 = vmul.f32 %v11038_v8, %v2811_v13 }
 0x4a1   :  { %v8285_v34 = vpop.eup %8284  ;;  %v2807_v39 = vmul.f32 0.6931472, %v8283_v44  ;;  %v11083_v59 = vadd.f32 2.72, %v2632_v52  ;;  %8316 = vlog2.f32 %v2721_v57  ;;  %v2638_v4 = vsub.f32 1.0, %v10861_v33  ;;  %v15615_v44 = vld [vmem:[#allocation52_spill] sm:$0xff] }
 0x4a2   :  { %v11069_v26 = vpop.eup %8286  ;;  %v11072_v62 = vpop.permute.xlu0 %3216  ;;  %v2815_v38 = vmul.f32 0.6931472, %v8285_v34  ;;  %8318 = vpow2.f32 %v7847_v41  ;;  %v11092_v45 = vadd.f32 2.72, %v2633_v12  ;;  %v11094_v52 = vadd.f32 2.72, %v2635_v10 }
 0x4a3   :  { %15613 = vst [vmem:[#allocation50_spill] sm:$0xff] %v11069_v26  ;;  %v11074_v32 = vpop.permute.xlu1 %3201  ;;  %v11080_v1 = vpop.eup %8288  ;;  %v11085_v26 = vadd.f32 2.72, %v2634_v37  ;;  %8320 = vrcp.f32 %v3623_v9  ;;  %v3626_v34 = vmul.f32 %v10906_v36, %v3000_v22  ;;  %v2639_v33 = vsub.f32 1.0, %v10864_v47 }
 0x4a4   :  { %15614 = vst [vmem:[#allocation110_spill] sm:$0xff] %v11080_v1  ;;  %v8291_v42 = vpop.eup %8290  ;;  %3478 = vbcast.lane.b32.xlu0 %v11078_v49, 256  ;;  %3463 = vbcast.lane.b32.xlu1 %v11008_v23, 280  ;;  %v7849_v1 = vmul.f32 -1.442695, %v15615_v44  ;;  %v2663_v40 = vsub.f32 1.0, %v10744_v56  ;;  %v2998_v12 = vmul.f32 %v11038_v8, %v2807_v39  ;;  %8322 = vlog2.f32 %v11010_v50 }
 0x4a5   :  { %v8293_v11 = vpop.eup %8292  ;;  %v2809_v44 = vmul.f32 0.6931472, %v8291_v42  ;;  %v2636_v10 = vsub.f32 1.0, %v10867_v54  ;;  %v3002_v36 = vmul.f32 %v11038_v8, %v2815_v38  ;;  %8324 = vlog2.f32 %v11044_v7 }
 0x4a6   :  { %v11096_v37 = vpop.eup %8294  ;;  %v11099_v57 = vpop.permute.xlu0 %3224  ;;  %v2819_v22 = vmul.f32 0.6931472, %v8293_v11  ;;  %v2661_v56 = vsub.f32 1.0, %v10755_v6  ;;  %8326 = vpow2.f32 %v7849_v1  ;;  %v3624_v39 = vmul.f32 %v10875_v48, %v2998_v12 }
 0x4a7   :  { %15616 = vst [vmem:[#allocation52_spill] sm:$0xff] %v11096_v37  ;;  %v11101_v13 = vpop.permute.xlu1 %3212  ;;  %v11105_v41 = vpop.eup %8296  ;;  %v11116_v42 = vadd.f32 2.72, %v2638_v4  ;;  %v2637_v50 = vsub.f32 1.0, %v10873_v55  ;;  %8328 = vrcp.f32 %v3626_v34  ;;  %v3628_v11 = vmul.f32 %v10916_v2, %v3002_v36 }
 0x4a8   :  { %15617 = vst [vmem:[#allocation111_spill] sm:$0xff] %v11105_v41  ;;  %v8299_v9 = vpop.eup %8298  ;;  %3486 = vbcast.lane.b32.xlu0 %v11078_v49, 272  ;;  %3471 = vbcast.lane.b32.xlu1 %v11008_v23, 296  ;;  %v11124_v38 = vadd.f32 2.72, %v2639_v33  ;;  %v2999_v4 = vmul.f32 %v11038_v8, %v2809_v44  ;;  %8330 = vlog2.f32 %v11030_v58  ;;  %v3004_v2 = vmul.f32 %v11038_v8, %v2819_v22 }
 0x4a9   :  { %v8301_v41 = vpop.eup %8300  ;;  %v11128_v6 = vadd.f32 2.72, %v2663_v40  ;;  %v2813_v48 = vmul.f32 0.6931472, %v8299_v9  ;;  %v11134_v12 = vadd.f32 2.72, %v2636_v10  ;;  %8332 = vlog2.f32 %v2725_v17 }
 0x4aa   :  { %v11119_v37 = vpop.eup %8302  ;;  %v11122_v7 = vpop.permute.xlu0 %3235  ;;  %v2823_v36 = vmul.f32 0.6931472, %v8301_v41  ;;  %v11139_v40 = vadd.f32 2.72, %v2661_v56  ;;  %8334 = vrcp.f32 %v3624_v39  ;;  %v3625_v9 = vmul.f32 %v10893_v14, %v2999_v4 }
 0x4ab   :  { %15618 = vst [vmem:[#allocation112_spill] sm:$0xff] %v11119_v37  ;;  %v11126_v23 = vpop.permute.xlu1 %3220  ;;  %15619 = vst [vmem:[#allocation113_spill] sm:$0xff] %v11128_v6  ;;  %v11130_v1 = vpop.eup %8304  ;;  %v11142_v44 = vadd.f32 2.72, %v2637_v50  ;;  %v2642_v58 = vsub.f32 1.0, %v10884_v28  ;;  %8336 = vrcp.f32 %v3628_v11  ;;  %v3630_v41 = vmul.f32 %v10929_v3, %v3004_v2  ;;  %v15626_v37 = vld [vmem:[#allocation80_spill] sm:$0xff] }
 0x4ac   :  { %15620 = vst [vmem:[#allocation114_spill] sm:$0xff] %v11130_v1  ;;  %v8307_v34 = vpop.eup %8306  ;;  %3494 = vbcast.lane.b32.xlu0 %v11078_v49, 288  ;;  %3482 = vbcast.lane.b32.xlu1 %v11078_v49, 264  ;;  %v11154_v56 = vrot.slane %v10683_v61, %v9767_v0  ;;  %v2643_v39 = vsub.f32 1.0, %v10889_v31  ;;  %v3001_v50 = vmul.f32 %v11038_v8, %v2813_v48  ;;  %8338 = vlog2.f32 %v11032_v15  ;;  %v15624_v15 = vld [vmem:[#allocation26_spill] sm:$0xff] }
 0x4ad   :  { %v8309_v33 = vpop.eup %8308  ;;  %v2817_v4 = vmul.f32 0.6931472, %v8307_v34  ;;  %v2640_v11 = vsub.f32 1.0, %v10895_v51  ;;  %v3006_v2 = vmul.f32 %v11038_v8, %v2823_v36  ;;  %8340 = vlog2.f32 %v11059_v60 }
 0x4ae   :  { %v11145_v10 = vpop.eup %8310  ;;  %v11148_v17 = vpop.permute.xlu0 %3243  ;;  %v2827_v1 = vmul.f32 0.6931472, %v8309_v33  ;;  %v2641_v61 = vsub.f32 1.0, %v10901_v43  ;;  %8342 = vrcp.f32 %v3625_v9  ;;  %v11168_v34 = vadd.f32 2.72, %v2642_v58 }
 0x4af   :  { %15621 = vst [vmem:[#allocation115_spill] sm:$0xff] %v11145_v10  ;;  %v11150_v22 = vpop.permute.xlu1 %3228  ;;  %v11157_v14 = vpop.eup %8312  ;;  %v2646_v10 = vsub.f32 1.0, %v15624_v15  ;;  %8344 = vrcp.f32 %v3630_v41  ;;  %v3632_v36 = vmul.f32 %v10941_v29, %v3006_v2  ;;  %v11176_v33 = vadd.f32 2.72, %v2643_v39 }
 0x4b0   :  { %15622 = vst [vmem:[#allocation116_spill] sm:$0xff] %v11157_v14  ;;  %v8315_v3 = vpop.eup %8314  ;;  %3505 = vbcast.lane.b32.xlu0 %v11154_v56, 256  ;;  %3490 = vbcast.lane.b32.xlu1 %v11078_v49, 280  ;;  %v15623_v14 = vld [vmem:[#allocation23_spill] sm:$0xff]  ;;  %v2667_v31 = vsub.f32 1.0, %v15626_v37  ;;  %v3003_v9 = vmul.f32 %v11038_v8, %v2817_v4  ;;  %8346 = vlog2.f32 %v11062_v19  ;;  %v3008_v41 = vmul.f32 %v11038_v8, %v2827_v1  ;;  %v15627_v4 = vld [vmem:[#allocation25_spill] sm:$0xff] }
 0x4b1   :  { %v8317_v0 = vpop.eup %8316  ;;  %v3627_v48 = vmul.f32 %v15623_v14, %v3001_v50  ;;  %v2821_v58 = vmul.f32 0.6931472, %v8315_v3  ;;  %v11183_v14 = vadd.f32 2.72, %v2640_v11  ;;  %8348 = vlog2.f32 %v11092_v45  ;;  %v15628_v19 = vld [vmem:[#allocation30_spill] sm:$0xff] }
 0x4b2   :  { %v11171_v28 = vpop.eup %8318  ;;  %v11174_v60 = vpop.permute.xlu0 %3251  ;;  %v2831_v29 = vmul.f32 0.6931472, %v8317_v0  ;;  %v11187_v39 = vadd.f32 2.72, %v2641_v61  ;;  %v3629_v3 = vmul.f32 %v15627_v4, %v3003_v9  ;;  %v11192_v37 = vadd.f32 2.72, %v2646_v10 }
 0x4b3   :  { %15625 = vst [vmem:[#allocation23_spill] sm:$0xff] %v11171_v28  ;;  %v11178_v51 = vpop.permute.xlu1 %3239  ;;  %v8321_v6 = vpop.eup %8320  ;;  %8350 = vrcp.f32 %v3627_v48  ;;  %v2647_v11 = vsub.f32 1.0, %v15628_v19  ;;  %v3634_v0 = vmul.f32 %v10953_v27, %v3008_v41  ;;  %v15631_v61 = vld [vmem:[#allocation73_spill] sm:$0xff]  ;;  %v3005_v10 = vmul.f32 %v11038_v8, %v2821_v58  ;;  %v15634_v4 = vld [vmem:[#allocation34_spill] sm:$0xff] }
 0x4b4   :  { %v8323_v50 = vpop.eup %8322  ;;  %3513 = vbcast.lane.b32.xlu0 %v11154_v56, 272  ;;  %3498 = vbcast.lane.b32.xlu1 %v11078_v49, 296  ;;  %8352 = vrcp.f32 %v3632_v36  ;;  %v11203_v15 = vmul.f32 %v8321_v6, %v15631_v61  ;;  %v11205_v49 = vadd.f32 2.72, %v2667_v31  ;;  %v3010_v27 = vmul.f32 %v11038_v8, %v2831_v29  ;;  %v15635_v31 = vld [vmem:[#allocation28_spill] sm:$0xff] }
 0x4b5   :  { %v8325_v2 = vpop.eup %8324  ;;  %v2825_v9 = vmul.f32 0.6931472, %v8323_v50  ;;  %8354 = vlog2.f32 %v11048_v46  ;;  %v2645_v19 = vsub.f32 1.0, %v10936_v24  ;;  %v3631_v58 = vmul.f32 %v15635_v31, %v3005_v10  ;;  %v15636_v50 = vld [vmem:[#allocation40_spill] sm:$0xff]  ;;  %v15638_v24 = vld [vmem:[#allocation74_spill] sm:$0xff] }
 0x4b6   :  { %v11195_v28 = vpop.eup %8326  ;;  %v11198_v45 = vpop.permute.xlu0 %3262  ;;  %15632 = vst [vmem:[#allocation73_spill] sm:$0xff] %v11203_v15  ;;  %15633 = vst [vmem:[#allocation118_spill] sm:$0xff] %v11205_v49  ;;  %v2835_v41 = vmul.f32 0.6931472, %v8325_v2  ;;  %8356 = vlog2.f32 %v11094_v52  ;;  %v2650_v46 = vsub.f32 1.0, %v15636_v50  ;;  %v3636_v29 = vmul.f32 %v10969_v53, %v3010_v27 }
 0x4b7   :  { %15629 = vst [vmem:[#allocation25_spill] sm:$0xff] %v11195_v28  ;;  %15630 = vst [vmem:[#allocation117_spill] sm:$0xff] %v11198_v45  ;;  %v11200_v1 = vpop.permute.xlu1 %3247  ;;  %v8329_v48 = vpop.eup %8328  ;;  %v2644_v28 = vsub.f32 1.0, %v15634_v4  ;;  %8358 = vrcp.f32 %v3629_v3  ;;  %v11217_v61 = vadd.f32 2.72, %v2647_v11  ;;  %v15176_v49 = vmax.f32 %v11203_v15, 0.0 }
 0x4b8   :  { %v8331_v36 = vpop.eup %8330  ;;  %3521 = vbcast.lane.b32.xlu0 %v11154_v56, 288  ;;  %3509 = vbcast.lane.b32.xlu1 %v11154_v56, 264  ;;  %8360 = vrcp.f32 %v3634_v0  ;;  %v11226_v45 = vmul.f32 %v8329_v48, %v15638_v24  ;;  %v3007_v10 = vmul.f32 %v11038_v8, %v2825_v9  ;;  %v3012_v53 = vmul.f32 %v11038_v8, %v2835_v41  ;;  %v15640_v48 = vld [vmem:[#allocation32_spill] sm:$0xff] }
 0x4b9   :  { %v8333_v6 = vpop.eup %8332  ;;  %v2829_v31 = vmul.f32 0.6931472, %v8331_v36  ;;  %8362 = vlog2.f32 %v11083_v59  ;;  %v11230_v11 = vadd.f32 2.72, %v2644_v28  ;;  %v11234_v50 = vadd.f32 2.72, %v2645_v19 }
 0x4ba   :  { %v8335_v4 = vpop.eup %8334  ;;  %v11220_v2 = vpop.permute.xlu0 %3270  ;;  %15639 = vst [vmem:[#allocation74_spill] sm:$0xff] %v11226_v45  ;;  %v2839_v27 = vmul.f32 0.6931472, %v8333_v6  ;;  %8364 = vlog2.f32 %v11142_v44  ;;  %v3633_v9 = vmul.f32 %v15640_v48, %v3007_v10  ;;  %v11240_v59 = vadd.f32 2.72, %v2650_v46  ;;  %v15641_v28 = vld [vmem:[#allocation77_spill] sm:$0xff] }
 0x4bb   :  { %15637 = vst [vmem:[#allocation28_spill] sm:$0xff] %v11220_v2  ;;  %v11222_v52 = vpop.permute.xlu1 %3255  ;;  %v8337_v3 = vpop.eup %8336  ;;  %8366 = vrcp.f32 %v3631_v58  ;;  %v11243_v36 = vmul.f32 %v8335_v4, %v15641_v28  ;;  %v3638_v44 = vmul.f32 %v10985_v16, %v3012_v53  ;;  %v15177_v15 = vmax.f32 %v11226_v45, 0.0  ;;  %v15646_v4 = vld [vmem:[#allocation94_spill] sm:$0xff]  ;;  %v15647_v28 = vld [vmem:[#allocation95_spill] sm:$0xff] }
 0x4bc   :  { %v8339_v0 = vpop.eup %8338  ;;  %3517 = vbcast.lane.b32.xlu1 %v11154_v56, 280  ;;  %4104 = vperm.xlu0 %8021, %v15176_v49   ;;  %8368 = vrcp.f32 %v3636_v29  ;;  %v15644_v49 = vld [vmem:[#allocation81_spill] sm:$0xff]  ;;  %v3009_v46 = vmul.f32 %v11038_v8, %v2829_v31  ;;  %v2651_v48 = vsub.f32 1.0, %v15646_v4  ;;  %v3014_v16 = vmul.f32 %v11038_v8, %v2839_v27 }
 0x4bd   :  { %v8341_v24 = vpop.eup %8340  ;;  %15642 = vst [vmem:[#allocation32_spill] sm:$0xff] %v11243_v36  ;;  %v11252_v2 = vmul.f32 %v8337_v3, %v15644_v49  ;;  %v2833_v10 = vmul.f32 0.6931472, %v8339_v0  ;;  %8370 = vlog2.f32 %v11085_v26  ;;  %v15648_v3 = vld [vmem:[#allocation38_spill] sm:$0xff]  ;;  %v15179_v26 = vmax.f32 %v11243_v36, 0.0  ;;  %v15674_v36 = vld [vmem:[#allocation83_spill] sm:$0xff] }
 0x4be   :  { %v8343_v41 = vpop.eup %8342  ;;  %v11246_v19 = vpop.permute.xlu0 %3278  ;;  %v2843_v53 = vmul.f32 0.6931472, %v8341_v24  ;;  %8372 = vlog2.f32 %v11124_v38  ;;  %v3635_v31 = vmul.f32 %v15648_v3, %v3009_v46  ;;  %v3640_v38 = vmul.f32 %v11004_v63, %v3014_v16 }
 0x4bf   :  { %15643 = vst [vmem:[#allocation77_spill] sm:$0xff] %v11246_v19  ;;  %v11248_v6 = vpop.permute.xlu1 %3266  ;;  %15645 = vst [vmem:[#allocation81_spill] sm:$0xff] %v11252_v2  ;;  %v8345_v58 = vpop.eup %8344  ;;  %v2648_v19 = vsub.f32 1.0, %v15647_v28  ;;  %8374 = vrcp.f32 %v3633_v9  ;;  %v11266_v0 = vmul.f32 %v8343_v41, %v10733_v21  ;;  %v3011_v46 = vmul.f32 %v11038_v8, %v2833_v10 }
 0x4c0   :  { %v8347_v29 = vpop.eup %8346  ;;  %3525 = vbcast.lane.b32.xlu1 %v11154_v56, 296  ;;  %4113 = vperm.xlu0 %8021, %v15177_v15   ;;  %8376 = vrcp.f32 %v3638_v44  ;;  %v15178_v56 = vmax.f32 %v11252_v2, 0.0  ;;  %v11275_v15 = vmul.f32 %v8345_v58, %v10764_v5  ;;  %v11279_v21 = vadd.f32 2.72, %v2651_v48  ;;  %v15651_v58 = vld [vmem:[#allocation42_spill] sm:$0xff]  ;;  %v15659_v2 = vld [vmem:[#allocation79_spill] sm:$0xff] }
 0x4c1   :  { %v8349_v49 = vpop.eup %8348  ;;  %15649 = vst [vmem:[#allocation94_spill] sm:$0xff] %v11266_v0  ;;  %v2837_v3 = vmul.f32 0.6931472, %v8347_v29  ;;  %8378 = vlog2.f32 %v11134_v12  ;;  %v3016_v63 = vmul.f32 %v11038_v8, %v2843_v53  ;;  %v11283_v16 = vadd.f32 2.72, %v2648_v19 }
 0x4c2   :  { %v8351_v27 = vpop.eup %8350  ;;  %v11269_v24 = vpop.permute.xlu0 %3289  ;;  %15650 = vst [vmem:[#allocation38_spill] sm:$0xff] %v11275_v15  ;;  %v2847_v44 = vmul.f32 0.6931472, %v8349_v49  ;;  %8380 = vlog2.f32 %v11187_v39  ;;  %v3637_v12 = vmul.f32 %v15651_v58, %v3011_v46  ;;  %v15656_v49 = vmax.f32 %v11266_v0, 0.0 }
 0x4c3   :  { %v11271_v28 = vpop.permute.xlu1 %3274  ;;  %v8353_v9 = vpop.eup %8352  ;;  %8382 = vrcp.f32 %v3635_v31  ;;  %v11292_v48 = vmul.f32 %v8351_v27, %v10772_v35  ;;  %v3642_v39 = vmul.f32 %v11028_v25, %v3016_v63  ;;  %v3013_v46 = vmul.f32 %v11038_v8, %v2837_v3  ;;  %v15654_v35 = vld [vmem:[#allocation96_spill] sm:$0xff]  ;;  %v15658_v3 = vld [vmem:[#allocation97_spill] sm:$0xff] }
 0x4c4   :  { %v8355_v41 = vpop.eup %8354  ;;  %4107 = vperm.xlu1 %8022, %v15179_v26   ;;  %4119 = vperm.xlu0 %8021, %v15178_v56   ;;  %8384 = vrcp.f32 %v3640_v38  ;;  %v11301_v56 = vmul.f32 %v8353_v9, %v10801_v20  ;;  %v2649_v27 = vsub.f32 1.0, %v15654_v35  ;;  %v3018_v25 = vmul.f32 %v11038_v8, %v2847_v44  ;;  %v15655_v26 = vld [vmem:[#allocation98_spill] sm:$0xff] }
 0x4c5   :  { %v8357_v5 = vpop.eup %8356  ;;  %15652 = vst [vmem:[#allocation42_spill] sm:$0xff] %v11292_v48  ;;  %v2841_v58 = vmul.f32 0.6931472, %v8355_v41  ;;  %8386 = vlog2.f32 %v11116_v42  ;;  %v2654_v10 = vsub.f32 1.0, %v15655_v26  ;;  %v15657_v20 = vmax.f32 %v11275_v15, 0.0 }
 0x4c6   :  { %v8359_v29 = vpop.eup %8358  ;;  %v11295_v19 = vpop.permute.xlu0 %3297  ;;  %15653 = vst [vmem:[#allocation119_spill] sm:$0xff] %v11301_v56  ;;  %v2851_v63 = vmul.f32 0.6931472, %v8357_v5  ;;  %8388 = vlog2.f32 %v11176_v33  ;;  %v3639_v42 = vmul.f32 %v15658_v3, %v3013_v46  ;;  %v15184_v41 = vmax.f32 %v11292_v48, 0.0 }
 0x4c7   :  { %v11297_v53 = vpop.permute.xlu1 %3282  ;;  %v8361_v31 = vpop.eup %8360  ;;  %8390 = vrcp.f32 %v3637_v12  ;;  %v11316_v45 = vmul.f32 %v8359_v29, %v15659_v2  ;;  %v3644_v33 = vmul.f32 %v11053_v18, %v3018_v25  ;;  %v3015_v46 = vmul.f32 %v11038_v8, %v2841_v58  ;;  %v15663_v58 = vld [vmem:[#allocation101_spill] sm:$0xff] }
 0x4c8   :  { %v8363_v38 = vpop.eup %8362  ;;  %4110 = vperm.xlu1 %8022, %v15656_v49   ;;  %4125 = vperm.xlu0 %8021, %v15657_v20   ;;  %8392 = vrcp.f32 %v3642_v39  ;;  %v15185_v49 = vmax.f32 %v11301_v56, 0.0  ;;  %v15661_v20 = vld [vmem:[#allocation84_spill] sm:$0xff]  ;;  %v2745_v2 = vadd.f32 2.72, %v2649_v27  ;;  %v3020_v39 = vmul.f32 %v11038_v8, %v2851_v63  ;;  %v15664_v27 = vld [vmem:[#allocation85_spill] sm:$0xff] }
 0x4c9   :  { %v8365_v9 = vpop.eup %8364  ;;  %15660 = vst [vmem:[#allocation96_spill] sm:$0xff] %v11316_v45  ;;  %v11325_v15 = vmul.f32 %v8361_v31, %v15661_v20  ;;  %v2845_v3 = vmul.f32 0.6931472, %v8363_v38  ;;  %8394 = vlog2.f32 %v11183_v14  ;;  %v11331_v25 = vadd.f32 2.72, %v2654_v10  ;;  %v15670_v14 = vld [vmem:[#allocation100_spill] sm:$0xff] }
 0x4ca   :  { %v8367_v44 = vpop.eup %8366  ;;  %v11319_v5 = vpop.permute.xlu0 %3305  ;;  %v2855_v18 = vmul.f32 0.6931472, %v8365_v9  ;;  %8396 = vlog2.f32 %v11234_v50  ;;  %v3641_v38 = vmul.f32 %v15663_v58, %v3015_v46  ;;  %v3646_v50 = vmul.f32 %v11074_v32, %v3020_v39 }
 0x4cb   :  { %v11321_v0 = vpop.permute.xlu1 %3293  ;;  %15662 = vst [vmem:[#allocation98_spill] sm:$0xff] %v11325_v15  ;;  %v8369_v12 = vpop.eup %8368  ;;  %8398 = vrcp.f32 %v3639_v42  ;;  %v11340_v20 = vmul.f32 %v8367_v44, %v15664_v27  ;;  %v3017_v46 = vmul.f32 %v11038_v8, %v2845_v3  ;;  %v15669_v44 = vld [vmem:[#allocation99_spill] sm:$0xff]  ;;  %v2652_v48 = vsub.f32 1.0, %v15670_v14  ;;  %v15673_v3 = vld [vmem:[#allocation104_spill] sm:$0xff] }
 0x4cc   :  { %v8371_v29 = vpop.eup %8370  ;;  %4116 = vperm.xlu1 %8022, %v15184_v41   ;;  %4131 = vperm.xlu0 %8021, %v15185_v49   ;;  %8400 = vrcp.f32 %v3644_v33  ;;  %v15667_v49 = vld [vmem:[#allocation89_spill] sm:$0xff]  ;;  %v2655_v27 = vsub.f32 1.0, %v15669_v44  ;;  %v3022_v32 = vmul.f32 %v11038_v8, %v2855_v18  ;;  %v15671_v41 = vmax.f32 %v11316_v45, 0.0 }
 0x4cd   :  { %v8373_v31 = vpop.eup %8372  ;;  %15665 = vst [vmem:[#allocation97_spill] sm:$0xff] %v11340_v20  ;;  %v11349_v56 = vmul.f32 %v8369_v12, %v15667_v49  ;;  %v2849_v58 = vmul.f32 0.6931472, %v8371_v29  ;;  %8402 = vlog2.f32 %v11168_v34  ;;  %v15672_v49 = vmax.f32 %v11325_v15, 0.0 }
 0x4ce   :  { %v8375_v63 = vpop.eup %8374  ;;  %v11343_v10 = vpop.permute.xlu0 %3316  ;;  %v2859_v39 = vmul.f32 0.6931472, %v8373_v31  ;;  %8404 = vlog2.f32 %v11217_v61  ;;  %v3643_v34 = vmul.f32 %v15673_v3, %v3017_v46  ;;  %v3648_v61 = vmul.f32 %v11101_v13, %v3022_v32  ;;  %v15679_v32 = vld [vmem:[#allocation102_spill] sm:$0xff] }
 0x4cf   :  { %15666 = vst [vmem:[#allocation79_spill] sm:$0xff] %v11343_v10  ;;  %v11345_v9 = vpop.permute.xlu1 %3301  ;;  %15668 = vst [vmem:[#allocation84_spill] sm:$0xff] %v11349_v56  ;;  %v8377_v42 = vpop.eup %8376  ;;  %8406 = vrcp.f32 %v3641_v38  ;;  %v11364_v10 = vmul.f32 %v8375_v63, %v15674_v36  ;;  %v3019_v46 = vmul.f32 %v11038_v8, %v2849_v58  ;;  %v11377_v36 = vadd.f32 2.72, %v2655_v27  ;;  %v15682_v58 = vld [vmem:[#allocation106_spill] sm:$0xff]  ;;  %v15683_v27 = vld [vmem:[#allocation88_spill] sm:$0xff] }
 0x4d0   :  { %v8379_v33 = vpop.eup %8378  ;;  %4122 = vperm.xlu1 %8022, %v15671_v41   ;;  %4137 = vperm.xlu0 %8021, %v15672_v49   ;;  %8408 = vrcp.f32 %v3646_v50  ;;  %v15677_v49 = vld [vmem:[#allocation87_spill] sm:$0xff]  ;;  %v3024_v13 = vmul.f32 %v11038_v8, %v2859_v39  ;;  %v2653_v29 = vsub.f32 1.0, %v15679_v32  ;;  %v15680_v41 = vmax.f32 %v11340_v20, 0.0 }
 0x4d1   :  { %v8381_v12 = vpop.eup %8380  ;;  %15675 = vst [vmem:[#allocation101_spill] sm:$0xff] %v11364_v10  ;;  %v11373_v15 = vmul.f32 %v8377_v42, %v15677_v49  ;;  %v2853_v3 = vmul.f32 0.6931472, %v8379_v33  ;;  %8410 = vlog2.f32 %v11230_v11  ;;  %v15681_v42 = vmax.f32 %v11349_v56, 0.0 }
 0x4d2   :  { %v8383_v18 = vpop.eup %8382  ;;  %v11367_v31 = vpop.permute.xlu0 %3324  ;;  %v2863_v50 = vmul.f32 0.6931472, %v8381_v12  ;;  %8412 = vlog2.f32 %v2745_v2  ;;  %v3645_v33 = vmul.f32 %v15682_v58, %v3019_v46  ;;  %v15192_v11 = vmax.f32 %v11364_v10, 0.0 }
 0x4d3   :  { %15676 = vst [vmem:[#allocation85_spill] sm:$0xff] %v11367_v31  ;;  %v11369_v45 = vpop.permute.xlu1 %3309  ;;  %15678 = vst [vmem:[#allocation89_spill] sm:$0xff] %v11373_v15  ;;  %v8385_v38 = vpop.eup %8384  ;;  %8414 = vrcp.f32 %v3643_v34  ;;  %v11388_v31 = vmul.f32 %v8383_v18, %v15683_v27  ;;  %v3650_v2 = vmul.f32 %v11126_v23, %v3024_v13  ;;  %v3021_v46 = vmul.f32 %v11038_v8, %v2853_v3 }
 0x4d4   :  { %v8387_v63 = vpop.eup %8386  ;;  %4128 = vperm.xlu1 %8022, %v15680_v41   ;;  %4143 = vperm.xlu0 %8021, %v15681_v42   ;;  %8416 = vrcp.f32 %v3648_v61  ;;  %v15193_v41 = vmax.f32 %v11373_v15, 0.0  ;;  %v11397_v42 = vmul.f32 %v8385_v38, %v10839_v30  ;;  %v11401_v18 = vadd.f32 2.72, %v2652_v48  ;;  %v15686_v38 = vld [vmem:[#allocation108_spill] sm:$0xff]  ;;  %v15687_v48 = vld [vmem:[#allocation86_spill] sm:$0xff] }
 0x4d5   :  { %v8389_v49 = vpop.eup %8388  ;;  %15684 = vst [vmem:[#allocation99_spill] sm:$0xff] %v11388_v31  ;;  %v2857_v58 = vmul.f32 0.6931472, %v8387_v63  ;;  %8418 = vlog2.f32 %v11192_v37  ;;  %v3026_v23 = vmul.f32 %v11038_v8, %v2863_v50  ;;  %v2749_v27 = vadd.f32 2.72, %v2653_v29  ;;  %v15693_v37 = vld [vmem:[#allocation103_spill] sm:$0xff] }
 0x4d6   :  { %v8391_v39 = vpop.eup %8390  ;;  %v11391_v12 = vpop.permute.xlu0 %3332  ;;  %15685 = vst [vmem:[#allocation100_spill] sm:$0xff] %v11397_v42  ;;  %v2867_v13 = vmul.f32 0.6931472, %v8389_v49  ;;  %8420 = vlog2.f32 %v11279_v21  ;;  %v3647_v3 = vmul.f32 %v15686_v38, %v3021_v46 }
 0x4d7   :  { %v11393_v20 = vpop.permute.xlu1 %3320  ;;  %v8393_v34 = vpop.eup %8392  ;;  %8422 = vrcp.f32 %v3645_v33  ;;  %v11412_v63 = vmul.f32 %v8391_v39, %v15687_v48  ;;  %v3652_v21 = vmul.f32 %v11150_v22, %v3026_v23  ;;  %v3023_v46 = vmul.f32 %v11038_v8, %v2857_v58  ;;  %v15692_v39 = vld [vmem:[#allocation107_spill] sm:$0xff] }
 0x4d8   :  { %v8395_v61 = vpop.eup %8394  ;;  %4134 = vperm.xlu1 %8022, %v15192_v11   ;;  %4149 = vperm.xlu0 %8021, %v15193_v41   ;;  %8424 = vrcp.f32 %v3650_v2  ;;  %v15690_v41 = vld [vmem:[#allocation91_spill] sm:$0xff]  ;;  %v2657_v48 = vsub.f32 1.0, %v15692_v39  ;;  %v3028_v22 = vmul.f32 %v11038_v8, %v2867_v13  ;;  %v15694_v11 = vmax.f32 %v11388_v31, 0.0 }
 0x4d9   :  { %v8397_v30 = vpop.eup %8396  ;;  %15688 = vst [vmem:[#allocation104_spill] sm:$0xff] %v11412_v63  ;;  %v11421_v15 = vmul.f32 %v8393_v34, %v15690_v41  ;;  %v2861_v38 = vmul.f32 0.6931472, %v8395_v61  ;;  %8426 = vlog2.f32 %v11283_v16  ;;  %v15695_v41 = vmax.f32 %v11397_v42, 0.0  ;;  %v15696_v61 = vld [vmem:[#allocation92_spill] sm:$0xff] }
 0x4da   :  { %v8399_v50 = vpop.eup %8398  ;;  %v11415_v29 = vpop.permute.xlu0 %3343  ;;  %v2871_v23 = vmul.f32 0.6931472, %v8397_v30  ;;  %8428 = vlog2.f32 %v2749_v27  ;;  %v3649_v58 = vmul.f32 %v11072_v62, %v3023_v46  ;;  %v3654_v27 = vmul.f32 %v11178_v51, %v3028_v22  ;;  %v15701_v22 = vld [vmem:[#allocation46_spill] sm:$0xff] }
 0x4db   :  { %15689 = vst [vmem:[#allocation83_spill] sm:$0xff] %v11415_v29  ;;  %v11417_v49 = vpop.permute.xlu1 %3328  ;;  %15691 = vst [vmem:[#allocation87_spill] sm:$0xff] %v11421_v15  ;;  %v8401_v33 = vpop.eup %8400  ;;  %8430 = vrcp.f32 %v3647_v3  ;;  %v11435_v10 = vmul.f32 %v8399_v50, %v15696_v61  ;;  %v3025_v62 = vmul.f32 %v11038_v8, %v2861_v38  ;;  %v2753_v50 = vadd.f32 2.72, %v2657_v48  ;;  %v15704_v48 = vld [vmem:[#allocation90_spill] sm:$0xff] }
 0x4dc   :  { %v8403_v2 = vpop.eup %8402  ;;  %4140 = vperm.xlu1 %8022, %v15694_v11   ;;  %4155 = vperm.xlu0 %8021, %v15695_v41   ;;  %8432 = vrcp.f32 %v3652_v21  ;;  %v15699_v41 = vld [vmem:[#allocation19_spill] sm:$0xff]  ;;  %v3030_v21 = vmul.f32 %v11038_v8, %v2871_v23  ;;  %v2659_v16 = vsub.f32 1.0, %v15701_v22  ;;  %v15702_v11 = vmax.f32 %v11412_v63, 0.0 }
 0x4dd   :  { %v8405_v34 = vpop.eup %8404  ;;  %15697 = vst [vmem:[#allocation102_spill] sm:$0xff] %v11435_v10  ;;  %v11444_v42 = vmul.f32 %v8401_v33, %v15699_v41  ;;  %v2865_v46 = vmul.f32 0.6931472, %v8403_v2  ;;  %8434 = vlog2.f32 %v11240_v59  ;;  %v15703_v33 = vmax.f32 %v11421_v15, 0.0 }
 0x4de   :  { %v8407_v13 = vpop.eup %8406  ;;  %v11438_v30 = vpop.permute.xlu0 %3351  ;;  %v2875_v51 = vmul.f32 0.6931472, %v8405_v34  ;;  %8436 = vlog2.f32 %v11377_v36  ;;  %v3651_v38 = vmul.f32 %v11099_v57, %v3025_v62  ;;  %v3656_v36 = vmul.f32 %v11200_v1, %v3030_v21 }
 0x4df   :  { %15698 = vst [vmem:[#allocation106_spill] sm:$0xff] %v11438_v30  ;;  %v11440_v56 = vpop.permute.xlu1 %3336  ;;  %15700 = vst [vmem:[#allocation88_spill] sm:$0xff] %v11444_v42  ;;  %v8409_v3 = vpop.eup %8408  ;;  %8438 = vrcp.f32 %v3649_v58  ;;  %v11458_v2 = vmul.f32 %v8407_v13, %v15704_v48  ;;  %v3027_v57 = vmul.f32 %v11038_v8, %v2865_v46  ;;  %v15709_v13 = vld [vmem:[#allocation105_spill] sm:$0xff]  ;;  %v2755_v59 = vadd.f32 2.72, %v2659_v16 }
 0x4e0   :  { %v8411_v61 = vpop.eup %8410  ;;  %4146 = vperm.xlu1 %8022, %v15702_v11   ;;  %4161 = vperm.xlu0 %8021, %v15703_v33   ;;  %8440 = vrcp.f32 %v3654_v27  ;;  %v15201_v11 = vmax.f32 %v11444_v42, 0.0  ;;  %v15707_v33 = vld [vmem:[#allocation18_spill] sm:$0xff]  ;;  %v2656_v48 = vsub.f32 1.0, %v15709_v13  ;;  %v3032_v1 = vmul.f32 %v11038_v8, %v2875_v51 }
 0x4e1   :  { %v8413_v41 = vpop.eup %8412  ;;  %15705 = vst [vmem:[#allocation108_spill] sm:$0xff] %v11458_v2  ;;  %v11467_v15 = vmul.f32 %v8409_v3, %v15707_v33  ;;  %v2869_v62 = vmul.f32 0.6931472, %v8411_v61  ;;  %8442 = vlog2.f32 %v11401_v18  ;;  %v15710_v31 = vmax.f32 %v11435_v10, 0.0  ;;  %v15711_v61 = vld [vmem:[#allocation93_spill] sm:$0xff] }
 0x4e2   :  { %v8415_v23 = vpop.eup %8414  ;;  %v11461_v34 = vpop.permute.xlu0 %3359  ;;  %v2879_v21 = vmul.f32 0.6931472, %v8413_v41  ;;  %8444 = vlog2.f32 %v2753_v50  ;;  %v3653_v46 = vmul.f32 %v11122_v7, %v3027_v57  ;;  %v15202_v18 = vmax.f32 %v11458_v2, 0.0 }
 0x4e3   :  { %15706 = vst [vmem:[#allocation86_spill] sm:$0xff] %v11461_v34  ;;  %v11463_v63 = vpop.permute.xlu1 %3347  ;;  %15708 = vst [vmem:[#allocation91_spill] sm:$0xff] %v11467_v15  ;;  %v8417_v58 = vpop.eup %8416  ;;  %8446 = vrcp.f32 %v3651_v38  ;;  %v11480_v33 = vmul.f32 %v8415_v23, %v15711_v61  ;;  %v3658_v50 = vmul.f32 %v11222_v52, %v3032_v1  ;;  %v3029_v7 = vmul.f32 %v11038_v8, %v2869_v62  ;;  %v15715_v1 = vld [vmem:[#allocation82_spill] sm:$0xff]  ;;  %v15716_v62 = vld [vmem:[#allocation17_spill] sm:$0xff] }
 0x4e4   :  { %v8419_v27 = vpop.eup %8418  ;;  %4152 = vperm.xlu1 %8022, %v15710_v31   ;;  %4167 = vperm.xlu0 %8021, %v15201_v11   ;;  %8448 = vrcp.f32 %v3656_v36  ;;  %v15203_v31 = vmax.f32 %v11467_v15, 0.0  ;;  %v11489_v41 = vmul.f32 %v8417_v58, %v10873_v55  ;;  %v2752_v23 = vadd.f32 2.72, %v2656_v48 }
 0x4e5   :  { %v8421_v3 = vpop.eup %8420  ;;  %15712 = vst [vmem:[#allocation107_spill] sm:$0xff] %v11480_v33  ;;  %v2873_v57 = vmul.f32 0.6931472, %v8419_v27  ;;  %8450 = vlog2.f32 %v11331_v25  ;;  %v3034_v36 = vmul.f32 %v11038_v8, %v2879_v21  ;;  %v2665_v11 = vsub.f32 1.0, %v15715_v1 }
 0x4e6   :  { %v8423_v34 = vpop.eup %8422  ;;  %v11483_v16 = vpop.permute.xlu0 %3370  ;;  %15714 = vst [vmem:[#allocation92_spill] sm:$0xff] %v11489_v41  ;;  %v2883_v52 = vmul.f32 0.6931472, %v8421_v3  ;;  %8452 = vlog2.f32 %v2755_v59  ;;  %v3655_v58 = vmul.f32 %v11148_v17, %v3029_v7 }
 0x4e7   :  { %15713 = vst [vmem:[#allocation103_spill] sm:$0xff] %v11483_v16  ;;  %v11485_v51 = vpop.permute.xlu1 %3355  ;;  %v8425_v38 = vpop.eup %8424  ;;  %8454 = vrcp.f32 %v3653_v46  ;;  %v11502_v48 = vmul.f32 %v8423_v34, %v15716_v62  ;;  %v3660_v59 = vmul.f32 %v11248_v6, %v3034_v36  ;;  %v3031_v17 = vmul.f32 %v11038_v8, %v2873_v57 }
 0x4e8   :  { %v8427_v61 = vpop.eup %8426  ;;  %4158 = vperm.xlu1 %8022, %v15202_v18   ;;  %4173 = vperm.xlu0 %8021, %v15203_v31   ;;  %8456 = vrcp.f32 %v3658_v50  ;;  %v11511_v31 = vmul.f32 %v8425_v38, %v10864_v47  ;;  %v15720_v34 = vsub.f32 1.0, %v15693_v37  ;;  %v3036_v6 = vmul.f32 %v11038_v8, %v2883_v52 }
 0x4e9   :  { %v8429_v55 = vpop.eup %8428  ;;  %15717 = vst [vmem:[#allocation19_spill] sm:$0xff] %v11502_v48  ;;  %v2877_v7 = vmul.f32 0.6931472, %v8427_v61  ;;  %8458 = vlog2.f32 %v2752_v23  ;;  %v2761_v25 = vadd.f32 2.72, %v2665_v11  ;;  %v15721_v18 = vmax.f32 %v11480_v33, 0.0 }
 0x4ea   :  { %v8431_v27 = vpop.eup %8430  ;;  %v11505_v21 = vpop.permute.xlu0 %3378  ;;  %15719 = vst [vmem:[#allocation90_spill] sm:$0xff] %v11511_v31  ;;  %v2754_v62 = vadd.f32 2.72, %v15720_v34  ;;  %v2887_v36 = vmul.f32 0.6931472, %v8429_v55  ;;  %8460 = vlog2.f32 %v11139_v40  ;;  %v15722_v47 = vmax.f32 %v11489_v41, 0.0 }
 0x4eb   :  { %15718 = vst [vmem:[#allocation46_spill] sm:$0xff] %v11505_v21  ;;  %v11507_v3 = vpop.permute.xlu1 %3363  ;;  %v8433_v46 = vpop.eup %8432  ;;  %8462 = vrcp.f32 %v3655_v58  ;;  %v3657_v57 = vmul.f32 %v11174_v60, %v3031_v17  ;;  %v11525_v61 = vmul.f32 %v8431_v27, %v10867_v54  ;;  %v3662_v40 = vmul.f32 %v11271_v28, %v3036_v6  ;;  %v15726_v60 = vld [vmem:[#allocation52_spill] sm:$0xff]  ;;  %v15728_v41 = vld [vmem:[#allocation113_spill] sm:$0xff] }
 0x4ec   :  { %v8435_v50 = vpop.eup %8434  ;;  %4164 = vperm.xlu1 %8022, %v15721_v18   ;;  %4179 = vperm.xlu0 %8021, %v15722_v47   ;;  %8464 = vrcp.f32 %v3660_v59  ;;  %v11534_v34 = vmul.f32 %v8433_v46, %v10901_v43  ;;  %v2397_v17 = vadd.f32 1.0, %v15726_v60  ;;  %v3033_v47 = vmul.f32 %v11038_v8, %v2877_v7  ;;  %v15727_v59 = vld [vmem:[#allocation54_spill] sm:$0xff]  ;;  %v15731_v60 = vld [vmem:[#allocation117_spill] sm:$0xff] }
 0x4ed   :  { %v8437_v38 = vpop.eup %8436  ;;  %15723 = vst [vmem:[#allocation18_spill] sm:$0xff] %v11525_v61  ;;  %v2881_v54 = vmul.f32 0.6931472, %v8435_v50  ;;  %8466 = vlog2.f32 %v2754_v62  ;;  %v7851_v23 = vmul.f32 -1.442695, %v15727_v59  ;;  %v3038_v28 = vmul.f32 %v11038_v8, %v2887_v36  ;;  %v15732_v50 = vld [vmem:[#allocation20_spill] sm:$0xff] }
 0x4ee   :  { %v8439_v52 = vpop.eup %8438  ;;  %v11528_v11 = vpop.permute.xlu0 %3386  ;;  %15725 = vst [vmem:[#allocation93_spill] sm:$0xff] %v11534_v34  ;;  %v2891_v6 = vmul.f32 0.6931472, %v8437_v38  ;;  %8468 = vlog2.f32 %v15728_v41  ;;  %v15729_v18 = vmax.f32 %v11502_v48, 0.0  ;;  %v15730_v43 = vmax.f32 %v11511_v31, 0.0  ;;  %v15738_v62 = vld [vmem:[#allocation44_spill] sm:$0xff] }
 0x4ef   :  { %15724 = vst [vmem:[#allocation105_spill] sm:$0xff] %v11528_v11  ;;  %v11530_v55 = vpop.permute.xlu1 %3374  ;;  %v8441_v58 = vpop.eup %8440  ;;  %8470 = vrcp.f32 %v3657_v57  ;;  %v3659_v7 = vmul.f32 %v15731_v60, %v3033_v47  ;;  %v11548_v15 = vmul.f32 %v8439_v52, %v15732_v50  ;;  %v3664_v36 = vmul.f32 %v11297_v53, %v3038_v28  ;;  %v15737_v47 = vld [vmem:[#allocation112_spill] sm:$0xff] }
 0x4f0   :  { %v8443_v27 = vpop.eup %8442  ;;  %4170 = vperm.xlu1 %8022, %v15729_v18   ;;  %4185 = vperm.xlu0 %8021, %v15730_v43   ;;  %8472 = vrcp.f32 %v3662_v40  ;;  %v15735_v43 = vld [vmem:[#allocation22_spill] sm:$0xff]  ;;  %v11560_v60 = vadd.f32 1.0, %v15737_v47  ;;  %v3035_v52 = vmul.f32 %v11038_v8, %v2881_v54  ;;  %v3040_v53 = vmul.f32 %v11038_v8, %v2891_v6 }
 0x4f1   :  { %v8445_v46 = vpop.eup %8444  ;;  %15733 = vst [vmem:[#allocation82_spill] sm:$0xff] %v11548_v15  ;;  %v11557_v31 = vmul.f32 %v8441_v58, %v15735_v43  ;;  %8474 = vrcp.f32 %v2397_v17  ;;  %v2885_v50 = vmul.f32 0.6931472, %v8443_v27  ;;  %v2669_v42 = vsub.f32 1.0, %v15738_v62  ;;  %v15741_v43 = vld [vmem:[#allocation28_spill] sm:$0xff] }
 0x4f2   :  { %v8447_v59 = vpop.eup %8446  ;;  %v11551_v41 = vpop.permute.xlu0 %3397  ;;  %v2895_v28 = vmul.f32 0.6931472, %v8445_v46  ;;  %8476 = vlog2.f32 %v2761_v25  ;;  %v15739_v18 = vmax.f32 %v11525_v61, 0.0  ;;  %v15740_v58 = vmax.f32 %v11534_v34, 0.0  ;;  %v15742_v27 = vld [vmem:[#allocation24_spill] sm:$0xff] }
 0x4f3   :  { %15734 = vst [vmem:[#allocation17_spill] sm:$0xff] %v11551_v41  ;;  %v11553_v38 = vpop.permute.xlu1 %3382  ;;  %15736 = vst [vmem:[#allocation52_spill] sm:$0xff] %v11557_v31  ;;  %v8449_v57 = vpop.eup %8448  ;;  %8478 = vrcp.f32 %v3659_v7  ;;  %v3661_v47 = vmul.f32 %v15741_v43, %v3035_v52  ;;  %v11572_v48 = vmul.f32 %v8447_v59, %v15742_v27  ;;  %v3666_v25 = vmul.f32 %v11321_v0, %v3040_v53  ;;  %v15747_v59 = vld [vmem:[#allocation48_spill] sm:$0xff]  ;;  %v15748_v53 = vld [vmem:[#allocation118_spill] sm:$0xff] }
 0x4f4   :  { %v8451_v40 = vpop.eup %8450  ;;  %4176 = vperm.xlu1 %8022, %v15739_v18   ;;  %4191 = vperm.xlu0 %8021, %v15740_v58   ;;  %8480 = vrcp.f32 %v3664_v36  ;;  %v15214_v18 = vmax.f32 %v11557_v31, 0.0  ;;  %v15745_v58 = vld [vmem:[#allocation36_spill] sm:$0xff]  ;;  %v3037_v52 = vmul.f32 %v11038_v8, %v2885_v50  ;;  %v2671_v27 = vsub.f32 1.0, %v15747_v59 }
 0x4f5   :  { %v8453_v17 = vpop.eup %8452  ;;  %15743 = vst [vmem:[#allocation54_spill] sm:$0xff] %v11572_v48  ;;  %v11581_v34 = vmul.f32 %v8449_v57, %v15745_v58  ;;  %8482 = vpow2.f32 %v7851_v23  ;;  %v2889_v43 = vmul.f32 0.6931472, %v8451_v40  ;;  %v3042_v36 = vmul.f32 %v11038_v8, %v2895_v28  ;;  %v15750_v23 = vld [vmem:[#allocation77_spill] sm:$0xff] }
 0x4f6   :  { %v8455_v6 = vpop.eup %8454  ;;  %v11575_v46 = vpop.permute.xlu0 %3405  ;;  %v2899_v0 = vmul.f32 0.6931472, %v8453_v17  ;;  %8484 = vlog2.f32 %v15748_v53  ;;  %v2765_v33 = vadd.f32 2.72, %v2669_v42  ;;  %v15749_v2 = vmax.f32 %v11548_v15, 0.0  ;;  %v15751_v58 = vld [vmem:[#allocation21_spill] sm:$0xff] }
 0x4f7   :  { %15744 = vst [vmem:[#allocation113_spill] sm:$0xff] %v11575_v46  ;;  %v11577_v61 = vpop.permute.xlu1 %3390  ;;  %15746 = vst [vmem:[#allocation117_spill] sm:$0xff] %v11581_v34  ;;  %v8457_v7 = vpop.eup %8456  ;;  %8486 = vrcp.f32 %v3661_v47  ;;  %v3663_v50 = vmul.f32 %v15750_v23, %v3037_v52  ;;  %v11594_v10 = vmul.f32 %v8455_v6, %v15751_v58  ;;  %v3668_v17 = vmul.f32 %v11345_v9, %v3042_v36  ;;  %v15756_v52 = vld [vmem:[#allocation56_spill] sm:$0xff]  ;;  %v15757_v36 = vld [vmem:[#allocation109_spill] sm:$0xff] }
 0x4f8   :  { %v8459_v54 = vpop.eup %8458  ;;  %4182 = vperm.xlu1 %8022, %v15749_v2   ;;  %4197 = vperm.xlu0 %8021, %v15214_v18   ;;  %8488 = vrcp.f32 %v3666_v25  ;;  %v15217_v2 = vmax.f32 %v11581_v34, 0.0  ;;  %v15754_v18 = vld [vmem:[#allocation30_spill] sm:$0xff]  ;;  %v7853_v23 = vmul.f32 -1.442695, %v15756_v52  ;;  %v3039_v40 = vmul.f32 %v11038_v8, %v2889_v43 }
 0x4f9   :  { %v8461_v57 = vpop.eup %8460  ;;  %15752 = vst [vmem:[#allocation20_spill] sm:$0xff] %v11594_v10  ;;  %v11603_v31 = vmul.f32 %v8457_v7, %v15754_v18  ;;  %v2893_v6 = vmul.f32 0.6931472, %v8459_v54  ;;  %v2767_v58 = vadd.f32 2.72, %v2671_v27  ;;  %v3044_v25 = vmul.f32 %v11038_v8, %v2899_v0  ;;  %v15759_v43 = vld [vmem:[#allocation34_spill] sm:$0xff] }
 0x4fa   :  { %v8463_v28 = vpop.eup %8462  ;;  %v11597_v42 = vpop.permute.xlu0 %3413  ;;  %v2903_v9 = vmul.f32 0.6931472, %v8461_v57  ;;  %8490 = vlog2.f32 %v2765_v33  ;;  %v15758_v46 = vmax.f32 %v11572_v48, 0.0  ;;  %v3665_v7 = vmul.f32 %v11269_v24, %v3039_v40 }
 0x4fb   :  { %15753 = vst [vmem:[#allocation22_spill] sm:$0xff] %v11597_v42  ;;  %v11599_v53 = vpop.permute.xlu1 %3401  ;;  %15755 = vst [vmem:[#allocation112_spill] sm:$0xff] %v11603_v31  ;;  %v8465_v47 = vpop.eup %8464  ;;  %v2673_v42 = vsub.f32 1.0, %v15757_v36  ;;  %8492 = vrcp.f32 %v3663_v50  ;;  %v11616_v27 = vmul.f32 %v8463_v28, %v15759_v43  ;;  %v3670_v33 = vmul.f32 %v11369_v45, %v3044_v25  ;;  %v15763_v28 = vld [vmem:[#allocation50_spill] sm:$0xff] }
 0x4fc   :  { %v8467_v15 = vpop.eup %8466  ;;  %4188 = vperm.xlu1 %8022, %v15758_v46   ;;  %4203 = vperm.xlu0 %8021, %v15217_v2   ;;  %8494 = vrcp.f32 %v3668_v17  ;;  %v11625_v2 = vmul.f32 %v8465_v47, %v15654_v35  ;;  %v3041_v24 = vmul.f32 %v11038_v8, %v2893_v6  ;;  %v2675_v43 = vsub.f32 1.0, %v15763_v28  ;;  %v15766_v6 = vld [vmem:[#allocation26_spill] sm:$0xff] }
 0x4fd   :  { %v8469_v18 = vpop.eup %8468  ;;  %15760 = vst [vmem:[#allocation44_spill] sm:$0xff] %v11616_v27  ;;  %8496 = vrcp.f32 %v11560_v60  ;;  %v2897_v40 = vmul.f32 0.6931472, %v8467_v15  ;;  %v3046_v45 = vmul.f32 %v11038_v8, %v2903_v9  ;;  %v2769_v54 = vadd.f32 2.72, %v2673_v42 }
 0x4fe   :  { %v8471_v0 = vpop.eup %8470  ;;  %v11619_v57 = vpop.permute.xlu0 %3424  ;;  %15762 = vst [vmem:[#allocation24_spill] sm:$0xff] %v11625_v2  ;;  %v2907_v25 = vmul.f32 0.6931472, %v8469_v18  ;;  %8498 = vlog2.f32 %v2767_v58  ;;  %v15764_v46 = vmax.f32 %v11594_v10, 0.0  ;;  %v15765_v35 = vmax.f32 %v11603_v31, 0.0 }
 0x4ff   :  { %15761 = vst [vmem:[#allocation28_spill] sm:$0xff] %v11619_v57  ;;  %v11621_v52 = vpop.permute.xlu1 %3409  ;;  %v8473_v50 = vpop.eup %8472  ;;  %8500 = vrcp.f32 %v3665_v7  ;;  %v3667_v60 = vmul.f32 %v11295_v19, %v3041_v24  ;;  %v11640_v34 = vmul.f32 %v8471_v0, %v15766_v6  ;;  %v3672_v58 = vmul.f32 %v11393_v20, %v3046_v45  ;;  %v15770_v19 = vld [vmem:[#allocation115_spill] sm:$0xff]  ;;  %v15771_v45 = vld [vmem:[#allocation110_spill] sm:$0xff] }
 0x500   :  { %v11630_v17 = vpop.eup %8474  ;;  %4194 = vperm.xlu1 %8022, %v15764_v46   ;;  %4209 = vperm.xlu0 %8021, %v15765_v35   ;;  %8502 = vrcp.f32 %v3670_v33  ;;  %v11649_v46 = vmul.f32 %v8473_v50, %v15646_v4  ;;  %v2401_v24 = vadd.f32 1.0, %v15770_v19  ;;  %v3043_v0 = vmul.f32 %v11038_v8, %v2897_v40  ;;  %v15779_v40 = vld [vmem:[#allocation111_spill] sm:$0xff] }
 0x501   :  { %v8477_v47 = vpop.eup %8476  ;;  %15767 = vst [vmem:[#allocation36_spill] sm:$0xff] %v11640_v34  ;;  %8504 = vpow2.f32 %v7853_v23  ;;  %v2771_v35 = vadd.f32 2.72, %v2675_v43  ;;  %v3048_v20 = vmul.f32 %v11038_v8, %v2907_v25  ;;  %v2677_v15 = vsub.f32 1.0, %v15771_v45  ;;  %v15774_v43 = vld [vmem:[#allocation95_spill] sm:$0xff] }
 0x502   :  { %v8479_v48 = vpop.eup %8478  ;;  %v11643_v42 = vpop.permute.xlu0 %3432  ;;  %15769 = vst [vmem:[#allocation118_spill] sm:$0xff] %v11649_v46  ;;  %v2911_v33 = vmul.f32 0.6931472, %v8477_v47  ;;  %8506 = vlog2.f32 %v2769_v54  ;;  %v15772_v18 = vmax.f32 %v11616_v27, 0.0  ;;  %v15773_v4 = vmax.f32 %v11625_v2, 0.0 }
 0x503   :  { %15768 = vst [vmem:[#allocation48_spill] sm:$0xff] %v11643_v42  ;;  %v11645_v9 = vpop.permute.xlu1 %3417  ;;  %v8481_v7 = vpop.eup %8480  ;;  %8508 = vrcp.f32 %v3667_v60  ;;  %v3669_v23 = vmul.f32 %v11319_v5, %v3043_v0  ;;  %v11664_v19 = vmul.f32 %v8479_v48, %v15774_v43  ;;  %v3674_v54 = vmul.f32 %v11417_v49, %v3048_v20  ;;  %v15778_v5 = vld [vmem:[#allocation58_spill] sm:$0xff]  ;;  %v15863_v42 = vld [vmem:[#allocation53_spill] sm:$0xff] }
 0x504   :  { %v11653_v6 = vpop.eup %8482  ;;  %4200 = vperm.xlu1 %8022, %v15772_v18   ;;  %4215 = vperm.xlu0 %8021, %v15773_v4   ;;  %8510 = vrcp.f32 %v3672_v58  ;;  %v15224_v18 = vmax.f32 %v11649_v46, 0.0  ;;  %v11673_v4 = vmul.f32 %v8481_v7, %v15679_v32  ;;  %v7855_v0 = vmul.f32 -1.442695, %v15778_v5  ;;  %v15781_v32 = vld [vmem:[#allocation23_spill] sm:$0xff]  ;;  %v15782_v5 = vld [vmem:[#allocation40_spill] sm:$0xff] }
 0x505   :  { %v8485_v50 = vpop.eup %8484  ;;  %15775 = vst [vmem:[#allocation77_spill] sm:$0xff] %v11664_v19  ;;  %8512 = vrcp.f32 %v2401_v24  ;;  %v2679_v48 = vsub.f32 1.0, %v15779_v40  ;;  %v3050_v43 = vmul.f32 %v11038_v8, %v2911_v33  ;;  %v2773_v49 = vadd.f32 2.72, %v2677_v15 }
 0x506   :  { %v8487_v25 = vpop.eup %8486  ;;  %v11667_v47 = vpop.permute.xlu0 %3440  ;;  %15777 = vst [vmem:[#allocation30_spill] sm:$0xff] %v11673_v4  ;;  %v2915_v58 = vmul.f32 0.6931472, %v8485_v50  ;;  %8514 = vlog2.f32 %v2771_v35  ;;  %v15780_v20 = vmax.f32 %v11640_v34, 0.0  ;;  %v2403_v7 = vadd.f32 1.0, %v15781_v32 }
 0x507   :  { %15776 = vst [vmem:[#allocation21_spill] sm:$0xff] %v11667_v47  ;;  %v11669_v31 = vpop.permute.xlu1 %3428  ;;  %v8489_v60 = vpop.eup %8488  ;;  %8516 = vrcp.f32 %v3669_v23  ;;  %v11685_v27 = vmul.f32 %v8487_v25, %v15782_v5  ;;  %v3676_v35 = vmul.f32 %v11440_v56, %v3050_v43  ;;  %v15227_v50 = vmax.f32 %v11673_v4, 0.0  ;;  %v15786_v23 = vld [vmem:[#allocation60_spill] sm:$0xff]  ;;  %v15787_v56 = vld [vmem:[#allocation114_spill] sm:$0xff] }
 0x508   :  { %4206 = vperm.xlu1 %8022, %v15780_v20   ;;  %4221 = vperm.xlu0 %8021, %v15224_v18   ;;  %v8491_v2 = vpop.eup %8490  ;;  %8518 = vrcp.f32 %v3674_v54  ;;  %v11694_v20 = vmul.f32 %v8489_v60, %v15669_v44  ;;  %v7857_v18 = vmul.f32 -1.442695, %v15786_v23  ;;  %v2775_v24 = vadd.f32 2.72, %v2679_v48  ;;  %v15789_v60 = vld [vmem:[#allocation25_spill] sm:$0xff]  ;;  %v15794_v4 = vld [vmem:[#allocation116_spill] sm:$0xff] }
 0x509   :  { %15783 = vst [vmem:[#allocation56_spill] sm:$0xff] %v11685_v27  ;;  %v8493_v10 = vpop.eup %8492  ;;  %8520 = vpow2.f32 %v7855_v0  ;;  %v3052_v54 = vmul.f32 %v11038_v8, %v2915_v58  ;;  %v2919_v5 = vmul.f32 0.6931472, %v8491_v2  ;;  %v2681_v43 = vsub.f32 1.0, %v15787_v56 }
 0x50a   :  { %v11688_v15 = vpop.permute.xlu0 %3451  ;;  %15785 = vst [vmem:[#allocation34_spill] sm:$0xff] %v11694_v20  ;;  %v8495_v32 = vpop.eup %8494  ;;  %8522 = vlog2.f32 %v2773_v49  ;;  %v15788_v46 = vmax.f32 %v11664_v19, 0.0  ;;  %v2405_v0 = vadd.f32 1.0, %v15789_v60  ;;  %v11708_v23 = vmul.f32 %v8493_v10, %v15670_v14  ;;  %v15793_v60 = vld [vmem:[#allocation62_spill] sm:$0xff] }
 0x50b   :  { %15784 = vst [vmem:[#allocation109_spill] sm:$0xff] %v11688_v15  ;;  %v11690_v33 = vpop.permute.xlu1 %3436  ;;  %v11697_v25 = vpop.eup %8496  ;;  %8524 = vrcp.f32 %v2403_v7  ;;  %v3678_v2 = vmul.f32 %v11463_v63, %v3052_v54  ;;  %v7859_v48 = vmul.f32 -1.442695, %v15793_v60  ;;  %v2683_v14 = vsub.f32 1.0, %v15794_v4 }
 0x50c   :  { %4212 = vperm.xlu1 %8022, %v15788_v46   ;;  %4227 = vperm.xlu0 %8021, %v15227_v50   ;;  %v8499_v44 = vpop.eup %8498  ;;  %15790 = vst [vmem:[#allocation50_spill] sm:$0xff] %v11708_v23  ;;  %8526 = vrcp.f32 %v3676_v35  ;;  %v15230_v46 = vmax.f32 %v11694_v20, 0.0  ;;  %v11717_v50 = vmul.f32 %v8495_v32, %v15692_v39  ;;  %v3054_v35 = vmul.f32 %v11038_v8, %v2919_v5  ;;  %v15796_v32 = vld [vmem:[#allocation64_spill] sm:$0xff] }
 0x50d   :  { %v8501_v58 = vpop.eup %8500  ;;  %8528 = vpow2.f32 %v7857_v18  ;;  %v2923_v34 = vmul.f32 0.6931472, %v8499_v44  ;;  %v2777_v63 = vadd.f32 2.72, %v2681_v43  ;;  %v15795_v54 = vmax.f32 %v11685_v27, 0.0 }
 0x50e   :  { %v11711_v49 = vpop.permute.xlu0 %3459  ;;  %15792 = vst [vmem:[#allocation115_spill] sm:$0xff] %v11717_v50  ;;  %v8503_v7 = vpop.eup %8502  ;;  %8530 = vlog2.f32 %v2775_v24  ;;  %v7861_v18 = vmul.f32 -1.442695, %v15796_v32  ;;  %v15231_v60 = vmax.f32 %v11708_v23, 0.0  ;;  %v3680_v24 = vmul.f32 %v11485_v51, %v3054_v35 }
 0x50f   :  { %15791 = vst [vmem:[#allocation26_spill] sm:$0xff] %v11711_v49  ;;  %v11713_v19 = vpop.permute.xlu1 %3444  ;;  %v8505_v10 = vpop.eup %8504  ;;  %8532 = vrcp.f32 %v2405_v0  ;;  %v11729_v49 = vmul.f32 %v8501_v58, %v15655_v26  ;;  %v15232_v44 = vmax.f32 %v11717_v50, 0.0  ;;  %v2407_v32 = vadd.f32 1.0, %v11653_v6 }
 0x510   :  { %4218 = vperm.xlu1 %8022, %v15795_v54   ;;  %4233 = vperm.xlu0 %8021, %v15230_v46   ;;  %v8507_v39 = vpop.eup %8506  ;;  %8534 = vrcp.f32 %v3678_v2  ;;  %v11738_v54 = vmul.f32 %v8503_v7, %v15701_v22  ;;  %v2779_v46 = vadd.f32 2.72, %v2683_v14  ;;  %v3056_v58 = vmul.f32 %v11038_v8, %v2923_v34 }
 0x511   :  { %15797 = vst [vmem:[#allocation110_spill] sm:$0xff] %v11729_v49  ;;  %v8509_v15 = vpop.eup %8508  ;;  %8536 = vpow2.f32 %v7859_v48  ;;  %v2927_v2 = vmul.f32 0.6931472, %v8507_v39  ;;  %v2685_v51 = vsub.f32 1.0, %v11630_v17  ;;  %v2409_v7 = vadd.f32 1.0, %v8505_v10 }
 0x512   :  { %v11732_v5 = vpop.permute.xlu0 %3467  ;;  %15799 = vst [vmem:[#allocation58_spill] sm:$0xff] %v11738_v54  ;;  %v8511_v0 = vpop.eup %8510  ;;  %8538 = vlog2.f32 %v2777_v63  ;;  %v11751_v48 = vmul.f32 %v8509_v15, %v15709_v13  ;;  %v3682_v34 = vmul.f32 %v11507_v3, %v3056_v58  ;;  %v15234_v39 = vmax.f32 %v11738_v54, 0.0 }
 0x513   :  { %15798 = vst [vmem:[#allocation95_spill] sm:$0xff] %v11732_v5  ;;  %v11734_v43 = vpop.permute.xlu1 %3455  ;;  %v11741_v26 = vpop.eup %8512  ;;  %8540 = vpow2.f32 %v7861_v18  ;;  %v15804_v18 = vld [vmem:[#allocation66_spill] sm:$0xff]  ;;  %v2687_v13 = vsub.f32 1.0, %v11697_v25  ;;  %v2781_v3 = vadd.f32 2.72, %v2685_v51  ;;  %v15805_v58 = vmax.f32 %v11729_v49, 0.0 }
 0x514   :  { %4224 = vperm.xlu1 %8022, %v15231_v60   ;;  %4239 = vperm.xlu0 %8021, %v15232_v44   ;;  %v8515_v22 = vpop.eup %8514  ;;  %15800 = vst [vmem:[#allocation111_spill] sm:$0xff] %v11751_v48  ;;  %8542 = vrcp.f32 %v3680_v24  ;;  %v15802_v60 = vld [vmem:[#allocation78_spill] sm:$0xff]  ;;  %v7863_v6 = vmul.f32 -1.442695, %v15804_v18  ;;  %v3058_v24 = vmul.f32 %v11038_v8, %v2927_v2  ;;  %v7850_v57 = vmul.f32 -1.442695, %v15863_v42 }
 0x515   :  { %v8517_v14 = vpop.eup %8516  ;;  %v11760_v44 = vmul.f32 %v8511_v0, %v15802_v60  ;;  %8544 = vrcp.f32 %v2407_v32  ;;  %v2931_v50 = vmul.f32 0.6931472, %v8515_v22  ;;  %v15807_v22 = vld [vmem:[#allocation75_spill] sm:$0xff] }
 0x516   :  { %v11754_v35 = vpop.permute.xlu0 %3478  ;;  %v8519_v10 = vpop.eup %8518  ;;  %8546 = vlog2.f32 %v2779_v46  ;;  %v11771_v32 = vmul.f32 %v8517_v14, %v15693_v37  ;;  %v3684_v2 = vmul.f32 %v11530_v55, %v3058_v24  ;;  %v2783_v55 = vadd.f32 2.72, %v2687_v13 }
 0x517   :  { %15801 = vst [vmem:[#allocation23_spill] sm:$0xff] %v11754_v35  ;;  %v11756_v63 = vpop.permute.xlu1 %3463  ;;  %15803 = vst [vmem:[#allocation40_spill] sm:$0xff] %v11760_v44  ;;  %v8521_v15 = vpop.eup %8520  ;;  %8548 = vrcp.f32 %v2409_v7  ;;  %v15237_v51 = vmax.f32 %v11760_v44, 0.0  ;;  %v2689_v7 = vsub.f32 1.0, %v11741_v26  ;;  %v3060_v14 = vmul.f32 %v11038_v8, %v2931_v50 }
 0x518   :  { %4230 = vperm.xlu1 %8022, %v15805_v58   ;;  %4245 = vperm.xlu0 %8021, %v15234_v39   ;;  %v8523_v60 = vpop.eup %8522  ;;  %15806 = vst [vmem:[#allocation60_spill] sm:$0xff] %v11771_v32  ;;  %8550 = vrcp.f32 %v3682_v34  ;;  %v11780_v58 = vmul.f32 %v8519_v10, %v15807_v22  ;;  %v2411_v54 = vadd.f32 1.0, %v8521_v15  ;;  %v15810_v24 = vmax.f32 %v11751_v48, 0.0 }
 0x519   :  { %v11773_v18 = vpop.eup %8524  ;;  %8552 = vpow2.f32 %v7863_v6  ;;  %v2935_v34 = vmul.f32 0.6931472, %v8523_v60  ;;  %v3686_v22 = vmul.f32 %v11553_v38, %v3060_v14  ;;  %v15812_v38 = vmax.f32 %v11771_v32, 0.0 }
 0x51a   :  { %15808 = vst [vmem:[#allocation114_spill] sm:$0xff] %v11780_v58  ;;  %v8527_v39 = vpop.eup %8526  ;;  %v11783_v0 = vpop.permute.xlu0 %3486  ;;  %8554 = vlog2.f32 %v2781_v3  ;;  %v15240_v50 = vmax.f32 %v11780_v58, 0.0 }
 0x51b   :  { %v11776_v46 = vpop.permute.xlu1 %3471  ;;  %15809 = vst [vmem:[#allocation25_spill] sm:$0xff] %v11783_v0  ;;  %v8529_v37 = vpop.eup %8528  ;;  %8556 = vrcp.f32 %v3684_v2  ;;  %v11798_v13 = vmul.f32 %v8527_v39, %v15715_v1  ;;  %v3062_v44 = vmul.f32 %v11038_v8, %v2935_v34  ;;  %v2691_v2 = vsub.f32 1.0, %v11773_v18 }
 0x51c   :  { %4236 = vperm.xlu1 %8022, %v15810_v24   ;;  %4251 = vperm.xlu0 %8021, %v15237_v51   ;;  %v8531_v10 = vpop.eup %8530  ;;  %8558 = vrcp.f32 %v2411_v54  ;;  %v2413_v60 = vadd.f32 1.0, %v8529_v37  ;;  %v2785_v24 = vadd.f32 2.72, %v2689_v7  ;;  %v15814_v37 = vld [vmem:[#allocation80_spill] sm:$0xff] }
 0x51d   :  { %v11791_v6 = vpop.eup %8532  ;;  %15811 = vst [vmem:[#allocation62_spill] sm:$0xff] %v11798_v13  ;;  %v2939_v15 = vmul.f32 0.6931472, %v8531_v10  ;;  %8560 = vlog2.f32 %v2783_v55  ;;  %v3688_v54 = vmul.f32 %v11577_v61, %v3062_v44  ;;  %v15244_v7 = vmax.f32 %v11798_v13, 0.0 }
 0x51e   :  { %v8535_v3 = vpop.eup %8534  ;;  %v11806_v1 = vpop.permute.xlu0 %3494  ;;  %8562 = vrcp.f32 %v3686_v22  ;;  %v2787_v22 = vadd.f32 2.72, %v2691_v2 }
 0x51f   :  { %v11794_v20 = vpop.permute.xlu1 %3482  ;;  %v8537_v51 = vpop.eup %8536  ;;  %15813 = vst [vmem:[#allocation116_spill] sm:$0xff] %v11806_v1  ;;  %v11811_v34 = vmul.f32 %v8535_v3, %v15814_v37  ;;  %8564 = vrcp.f32 %v2413_v60  ;;  %v3064_v58 = vmul.f32 %v11038_v8, %v2939_v15 }
 0x520   :  { %4242 = vperm.xlu1 %8022, %v15812_v38   ;;  %4257 = vperm.xlu0 %8021, %v15240_v50   ;;  %v8539_v14 = vpop.eup %8538  ;;  %v2415_v10 = vadd.f32 1.0, %v8537_v51  ;;  %v2693_v38 = vsub.f32 1.0, %v11791_v6  ;;  %8566 = vlog2.f32 %v2785_v24 }
 0x521   :  { %v8541_v39 = vpop.eup %8540  ;;  %15815 = vst [vmem:[#allocation64_spill] sm:$0xff] %v11811_v34  ;;  %v2943_v48 = vmul.f32 0.6931472, %v8539_v14  ;;  %8568 = vrcp.f32 %v3688_v54  ;;  %v3690_v51 = vmul.f32 %v11599_v53, %v3064_v58  ;;  %v15245_v60 = vmax.f32 %v11811_v34, 0.0 }
 0x522   :  { %v8543_v55 = vpop.eup %8542  ;;  %v2417_v44 = vadd.f32 1.0, %v8541_v39  ;;  %8570 = vrcp.f32 %v2415_v10  ;;  %v2789_v15 = vadd.f32 2.72, %v2693_v38  ;;  %v11828_v24 = vpop.permute.xlu0 %3505 }
 0x523   :  { %v11814_v32 = vpop.permute.xlu1 %3490  ;;  %v11816_v50 = vpop.eup %8544  ;;  %v11826_v37 = vmul.f32 %v8543_v55, %v15738_v62  ;;  %15817 = vst [vmem:[#allocation66_spill] sm:$0xff] %v11828_v24  ;;  %v3066_v14 = vmul.f32 %v11038_v8, %v2943_v48  ;;  %8572 = vlog2.f32 %v2787_v22 }
 0x524   :  { %4263 = vperm.xlu0 %8021, %v15244_v7   ;;  %v8547_v61 = vpop.eup %8546  ;;  %v2695_v39 = vsub.f32 1.0, %v11816_v50  ;;  %8574 = vrcp.f32 %v2417_v44 }
 0x525   :  { %v11821_v3 = vpop.eup %8548  ;;  %15816 = vst [vmem:[#allocation78_spill] sm:$0xff] %v11826_v37  ;;  %v2947_v7 = vmul.f32 0.6931472, %v8547_v61  ;;  %8576 = vrcp.f32 %v3690_v51  ;;  %v3692_v62 = vmul.f32 %v11621_v52, %v3066_v14  ;;  %v15246_v54 = vmax.f32 %v11826_v37, 0.0 }
 0x526   :  { %v8551_v49 = vpop.eup %8550  ;;  %8578 = vlog2.f32 %v2789_v15  ;;  %v2697_v44 = vsub.f32 1.0, %v11821_v3  ;;  %v11847_v51 = vpop.permute.xlu0 %3513 }
 0x527   :  { %v8553_v2 = vpop.eup %8552  ;;  %v11834_v58 = vpop.permute.xlu1 %3498  ;;  %v11839_v55 = vmul.f32 %v8551_v49, %v15747_v59  ;;  %v3068_v22 = vmul.f32 %v11038_v8, %v2947_v7  ;;  %15819 = vst [vmem:[#allocation80_spill] sm:$0xff] %v11847_v51  ;;  %8580 = vrcp.f32 %v3692_v62 }
 0x528   :  { %4269 = vperm.xlu0 %8021, %v15245_v60   ;;  %v8555_v53 = vpop.eup %8554  ;;  %v2419_v10 = vadd.f32 1.0, %v8553_v2  ;;  %v2791_v60 = vadd.f32 2.72, %v2695_v39  ;;  %v2793_v62 = vadd.f32 2.72, %v2697_v44 }
 0x529   :  { %15818 = vst [vmem:[#allocation75_spill] sm:$0xff] %v11839_v55  ;;  %v8557_v48 = vpop.eup %8556  ;;  %v2951_v61 = vmul.f32 0.6931472, %v8555_v53  ;;  %v3694_v59 = vmul.f32 %v11645_v9, %v3068_v22  ;;  %v15250_v49 = vmax.f32 %v11839_v55, 0.0 }
 0x52a   :  { %v11841_v38 = vpop.eup %8558  ;;  %v11852_v15 = vmul.f32 %v8557_v48, %v15757_v36  ;;  %8582 = vrcp.f32 %v2419_v10  ;;  %v11867_v34 = vpop.permute.xlu0 %3521 }
 0x52b   :  { %v8561_v52 = vpop.eup %8560  ;;  %v2699_v7 = vsub.f32 1.0, %v11841_v38  ;;  %v11855_v14 = vpop.permute.xlu1 %3509  ;;  %v3070_v53 = vmul.f32 %v11038_v8, %v2951_v61  ;;  %8584 = vlog2.f32 %v2791_v60  ;;  %15822 = vst [vmem:[#allocation122_spill] sm:$0xff] %v11867_v34 }
 0x52c   :  { %4275 = vperm.xlu0 %8021, %v15246_v54   ;;  %15820 = vst [vmem:[#allocation120_spill] sm:$0xff] %v11852_v15  ;;  %v8563_v2 = vpop.eup %8562  ;;  %v2955_v54 = vmul.f32 0.6931472, %v8561_v52  ;;  %8586 = vrcp.f32 %v3694_v59  ;;  %v15249_v48 = vmax.f32 %v11852_v15, 0.0 }
 0x52d   :  { %v11857_v39 = vpop.eup %8564  ;;  %v3696_v36 = vmul.f32 %v11669_v31, %v3070_v53  ;;  %v11865_v10 = vmul.f32 %v8563_v2, %v15763_v28  ;;  %v2795_v37 = vadd.f32 2.72, %v2699_v7  ;;  %8588 = vlog2.f32 %v2793_v62 }
 0x52e   :  { %v8567_v9 = vpop.eup %8566  ;;  %v3072_v60 = vmul.f32 %v11038_v8, %v2955_v54  ;;  %v2701_v52 = vsub.f32 1.0, %v11857_v39 }
 0x52f   :  { %15821 = vst [vmem:[#allocation121_spill] sm:$0xff] %v11865_v10  ;;  %v8569_v22 = vpop.eup %8568  ;;  %v2959_v44 = vmul.f32 0.6931472, %v8567_v9  ;;  %v11875_v59 = vpop.permute.xlu1 %3517  ;;  %8590 = vrcp.f32 %v3696_v36  ;;  %v15253_v7 = vmax.f32 %v11865_v10, 0.0 }
 0x530   :  { %4281 = vperm.xlu0 %8021, %v15250_v49   ;;  %v11869_v61 = vpop.eup %8570  ;;  %v3698_v2 = vmul.f32 %v11690_v33, %v3072_v60  ;;  %v11882_v53 = vmul.f32 %v8569_v22, %v15771_v45  ;;  %8592 = vlog2.f32 %v2795_v37  ;;  %v2797_v15 = vadd.f32 2.72, %v2701_v52 }
 0x531   :  { %v8573_v31 = vpop.eup %8572  ;;  %v2703_v55 = vsub.f32 1.0, %v11869_v61 }
 0x532   :  { %v11877_v28 = vpop.eup %8574  ;;  %15823 = vst [vmem:[#allocation123_spill] sm:$0xff] %v11882_v53  ;;  %v2963_v49 = vmul.f32 0.6931472, %v8573_v31  ;;  %8594 = vrcp.f32 %v3698_v2  ;;  %v15257_v45 = vmax.f32 %v11882_v53, 0.0 }
 0x533   :  { %v8577_v54 = vpop.eup %8576  ;;  %v11895_v60 = vpop.permute.xlu1 %3525  ;;  %8596 = vlog2.f32 %v2797_v15  ;;  %v2705_v2 = vsub.f32 1.0, %v11877_v28 }
 0x534   :  { %4287 = vperm.xlu0 %8021, %v15249_v48   ;;  %v8579_v9 = vpop.eup %8578  ;;  %v3074_v48 = vmul.f32 %v11038_v8, %v2959_v44  ;;  %v11893_v36 = vmul.f32 %v8577_v54, %v15779_v40  ;;  %v3076_v31 = vmul.f32 %v11038_v8, %v2963_v49  ;;  %v15825_v40 = vld [vmem:[#allocation14_spill] sm:$0xff] }
 0x535   :  { %v8581_v37 = vpop.eup %8580  ;;  %v2967_v22 = vmul.f32 0.6931472, %v8579_v9 }
 0x536   :  { %v3700_v33 = vmul.f32 %v11713_v19, %v3074_v48  ;;  %15824 = vst [vmem:[#allocation124_spill] sm:$0xff] %v11893_v36  ;;  %v7816_v48 = vmul.f32 -1.442695, %v15825_v40  ;;  %v3702_v54 = vmul.f32 %v11734_v43, %v3076_v31  ;;  %v15259_v9 = vmax.f32 %v11893_v36, 0.0 }
 0x537   :  { %v11884_v62 = vpop.permute.xlu0 %4104  ;;  %v11899_v52 = vpop.eup %8582  ;;  %v11909_v10 = vmul.f32 %v8581_v37, %v15787_v56  ;;  %v3078_v49 = vmul.f32 %v11038_v8, %v2967_v22 }
 0x538   :  { %4293 = vperm.xlu0 %8021, %v15253_v7   ;;  %v2799_v7 = vadd.f32 2.72, %v2703_v55  ;;  %v8585_v19 = vpop.eup %8584  ;;  %8598 = vrcp.f32 %v3700_v33  ;;  %v2707_v40 = vsub.f32 1.0, %v11899_v52 }
 0x539   :  { %15826 = vst [vmem:[#allocation14_spill] sm:$0xff] %v11909_v10  ;;  %v8587_v13 = vpop.eup %8586  ;;  %v2971_v53 = vmul.f32 0.6931472, %v8585_v19  ;;  %v3704_v56 = vmul.f32 %v11756_v63, %v3078_v49  ;;  %v15261_v33 = vmax.f32 %v11909_v10, 0.0  ;;  %v15828_v63 = vld [vmem:[#allocation13_spill] sm:$0xff] }
 0x53a   :  { %8600 = vlog2.f32 %v2799_v7  ;;  %v8589_v43 = vpop.eup %8588  ;;  %v11922_v37 = vmul.f32 %v8587_v13, %v15794_v4 }
 0x53b   :  { %v11897_v44 = vpop.permute.xlu0 %4113  ;;  %8602 = vpow2.f32 %v7816_v48  ;;  %v3080_v19 = vmul.f32 %v11038_v8, %v2971_v53  ;;  %v2975_v36 = vmul.f32 0.6931472, %v8589_v43  ;;  %v7818_v48 = vmul.f32 -1.442695, %v15828_v63 }
 0x53c   :  { %4299 = vperm.xlu0 %8021, %v15257_v45   ;;  %v2801_v45 = vadd.f32 2.72, %v2705_v2  ;;  %8604 = vrcp.f32 %v3702_v54  ;;  %15827 = vst [vmem:[#allocation125_spill] sm:$0xff] %v11922_v37  ;;  %v8591_v22 = vpop.eup %8590  ;;  %v15262_v13 = vmax.f32 %v11922_v37, 0.0  ;;  %v15835_v37 = vld [vmem:[#allocation27_spill] sm:$0xff] }
 0x53d   :  { %v8593_v2 = vpop.eup %8592  ;;  %v3706_v4 = vmul.f32 %v11776_v46, %v3080_v19  ;;  %v11935_v54 = vmul.f32 %v8591_v22, %v11630_v17  ;;  %v15830_v46 = vld [vmem:[#allocation16_spill] sm:$0xff]  ;;  %v7824_v10 = vmul.f32 -1.442695, %v15835_v37 }
 0x53e   :  { %8606 = vlog2.f32 %v2801_v45  ;;  %v3082_v45 = vmul.f32 %v11038_v8, %v2975_v36 }
 0x53f   :  { %v11912_v55 = vpop.permute.xlu0 %4119  ;;  %v11914_v15 = vpop.permute.xlu1 %4107  ;;  %8608 = vrcp.f32 %v3704_v56  ;;  %15829 = vst [vmem:[#allocation13_spill] sm:$0xff] %v11935_v54  ;;  %v7820_v56 = vmul.f32 -1.442695, %v15830_v46  ;;  %v15263_v22 = vmax.f32 %v11935_v54, 0.0 }
 0x540   :  { %4305 = vperm.xlu0 %8021, %v15259_v9   ;;  %v2803_v9 = vadd.f32 2.72, %v2707_v40  ;;  %v8595_v49 = vpop.eup %8594  ;;  %v2979_v40 = vmul.f32 0.6931472, %v8593_v2  ;;  %v3708_v17 = vmul.f32 %v11794_v20, %v3082_v45 }
 0x541   :  { %v8597_v43 = vpop.eup %8596  ;;  %v11948_v19 = vmul.f32 %v8595_v49, %v11697_v25 }
 0x542   :  { %8610 = vlog2.f32 %v2803_v9  ;;  %v3084_v9 = vmul.f32 %v11038_v8, %v2979_v40  ;;  %v2983_v2 = vmul.f32 0.6931472, %v8597_v43  ;;  %v15833_v40 = vld [vmem:[#allocation15_spill] sm:$0xff] }
 0x543   :  { %v11924_v31 = vpop.permute.xlu0 %4125  ;;  %v11926_v7 = vpop.permute.xlu1 %4110  ;;  %8612 = vpow2.f32 %v7818_v48  ;;  %15831 = vst [vmem:[#allocation16_spill] sm:$0xff] %v11948_v19  ;;  %v15267_v25 = vmax.f32 %v11948_v19, 0.0  ;;  %v7822_v43 = vmul.f32 -1.442695, %v15833_v40 }
 0x544   :  { %4311 = vperm.xlu0 %8021, %v15261_v33   ;;  %8614 = vrcp.f32 %v3706_v4  ;;  %v3710_v20 = vmul.f32 %v11814_v32, %v3084_v9 }
 0x545   :  { %v8599_v63 = vpop.eup %8598  ;;  %8616 = vpow2.f32 %v7820_v56 }
 0x546   :  { %8618 = vrcp.f32 %v3708_v17  ;;  %v11960_v49 = vmul.f32 %v8599_v63, %v11741_v26 }
 0x547   :  { %v11937_v23 = vpop.permute.xlu0 %4131  ;;  %v11939_v53 = vpop.permute.xlu1 %4116  ;;  %8620 = vrcp.f32 %v3710_v20 }
 0x548   :  { %4317 = vperm.xlu0 %8021, %v15262_v13   ;;  %v8601_v48 = vpop.eup %8600  ;;  %15832 = vst [vmem:[#allocation126_spill] sm:$0xff] %v11960_v49  ;;  %v15270_v26 = vmax.f32 %v11960_v49, 0.0  ;;  %8622 = vpow2.f32 %v7822_v43 }
 0x549   :  { %v8603_v4 = vpop.eup %8602  ;;  %v2987_v54 = vmul.f32 0.6931472, %v8601_v48  ;;  %v15836_v48 = vld [vmem:[#allocation29_spill] sm:$0xff] }
 0x54a   :  { %v8605_v45 = vpop.eup %8604  ;;  %v2372_v32 = vadd.f32 1.0, %v8603_v4 }
 0x54b   :  { %v11950_v33 = vpop.permute.xlu0 %4137  ;;  %v11952_v36 = vpop.permute.xlu1 %4122  ;;  %v11973_v63 = vmul.f32 %v8605_v45, %v11773_v18  ;;  %v3088_v4 = vmul.f32 %v11038_v8, %v2987_v54  ;;  %v15837_v18 = vld [vmem:[#allocation31_spill] sm:$0xff]  ;;  %v15839_v54 = vld [vmem:[#allocation33_spill] sm:$0xff] }
 0x54c   :  { %4323 = vperm.xlu0 %8021, %v15263_v22   ;;  %v3086_v22 = vmul.f32 %v11038_v8, %v2983_v2  ;;  %v8607_v56 = vpop.eup %8606  ;;  %8624 = vrcp.f32 %v2372_v32 }
 0x54d   :  { %15834 = vst [vmem:[#allocation15_spill] sm:$0xff] %v11973_v63  ;;  %v8609_v9 = vpop.eup %8608  ;;  %v2991_v20 = vmul.f32 0.6931472, %v8607_v56  ;;  %v3714_v37 = vmul.f32 %v11855_v14, %v3088_v4  ;;  %v15271_v19 = vmax.f32 %v11973_v63, 0.0  ;;  %v7830_v56 = vmul.f32 -1.442695, %v15839_v54 }
 0x54e   :  { %v3712_v17 = vmul.f32 %v11834_v58, %v3086_v22  ;;  %v7828_v22 = vmul.f32 -1.442695, %v15837_v18  ;;  %v11988_v43 = vmul.f32 %v8609_v9, %v11791_v6 }
 0x54f   :  { %v11962_v46 = vpop.permute.xlu0 %4143  ;;  %v11964_v13 = vpop.permute.xlu1 %4128  ;;  %v3090_v32 = vmul.f32 %v11038_v8, %v2991_v20 }
 0x550   :  { %4329 = vperm.xlu0 %8021, %v15267_v25   ;;  %v7826_v25 = vmul.f32 -1.442695, %v15836_v48  ;;  %v8611_v58 = vpop.eup %8610  ;;  %8626 = vrcp.f32 %v3712_v17  ;;  %15838 = vst [vmem:[#allocation27_spill] sm:$0xff] %v11988_v43 }
 0x551   :  { %v8613_v45 = vpop.eup %8612  ;;  %8628 = vpow2.f32 %v7824_v10  ;;  %v2995_v18 = vmul.f32 0.6931472, %v8611_v58  ;;  %v3716_v6 = vmul.f32 %v11875_v59, %v3090_v32  ;;  %v15272_v10 = vmax.f32 %v11988_v43, 0.0  ;;  %v15841_v58 = vld [vmem:[#allocation35_spill] sm:$0xff]  ;;  %v15850_v43 = vld [vmem:[#allocation45_spill] sm:$0xff] }
 0x552   :  { %v8615_v48 = vpop.eup %8614  ;;  %8630 = vpow2.f32 %v7826_v25  ;;  %v2374_v14 = vadd.f32 1.0, %v8613_v45  ;;  %v7832_v54 = vmul.f32 -1.442695, %v15841_v58  ;;  %v7842_v63 = vmul.f32 -1.442695, %v15850_v43 }
 0x553   :  { %v11976_v40 = vpop.permute.xlu0 %4149  ;;  %v11978_v2 = vpop.permute.xlu1 %4134  ;;  %8632 = vpow2.f32 %v7828_v22  ;;  %v12001_v9 = vmul.f32 %v8615_v48, %v11816_v50  ;;  %v3092_v45 = vmul.f32 %v11038_v8, %v2995_v18  ;;  %v15844_v18 = vld [vmem:[#allocation39_spill] sm:$0xff] }
 0x554   :  { %4335 = vperm.xlu0 %8021, %v15270_v26   ;;  %v8617_v17 = vpop.eup %8616  ;;  %8634 = vrcp.f32 %v3714_v37 }
 0x555   :  { %15840 = vst [vmem:[#allocation29_spill] sm:$0xff] %v12001_v9  ;;  %v8619_v4 = vpop.eup %8618  ;;  %8636 = vpow2.f32 %v7830_v56  ;;  %v2376_v59 = vadd.f32 1.0, %v8617_v17  ;;  %v3718_v22 = vmul.f32 %v11895_v60, %v3092_v45  ;;  %v15273_v50 = vmax.f32 %v12001_v9, 0.0  ;;  %v15843_v56 = vld [vmem:[#allocation37_spill] sm:$0xff] }
 0x556   :  { %8638 = vrcp.f32 %v2374_v14  ;;  %v12014_v37 = vmul.f32 %v8619_v4, %v11821_v3  ;;  %v8621_v48 = vpop.eup %8620  ;;  %v7834_v32 = vmul.f32 -1.442695, %v15843_v56  ;;  %v15846_v17 = vld [vmem:[#allocation41_spill] sm:$0xff] }
 0x557   :  { %v11991_v27 = vpop.permute.xlu0 %4155  ;;  %v11993_v26 = vpop.permute.xlu1 %4140  ;;  %8640 = vrcp.f32 %v3716_v6  ;;  %v7838_v3 = vmul.f32 -1.442695, %v15846_v17  ;;  %v12029_v4 = vmul.f32 %v8621_v48, %v11841_v38 }
 0x558   :  { %4341 = vperm.xlu0 %8021, %v15271_v19   ;;  %15842 = vst [vmem:[#allocation31_spill] sm:$0xff] %v12014_v37  ;;  %8642 = vpow2.f32 %v7832_v54  ;;  %v8623_v14 = vpop.eup %8622  ;;  %v15279_v6 = vmax.f32 %v12014_v37, 0.0 }
 0x559   :  { %8644 = vrcp.f32 %v2376_v59  ;;  %v12024_v60 = vpop.eup %8624  ;;  %15847 = vst [vmem:[#allocation35_spill] sm:$0xff] %v12029_v4  ;;  %v2378_v9 = vadd.f32 1.0, %v8623_v14  ;;  %v15281_v38 = vmax.f32 %v12029_v4, 0.0 }
 0x55a   :  { %15845 = vst [vmem:[#allocation33_spill] sm:$0xff] %v12024_v60  ;;  %8646 = vrcp.f32 %v3718_v22  ;;  %v2660_v14 = vsub.f32 1.0, %v12024_v60 }
 0x55b   :  { %v12003_v25 = vpop.permute.xlu0 %4161  ;;  %v12005_v20 = vpop.permute.xlu1 %4146  ;;  %8648 = vpow2.f32 %v7834_v32 }
 0x55c   :  { %4347 = vperm.xlu0 %8021, %v15272_v10   ;;  %v7836_v10 = vmul.f32 -1.442695, %v15844_v18 }
 0x55d   :  { %v8627_v45 = vpop.eup %8626 }
 0x55e   :  { %v8629_v18 = vpop.eup %8628  ;;  %8650 = vpow2.f32 %v7836_v10  ;;  %v12040_v48 = vmul.f32 %v8627_v45, %v11857_v39 }
 0x55f   :  { %v12017_v19 = vpop.permute.xlu0 %4167  ;;  %v12019_v58 = vpop.permute.xlu1 %4152  ;;  %8652 = vpow2.f32 %v7838_v3 }
 0x560   :  { %4353 = vperm.xlu0 %8021, %v15273_v50   ;;  %v8631_v59 = vpop.eup %8630  ;;  %v15848_v50 = vld [vmem:[#allocation43_spill] sm:$0xff]  ;;  %15849 = vst [vmem:[#allocation37_spill] sm:$0xff] %v12040_v48  ;;  %v15282_v45 = vmax.f32 %v12040_v48, 0.0 }
 0x561   :  { %v7840_v17 = vmul.f32 -1.442695, %v15848_v50  ;;  %v8633_v22 = vpop.eup %8632  ;;  %v2382_v50 = vadd.f32 1.0, %v8631_v59  ;;  %v15853_v59 = vld [vmem:[#allocation47_spill] sm:$0xff] }
 0x562   :  { %v8635_v32 = vpop.eup %8634  ;;  %v2384_v39 = vadd.f32 1.0, %v8633_v22  ;;  %v2756_v22 = vadd.f32 2.72, %v2660_v14 }
 0x563   :  { %v12031_v54 = vpop.permute.xlu0 %4173  ;;  %v12033_v56 = vpop.permute.xlu1 %4158  ;;  %8654 = vpow2.f32 %v7840_v17  ;;  %v12054_v43 = vmul.f32 %v8635_v32, %v11869_v61  ;;  %v7844_v17 = vmul.f32 -1.442695, %v15853_v59 }
 0x564   :  { %4359 = vperm.xlu0 %8021, %v15279_v6   ;;  %v8637_v37 = vpop.eup %8636  ;;  %v2380_v6 = vadd.f32 1.0, %v8629_v18  ;;  %8656 = vrcp.f32 %v2378_v9 }
 0x565   :  { %v12050_v3 = vpop.eup %8638  ;;  %15852 = vst [vmem:[#allocation41_spill] sm:$0xff] %v12054_v43  ;;  %v2386_v51 = vadd.f32 1.0, %v8637_v37  ;;  %8658 = vpow2.f32 %v7842_v63  ;;  %v15284_v63 = vmax.f32 %v12054_v43, 0.0 }
 0x566   :  { %15851 = vst [vmem:[#allocation39_spill] sm:$0xff] %v12050_v3  ;;  %v8641_v34 = vpop.eup %8640  ;;  %8660 = vrcp.f32 %v2380_v6 }
 0x567   :  { %v12043_v49 = vpop.permute.xlu0 %4179  ;;  %v12045_v10 = vpop.permute.xlu1 %4164  ;;  %8662 = vrcp.f32 %v2382_v50  ;;  %v12068_v37 = vmul.f32 %v8641_v34, %v11877_v28 }
 0x568   :  { %4365 = vperm.xlu0 %8021, %v15281_v38   ;;  %v8643_v9 = vpop.eup %8642  ;;  %v2662_v38 = vsub.f32 1.0, %v12050_v3  ;;  %8664 = vrcp.f32 %v2384_v39 }
 0x569   :  { %v12064_v61 = vpop.eup %8644  ;;  %15855 = vst [vmem:[#allocation45_spill] sm:$0xff] %v12068_v37  ;;  %8666 = vrcp.f32 %v2386_v51  ;;  %v2388_v48 = vadd.f32 1.0, %v8643_v9  ;;  %v15286_v34 = vmax.f32 %v12068_v37, 0.0 }
 0x56a   :  { %15854 = vst [vmem:[#allocation43_spill] sm:$0xff] %v12064_v61  ;;  %v8647_v32 = vpop.eup %8646  ;;  %8668 = vpow2.f32 %v7844_v17  ;;  %v2758_v14 = vadd.f32 2.72, %v2662_v38  ;;  %v2664_v39 = vsub.f32 1.0, %v12064_v61 }
 0x56b   :  { %v12056_v18 = vpop.permute.xlu0 %4185  ;;  %v12058_v4 = vpop.permute.xlu1 %4170  ;;  %8670 = vlog2.f32 %v2756_v22  ;;  %v12079_v28 = vmul.f32 %v8647_v32, %v11899_v52  ;;  %v15858_v52 = vlaneseq }
 0x56c   :  { %4371 = vperm.xlu0 %8021, %v15282_v45   ;;  %v8649_v45 = vpop.eup %8648  ;;  %8672 = vrcp.f32 %v2388_v48  ;;  %v2760_v38 = vadd.f32 2.72, %v2664_v39 }
 0x56d   :  { %v8651_v50 = vpop.eup %8650  ;;  %15856 = vst [vmem:[#allocation47_spill] sm:$0xff] %v12079_v28  ;;  %v2390_v24 = vadd.f32 1.0, %v8649_v45  ;;  %8674 = vlog2.f32 %v2758_v14  ;;  %v4392_v32 = vand.u32 127, %v15858_v52  ;;  %v15859_v45 = vld [vmem:[#allocation49_spill] sm:$0xff] }
 0x56e   :  { %v8653_v51 = vpop.eup %8652  ;;  %v2392_v17 = vadd.f32 1.0, %v8651_v50  ;;  %v7846_v35 = vmul.f32 -1.442695, %v15859_v45 }
 0x56f   :  { %v12070_v6 = vpop.permute.xlu0 %4191  ;;  %v12072_v59 = vpop.permute.xlu1 %4176  ;;  %v2394_v22 = vadd.f32 1.0, %v8653_v51  ;;  %8676 = vrcp.f32 %v2390_v24  ;;  %v4397_v51 = vadd.s32 4294967288, %v4392_v32  ;;  %v4404_v37 = vadd.s32 4294967280, %v4392_v32 }
 0x570   :  { %4377 = vperm.xlu0 %8021, %v15284_v63   ;;  %v8655_v9 = vpop.eup %8654  ;;  %v15288_v63 = vmax.f32 %v12079_v28, 0.0  ;;  %8678 = vrcp.f32 %v2392_v17  ;;  %v4411_v52 = vadd.s32 4294967272, %v4392_v32  ;;  %v4418_v45 = vadd.s32 4294967264, %v4392_v32 }
 0x571   :  { %v12088_v43 = vpop.eup %8656  ;;  %v2396_v47 = vadd.f32 1.0, %v8655_v9  ;;  %8680 = vlog2.f32 %v2760_v38  ;;  %v4425_v17 = vadd.s32 4294967256, %v4392_v32  ;;  %v15866_v38 = vld [vmem:[#allocation11_spill] sm:$0xff] }
 0x572   :  { %15857 = vst [vmem:[#allocation127_spill] sm:$0xff] %v12088_v43  ;;  %v8659_v50 = vpop.eup %8658  ;;  %8682 = vrcp.f32 %v2394_v22  ;;  %v12114_v61 = vsub.s32 %v4392_v32, %v15866_v38  ;;  %v12118_v21 = vsub.s32 %v4397_v51, %v15866_v38  ;;  %v12123_v16 = vsub.s32 %v4404_v37, %v15866_v38 }
 0x573   :  { %v12081_v1 = vpop.permute.xlu0 %4197  ;;  %v12083_v0 = vpop.permute.xlu1 %4182  ;;  %8684 = vpow2.f32 %v7846_v35  ;;  %v15867_v35 = vld [vmem:[#allocation55_spill] sm:$0xff]  ;;  %v12126_v60 = vsub.s32 %v4411_v52, %v15866_v38  ;;  %v12133_v51 = vsub.s32 %v4425_v17, %v15866_v38 }
 0x574   :  { %4383 = vperm.xlu0 %8021, %v15286_v34   ;;  %v15860_v34 = vld [vmem:[#allocation51_spill] sm:$0xff]  ;;  %v12099_v39 = vpop.eup %8660 }
 0x575   :  { %v7848_v14 = vmul.f32 -1.442695, %v15860_v34  ;;  %15861 = vst [vmem:[#allocation49_spill] sm:$0xff] %v12099_v39  ;;  %v12101_v24 = vpop.eup %8662  ;;  %v2398_v34 = vadd.f32 1.0, %v8659_v50  ;;  %v2668_v22 = vsub.f32 1.0, %v12099_v39  ;;  %v15868_v39 = vld [vmem:[#allocation57_spill] sm:$0xff] }
 0x576   :  { %15862 = vst [vmem:[#allocation51_spill] sm:$0xff] %v12101_v24  ;;  %v12104_v41 = vpop.eup %8664  ;;  %v7852_v50 = vmul.f32 -1.442695, %v15867_v35  ;;  %v12142_v52 = vmul.f32 -1.442695, %v15868_v39  ;;  %v4435_v39 = vrot.slane %v11952_v36, %v12114_v61  ;;  %v4439_v36 = vrot.slane %v11924_v31, %v12118_v21 }
 0x577   :  { %v12092_v5 = vpop.permute.xlu0 %4203  ;;  %v12094_v48 = vpop.permute.xlu1 %4188  ;;  %15864 = vst [vmem:[#allocation53_spill] sm:$0xff] %v12104_v41  ;;  %8686 = vpow2.f32 %v7848_v14  ;;  %v2672_v32 = vsub.f32 1.0, %v12104_v41  ;;  %v12130_v14 = vsub.s32 %v4418_v45, %v15866_v38  ;;  %v4415_v31 = vrot.slane %v11897_v44, %v12126_v60 }
 0x578   :  { %4389 = vperm.xlu0 %8021, %v15288_v63   ;;  %v2666_v63 = vsub.f32 1.0, %v12088_v43  ;;  %v12111_v9 = vpop.eup %8666  ;;  %8688 = vrcp.f32 %v2396_v47  ;;  %v2670_v43 = vsub.f32 1.0, %v12101_v24  ;;  %15869 = vst [vmem:[#allocation11_spill] sm:$0xff] %v12142_v52 }
 0x579   :  { %15865 = vst [vmem:[#allocation128_spill] sm:$0xff] %v12111_v9  ;;  %v8669_v42 = vpop.eup %8668  ;;  %8690 = vpow2.f32 %v7850_v57  ;;  %v2764_v57 = vadd.f32 2.72, %v2668_v22  ;;  %v2674_v41 = vsub.f32 1.0, %v12111_v9  ;;  %v2768_v38 = vadd.f32 2.72, %v2672_v32 }
 0x57a   :  { %v8671_v3 = vpop.eup %8670  ;;  %8692 = vrcp.f32 %v2398_v34  ;;  %v2762_v47 = vadd.f32 2.72, %v2666_v63  ;;  %v12139_v37 = vadd.f32 1.0, %v8669_v42  ;;  %v2766_v17 = vadd.f32 2.72, %v2670_v43 }
 0x57b   :  { %v12107_v28 = vpop.permute.xlu0 %4209  ;;  %v12109_v11 = vpop.permute.xlu1 %4194  ;;  %8694 = vpow2.f32 %v7852_v50  ;;  %v2901_v45 = vmul.f32 0.6931472, %v8671_v3  ;;  %v4401_v63 = vrot.slane %v11914_v15, %v12118_v21  ;;  %v4408_v42 = vrot.slane %v11926_v7, %v12123_v16 }
 0x57c   :  { %v12145_v30 = vpop.eup %8672  ;;  %8696 = vlog2.f32 %v2762_v47  ;;  %v4396_v22 = vrot.slane %v11884_v62, %v12114_v61  ;;  %v4444_v3 = vrot.slane %v11964_v13, %v12123_v16  ;;  %v12163_v32 = vadd.f32 2.72, %v2674_v41 }
 0x57d   :  { %15870 = vst [vmem:[#allocation55_spill] sm:$0xff] %v12145_v30  ;;  %v8675_v34 = vpop.eup %8674  ;;  %8698 = vlog2.f32 %v2764_v57  ;;  %v2676_v7 = vsub.f32 1.0, %v12145_v30  ;;  %v3045_v62 = vmul.f32 %v11038_v8, %v2901_v45  ;;  %v4422_v41 = vrot.slane %v11939_v53, %v12130_v14 }
 0x57e   :  { %v12161_v50 = vpop.eup %8676  ;;  %v2905_v9 = vmul.f32 0.6931472, %v8675_v34  ;;  %8700 = vlog2.f32 %v2766_v17  ;;  %v4403_v13 = vsel %vm4402_vm3, %v4401_v63, %v4396_v22  ;;  %v4440_v57 = vsel %vm4402_vm3, %v4439_v36, %v4435_v39 }
 0x57f   :  { %v12135_v35 = vpop.permute.xlu0 %4215  ;;  %v12137_v24 = vpop.permute.xlu1 %4200  ;;  %v4410_v52 = vsel %vm4409_vm4, %v4408_v42, %v4403_v13  ;;  %v4445_v45 = vsel %vm4409_vm4, %v4444_v3, %v4440_v57  ;;  %v4454_v17 = vrot.slane %v11978_v2, %v12130_v14  ;;  %v15871_v42 = vld [vmem:[#allocation79_spill] sm:$0xff]  ;;  %8702 = vlog2.f32 %v2768_v38 }
 0x580   :  { %v12168_v47 = vpop.eup %8678  ;;  %v3671_v22 = vmul.f32 %v15871_v42, %v3045_v62  ;;  %v12188_v53 = vadd.f32 2.72, %v2676_v7  ;;  %v4449_v39 = vrot.slane %v11937_v23, %v12126_v60  ;;  %v3047_v3 = vmul.f32 %v11038_v8, %v2905_v9 }
 0x581   :  { %v8681_v29 = vpop.eup %8680  ;;  %v4417_v2 = vsel %vm4416_vm5, %v4415_v31, %v4410_v52  ;;  %v4464_v57 = vrot.slane %v11993_v26, %v12114_v61  ;;  %v4473_v7 = vrot.slane %v12005_v20, %v12123_v16  ;;  %v4468_v9 = vrot.slane %v11962_v46, %v12118_v21 }
 0x582   :  { %v12176_v30 = vpop.eup %8682  ;;  %v12197_v13 = vmul.f32 0.6931472, %v8681_v29  ;;  %v4424_v38 = vsel %vm4423_vm6, %v4422_v41, %v4417_v2  ;;  %v4450_v23 = vsel %vm4416_vm5, %v4449_v39, %v4445_v45  ;;  %v4429_v29 = vrot.slane %v11912_v55, %v12133_v51  ;;  %v15872_v45 = vld [vmem:[#allocation85_spill] sm:$0xff] }
 0x583   :  { %v12157_v43 = vpop.permute.xlu0 %4221  ;;  %v12159_v15 = vpop.permute.xlu1 %4206  ;;  %v4455_v26 = vsel %vm4423_vm6, %v4454_v17, %v4450_v23  ;;  %v4493_v52 = vrot.slane %v12033_v56, %v12114_v61  ;;  %8704 = vrcp.f32 %v3671_v22  ;;  %v12220_v39 = vmul.f32 %v15872_v45, %v3047_v3 }
 0x584   :  { %v12185_v34 = vpop.eup %8684  ;;  %v4459_v20 = vrot.slane %v11950_v33, %v12133_v51  ;;  %v4502_v55 = vrot.slane %v12045_v10, %v12123_v16  ;;  %v12227_v46 = vsel %vm4430_vm7, %v4429_v29, %v4424_v38  ;;  %v4478_v17 = vrot.slane %v11976_v40, %v12126_v60 }
 0x585   :  { %v12194_v44 = vpop.eup %8686  ;;  %v4469_v56 = vsel %vm4402_vm3, %v4468_v9, %v4464_v57  ;;  %v4497_v22 = vrot.slane %v12003_v25, %v12118_v21  ;;  %v4483_v10 = vrot.slane %v12019_v58, %v12130_v14  ;;  %v4522_v38 = vrot.slane %v12072_v59, %v12114_v61 }
 0x586   :  { %v12202_v62 = vpop.eup %8688  ;;  %v12237_v3 = vsel %vm4430_vm7, %v4459_v20, %v4455_v26  ;;  %v4474_v33 = vsel %vm4409_vm4, %v4473_v7, %v4469_v56  ;;  %v4488_v40 = vrot.slane %v11991_v27, %v12133_v51  ;;  %v4531_v57 = vrot.slane %v12083_v0, %v12123_v16 }
 0x587   :  { %v12183_v63 = vpop.permute.xlu1 %4212  ;;  %v12192_v36 = vpop.permute.xlu0 %4227  ;;  %v4498_v25 = vsel %vm4402_vm3, %v4497_v22, %v4493_v52  ;;  %v4551_v29 = vrot.slane %v12109_v11, %v12114_v61  ;;  %v4526_v58 = vrot.slane %v12043_v49, %v12118_v21  ;;  %v4560_v27 = vrot.slane %v12137_v24, %v12123_v16 }
 0x588   :  { %v12208_v42 = vpop.eup %8690  ;;  %v4503_v59 = vsel %vm4409_vm4, %v4502_v55, %v4498_v25  ;;  %v4580_v26 = vrot.slane %v12183_v63, %v12114_v61  ;;  %v4507_v11 = vrot.slane %v12017_v19, %v12126_v60  ;;  %v4479_v0 = vsel %vm4416_vm5, %v4478_v17, %v4474_v33 }
 0x589   :  { %v12217_v41 = vpop.eup %8692  ;;  %v4555_v45 = vrot.slane %v12081_v1, %v12118_v21  ;;  %v4484_v24 = vsel %vm4423_vm6, %v4483_v10, %v4479_v0  ;;  %v4512_v63 = vrot.slane %v12058_v4, %v12130_v14  ;;  %v4527_v55 = vsel %vm4402_vm3, %v4526_v58, %v4522_v38 }
 0x58a   :  { %v12234_v2 = vpop.eup %8694  ;;  %v4584_v19 = vrot.slane %v12135_v35, %v12118_v21  ;;  %v4508_v17 = vsel %vm4416_vm5, %v4507_v11, %v4503_v59  ;;  %v4532_v56 = vsel %vm4409_vm4, %v4531_v57, %v4527_v55  ;;  %v4541_v1 = vrot.slane %v12094_v48, %v12130_v14 }
 0x58b   :  { %v4219_v31 = vpop.permute.xlu1 %4218  ;;  %v4234_v23 = vpop.permute.xlu0 %4233  ;;  %v4536_v33 = vrot.slane %v12056_v18, %v12126_v60  ;;  %v4570_v10 = vrot.slane %v12159_v15, %v12130_v14  ;;  %v4565_v57 = vrot.slane %v12092_v5, %v12126_v60  ;;  %v4489_v18 = vsel %vm4430_vm7, %v4488_v40, %v4484_v24 }
 0x58c   :  { %v12251_v9 = vpop.eup %8696  ;;  %v4589_v49 = vrot.slane %v4219_v31, %v12123_v16  ;;  %v4556_v31 = vsel %vm4402_vm3, %v4555_v45, %v4551_v29  ;;  %v4585_v35 = vsel %vm4402_vm3, %v4584_v19, %v4580_v26  ;;  %v4513_v59 = vsel %vm4423_vm6, %v4512_v63, %v4508_v17 }
 0x58d   :  { %v12260_v52 = vpop.eup %8698  ;;  %v4561_v4 = vsel %vm4409_vm4, %v4560_v27, %v4556_v31  ;;  %v4537_v15 = vsel %vm4416_vm5, %v4536_v33, %v4532_v56  ;;  %v4594_v27 = vrot.slane %v12157_v43, %v12126_v60  ;;  %v4517_v26 = vrot.slane %v12031_v54, %v12133_v51 }
 0x58e   :  { %v12268_v20 = vpop.eup %8700  ;;  %v4590_v48 = vsel %vm4409_vm4, %v4589_v49, %v4585_v35  ;;  %v4542_v5 = vsel %vm4423_vm6, %v4541_v1, %v4537_v15  ;;  %v4566_v11 = vsel %vm4416_vm5, %v4565_v57, %v4561_v4  ;;  %v4546_v40 = vrot.slane %v12070_v6, %v12133_v51 }
 0x58f   :  { %v4225_v7 = vpop.permute.xlu1 %4224  ;;  %v4240_v38 = vpop.permute.xlu0 %4239  ;;  %v4571_v45 = vsel %vm4423_vm6, %v4570_v10, %v4566_v11  ;;  %v4595_v49 = vsel %vm4416_vm5, %v4594_v27, %v4590_v48  ;;  %v4518_v54 = vsel %vm4430_vm7, %v4517_v26, %v4513_v59  ;;  %v4575_v63 = vrot.slane %v12107_v28, %v12133_v51 }
 0x590   :  { %v12287_v25 = vpop.eup %8702  ;;  %v4599_v29 = vrot.slane %v4225_v7, %v12130_v14  ;;  %v4613_v7 = vrot.slane %v4234_v23, %v12118_v21  ;;  %v4868_v6 = vsel %vm4867_vm8, %v12237_v3, %v12227_v46  ;;  %v4547_v19 = vsel %vm4430_vm7, %v4546_v40, %v4542_v5  ;;  %v15873_v5 = vld [vmem:[#allocation11_spill] sm:$0xff]  ;;  %v15876_v40 = vld [vmem:[#allocation61_spill] sm:$0xff] }
 0x591   :  { %v12309_v43 = vpop.eup %8704  ;;  %v4604_v17 = vrot.slane %v12192_v36, %v12133_v51  ;;  %v4870_v31 = vsel %vm4869_vm9, %v4489_v18, %v4868_v6  ;;  %v4576_v28 = vsel %vm4430_vm7, %v4575_v63, %v4571_v45  ;;  %8706 = vlog2.f32 %v12163_v32 }
 0x592   :  { %v4600_v55 = vsel %vm4423_vm6, %v4599_v29, %v4595_v49  ;;  %v4872_v4 = vsel %vm4871_vm10, %v4518_v54, %v4870_v31  ;;  %v3049_v29 = vmul.f32 %v11038_v8, %v12197_v13  ;;  %8708 = vrcp.f32 %v12139_v37  ;;  %v15874_v13 = vld [vmem:[#allocation59_spill] sm:$0xff] }
 0x593   :  { %v4231_v22 = vpop.permute.xlu1 %4230  ;;  %v4246_v56 = vpop.permute.xlu0 %4245  ;;  %v4605_v3 = vsel %vm4430_vm7, %v4604_v17, %v4600_v55  ;;  %v4874_v35 = vsel %vm4873_vm11, %v4547_v19, %v4872_v4  ;;  %v2402_v15 = vadd.f32 1.0, %v12185_v34  ;;  %8710 = vrcp.f32 %v12220_v39  ;;  %v15878_v55 = vld [vmem:[#allocation106_spill] sm:$0xff] }
 0x594   :  { %v4609_v58 = vrot.slane %v4231_v22, %v12114_v61  ;;  %v4623_v22 = vrot.slane %v4240_v38, %v12126_v60  ;;  %v4633_v36 = vrot.slane %v4246_v56, %v12133_v51  ;;  %v2678_v38 = vsub.f32 1.0, %v12161_v50 }
 0x595   :  { %v4876_v48 = vsel %vm4875_vm12, %v4576_v28, %v4874_v35  ;;  %v3675_v27 = vmul.f32 %v11391_v12, %v3049_v29  ;;  %8712 = vpow2.f32 %v15873_v5  ;;  %v2917_v37 = vmul.f32 0.6931472, %v12260_v52  ;;  %v15875_v12 = vld [vmem:[#allocation83_spill] sm:$0xff]  ;;  %v15879_v28 = vld [vmem:[#allocation86_spill] sm:$0xff] }
 0x596   :  { %v4614_v23 = vsel %vm4402_vm3, %v4613_v7, %v4609_v58  ;;  %v2913_v58 = vmul.f32 0.6931472, %v12251_v9  ;;  %v4878_v59 = vsel %vm4877_vm13, %v4605_v3, %v4876_v48  ;;  %v7856_v9 = vmul.f32 -1.442695, %v15874_v13  ;;  %v15883_v48 = vld [vmem:[#allocation103_spill] sm:$0xff] }
 0x597   :  { %v4237_v0 = vpop.permute.xlu1 %4236  ;;  %v2774_v11 = vadd.f32 2.72, %v2678_v38  ;;  %8714 = vlog2.f32 %v12188_v53  ;;  %v2680_v34 = vsub.f32 1.0, %v12168_v47  ;;  %v2404_v39 = vadd.f32 1.0, %v12194_v44  ;;  %v15877_v53 = vld [vmem:[#allocation63_spill] sm:$0xff] }
 0x598   :  { %v4618_v24 = vrot.slane %v4237_v0, %v12123_v16  ;;  %v3051_v7 = vmul.f32 %v11038_v8, %v2913_v58  ;;  %8716 = vrcp.f32 %v2402_v15  ;;  %v7858_v45 = vmul.f32 -1.442695, %v15876_v40  ;;  %v15884_v58 = vld [vmem:[#allocation39_spill] sm:$0xff] }
 0x599   :  { %8718 = vrcp.f32 %v3675_v27  ;;  %v2682_v49 = vsub.f32 1.0, %v12176_v30  ;;  %v2921_v54 = vmul.f32 0.6931472, %v12268_v20  ;;  %v2776_v52 = vadd.f32 2.72, %v2680_v34 }
 0x59a   :  { %v4619_v1 = vsel %vm4409_vm4, %v4618_v24, %v4614_v23  ;;  %v3677_v0 = vmul.f32 %v15875_v12, %v3051_v7  ;;  %8720 = vpow2.f32 %v7856_v9  ;;  %v3053_v24 = vmul.f32 %v11038_v8, %v2917_v37  ;;  %v15886_v7 = vld [vmem:[#allocation46_spill] sm:$0xff] }
 0x59b   :  { %v4243_v33 = vpop.permute.xlu1 %4242  ;;  %v4624_v10 = vsel %vm4416_vm5, %v4623_v22, %v4619_v1  ;;  %8722 = vlog2.f32 %v2774_v11  ;;  %v7860_v63 = vmul.f32 -1.442695, %v15877_v53  ;;  %v2406_v23 = vadd.f32 1.0, %v12208_v42 }
 0x59c   :  { %v4628_v46 = vrot.slane %v4243_v33, %v12130_v14  ;;  %8724 = vrcp.f32 %v2404_v39  ;;  %v3679_v44 = vmul.f32 %v15878_v55, %v3053_v24  ;;  %v2778_v6 = vadd.f32 2.72, %v2682_v49  ;;  %v15880_v33 = vld [vmem:[#allocation33_spill] sm:$0xff]  ;;  %v15887_v39 = vld [vmem:[#allocation43_spill] sm:$0xff] }
 0x59d   :  { %8726 = vrcp.f32 %v3677_v0  ;;  %v3055_v17 = vmul.f32 %v11038_v8, %v2921_v54  ;;  %v2925_v56 = vmul.f32 0.6931472, %v12287_v25  ;;  %v2684_v20 = vsub.f32 1.0, %v12202_v62  ;;  %v15889_v55 = vld [vmem:[#allocation105_spill] sm:$0xff] }
 0x59e   :  { %v4629_v57 = vsel %vm4423_vm6, %v4628_v46, %v4624_v10  ;;  %8728 = vpow2.f32 %v7858_v45  ;;  %v8707_v19 = vpop.eup %8706  ;;  %v2408_v1 = vadd.f32 1.0, %v12234_v2  ;;  %v12371_v42 = vmul.f32 %v12309_v43, %v15880_v33  ;;  %v15882_v46 = vld [vmem:[#allocation65_spill] sm:$0xff] }
 0x59f   :  { %v4634_v18 = vsel %vm4430_vm7, %v4633_v36, %v4629_v57  ;;  %8730 = vlog2.f32 %v2776_v52  ;;  %v12366_v31 = vpop.eup %8708  ;;  %v3681_v22 = vmul.f32 %v15879_v28, %v3055_v17  ;;  %v7862_v3 = vmul.f32 -1.442695, %v15882_v46 }
 0x5a0   :  { %v4880_v32 = vsel %vm4879_vm14, %v4634_v18, %v4878_v59  ;;  %8732 = vpow2.f32 %v7860_v63  ;;  %15881 = vst [vmem:[#allocation57_spill] sm:$0xff] %v12371_v42  ;;  %v8711_v4 = vpop.eup %8710  ;;  %v2686_v25 = vsub.f32 1.0, %v12217_v41  ;;  %v3057_v10 = vmul.f32 %v11038_v8, %v2925_v56 }
 0x5a1   :  { %v4890_v26 = vsel %vm1989_vm2, %v4880_v32, -inf  ;;  %8734 = vrcp.f32 %v3679_v44  ;;  %v2929_v2 = vmul.f32 0.6931472, %v8707_v19  ;;  %v2780_v35 = vadd.f32 2.72, %v2684_v20 }
 0x5a2   :  { %4891 = vmax.xlane.f32.xlu1 %v4890_v26  ;;  %8736 = vrcp.f32 %v2406_v23  ;;  %v8713_v36 = vpop.eup %8712  ;;  %v3683_v43 = vmul.f32 %v15883_v48, %v3057_v10  ;;  %v15322_v29 = vmax.f32 %v12371_v42, 0.0  ;;  %v12381_v18 = vmul.f32 %v8711_v4, %v15884_v58 }
 0x5a3   :  { %8738 = vlog2.f32 %v2778_v6  ;;  %v2410_v15 = vadd.f32 1.0, %v8713_v36  ;;  %v2688_v32 = vsub.f32 1.0, %v12366_v31  ;;  %v3059_v26 = vmul.f32 %v11038_v8, %v2929_v2  ;;  %v15890_v6 = vld [vmem:[#allocation127_spill] sm:$0xff]  ;;  %v15893_v2 = vld [vmem:[#allocation49_spill] sm:$0xff] }
 0x5a4   :  { %v8715_v38 = vpop.eup %8714  ;;  %8740 = vrcp.f32 %v2408_v1  ;;  %15885 = vst [vmem:[#allocation79_spill] sm:$0xff] %v12381_v18  ;;  %v2782_v13 = vadd.f32 2.72, %v2686_v25  ;;  %v15321_v34 = vmax.f32 %v12381_v18, 0.0  ;;  %v15892_v25 = vld [vmem:[#allocation17_spill] sm:$0xff] }
 0x5a5   :  { %v12376_v57 = vpop.eup %8716  ;;  %8742 = vrcp.f32 %v3681_v22  ;;  %v2933_v5 = vmul.f32 0.6931472, %v8715_v38  ;;  %v3685_v37 = vmul.f32 %v15886_v7, %v3059_v26  ;;  %v2784_v45 = vadd.f32 2.72, %v2688_v32 }
 0x5a6   :  { %v8719_v59 = vpop.eup %8718  ;;  %8744 = vpow2.f32 %v7862_v3  ;;  %v2690_v52 = vsub.f32 1.0, %v12376_v57 }
 0x5a7   :  { %v8721_v27 = vpop.eup %8720  ;;  %8746 = vlog2.f32 %v2780_v35  ;;  %v12392_v12 = vmul.f32 %v8719_v59, %v15887_v39  ;;  %v3061_v24 = vmul.f32 %v11038_v8, %v2933_v5 }
 0x5a8   :  { %v8723_v9 = vpop.eup %8722  ;;  %8748 = vrcp.f32 %v3683_v43  ;;  %v2412_v40 = vadd.f32 1.0, %v8721_v27  ;;  %v2786_v33 = vadd.f32 2.72, %v2690_v52  ;;  %v15895_v27 = vld [vmem:[#allocation113_spill] sm:$0xff] }
 0x5a9   :  { %v12387_v11 = vpop.eup %8724  ;;  %15888 = vst [vmem:[#allocation85_spill] sm:$0xff] %v12392_v12  ;;  %8750 = vrcp.f32 %v2410_v15  ;;  %v2937_v54 = vmul.f32 0.6931472, %v8723_v9  ;;  %v3687_v44 = vmul.f32 %v15889_v55, %v3061_v24  ;;  %v15320_v23 = vmax.f32 %v12392_v12, 0.0 }
 0x5aa   :  { %v8727_v0 = vpop.eup %8726  ;;  %8752 = vlog2.f32 %v2782_v13  ;;  %v2692_v20 = vsub.f32 1.0, %v12387_v11  ;;  %v15896_v13 = vld [vmem:[#allocation51_spill] sm:$0xff] }
 0x5ab   :  { %v8729_v49 = vpop.eup %8728  ;;  %8754 = vrcp.f32 %v3685_v37  ;;  %v12401_v19 = vmul.f32 %v8727_v0, %v15890_v6  ;;  %v3063_v28 = vmul.f32 %v11038_v8, %v2937_v54  ;;  %v15898_v54 = vld [vmem:[#allocation22_spill] sm:$0xff] }
 0x5ac   :  { %v8731_v53 = vpop.eup %8730  ;;  %8756 = vrcp.f32 %v2412_v40  ;;  %v2414_v56 = vadd.f32 1.0, %v8729_v49  ;;  %v2788_v48 = vadd.f32 2.72, %v2692_v20 }
 0x5ad   :  { %v8733_v63 = vpop.eup %8732  ;;  %15891 = vst [vmem:[#allocation11_spill] sm:$0xff] %v12401_v19  ;;  %v2941_v22 = vmul.f32 0.6931472, %v8731_v53  ;;  %8758 = vlog2.f32 %v2784_v45  ;;  %v3689_v36 = vmul.f32 %v15892_v25, %v3063_v28  ;;  %v15319_v10 = vmax.f32 %v12401_v19, 0.0  ;;  %v15902_v25 = vld [vmem:[#allocation128_spill] sm:$0xff] }
 0x5ae   :  { %v8735_v17 = vpop.eup %8734  ;;  %v2416_v46 = vadd.f32 1.0, %v8733_v63  ;;  %8760 = vrcp.f32 %v3687_v44  ;;  %v15899_v63 = vld [vmem:[#allocation53_spill] sm:$0xff] }
 0x5af   :  { %v12404_v1 = vpop.eup %8736  ;;  %v12414_v35 = vmul.f32 %v8735_v17, %v15893_v2  ;;  %8762 = vrcp.f32 %v2414_v56  ;;  %v3065_v58 = vmul.f32 %v11038_v8, %v2941_v22 }
 0x5b0   :  { %v8739_v4 = vpop.eup %8738  ;;  %8764 = vlog2.f32 %v2786_v33  ;;  %v2694_v15 = vsub.f32 1.0, %v12404_v1  ;;  %v15901_v33 = vld [vmem:[#allocation28_spill] sm:$0xff] }
 0x5b1   :  { %v12409_v3 = vpop.eup %8740  ;;  %15894 = vst [vmem:[#allocation59_spill] sm:$0xff] %v12414_v35  ;;  %v2945_v59 = vmul.f32 0.6931472, %v8739_v4  ;;  %8766 = vrcp.f32 %v2416_v46  ;;  %v3691_v26 = vmul.f32 %v15895_v27, %v3065_v58  ;;  %v15318_v5 = vmax.f32 %v12414_v35, 0.0  ;;  %v15904_v27 = vld [vmem:[#allocation48_spill] sm:$0xff] }
 0x5b2   :  { %v8743_v38 = vpop.eup %8742  ;;  %8768 = vrcp.f32 %v3689_v36  ;;  %v2790_v45 = vadd.f32 2.72, %v2694_v15  ;;  %v2696_v49 = vsub.f32 1.0, %v12409_v3 }
 0x5b3   :  { %4248 = vperm.xlu1 %8022, %v15322_v29   ;;  %v8745_v43 = vpop.eup %8744  ;;  %v12423_v9 = vmul.f32 %v8743_v38, %v15896_v13  ;;  %8770 = vlog2.f32 %v2788_v48  ;;  %v3067_v0 = vmul.f32 %v11038_v8, %v2945_v59 }
 0x5b4   :  { %v8747_v32 = vpop.eup %8746  ;;  %v2418_v37 = vadd.f32 1.0, %v8745_v43  ;;  %8772 = vrcp.f32 %v3691_v26  ;;  %v2792_v28 = vadd.f32 2.72, %v2696_v49 }
 0x5b5   :  { %15897 = vst [vmem:[#allocation83_spill] sm:$0xff] %v12423_v9  ;;  %v8749_v7 = vpop.eup %8748  ;;  %v2949_v40 = vmul.f32 0.6931472, %v8747_v32  ;;  %v3693_v52 = vmul.f32 %v15898_v54, %v3067_v0  ;;  %v15317_v53 = vmax.f32 %v12423_v9, 0.0 }
 0x5b6   :  { %v12425_v39 = vpop.eup %8750  ;;  %v12434_v55 = vmul.f32 %v8749_v7, %v15899_v63  ;;  %8774 = vrcp.f32 %v2418_v37  ;;  %v15905_v7 = vld [vmem:[#allocation55_spill] sm:$0xff] }
 0x5b7   :  { %4254 = vperm.xlu1 %8022, %v15321_v34   ;;  %v8753_v24 = vpop.eup %8752  ;;  %v2698_v6 = vsub.f32 1.0, %v12425_v39  ;;  %v3069_v56 = vmul.f32 %v11038_v8, %v2949_v40  ;;  %8776 = vlog2.f32 %v2790_v45 }
 0x5b8   :  { %15900 = vst [vmem:[#allocation61_spill] sm:$0xff] %v12434_v55  ;;  %v8755_v44 = vpop.eup %8754  ;;  %v2953_v20 = vmul.f32 0.6931472, %v8753_v24  ;;  %8778 = vrcp.f32 %v3693_v52  ;;  %v15316_v46 = vmax.f32 %v12434_v55, 0.0  ;;  %v15907_v52 = vld [vmem:[#allocation21_spill] sm:$0xff] }
 0x5b9   :  { %v12437_v17 = vpop.eup %8756  ;;  %v3695_v4 = vmul.f32 %v15901_v33, %v3069_v56  ;;  %v12445_v36 = vmul.f32 %v8755_v44, %v15902_v25  ;;  %v2794_v38 = vadd.f32 2.72, %v2698_v6  ;;  %8780 = vlog2.f32 %v2792_v28 }
 0x5ba   :  { %v8759_v22 = vpop.eup %8758  ;;  %v3071_v43 = vmul.f32 %v11038_v8, %v2953_v20  ;;  %v2700_v59 = vsub.f32 1.0, %v12437_v17 }
 0x5bb   :  { %4260 = vperm.xlu1 %8022, %v15320_v23   ;;  %15903 = vst [vmem:[#allocation63_spill] sm:$0xff] %v12445_v36  ;;  %v8761_v2 = vpop.eup %8760  ;;  %v2957_v58 = vmul.f32 0.6931472, %v8759_v22  ;;  %8782 = vrcp.f32 %v3695_v4  ;;  %v15315_v13 = vmax.f32 %v12445_v36, 0.0 }
 0x5bc   :  { %v12447_v48 = vpop.eup %8762  ;;  %v3697_v26 = vmul.f32 %v15904_v27, %v3071_v43  ;;  %v12458_v37 = vmul.f32 %v8761_v2, %v15905_v7  ;;  %8784 = vlog2.f32 %v2794_v38  ;;  %v2796_v24 = vadd.f32 2.72, %v2700_v59  ;;  %v15909_v2 = vld [vmem:[#allocation109_spill] sm:$0xff] }
 0x5bd   :  { %v8765_v15 = vpop.eup %8764  ;;  %v3073_v45 = vmul.f32 %v11038_v8, %v2957_v58  ;;  %v2702_v54 = vsub.f32 1.0, %v12447_v48 }
 0x5be   :  { %v12453_v32 = vpop.eup %8766  ;;  %15906 = vst [vmem:[#allocation106_spill] sm:$0xff] %v12458_v37  ;;  %v2961_v49 = vmul.f32 0.6931472, %v8765_v15  ;;  %8786 = vrcp.f32 %v3697_v26  ;;  %v15314_v44 = vmax.f32 %v12458_v37, 0.0 }
 0x5bf   :  { %4266 = vperm.xlu1 %8022, %v15319_v10   ;;  %v8769_v0 = vpop.eup %8768  ;;  %v3699_v63 = vmul.f32 %v15907_v52, %v3073_v45  ;;  %8788 = vlog2.f32 %v2796_v24  ;;  %v2798_v33 = vadd.f32 2.72, %v2702_v54  ;;  %v2704_v4 = vsub.f32 1.0, %v12453_v32 }
 0x5c0   :  { %v8771_v40 = vpop.eup %8770  ;;  %v12467_v6 = vmul.f32 %v8769_v0, %v12161_v50  ;;  %v3075_v22 = vmul.f32 %v11038_v8, %v2961_v49  ;;  %v15911_v0 = vld [vmem:[#allocation26_spill] sm:$0xff] }
 0x5c1   :  { %v8773_v56 = vpop.eup %8772  ;;  %v2965_v20 = vmul.f32 0.6931472, %v8771_v40  ;;  %8790 = vrcp.f32 %v3699_v63  ;;  %v2800_v27 = vadd.f32 2.72, %v2704_v4 }
 0x5c2   :  { %15908 = vst [vmem:[#allocation86_spill] sm:$0xff] %v12467_v6  ;;  %v3701_v38 = vmul.f32 %v15909_v2, %v3075_v22  ;;  %v15313_v50 = vmax.f32 %v12467_v6, 0.0  ;;  %v12478_v43 = vmul.f32 %v8773_v56, %v12168_v47  ;;  %8792 = vlog2.f32 %v2798_v33  ;;  %v15913_v56 = vld [vmem:[#allocation95_spill] sm:$0xff] }
 0x5c3   :  { %4272 = vperm.xlu1 %8022, %v15318_v5   ;;  %v12469_v28 = vpop.eup %8774  ;;  %v3077_v59 = vmul.f32 %v11038_v8, %v2965_v20 }
 0x5c4   :  { %v8777_v25 = vpop.eup %8776  ;;  %15910 = vst [vmem:[#allocation33_spill] sm:$0xff] %v12478_v43  ;;  %v2706_v26 = vsub.f32 1.0, %v12469_v28  ;;  %8794 = vrcp.f32 %v3701_v38  ;;  %v15312_v45 = vmax.f32 %v12478_v43, 0.0  ;;  %v15915_v38 = vld [vmem:[#allocation23_spill] sm:$0xff] }
 0x5c5   :  { %v8779_v58 = vpop.eup %8778  ;;  %v2969_v15 = vmul.f32 0.6931472, %v8777_v25  ;;  %v3703_v40 = vmul.f32 %v15911_v0, %v3077_v59  ;;  %8796 = vlog2.f32 %v2800_v27  ;;  %v15917_v0 = vld [vmem:[#allocation25_spill] sm:$0xff] }
 0x5c6   :  { %v8781_v7 = vpop.eup %8780  ;;  %v12487_v47 = vmul.f32 %v8779_v58, %v12176_v30  ;;  %v2802_v63 = vadd.f32 2.72, %v2706_v26 }
 0x5c7   :  { %4278 = vperm.xlu1 %8022, %v15317_v53   ;;  %v3079_v54 = vmul.f32 %v11038_v8, %v2969_v15  ;;  %v2973_v52 = vmul.f32 0.6931472, %v8781_v7  ;;  %8798 = vrcp.f32 %v3703_v40  ;;  %v15940_v53 = vld [vmem:[#allocation42_spill] sm:$0xff] }
 0x5c8   :  { %15912 = vst [vmem:[#allocation65_spill] sm:$0xff] %v12487_v47  ;;  %v8783_v49 = vpop.eup %8782  ;;  %v15311_v22 = vmax.f32 %v12487_v47, 0.0  ;;  %8800 = vlog2.f32 %v2802_v63  ;;  %v15941_v5 = vmax.f32 %v15940_v53, 0.0 }
 0x5c9   :  { %v8785_v24 = vpop.eup %8784  ;;  %v3705_v20 = vmul.f32 %v15913_v56, %v3079_v54  ;;  %v12495_v33 = vmul.f32 %v8783_v49, %v12202_v62  ;;  %v3081_v4 = vmul.f32 %v11038_v8, %v2973_v52  ;;  %v15919_v56 = vld [vmem:[#allocation116_spill] sm:$0xff] }
 0x5ca   :  { %v2977_v25 = vmul.f32 0.6931472, %v8785_v24 }
 0x5cb   :  { %4284 = vperm.xlu1 %8022, %v15316_v46   ;;  %15914 = vst [vmem:[#allocation103_spill] sm:$0xff] %v12495_v33  ;;  %v8787_v30 = vpop.eup %8786  ;;  %8802 = vrcp.f32 %v3705_v20  ;;  %v3707_v58 = vmul.f32 %v15915_v38, %v3081_v4  ;;  %v15310_v59 = vmax.f32 %v12495_v33, 0.0 }
 0x5cc   :  { %v8789_v2 = vpop.eup %8788  ;;  %v12503_v15 = vmul.f32 %v8787_v30, %v12217_v41  ;;  %v3083_v62 = vmul.f32 %v11038_v8, %v2977_v25 }
 0x5cd   :  { %v2981_v26 = vmul.f32 0.6931472, %v8789_v2  ;;  %8804 = vrcp.f32 %v3707_v58  ;;  %v15921_v58 = vld [vmem:[#allocation66_spill] sm:$0xff] }
 0x5ce   :  { %15916 = vst [vmem:[#allocation39_spill] sm:$0xff] %v12503_v15  ;;  %v8791_v27 = vpop.eup %8790  ;;  %v3709_v40 = vmul.f32 %v15917_v0, %v3083_v62  ;;  %v15309_v49 = vmax.f32 %v12503_v15, 0.0 }
 0x5cf   :  { %4290 = vperm.xlu1 %8022, %v15315_v13   ;;  %v8793_v7 = vpop.eup %8792  ;;  %v12511_v24 = vmul.f32 %v8791_v27, %v12366_v31  ;;  %v3085_v41 = vmul.f32 %v11038_v8, %v2981_v26  ;;  %v15938_v13 = vld [vmem:[#allocation68_spill] sm:$0xff] }
 0x5d0   :  { %v2985_v52 = vmul.f32 0.6931472, %v8793_v7  ;;  %8806 = vrcp.f32 %v3709_v40  ;;  %v15923_v40 = vld [vmem:[#allocation80_spill] sm:$0xff] }
 0x5d1   :  { %15918 = vst [vmem:[#allocation46_spill] sm:$0xff] %v12511_v24  ;;  %v8795_v54 = vpop.eup %8794  ;;  %v3711_v20 = vmul.f32 %v15919_v56, %v3085_v41  ;;  %v15308_v30 = vmax.f32 %v12511_v24, 0.0 }
 0x5d2   :  { %v8797_v63 = vpop.eup %8796  ;;  %v12519_v4 = vmul.f32 %v8795_v54, %v12376_v57  ;;  %v3087_v31 = vmul.f32 %v11038_v8, %v2985_v52 }
 0x5d3   :  { %4296 = vperm.xlu1 %8022, %v15314_v44   ;;  %v2989_v2 = vmul.f32 0.6931472, %v8797_v63  ;;  %8808 = vrcp.f32 %v3711_v20 }
 0x5d4   :  { %15920 = vst [vmem:[#allocation43_spill] sm:$0xff] %v12519_v4  ;;  %v8799_v25 = vpop.eup %8798  ;;  %v3713_v27 = vmul.f32 %v15921_v58, %v3087_v31  ;;  %v15307_v62 = vmax.f32 %v12519_v4, 0.0 }
 0x5d5   :  { %v8801_v38 = vpop.eup %8800  ;;  %v12527_v26 = vmul.f32 %v8799_v25, %v12387_v11  ;;  %v3089_v57 = vmul.f32 %v11038_v8, %v2989_v2  ;;  %v15925_v11 = vld [vmem:[#allocation122_spill] sm:$0xff] }
 0x5d6   :  { %v2993_v0 = vmul.f32 0.6931472, %v8801_v38  ;;  %8810 = vrcp.f32 %v3713_v27 }
 0x5d7   :  { %4302 = vperm.xlu1 %8022, %v15313_v50   ;;  %15922 = vst [vmem:[#allocation105_spill] sm:$0xff] %v12527_v26  ;;  %v3715_v54 = vmul.f32 %v15923_v40, %v3089_v57  ;;  %v15306_v41 = vmax.f32 %v12527_v26, 0.0 }
 0x5d8   :  { %v8803_v7 = vpop.eup %8802  ;;  %v3091_v56 = vmul.f32 %v11038_v8, %v2993_v0 }
 0x5d9   :  { %v12535_v52 = vmul.f32 %v8803_v7, %v12404_v1  ;;  %8812 = vrcp.f32 %v3715_v54  ;;  %v12547_v1 = vpop.permute.xlu0 %4251 }
 0x5da   :  { %v8805_v63 = vpop.eup %8804  ;;  %v3717_v20 = vmul.f32 %v15925_v11, %v3091_v56 }
 0x5db   :  { %4308 = vperm.xlu1 %8022, %v15312_v45   ;;  %15924 = vst [vmem:[#allocation127_spill] sm:$0xff] %v12535_v52  ;;  %v15305_v25 = vmax.f32 %v12535_v52, 0.0  ;;  %v12543_v31 = vmul.f32 %v8805_v63, %v12409_v3 }
 0x5dc   :  { %8814 = vrcp.f32 %v3717_v20 }
 0x5dd   :  { %15926 = vst [vmem:[#allocation17_spill] sm:$0xff] %v12543_v31  ;;  %v8807_v2 = vpop.eup %8806  ;;  %v15304_v8 = vmax.f32 %v12543_v31, 0.0  ;;  %v12559_v57 = vpop.permute.xlu0 %4257 }
 0x5de   :  { %v12551_v38 = vmul.f32 %v8807_v2, %v12425_v39 }
 0x5df   :  { %4314 = vperm.xlu1 %8022, %v15311_v22  }
 0x5e0   :  { %15927 = vst [vmem:[#allocation49_spill] sm:$0xff] %v12551_v38  ;;  %v8809_v58 = vpop.eup %8808  ;;  %v15302_v27 = vmax.f32 %v12551_v38, 0.0 }
 0x5e1   :  { %v12557_v3 = vmul.f32 %v8809_v58, %v12437_v17  ;;  %v12569_v54 = vpop.permute.xlu0 %4263 }
 0x5e3   :  { %4320 = vperm.xlu1 %8022, %v15310_v59   ;;  %15928 = vst [vmem:[#allocation113_spill] sm:$0xff] %v12557_v3  ;;  %v8811_v7 = vpop.eup %8810  ;;  %v15301_v0 = vmax.f32 %v12557_v3, 0.0 }
 0x5e4   :  { %v12565_v39 = vmul.f32 %v8811_v7, %v12447_v48 }
 0x5e5   :  { %v12581_v20 = vpop.permute.xlu0 %4269 }
 0x5e6   :  { %15929 = vst [vmem:[#allocation51_spill] sm:$0xff] %v12565_v39  ;;  %v8813_v40 = vpop.eup %8812  ;;  %v15299_v17 = vmax.f32 %v12565_v39, 0.0 }
 0x5e7   :  { %4326 = vperm.xlu1 %8022, %v15309_v49   ;;  %v12573_v63 = vmul.f32 %v8813_v40, %v12453_v32  ;;  %v15936_v49 = vld [vmem:[#allocation94_spill] sm:$0xff] }
 0x5e8   :  { %v15937_v59 = vmax.f32 %v15936_v49, 0.0 }
 0x5e9   :  { %15930 = vst [vmem:[#allocation22_spill] sm:$0xff] %v12573_v63  ;;  %v8815_v56 = vpop.eup %8814  ;;  %v15300_v11 = vmax.f32 %v12573_v63, 0.0  ;;  %v12588_v32 = vpop.permute.xlu0 %4275 }
 0x5ea   :  { %v12579_v48 = vmul.f32 %v8815_v56, %v12469_v28 }
 0x5eb   :  { %4332 = vperm.xlu1 %8022, %v15308_v30  }
 0x5ec   :  { %15931 = vst [vmem:[#allocation53_spill] sm:$0xff] %v12579_v48  ;;  %v15303_v2 = vmax.f32 %v12579_v48, 0.0  ;;  %v15944_v48 = vld [vmem:[#allocation97_spill] sm:$0xff] }
 0x5ed   :  { %v12590_v58 = vpop.permute.xlu0 %4281  ;;  %v15945_v63 = vmax.f32 %v15944_v48, 0.0  ;;  %v15951_v48 = vld [vmem:[#allocation99_spill] sm:$0xff] }
 0x5ef   :  { %4338 = vperm.xlu1 %8022, %v15307_v62  }
 0x5f1   :  { %v12592_v7 = vpop.permute.xlu0 %4287 }
 0x5f3   :  { %4344 = vperm.xlu1 %8022, %v15306_v41  }
 0x5f5   :  { %v12594_v40 = vpop.permute.xlu0 %4293 }
 0x5f7   :  { %4350 = vperm.xlu1 %8022, %v15305_v25   ;;  %v15934_v25 = vld [vmem:[#allocation32_spill] sm:$0xff] }
 0x5f8   :  { %v15935_v41 = vmax.f32 %v15934_v25, 0.0 }
 0x5f9   :  { %v12596_v28 = vpop.permute.xlu0 %4299 }
 0x5fb   :  { %4356 = vperm.xlu1 %8022, %v15304_v8  }
 0x5ff   :  { %4362 = vperm.xlu1 %8022, %v15302_v27  }
 0x603   :  { %4368 = vperm.xlu1 %8022, %v15301_v0   ;;  %v15932_v0 = vld [vmem:[#allocation67_spill] sm:$0xff] }
 0x607   :  { %4374 = vperm.xlu1 %8022, %v15299_v17   ;;  %v12600_v17 = vpop.permute.xlu0 %4305 }
 0x60b   :  { %4380 = vperm.xlu1 %8022, %v15300_v11   ;;  %v12610_v8 = vpop.permute.xlu0 %4311 }
 0x60f   :  { %4386 = vperm.xlu1 %8022, %v15303_v2   ;;  %v12620_v45 = vpop.permute.xlu0 %4317 }
 0x613   :  { %v12633_v23 = vpop.permute.xlu0 %4323 }
 0x617   :  { %v12643_v53 = vpop.permute.xlu0 %4329 }
 0x62b   :  { %v12598_v56 = vpop.xlane.xlu1 %4891 }
 0x62c   :  { %v12606_v27 = vrot.slane %v12598_v56, %v15932_v0  ;;  %v12626_v46 = vrot.slane %v12598_v56, %v15938_v13 }
 0x62e   :  { %15933 = vst [vmem:[#allocation28_spill] sm:$0xff] %v12606_v27  ;;  %v4979_v62 = vsub.f32 %v15935_v41, %v12606_v27  ;;  %v4980_v22 = vsub.f32 %v15937_v59, %v12606_v27  ;;  %15939 = vst [vmem:[#allocation128_spill] sm:$0xff] %v12626_v46  ;;  %v4982_v25 = vsub.f32 %v15941_v5, %v12606_v27  ;;  %v15942_v59 = vld [vmem:[#allocation96_spill] sm:$0xff] }
 0x62f   :  { %v12602_v11 = vpop.permute.xlu1 %4248  ;;  %v15943_v49 = vmax.f32 %v15942_v59, 0.0  ;;  %v4986_v39 = vsub.f32 %v15945_v63, %v12626_v46  ;;  %v15948_v59 = vld [vmem:[#allocation101_spill] sm:$0xff]  ;;  %v12659_v63 = vpop.permute.xlu0 %4335  ;;  %v15999_v27 = vld [vmem:[#allocation12_spill] sm:$0xff] }
 0x630   :  { %v5076_v50 = vmul.f32 1.442695, %v4979_v62  ;;  %v5078_v41 = vmul.f32 1.442695, %v4980_v22  ;;  %v5082_v34 = vmul.f32 1.442695, %v4982_v25 }
 0x631   :  { %v4984_v62 = vsub.f32 %v15943_v49, %v12626_v46  ;;  %v15946_v22 = vld [vmem:[#allocation69_spill] sm:$0xff]  ;;  %v5090_v49 = vmul.f32 1.442695, %v4986_v39  ;;  %v15954_v39 = vld [vmem:[#allocation104_spill] sm:$0xff] }
 0x632   :  { %8816 = vpow2.f32 %v5076_v50  ;;  %v12649_v3 = vrot.slane %v12598_v56, %v15946_v22 }
 0x633   :  { %v12608_v2 = vpop.permute.xlu1 %4254  ;;  %8818 = vpow2.f32 %v5078_v41  ;;  %v5086_v5 = vmul.f32 1.442695, %v4984_v62  ;;  %v15949_v41 = vmax.f32 %v15948_v59, 0.0  ;;  %v15952_v62 = vmax.f32 %v15951_v48, 0.0  ;;  %v12674_v24 = vpop.permute.xlu0 %4341 }
 0x634   :  { %8820 = vpow2.f32 %v5082_v34  ;;  %15947 = vst [vmem:[#allocation48_spill] sm:$0xff] %v12649_v3  ;;  %v15955_v59 = vmax.f32 %v15954_v39, 0.0 }
 0x635   :  { %v4988_v25 = vsub.f32 %v15949_v41, %v12626_v46  ;;  %8822 = vpow2.f32 %v5086_v5  ;;  %v4990_v31 = vsub.f32 %v15952_v62, %v12649_v3  ;;  %v15959_v62 = vld [vmem:[#allocation102_spill] sm:$0xff] }
 0x636   :  { %8824 = vpow2.f32 %v5090_v49  ;;  %v4992_v41 = vsub.f32 %v15955_v59, %v12649_v3 }
 0x637   :  { %v12615_v30 = vpop.permute.xlu1 %4260  ;;  %v5094_v52 = vmul.f32 1.442695, %v4988_v25  ;;  %v15957_v25 = vld [vmem:[#allocation70_spill] sm:$0xff]  ;;  %v12691_v59 = vpop.permute.xlu0 %4347 }
 0x638   :  { %v12681_v48 = vrot.slane %v12598_v56, %v15957_v25  ;;  %v5102_v39 = vmul.f32 1.442695, %v4992_v41 }
 0x639   :  { %8826 = vpow2.f32 %v5094_v52 }
 0x63a   :  { %15958 = vst [vmem:[#allocation26_spill] sm:$0xff] %v12681_v48 }
 0x63b   :  { %v12622_v44 = vpop.permute.xlu1 %4266  ;;  %v12706_v36 = vpop.permute.xlu0 %4353 }
 0x63c   :  { %15968 = vst [vmem:[#allocation116_spill] sm:$0xff] %v12706_v36  ;;  %v4667_v46 = vrot.slane %v12622_v44, %v12114_v61 }
 0x63f   :  { %v12631_v10 = vpop.permute.xlu1 %4272  ;;  %v12654_v38 = vpop.eup %8816 }
 0x640   :  { %15950 = vst [vmem:[#allocation55_spill] sm:$0xff] %v12654_v38  ;;  %5366 = vperm.xlu1 %8022, %v12654_v38   ;;  %v12664_v26 = vpop.eup %8818  ;;  %v5098_v38 = vmul.f32 1.442695, %v4990_v31 }
 0x641   :  { %15953 = vst [vmem:[#allocation21_spill] sm:$0xff] %v12664_v26  ;;  %v12672_v4 = vpop.eup %8820 }
 0x642   :  { %15956 = vst [vmem:[#allocation109_spill] sm:$0xff] %v12672_v4  ;;  %8828 = vpow2.f32 %v5098_v38  ;;  %v12686_v52 = vpop.eup %8822  ;;  %v15965_v38 = vld [vmem:[#allocation107_spill] sm:$0xff] }
 0x643   :  { %v12638_v29 = vpop.permute.xlu1 %4278  ;;  %15961 = vst [vmem:[#allocation95_spill] sm:$0xff] %v12686_v52  ;;  %8830 = vpow2.f32 %v5102_v39  ;;  %v12696_v6 = vpop.eup %8824  ;;  %v15966_v41 = vmax.f32 %v15965_v38, 0.0  ;;  %v15971_v39 = vld [vmem:[#allocation19_spill] sm:$0xff] }
 0x644   :  { %5369 = vperm.xlu1 %8022, %v12664_v26   ;;  %v15960_v26 = vmax.f32 %v15959_v62, 0.0  ;;  %15964 = vst [vmem:[#allocation23_spill] sm:$0xff] %v12696_v6 }
 0x645   :  { %v4998_v62 = vsub.f32 %v15966_v41, %v12681_v48  ;;  %v12723_v41 = vpop.permute.xlu0 %4359 }
 0x646   :  { %v4994_v15 = vsub.f32 %v15960_v26, %v12649_v3  ;;  %v12704_v37 = vpop.eup %8826 }
 0x647   :  { %v12645_v50 = vpop.permute.xlu1 %4284  ;;  %15967 = vst [vmem:[#allocation25_spill] sm:$0xff] %v12704_v37  ;;  %v5114_v38 = vmul.f32 1.442695, %v4998_v62 }
 0x648   :  { %5375 = vperm.xlu1 %8022, %v12672_v4   ;;  %v15962_v4 = vld [vmem:[#allocation108_spill] sm:$0xff]  ;;  %v5106_v43 = vmul.f32 1.442695, %v4994_v15  ;;  %v15969_v15 = vld [vmem:[#allocation71_spill] sm:$0xff] }
 0x649   :  { %v15963_v33 = vmax.f32 %v15962_v4, 0.0  ;;  %v12713_v4 = vrot.slane %v12598_v56, %v15969_v15  ;;  %v12738_v42 = vpop.permute.xlu0 %4365 }
 0x64a   :  { %8832 = vpow2.f32 %v5106_v43 }
 0x64b   :  { %v12657_v34 = vpop.permute.xlu1 %4290  ;;  %v4996_v47 = vsub.f32 %v15963_v33, %v12681_v48  ;;  %15970 = vst [vmem:[#allocation66_spill] sm:$0xff] %v12713_v4 }
 0x64c   :  { %5381 = vperm.xlu1 %8022, %v12686_v52   ;;  %v4705_v36 = vrot.slane %v12657_v34, %v12123_v16 }
 0x64d   :  { %v5110_v52 = vmul.f32 1.442695, %v4996_v47 }
 0x64f   :  { %v12667_v5 = vpop.permute.xlu1 %4296  ;;  %8834 = vpow2.f32 %v5110_v52  ;;  %v12718_v43 = vpop.eup %8828  ;;  %v15977_v52 = vld [vmem:[#allocation82_spill] sm:$0xff] }
 0x650   :  { %5387 = vperm.xlu1 %8022, %v12696_v6   ;;  %v15972_v6 = vmax.f32 %v15971_v39, 0.0  ;;  %15973 = vst [vmem:[#allocation80_spill] sm:$0xff] %v12718_v43  ;;  %8836 = vpow2.f32 %v5114_v38  ;;  %v12728_v12 = vpop.eup %8830  ;;  %v15978_v62 = vmax.f32 %v15977_v52, 0.0  ;;  %v15982_v38 = vld [vmem:[#allocation54_spill] sm:$0xff] }
 0x651   :  { %15976 = vst [vmem:[#allocation122_spill] sm:$0xff] %v12728_v12 }
 0x652   :  { %v5000_v55 = vsub.f32 %v15972_v6, %v12681_v48  ;;  %v5004_v39 = vsub.f32 %v15978_v62, %v12713_v4  ;;  %v12755_v62 = vpop.permute.xlu0 %4371  ;;  %v15994_v48 = vld [vmem:[#allocation77_spill] sm:$0xff] }
 0x653   :  { %v12677_v49 = vpop.permute.xlu1 %4302 }
 0x654   :  { %5393 = vperm.xlu1 %8022, %v12704_v37   ;;  %v15974_v37 = vld [vmem:[#allocation18_spill] sm:$0xff]  ;;  %v5118_v19 = vmul.f32 1.442695, %v5000_v55  ;;  %v15980_v55 = vld [vmem:[#allocation72_spill] sm:$0xff]  ;;  %v5126_v52 = vmul.f32 1.442695, %v5004_v39 }
 0x655   :  { %v15975_v9 = vmax.f32 %v15974_v37, 0.0  ;;  %v12745_v37 = vrot.slane %v12598_v56, %v15980_v55  ;;  %v15985_v55 = vld [vmem:[#allocation20_spill] sm:$0xff] }
 0x656   :  { %8838 = vpow2.f32 %v5118_v19  ;;  %v15986_v25 = vmax.f32 %v15985_v55, 0.0  ;;  %v4647_v55 = vrot.slane %v12608_v2, %v12123_v16 }
 0x657   :  { %v12689_v31 = vpop.permute.xlu1 %4308  ;;  %v5002_v35 = vsub.f32 %v15975_v9, %v12713_v4  ;;  %v12736_v18 = vpop.eup %8832  ;;  %15981 = vst [vmem:[#allocation94_spill] sm:$0xff] %v12745_v37 }
 0x658   :  { %5399 = vperm.xlu1 %8022, %v12718_v43   ;;  %15979 = vst [vmem:[#allocation32_spill] sm:$0xff] %v12736_v18  ;;  %v5008_v22 = vsub.f32 %v15986_v25, %v12745_v37  ;;  %v4700_v25 = vrot.slane %v12592_v7, %v12118_v21  ;;  %v15988_v7 = vld [vmem:[#allocation76_spill] sm:$0xff]  ;;  %v4734_v34 = vrot.slane %v12689_v31, %v12123_v16 }
 0x659   :  { %v5122_v43 = vmul.f32 1.442695, %v5002_v35 }
 0x65a   :  { %v5134_v0 = vmul.f32 1.442695, %v5008_v22  ;;  %v15995_v22 = vmax.f32 %v15994_v48, 0.0 }
 0x65b   :  { %v12699_v26 = vpop.permute.xlu1 %4314  ;;  %8840 = vpow2.f32 %v5122_v43  ;;  %v4652_v43 = vrot.slane %v12559_v57, %v12126_v60  ;;  %v4638_v57 = vrot.slane %v12602_v11, %v12114_v61  ;;  %v4816_v11 = vrot.slane %v12723_v41, %v12118_v21 }
 0x65c   :  { %5405 = vperm.xlu1 %8022, %v12728_v12   ;;  %v15983_v12 = vmax.f32 %v15982_v38, 0.0  ;;  %v12750_v19 = vpop.eup %8834  ;;  %8842 = vpow2.f32 %v5126_v52 }
 0x65d   :  { %15984 = vst [vmem:[#allocation42_spill] sm:$0xff] %v12750_v19 }
 0x65e   :  { %v5006_v15 = vsub.f32 %v15983_v12, %v12713_v4  ;;  %v12762_v12 = vpop.eup %8836  ;;  %v12806_v4 = vpop.permute.xlu0 %4377 }
 0x65f   :  { %v12709_v33 = vpop.permute.xlu1 %4320  ;;  %15987 = vst [vmem:[#allocation96_spill] sm:$0xff] %v12762_v12 }
 0x660   :  { %5411 = vperm.xlu1 %8022, %v12736_v18   ;;  %v4642_v18 = vrot.slane %v12547_v1, %v12118_v21  ;;  %v5130_v38 = vmul.f32 1.442695, %v5006_v15  ;;  %v12791_v1 = vrot.slane %v12598_v56, %v15988_v7  ;;  %v15989_v15 = vld [vmem:[#allocation44_spill] sm:$0xff] }
 0x662   :  { %8844 = vpow2.f32 %v5130_v38  ;;  %v5014_v3 = vsub.f32 %v15995_v22, %v12791_v1  ;;  %v12840_v38 = vrot.slane %v12598_v56, %v15999_v27  ;;  %v4643_v48 = vsel %vm4402_vm3, %v4642_v18, %v4638_v57 }
 0x663   :  { %v12721_v47 = vpop.permute.xlu1 %4326  ;;  %8846 = vpow2.f32 %v5134_v0  ;;  %v4676_v22 = vrot.slane %v12631_v10, %v12123_v16  ;;  %v16000_v0 = vld [vmem:[#allocation50_spill] sm:$0xff]  ;;  %v4648_v44 = vsel %vm4409_vm4, %v4647_v55, %v4643_v48  ;;  %v4657_v10 = vrot.slane %v12615_v30, %v12130_v14 }
 0x664   :  { %5417 = vperm.xlu1 %8022, %v12750_v19   ;;  %v4671_v19 = vrot.slane %v12581_v20, %v12118_v21  ;;  %v4729_v20 = vrot.slane %v12600_v17, %v12118_v21  ;;  %v12798_v17 = vpop.eup %8838  ;;  %v5146_v18 = vmul.f32 1.442695, %v5014_v3  ;;  %v4653_v3 = vsel %vm4416_vm5, %v4652_v43, %v4648_v44 }
 0x665   :  { %15991 = vst [vmem:[#allocation97_spill] sm:$0xff] %v12798_v17  ;;  %v4658_v43 = vsel %vm4423_vm6, %v4657_v10, %v4653_v3 }
 0x667   :  { %v12731_v6 = vpop.permute.xlu1 %4332 }
 0x668   :  { %5423 = vperm.xlu1 %8022, %v12762_v12   ;;  %v15990_v12 = vmax.f32 %v15989_v15, 0.0  ;;  %v12836_v41 = vpop.eup %8840  ;;  %v4773_v10 = vrot.slane %v12731_v6, %v12130_v14 }
 0x669   :  { %15998 = vst [vmem:[#allocation101_spill] sm:$0xff] %v12836_v41  ;;  %v12863_v55 = vpop.eup %8842 }
 0x66a   :  { %v5010_v13 = vsub.f32 %v15990_v12, %v12745_v37  ;;  %v15992_v12 = vld [vmem:[#allocation36_spill] sm:$0xff]  ;;  %16002 = vst [vmem:[#allocation99_spill] sm:$0xff] %v12863_v55 }
 0x66b   :  { %v12741_v9 = vpop.permute.xlu1 %4338  ;;  %v15993_v15 = vmax.f32 %v15992_v12, 0.0  ;;  %v15996_v12 = vld [vmem:[#allocation56_spill] sm:$0xff] }
 0x66c   :  { %5429 = vperm.xlu1 %8022, %v12798_v17   ;;  %v5138_v17 = vmul.f32 1.442695, %v5010_v13  ;;  %v16001_v13 = vmax.f32 %v16000_v0, 0.0  ;;  %v4672_v0 = vsel %vm4402_vm3, %v4671_v19, %v4667_v46  ;;  %v4715_v46 = vrot.slane %v12667_v5, %v12130_v14 }
 0x66d   :  { %v5012_v39 = vsub.f32 %v15993_v15, %v12745_v37  ;;  %v15997_v15 = vmax.f32 %v15996_v12, 0.0  ;;  %v4696_v12 = vrot.slane %v12645_v50, %v12114_v61  ;;  %v4725_v50 = vrot.slane %v12677_v49, %v12114_v61 }
 0x66e   :  { %8848 = vpow2.f32 %v5138_v17  ;;  %v4754_v49 = vrot.slane %v12709_v33, %v12114_v61  ;;  %v4783_v31 = vrot.slane %v12741_v9, %v12114_v61  ;;  %v16003_v5 = vrot.slane %v12588_v32, %v12126_v60 }
 0x66f   :  { %v12753_v35 = vpop.permute.xlu1 %4344  ;;  %v5016_v37 = vsub.f32 %v15997_v15, %v12791_v1  ;;  %v5018_v15 = vsub.f32 %v16001_v13, %v12791_v1  ;;  %v5142_v2 = vmul.f32 1.442695, %v5012_v39  ;;  %v4686_v39 = vrot.slane %v12638_v29, %v12130_v14 }
 0x670   :  { %5435 = vperm.xlu1 %8022, %v12836_v41   ;;  %v4701_v30 = vsel %vm4402_vm3, %v4700_v25, %v4696_v12  ;;  %v4763_v29 = vrot.slane %v12721_v47, %v12123_v16  ;;  %v4730_v25 = vsel %vm4402_vm3, %v4729_v20, %v4725_v50  ;;  %v4792_v33 = vrot.slane %v12753_v35, %v12123_v16  ;;  %v4384_v12 = vpop.permute.xlu0 %4383 }
 0x671   :  { %v5150_v57 = vmul.f32 1.442695, %v5016_v37  ;;  %v4677_v37 = vsel %vm4409_vm4, %v4676_v22, %v4672_v0  ;;  %v4706_v17 = vsel %vm4409_vm4, %v4705_v36, %v4701_v30  ;;  %8850 = vpow2.f32 %v5142_v2  ;;  %v12890_v22 = vpop.eup %8844 }
 0x672   :  { %v4682_v47 = vsel %vm4416_vm5, %v16003_v5, %v4677_v37  ;;  %v4735_v9 = vsel %vm4409_vm4, %v4734_v34, %v4730_v25  ;;  %16004 = vst [vmem:[#allocation104_spill] sm:$0xff] %v12890_v22  ;;  %v16005_v35 = vrot.slane %v12594_v40, %v12126_v60  ;;  %v4744_v2 = vrot.slane %v12699_v26, %v12130_v14  ;;  %v12923_v30 = vpop.eup %8846 }
 0x673   :  { %v12781_v52 = vpop.permute.xlu1 %4350  ;;  %v4687_v20 = vsel %vm4423_vm6, %v4686_v39, %v4682_v47  ;;  %v16006_v32 = vrot.slane %v12633_v23, %v12118_v21  ;;  %v16007_v40 = vrot.slane %v12674_v24, %v12118_v21  ;;  %v16008_v23 = vrot.slane %v12610_v8, %v12126_v60  ;;  %16009 = vst [vmem:[#allocation102_spill] sm:$0xff] %v12923_v30  ;;  %v16010_v8 = vld [vmem:[#allocation110_spill] sm:$0xff] }
 0x674   :  { %5441 = vperm.xlu1 %8022, %v12863_v55   ;;  %v4802_v34 = vrot.slane %v12781_v52, %v12130_v14  ;;  %8852 = vpow2.f32 %v5146_v18  ;;  %v16012_v52 = vrot.slane %v12643_v53, %v12126_v60  ;;  %v16013_v18 = vrot.slane %v12569_v54, %v12133_v51  ;;  %v4390_v5 = vpop.permute.xlu0 %4389 }
 0x675   :  { %v4759_v13 = vsel %vm4402_vm3, %v16006_v32, %v4754_v49  ;;  %v4788_v50 = vsel %vm4402_vm3, %v16007_v40, %v4783_v31  ;;  %v4740_v0 = vsel %vm4416_vm5, %v16008_v23, %v4735_v9  ;;  %v16011_v49 = vmax.f32 %v16010_v8, 0.0 }
 0x676   :  { %v4793_v39 = vsel %vm4409_vm4, %v4792_v33, %v4788_v50  ;;  %v4663_v31 = vsel %vm4430_vm7, %v16013_v18, %v4658_v43  ;;  %v16016_v54 = vrot.slane %v12596_v28, %v12133_v51  ;;  %v16017_v47 = vrot.slane %v12738_v42, %v12126_v60 }
 0x677   :  { %v12820_v7 = vpop.permute.xlu1 %4356  ;;  %8854 = vpow2.f32 %v5150_v57  ;;  %v16019_v28 = vrot.slane %v12806_v4, %v12118_v21  ;;  %v4836_v42 = vrot.slane %v12755_v62, %v12133_v51  ;;  %v16021_v57 = vrot.slane %v12659_v63, %v12133_v51  ;;  %v16024_v63 = vld [vmem:[#allocation111_spill] sm:$0xff] }
 0x678   :  { %v4812_v36 = vrot.slane %v12820_v7, %v12114_v61  ;;  %v4711_v7 = vsel %vm4416_vm5, %v16005_v35, %v4706_v17  ;;  %5447 = vperm.xlu1 %8022, %v12890_v22   ;;  %v5020_v17 = vsub.f32 %v16011_v49, %v12840_v38  ;;  %v4865_v4 = vrot.slane %v4390_v5, %v12133_v51 }
 0x679   :  { %v4716_v44 = vsel %vm4423_vm6, %v4715_v46, %v4711_v7  ;;  %v5154_v46 = vmul.f32 1.442695, %v5018_v15  ;;  %v16015_v15 = vrot.slane %v12691_v59, %v12126_v60 }
 0x67a   :  { %v4817_v6 = vsel %vm4402_vm3, %v4816_v11, %v4812_v36  ;;  %v4721_v43 = vsel %vm4430_vm7, %v16016_v54, %v4716_v44  ;;  %v4855_v44 = vrot.slane %v4384_v12, %v12126_v60  ;;  %v16034_v54 = vld [vmem:[#allocation74_spill] sm:$0xff] }
 0x67b   :  { %v4363_v56 = vpop.permute.xlu1 %4362  ;;  %v4798_v36 = vsel %vm4416_vm5, %v16015_v15, %v4793_v39  ;;  %8856 = vpow2.f32 %v5154_v46 }
 0x67c   :  { %v4821_v48 = vrot.slane %v4363_v56, %v12123_v16  ;;  %v4764_v56 = vsel %vm4409_vm4, %v4763_v29, %v4759_v13  ;;  %v4745_v29 = vsel %vm4423_vm6, %v4744_v2, %v4740_v0  ;;  %5453 = vperm.xlu1 %8022, %v12923_v30   ;;  %v12966_v2 = vpop.eup %8848 }
 0x67d   :  { %v4769_v11 = vsel %vm4416_vm5, %v16012_v52, %v4764_v56  ;;  %16020 = vst [vmem:[#allocation108_spill] sm:$0xff] %v12966_v2 }
 0x67e   :  { %v4822_v24 = vsel %vm4409_vm4, %v4821_v48, %v4817_v6  ;;  %v4774_v33 = vsel %vm4423_vm6, %v4773_v10, %v4769_v11  ;;  %v16018_v48 = vrot.slane %v12620_v45, %v12133_v51  ;;  %v16022_v10 = vld [vmem:[#allocation116_spill] sm:$0xff] }
 0x67f   :  { %v4369_v19 = vpop.permute.xlu1 %4368  ;;  %v4827_v9 = vsel %vm4416_vm5, %v16017_v47, %v4822_v24  ;;  %v4779_v45 = vsel %vm4430_vm7, %v16021_v57, %v4774_v33  ;;  %v16023_v40 = vrot.slane %v16022_v10, %v12133_v51  ;;  %v16031_v33 = vld [vmem:[#allocation73_spill] sm:$0xff] }
 0x680   :  { %v4831_v3 = vrot.slane %v4369_v19, %v12130_v14  ;;  %v16014_v19 = vrot.slane %v12590_v58, %v12133_v51  ;;  %v4803_v58 = vsel %vm4423_vm6, %v4802_v34, %v4798_v36  ;;  %5459 = vperm.xlu1 %8022, %v12966_v2   ;;  %v5158_v34 = vmul.f32 1.442695, %v5020_v17  ;;  %v16027_v17 = vld [vmem:[#allocation60_spill] sm:$0xff] }
 0x681   :  { %v4808_v62 = vsel %vm4430_vm7, %v16023_v40, %v4803_v58  ;;  %v16028_v46 = vmax.f32 %v16027_v17, 0.0  ;;  %v16032_v15 = vmax.f32 %v16031_v33, 0.0  ;;  %v16057_v17 = vld [vmem:[#allocation100_spill] sm:$0xff]  ;;  %v16061_v33 = vld [vmem:[#allocation87_spill] sm:$0xff] }
 0x682   :  { %v4692_v25 = vsel %vm4430_vm7, %v16014_v19, %v4687_v20  ;;  %v4750_v20 = vsel %vm4430_vm7, %v16018_v48, %v4745_v29  ;;  %v4832_v35 = vsel %vm4423_vm6, %v4831_v3, %v4827_v9  ;;  %v12992_v3 = vpop.eup %8850  ;;  %8858 = vpow2.f32 %v5158_v34 }
 0x683   :  { %v4375_v26 = vpop.permute.xlu1 %4374  ;;  %v4881_v32 = vsel %vm4867_vm8, %v4692_v25, %v4663_v31  ;;  %v4837_v39 = vsel %vm4430_vm7, %v4836_v42, %v4832_v35  ;;  %16026 = vst [vmem:[#allocation107_spill] sm:$0xff] %v12992_v3  ;;  %v5024_v11 = vsub.f32 %v16028_v46, %v12840_v38  ;;  %v13004_v19 = vpop.eup %8852  ;;  %v16030_v25 = vld [vmem:[#allocation28_spill] sm:$0xff]  ;;  %v16041_v42 = vld [vmem:[#allocation38_spill] sm:$0xff]  ;;  %v16058_v46 = vmax.f32 %v16057_v17, 0.0 }
 0x684   :  { %v4841_v37 = vrot.slane %v4375_v26, %v12114_v61  ;;  %v4882_v56 = vsel %vm4869_vm9, %v4721_v43, %v4881_v32  ;;  %v16025_v26 = vmax.f32 %v16024_v63, 0.0  ;;  %5465 = vperm.xlu1 %8022, %v12992_v3   ;;  %16029 = vst [vmem:[#allocation19_spill] sm:$0xff] %v13004_v19  ;;  %v4978_v36 = vsub.f32 %v16032_v15, %v16030_v25  ;;  %v13010_v5 = vpop.eup %8854 }
 0x685   :  { %v4883_v0 = vsel %vm4871_vm10, %v4750_v20, %v4882_v56  ;;  %16033 = vst [vmem:[#allocation18_spill] sm:$0xff] %v13010_v5  ;;  %v16035_v43 = vmax.f32 %v16034_v54, 0.0  ;;  %v16042_v32 = vmax.f32 %v16041_v42, 0.0  ;;  %v16062_v15 = vmax.f32 %v16061_v33, 0.0 }
 0x686   :  { %v4846_v7 = vsel %vm4402_vm3, %v16019_v28, %v4841_v37  ;;  %v5022_v23 = vsub.f32 %v16025_v26, %v12840_v38  ;;  %v4884_v24 = vsel %vm4873_vm11, %v4779_v45, %v4883_v0  ;;  %v5074_v47 = vmul.f32 1.442695, %v4978_v36  ;;  %v16050_v0 = vld [vmem:[#allocation48_spill] sm:$0xff] }
 0x687   :  { %v4381_v53 = vpop.permute.xlu1 %4380  ;;  %v4885_v8 = vsel %vm4875_vm12, %v4808_v62, %v4884_v24  ;;  %v4981_v58 = vsub.f32 %v16035_v43, %v16030_v25  ;;  %v16047_v62 = vld [vmem:[#allocation98_spill] sm:$0xff]  ;;  %v16064_v43 = vld [vmem:[#allocation88_spill] sm:$0xff] }
 0x688   :  { %v4850_v59 = vrot.slane %v4381_v53, %v12123_v16  ;;  %v4886_v29 = vsel %vm4877_vm13, %v4837_v39, %v4885_v8  ;;  %v5162_v18 = vmul.f32 1.442695, %v5022_v23  ;;  %5471 = vperm.xlu1 %8022, %v13004_v19   ;;  %v5166_v53 = vmul.f32 1.442695, %v5024_v11  ;;  %v13016_v9 = vpop.eup %8856 }
 0x689   :  { %16036 = vst [vmem:[#allocation82_spill] sm:$0xff] %v13016_v9  ;;  %v5080_v35 = vmul.f32 1.442695, %v4981_v58  ;;  %v4995_v11 = vsub.f32 %v16058_v46, %v16050_v0  ;;  %v16065_v58 = vmax.f32 %v16064_v43, 0.0 }
 0x68a   :  { %v4851_v13 = vsel %vm4409_vm4, %v4850_v59, %v4846_v7  ;;  %8860 = vpow2.f32 %v5162_v18  ;;  %v16037_v59 = vld [vmem:[#allocation81_spill] sm:$0xff]  ;;  %v16040_v7 = vld [vmem:[#allocation128_spill] sm:$0xff] }
 0x68b   :  { %v4387_v50 = vpop.permute.xlu1 %4386  ;;  %v4856_v6 = vsel %vm4416_vm5, %v4855_v44, %v4851_v13  ;;  %8862 = vpow2.f32 %v5166_v53  ;;  %v16038_v48 = vmax.f32 %v16037_v59, 0.0  ;;  %v4985_v57 = vsub.f32 %v16042_v32, %v16040_v7  ;;  %v16044_v44 = vld [vmem:[#allocation119_spill] sm:$0xff] }
 0x68c   :  { %v4860_v12 = vrot.slane %v4387_v50, %v12130_v14  ;;  %5477 = vperm.xlu1 %8022, %v13010_v5   ;;  %8864 = vpow2.f32 %v5074_v47  ;;  %v16048_v50 = vmax.f32 %v16047_v62, 0.0  ;;  %v5108_v53 = vmul.f32 1.442695, %v4995_v11  ;;  %v16074_v62 = vld [vmem:[#allocation90_spill] sm:$0xff] }
 0x68d   :  { %v4983_v20 = vsub.f32 %v16038_v48, %v16030_v25  ;;  %8866 = vpow2.f32 %v5080_v35  ;;  %v5088_v10 = vmul.f32 1.442695, %v4985_v57  ;;  %v16060_v25 = vld [vmem:[#allocation26_spill] sm:$0xff] }
 0x68e   :  { %v4861_v37 = vsel %vm4423_vm6, %v4860_v12, %v4856_v6  ;;  %v4989_v63 = vsub.f32 %v16048_v50, %v16040_v7  ;;  %v16051_v12 = vld [vmem:[#allocation84_spill] sm:$0xff]  ;;  %v4997_v36 = vsub.f32 %v16062_v15, %v16060_v25  ;;  %v4999_v47 = vsub.f32 %v16065_v58, %v16060_v25  ;;  %v16070_v57 = vld [vmem:[#allocation66_spill] sm:$0xff] }
 0x68f   :  { %v4866_v49 = vsel %vm4430_vm7, %v4865_v4, %v4861_v37  ;;  %v13022_v28 = vpop.eup %8858  ;;  %v5084_v45 = vmul.f32 1.442695, %v4983_v20  ;;  %v16045_v4 = vmax.f32 %v16044_v44, 0.0  ;;  %v16052_v39 = vmax.f32 %v16051_v12, 0.0  ;;  %v16054_v37 = vld [vmem:[#allocation89_spill] sm:$0xff]  ;;  %v16067_v20 = vld [vmem:[#allocation91_spill] sm:$0xff] }
 0x690   :  { %v4887_v52 = vsel %vm4879_vm14, %v4866_v49, %v4886_v29  ;;  %5483 = vperm.xlu1 %8022, %v13016_v9   ;;  %16039 = vst [vmem:[#allocation54_spill] sm:$0xff] %v13022_v28  ;;  %v5096_v6 = vmul.f32 1.442695, %v4989_v63  ;;  %v16055_v8 = vmax.f32 %v16054_v37, 0.0  ;;  %v5112_v59 = vmul.f32 1.442695, %v4997_v36 }
 0x691   :  { %v4893_v31 = vsel %vm1989_vm2, %v4887_v52, -inf  ;;  %v4987_v56 = vsub.f32 %v16045_v4, %v16040_v7  ;;  %8868 = vpow2.f32 %v5084_v45  ;;  %v4991_v34 = vsub.f32 %v16052_v39, %v16050_v0  ;;  %v16071_v45 = vld [vmem:[#allocation92_spill] sm:$0xff]  ;;  %v16077_v12 = vld [vmem:[#allocation93_spill] sm:$0xff] }
 0x692   :  { %4894 = vmax.xlane.f32.xlu0 %v4893_v31  ;;  %8870 = vpow2.f32 %v5088_v10  ;;  %v4993_v49 = vsub.f32 %v16055_v8, %v16050_v0  ;;  %v16068_v35 = vmax.f32 %v16067_v20, 0.0  ;;  %v5116_v42 = vmul.f32 1.442695, %v4999_v47  ;;  %v16080_v8 = vld [vmem:[#allocation94_spill] sm:$0xff]  ;;  %v16090_v20 = vld [vmem:[#allocation24_spill] sm:$0xff] }
 0x693   :  { %v5092_v26 = vmul.f32 1.442695, %v4987_v56  ;;  %v5100_v29 = vmul.f32 1.442695, %v4991_v34  ;;  %v16072_v44 = vmax.f32 %v16071_v45, 0.0  ;;  %v16075_v50 = vmax.f32 %v16074_v62, 0.0 }
 0x694   :  { %5489 = vperm.xlu1 %8022, %v13022_v28   ;;  %v5104_v18 = vmul.f32 1.442695, %v4993_v49  ;;  %v5001_v7 = vsub.f32 %v16068_v35, %v16060_v25  ;;  %v16078_v39 = vmax.f32 %v16077_v12, 0.0  ;;  %v16081_v49 = vld [vmem:[#allocation52_spill] sm:$0xff]  ;;  %v16091_v35 = vmax.f32 %v16090_v20, 0.0  ;;  %v16093_v45 = vld [vmem:[#allocation118_spill] sm:$0xff] }
 0x695   :  { %8872 = vpow2.f32 %v5092_v26  ;;  %v5003_v4 = vsub.f32 %v16072_v44, %v16070_v57  ;;  %v5005_v63 = vsub.f32 %v16075_v50, %v16070_v57  ;;  %v16094_v44 = vmax.f32 %v16093_v45, 0.0  ;;  %v16096_v50 = vld [vmem:[#allocation30_spill] sm:$0xff] }
 0x696   :  { %8874 = vpow2.f32 %v5096_v6  ;;  %v5120_v56 = vmul.f32 1.442695, %v5001_v7  ;;  %v5007_v34 = vsub.f32 %v16078_v39, %v16070_v57  ;;  %v5015_v7 = vsub.f32 %v16091_v35, %v12791_v1 }
 0x697   :  { %v13028_v13 = vpop.eup %8860  ;;  %8876 = vpow2.f32 %v5100_v29  ;;  %v5124_v26 = vmul.f32 1.442695, %v5003_v4  ;;  %v5128_v6 = vmul.f32 1.442695, %v5005_v63  ;;  %v16082_v29 = vmax.f32 %v16081_v49, 0.0 }
 0x698   :  { %16043 = vst [vmem:[#allocation20_spill] sm:$0xff] %v13028_v13  ;;  %5495 = vperm.xlu1 %8022, %v13028_v13   ;;  %v13034_v40 = vpop.eup %8862  ;;  %8878 = vpow2.f32 %v5104_v18  ;;  %v5132_v46 = vmul.f32 1.442695, %v5007_v34  ;;  %v16084_v18 = vld [vmem:[#allocation117_spill] sm:$0xff]  ;;  %v5017_v4 = vsub.f32 %v16094_v44, %v12791_v1  ;;  %v16097_v63 = vmax.f32 %v16096_v50, 0.0  ;;  %v16099_v34 = vld [vmem:[#allocation34_spill] sm:$0xff] }
 0x699   :  { %16046 = vst [vmem:[#allocation44_spill] sm:$0xff] %v13034_v40  ;;  %v13039_v23 = vpop.eup %8864  ;;  %8880 = vpow2.f32 %v5108_v53  ;;  %v5009_v17 = vsub.f32 %v16082_v29, %v16080_v8  ;;  %v16085_v25 = vmax.f32 %v16084_v18, 0.0  ;;  %v16087_v53 = vld [vmem:[#allocation112_spill] sm:$0xff] }
 0x69a   :  { %16049 = vst [vmem:[#allocation36_spill] sm:$0xff] %v13039_v23  ;;  %v13046_v24 = vpop.eup %8866  ;;  %8882 = vpow2.f32 %v5112_v59  ;;  %v16088_v43 = vmax.f32 %v16087_v53, 0.0  ;;  %v5152_v12 = vmul.f32 1.442695, %v5017_v4  ;;  %v16105_v53 = vld [vmem:[#allocation58_spill] sm:$0xff] }
 0x69b   :  { %16053 = vst [vmem:[#allocation77_spill] sm:$0xff] %v13046_v24  ;;  %8884 = vpow2.f32 %v5116_v42  ;;  %v5011_v33 = vsub.f32 %v16085_v25, %v16080_v8  ;;  %v5136_v15 = vmul.f32 1.442695, %v5009_v17 }
 0x69c   :  { %5501 = vperm.xlu1 %8022, %v13034_v40   ;;  %8886 = vpow2.f32 %v5120_v56  ;;  %v5013_v58 = vsub.f32 %v16088_v43, %v16080_v8  ;;  %v5148_v56 = vmul.f32 1.442695, %v5015_v7  ;;  %v16106_v43 = vmax.f32 %v16105_v53, 0.0 }
 0x69d   :  { %8888 = vpow2.f32 %v5124_v26  ;;  %v5140_v47 = vmul.f32 1.442695, %v5011_v33  ;;  %v5019_v26 = vsub.f32 %v16097_v63, %v12791_v1  ;;  %v16102_v1 = vld [vmem:[#allocation115_spill] sm:$0xff] }
 0x69e   :  { %v13052_v52 = vpop.eup %8868  ;;  %8890 = vpow2.f32 %v5128_v6  ;;  %v5144_v42 = vmul.f32 1.442695, %v5013_v58  ;;  %v16100_v6 = vmax.f32 %v16099_v34, 0.0  ;;  %v5025_v58 = vsub.f32 %v16106_v43, %v12840_v38 }
 0x69f   :  { %16056 = vst [vmem:[#allocation56_spill] sm:$0xff] %v13052_v52  ;;  %v13058_v31 = vpop.eup %8870  ;;  %8892 = vpow2.f32 %v5132_v46  ;;  %v5156_v49 = vmul.f32 1.442695, %v5019_v26  ;;  %v16103_v46 = vmax.f32 %v16102_v1, 0.0  ;;  %v16113_v1 = vld [vmem:[#allocation67_spill] sm:$0xff] }
 0x6a0   :  { %16059 = vst [vmem:[#allocation50_spill] sm:$0xff] %v13058_v31  ;;  %8894 = vpow2.f32 %v5136_v15  ;;  %v5021_v8 = vsub.f32 %v16100_v6, %v12840_v38  ;;  %v5168_v35 = vmul.f32 1.442695, %v5025_v58 }
 0x6a1   :  { %8896 = vpow2.f32 %v5140_v47  ;;  %v5023_v18 = vsub.f32 %v16103_v46, %v12840_v38 }
 0x6a2   :  { %v13064_v54 = vpop.eup %8872  ;;  %8898 = vpow2.f32 %v5144_v42  ;;  %v5160_v25 = vmul.f32 1.442695, %v5021_v8 }
 0x6a3   :  { %16063 = vst [vmem:[#allocation110_spill] sm:$0xff] %v13064_v54  ;;  %v13070_v48 = vpop.eup %8874  ;;  %8900 = vpow2.f32 %v5148_v56  ;;  %v5164_v47 = vmul.f32 1.442695, %v5023_v18 }
 0x6a4   :  { %16066 = vst [vmem:[#allocation116_spill] sm:$0xff] %v13070_v48  ;;  %v13076_v32 = vpop.eup %8876  ;;  %8902 = vpow2.f32 %v5152_v12 }
 0x6a5   :  { %16069 = vst [vmem:[#allocation111_spill] sm:$0xff] %v13076_v32  ;;  %v13082_v10 = vpop.eup %8878  ;;  %8904 = vpow2.f32 %v5156_v49 }
 0x6a6   :  { %16073 = vst [vmem:[#allocation60_spill] sm:$0xff] %v13082_v10  ;;  %v13088_v0 = vpop.eup %8880  ;;  %8906 = vpow2.f32 %v5160_v25  ;;  %v16115_v25 = vld [vmem:[#allocation40_spill] sm:$0xff] }
 0x6a7   :  { %16076 = vst [vmem:[#allocation28_spill] sm:$0xff] %v13088_v0  ;;  %v13094_v37 = vpop.eup %8882  ;;  %8908 = vpow2.f32 %v5164_v47  ;;  %v16116_v53 = vmax.f32 %v16115_v25, 0.0 }
 0x6a8   :  { %5363 = vperm.xlu0 %8021, %v13039_v23   ;;  %16079 = vst [vmem:[#allocation73_spill] sm:$0xff] %v13094_v37  ;;  %v13100_v11 = vpop.eup %8884  ;;  %8910 = vpow2.f32 %v5168_v35  ;;  %v16117_v35 = vld [vmem:[#allocation114_spill] sm:$0xff] }
 0x6a9   :  { %16083 = vst [vmem:[#allocation74_spill] sm:$0xff] %v13100_v11  ;;  %v13106_v36 = vpop.eup %8886 }
 0x6aa   :  { %16086 = vst [vmem:[#allocation81_spill] sm:$0xff] %v13106_v36  ;;  %v13112_v59 = vpop.eup %8888 }
 0x6ab   :  { %16089 = vst [vmem:[#allocation128_spill] sm:$0xff] %v13112_v59  ;;  %v13118_v57 = vpop.eup %8890 }
 0x6ac   :  { %5372 = vperm.xlu0 %8021, %v13046_v24   ;;  %16092 = vst [vmem:[#allocation38_spill] sm:$0xff] %v13118_v57  ;;  %v13124_v62 = vpop.eup %8892 }
 0x6ad   :  { %16095 = vst [vmem:[#allocation119_spill] sm:$0xff] %v13124_v62  ;;  %v13130_v39 = vpop.eup %8894 }
 0x6ae   :  { %16098 = vst [vmem:[#allocation98_spill] sm:$0xff] %v13130_v39  ;;  %v13138_v17 = vpop.eup %8896 }
 0x6af   :  { %16101 = vst [vmem:[#allocation48_spill] sm:$0xff] %v13138_v17  ;;  %v13144_v33 = vpop.eup %8898 }
 0x6b0   :  { %5378 = vperm.xlu0 %8021, %v13052_v52   ;;  %16104 = vst [vmem:[#allocation84_spill] sm:$0xff] %v13144_v33  ;;  %v13152_v20 = vpop.eup %8900 }
 0x6b1   :  { %16107 = vst [vmem:[#allocation89_spill] sm:$0xff] %v13152_v20  ;;  %v13157_v42 = vpop.eup %8902 }
 0x6b2   :  { %16108 = vst [vmem:[#allocation100_spill] sm:$0xff] %v13157_v42  ;;  %v13160_v45 = vpop.eup %8904 }
 0x6b3   :  { %16109 = vst [vmem:[#allocation26_spill] sm:$0xff] %v13160_v45  ;;  %v13165_v38 = vpop.eup %8906 }
 0x6b4   :  { %5384 = vperm.xlu0 %8021, %v13058_v31   ;;  %16110 = vst [vmem:[#allocation87_spill] sm:$0xff] %v13165_v38  ;;  %v13170_v56 = vpop.eup %8908 }
 0x6b5   :  { %16111 = vst [vmem:[#allocation88_spill] sm:$0xff] %v13170_v56  ;;  %v13173_v50 = vpop.eup %8910 }
 0x6b6   :  { %16112 = vst [vmem:[#allocation91_spill] sm:$0xff] %v13173_v50 }
 0x6b8   :  { %5390 = vperm.xlu0 %8021, %v13064_v54  }
 0x6bb   :  { %v13136_v29 = vpop.permute.xlu1 %5366 }
 0x6bc   :  { %5396 = vperm.xlu0 %8021, %v13070_v48  }
 0x6bf   :  { %v13146_v15 = vpop.permute.xlu1 %5369 }
 0x6c0   :  { %5402 = vperm.xlu0 %8021, %v13076_v32  }
 0x6c3   :  { %v13155_v7 = vpop.permute.xlu1 %5375 }
 0x6c4   :  { %5408 = vperm.xlu0 %8021, %v13082_v10  }
 0x6c7   :  { %v13162_v44 = vpop.permute.xlu1 %5381 }
 0x6c8   :  { %5414 = vperm.xlu0 %8021, %v13088_v0  }
 0x6cb   :  { %v13168_v4 = vpop.permute.xlu1 %5387 }
 0x6cc   :  { %5420 = vperm.xlu0 %8021, %v13094_v37   ;;  %v16127_v37 = vld [vmem:[#allocation69_spill] sm:$0xff] }
 0x6cf   :  { %v13175_v63 = vpop.permute.xlu1 %5393 }
 0x6d0   :  { %5426 = vperm.xlu0 %8021, %v13100_v11   ;;  %v16125_v11 = vld [vmem:[#allocation78_spill] sm:$0xff] }
 0x6d3   :  { %v13178_v26 = vpop.permute.xlu1 %5399 }
 0x6d4   :  { %5432 = vperm.xlu0 %8021, %v13106_v36  }
 0x6d7   :  { %v13180_v12 = vpop.permute.xlu1 %5405 }
 0x6d8   :  { %5438 = vperm.xlu0 %8021, %v13112_v59  }
 0x6db   :  { %v13182_v34 = vpop.permute.xlu1 %5411 }
 0x6dc   :  { %5444 = vperm.xlu0 %8021, %v13118_v57  }
 0x6df   :  { %v13184_v6 = vpop.permute.xlu1 %5417 }
 0x6e0   :  { %5450 = vperm.xlu0 %8021, %v13124_v62  }
 0x6e3   :  { %v13188_v49 = vpop.permute.xlu1 %5423 }
 0x6e4   :  { %5456 = vperm.xlu0 %8021, %v13130_v39  }
 0x6e7   :  { %v13201_v47 = vpop.permute.xlu1 %5429 }
 0x6e8   :  { %5462 = vperm.xlu0 %8021, %v13138_v17  }
 0x6eb   :  { %v13215_v39 = vpop.permute.xlu1 %5435 }
 0x6ec   :  { %5468 = vperm.xlu0 %8021, %v13144_v33   ;;  %v16121_v33 = vld [vmem:[#allocation62_spill] sm:$0xff] }
 0x6ed   :  { %v16122_v17 = vmax.f32 %v16121_v33, 0.0  ;;  %v16126_v33 = vmax.f32 %v16125_v11, 0.0 }
 0x6ef   :  { %v13224_v36 = vpop.permute.xlu1 %5441 }
 0x6f0   :  { %5474 = vperm.xlu0 %8021, %v13152_v20  }
 0x6f3   :  { %v13240_v32 = vpop.permute.xlu1 %5447 }
 0x6f4   :  { %5480 = vperm.xlu0 %8021, %v13157_v42   ;;  %v16119_v42 = vld [vmem:[#allocation68_spill] sm:$0xff] }
 0x6f8   :  { %5486 = vperm.xlu0 %8021, %v13160_v45  }
 0x6fc   :  { %5492 = vperm.xlu0 %8021, %v13165_v38  }
 0x700   :  { %5498 = vperm.xlu0 %8021, %v13170_v56  }
 0x704   :  { %5504 = vperm.xlu0 %8021, %v13173_v50   ;;  %v16118_v50 = vmax.f32 %v16117_v35, 0.0  ;;  %v16123_v35 = vld [vmem:[#allocation64_spill] sm:$0xff] }
 0x71b   :  { %v13186_v8 = vpop.xlane.xlu0 %4894 }
 0x71c   :  { %v13192_v46 = vrot.slane %v13186_v8, %v16113_v1  ;;  %v13210_v20 = vrot.slane %v13186_v8, %v16119_v42  ;;  %v13233_v0 = vrot.slane %v13186_v8, %v16127_v37 }
 0x71e   :  { %16114 = vst [vmem:[#allocation66_spill] sm:$0xff] %v13192_v46  ;;  %v5027_v43 = vsub.f32 %v16116_v53, %v13192_v46  ;;  %v5029_v56 = vsub.f32 %v16118_v50, %v13192_v46  ;;  %16120 = vst [vmem:[#allocation92_spill] sm:$0xff] %v13210_v20  ;;  %v5031_v25 = vsub.f32 %v16122_v17, %v13192_v46  ;;  %v16124_v50 = vmax.f32 %v16123_v35, 0.0  ;;  %v16129_v35 = vld [vmem:[#allocation75_spill] sm:$0xff] }
 0x71f   :  { %v5035_v17 = vsub.f32 %v16126_v33, %v13210_v20  ;;  %16128 = vst [vmem:[#allocation90_spill] sm:$0xff] %v13233_v0 }
 0x720   :  { %v5172_v38 = vmul.f32 1.442695, %v5027_v43  ;;  %v5176_v53 = vmul.f32 1.442695, %v5029_v56  ;;  %v5033_v43 = vsub.f32 %v16124_v50, %v13210_v20  ;;  %v5180_v57 = vmul.f32 1.442695, %v5031_v25 }
 0x721   :  { %v5188_v50 = vmul.f32 1.442695, %v5035_v17  ;;  %v13253_v17 = vpop.permute.xlu1 %5453 }
 0x722   :  { %8912 = vpow2.f32 %v5172_v38  ;;  %v5184_v38 = vmul.f32 1.442695, %v5033_v43 }
 0x723   :  { %v13194_v18 = vpop.permute.xlu0 %5363  ;;  %8914 = vpow2.f32 %v5176_v53  ;;  %v16130_v53 = vmax.f32 %v16129_v35, 0.0  ;;  %v16135_v35 = vld [vmem:[#allocation121_spill] sm:$0xff] }
 0x724   :  { %8916 = vpow2.f32 %v5180_v57  ;;  %v16132_v57 = vld [vmem:[#allocation120_spill] sm:$0xff] }
 0x725   :  { %v5037_v25 = vsub.f32 %v16130_v53, %v13210_v20  ;;  %8918 = vpow2.f32 %v5184_v38  ;;  %v16133_v43 = vmax.f32 %v16132_v57, 0.0  ;;  %v16136_v53 = vmax.f32 %v16135_v35, 0.0 }
 0x726   :  { %8920 = vpow2.f32 %v5188_v50 }
 0x727   :  { %v13199_v58 = vpop.permute.xlu0 %5372  ;;  %v5039_v33 = vsub.f32 %v16133_v43, %v13233_v0  ;;  %v5192_v48 = vmul.f32 1.442695, %v5037_v25  ;;  %v16138_v25 = vld [vmem:[#allocation70_spill] sm:$0xff]  ;;  %v16140_v43 = vld [vmem:[#allocation123_spill] sm:$0xff] }
 0x728   :  { %v13265_v57 = vrot.slane %v13186_v8, %v16138_v25 }
 0x729   :  { %8922 = vpow2.f32 %v5192_v48  ;;  %v5196_v31 = vmul.f32 1.442695, %v5039_v33  ;;  %v13272_v48 = vpop.permute.xlu1 %5459 }
 0x72a   :  { %16139 = vst [vmem:[#allocation117_spill] sm:$0xff] %v13265_v57 }
 0x72b   :  { %v13206_v45 = vpop.permute.xlu0 %5378  ;;  %8924 = vpow2.f32 %v5196_v31 }
 0x72f   :  { %v13217_v62 = vpop.permute.xlu0 %5384  ;;  %v13238_v10 = vpop.eup %8912 }
 0x730   :  { %16131 = vst [vmem:[#allocation93_spill] sm:$0xff] %v13238_v10  ;;  %5510 = vperm.xlu0 %8021, %v13238_v10   ;;  %v13248_v54 = vpop.eup %8914  ;;  %v5041_v10 = vsub.f32 %v16136_v53, %v13233_v0  ;;  %v16143_v53 = vld [vmem:[#allocation124_spill] sm:$0xff] }
 0x731   :  { %16134 = vst [vmem:[#allocation94_spill] sm:$0xff] %v13248_v54  ;;  %v13258_v52 = vpop.eup %8916 }
 0x732   :  { %16137 = vst [vmem:[#allocation52_spill] sm:$0xff] %v13258_v52  ;;  %v5200_v23 = vmul.f32 1.442695, %v5041_v10  ;;  %v13270_v35 = vpop.eup %8918  ;;  %v16146_v10 = vld [vmem:[#allocation14_spill] sm:$0xff] }
 0x733   :  { %v13222_v59 = vpop.permute.xlu0 %5390  ;;  %16142 = vst [vmem:[#allocation112_spill] sm:$0xff] %v13270_v35  ;;  %v13280_v28 = vpop.eup %8920 }
 0x734   :  { %5516 = vperm.xlu0 %8021, %v13248_v54   ;;  %v16141_v54 = vmax.f32 %v16140_v43, 0.0  ;;  %8926 = vpow2.f32 %v5200_v23  ;;  %16145 = vst [vmem:[#allocation24_spill] sm:$0xff] %v13280_v28  ;;  %v16147_v43 = vmax.f32 %v16146_v10, 0.0 }
 0x736   :  { %v5043_v24 = vsub.f32 %v16141_v54, %v13233_v0  ;;  %v13285_v54 = vpop.permute.xlu1 %5465  ;;  %v13290_v5 = vpop.eup %8922 }
 0x737   :  { %v13229_v56 = vpop.permute.xlu0 %5396  ;;  %16148 = vst [vmem:[#allocation118_spill] sm:$0xff] %v13290_v5 }
 0x738   :  { %5522 = vperm.xlu0 %8021, %v13258_v52   ;;  %v16144_v52 = vmax.f32 %v16143_v53, 0.0  ;;  %v5204_v13 = vmul.f32 1.442695, %v5043_v24  ;;  %v16149_v24 = vld [vmem:[#allocation71_spill] sm:$0xff]  ;;  %v16151_v53 = vld [vmem:[#allocation125_spill] sm:$0xff]  ;;  %v13302_v10 = vpop.eup %8924 }
 0x739   :  { %16153 = vst [vmem:[#allocation34_spill] sm:$0xff] %v13302_v10 }
 0x73a   :  { %v5045_v40 = vsub.f32 %v16144_v52, %v13265_v57  ;;  %8928 = vpow2.f32 %v5204_v13  ;;  %v13297_v52 = vrot.slane %v13186_v8, %v16149_v24  ;;  %v13304_v13 = vpop.permute.xlu1 %5471 }
 0x73b   :  { %v13243_v11 = vpop.permute.xlu0 %5402 }
 0x73c   :  { %5528 = vperm.xlu0 %8021, %v13270_v35   ;;  %v5047_v35 = vsub.f32 %v16147_v43, %v13265_v57  ;;  %v5208_v9 = vmul.f32 1.442695, %v5045_v40  ;;  %16150 = vst [vmem:[#allocation30_spill] sm:$0xff] %v13297_v52  ;;  %v16154_v43 = vld [vmem:[#allocation13_spill] sm:$0xff] }
 0x73e   :  { %8930 = vpow2.f32 %v5208_v9  ;;  %v5212_v3 = vmul.f32 1.442695, %v5047_v35  ;;  %v16157_v35 = vld [vmem:[#allocation16_spill] sm:$0xff] }
 0x73f   :  { %v13251_v38 = vpop.permute.xlu0 %5408 }
 0x740   :  { %5534 = vperm.xlu0 %8021, %v13280_v28   ;;  %v16152_v28 = vmax.f32 %v16151_v53, 0.0  ;;  %8932 = vpow2.f32 %v5212_v3  ;;  %v16158_v53 = vmax.f32 %v16157_v35, 0.0 }
 0x741   :  { %v13312_v22 = vpop.eup %8926 }
 0x742   :  { %v5049_v19 = vsub.f32 %v16152_v28, %v13265_v57  ;;  %16156 = vst [vmem:[#allocation115_spill] sm:$0xff] %v13312_v22  ;;  %v13317_v28 = vpop.permute.xlu1 %5477 }
 0x743   :  { %v13261_v50 = vpop.permute.xlu0 %5414 }
 0x744   :  { %5540 = vperm.xlu0 %8021, %v13290_v5   ;;  %v16155_v5 = vmax.f32 %v16154_v43, 0.0  ;;  %v5216_v30 = vmul.f32 1.442695, %v5049_v19  ;;  %v16160_v19 = vld [vmem:[#allocation72_spill] sm:$0xff]  ;;  %v16162_v43 = vld [vmem:[#allocation126_spill] sm:$0xff] }
 0x746   :  { %v5051_v2 = vsub.f32 %v16155_v5, %v13297_v52  ;;  %8934 = vpow2.f32 %v5216_v30  ;;  %v13329_v5 = vrot.slane %v13186_v8, %v16160_v19  ;;  %v13336_v30 = vpop.permute.xlu1 %5483 }
 0x747   :  { %v13275_v33 = vpop.permute.xlu0 %5420  ;;  %v13322_v41 = vpop.eup %8928  ;;  %16165 = vst [vmem:[#allocation62_spill] sm:$0xff] %v13336_v30 }
 0x748   :  { %5546 = vperm.xlu0 %8021, %v13302_v10   ;;  %v5053_v10 = vsub.f32 %v16158_v53, %v13297_v52  ;;  %v5220_v55 = vmul.f32 1.442695, %v5051_v2  ;;  %16159 = vst [vmem:[#allocation58_spill] sm:$0xff] %v13322_v41  ;;  %16161 = vst [vmem:[#allocation40_spill] sm:$0xff] %v13329_v5  ;;  %v16166_v53 = vld [vmem:[#allocation15_spill] sm:$0xff] }
 0x74a   :  { %8936 = vpow2.f32 %v5220_v55  ;;  %v5224_v25 = vmul.f32 1.442695, %v5053_v10  ;;  %v5662_v10 = vrot.slane %v13146_v15, %v12123_v16  ;;  %v16172_v15 = vld [vmem:[#allocation76_spill] sm:$0xff] }
 0x74b   :  { %v13283_v31 = vpop.permute.xlu0 %5426  ;;  %v13334_v35 = vpop.eup %8930 }
 0x74c   :  { %5552 = vperm.xlu0 %8021, %v13312_v22   ;;  %v16163_v22 = vmax.f32 %v16162_v43, 0.0  ;;  %16164 = vst [vmem:[#allocation114_spill] sm:$0xff] %v13334_v35  ;;  %8938 = vpow2.f32 %v5224_v25  ;;  %v13357_v25 = vpop.permute.xlu1 %5489  ;;  %v5711_v43 = vrot.slane %v13178_v26, %v12114_v61 }
 0x74d   :  { %v13344_v42 = vpop.eup %8932 }
 0x74e   :  { %v5055_v24 = vsub.f32 %v16163_v22, %v13297_v52  ;;  %16168 = vst [vmem:[#allocation64_spill] sm:$0xff] %v13344_v42  ;;  %v5657_v22 = vrot.slane %v13136_v29, %v12118_v21 }
 0x74f   :  { %v13293_v23 = vpop.permute.xlu0 %5432 }
 0x750   :  { %5558 = vperm.xlu0 %8021, %v13322_v41   ;;  %v16167_v41 = vmax.f32 %v16166_v53, 0.0  ;;  %v5228_v19 = vmul.f32 1.442695, %v5055_v24  ;;  %v5691_v24 = vrot.slane %v13168_v4, %v12123_v16  ;;  %v16169_v53 = vld [vmem:[#allocation27_spill] sm:$0xff]  ;;  %v13406_v0 = vpop.permute.xlu1 %5495 }
 0x751   :  { %16176 = vst [vmem:[#allocation120_spill] sm:$0xff] %v13406_v0 }
 0x752   :  { %v5057_v37 = vsub.f32 %v16167_v41, %v13329_v5  ;;  %v5682_v41 = vrot.slane %v13162_v44, %v12114_v61  ;;  %8940 = vpow2.f32 %v5228_v19  ;;  %v5720_v44 = vrot.slane %v13180_v12, %v12123_v16  ;;  %v16173_v19 = vld [vmem:[#allocation29_spill] sm:$0xff] }
 0x753   :  { %v13307_v40 = vpop.permute.xlu0 %5438  ;;  %v13364_v1 = vpop.eup %8934 }
 0x754   :  { %5564 = vperm.xlu0 %8021, %v13334_v35   ;;  %v5232_v29 = vmul.f32 1.442695, %v5057_v37  ;;  %16171 = vst [vmem:[#allocation78_spill] sm:$0xff] %v13364_v1 }
 0x756   :  { %8942 = vpow2.f32 %v5232_v29  ;;  %v5696_v29 = vrot.slane %v13222_v59, %v12126_v60  ;;  %v5677_v59 = vrot.slane %v13206_v45, %v12133_v51 }
 0x757   :  { %v13315_v9 = vpop.permute.xlu0 %5444  ;;  %v13400_v12 = vpop.eup %8936 }
 0x758   :  { %5570 = vperm.xlu0 %8021, %v13344_v42   ;;  %v16170_v42 = vmax.f32 %v16169_v53, 0.0  ;;  %v13391_v53 = vrot.slane %v13186_v8, %v16172_v15  ;;  %16175 = vst [vmem:[#allocation75_spill] sm:$0xff] %v13400_v12  ;;  %v5715_v15 = vrot.slane %v13243_v11, %v12118_v21  ;;  %v16179_v11 = vld [vmem:[#allocation35_spill] sm:$0xff] }
 0x759   :  { %v13436_v46 = vpop.eup %8938 }
 0x75a   :  { %v5059_v35 = vsub.f32 %v16170_v42, %v13329_v5  ;;  %v5653_v42 = vrot.slane %v13194_v18, %v12114_v61  ;;  %v13410_v18 = vrot.slane %v13186_v8, %v15999_v27  ;;  %16181 = vst [vmem:[#allocation121_spill] sm:$0xff] %v13436_v46  ;;  %v16182_v8 = vld [vmem:[#allocation37_spill] sm:$0xff]  ;;  %v5716_v0 = vsel %vm4402_vm3, %v5715_v15, %v5711_v43 }
 0x75b   :  { %v13325_v3 = vpop.permute.xlu0 %5450  ;;  %v5773_v43 = vrot.slane %v13307_v40, %v12118_v21 }
 0x75c   :  { %5576 = vperm.xlu0 %8021, %v13364_v1   ;;  %v16174_v1 = vmax.f32 %v16173_v19, 0.0  ;;  %v5236_v57 = vmul.f32 1.442695, %v5059_v35  ;;  %v5686_v19 = vrot.slane %v13217_v62, %v12118_v21  ;;  %v16177_v62 = vld [vmem:[#allocation31_spill] sm:$0xff]  ;;  %v5667_v35 = vrot.slane %v13199_v58, %v12126_v60 }
 0x75d   :  { %v16178_v37 = vmax.f32 %v16177_v62, 0.0  ;;  %v16183_v62 = vmax.f32 %v16182_v8, 0.0  ;;  %v5725_v8 = vrot.slane %v13251_v38, %v12126_v60 }
 0x75e   :  { %v5061_v52 = vsub.f32 %v16174_v1, %v13329_v5  ;;  %v5827_v1 = vrot.slane %v13304_v13, %v12114_v61  ;;  %v5658_v13 = vsel %vm4402_vm3, %v5657_v22, %v5653_v42  ;;  %v16180_v5 = vmax.f32 %v16179_v11, 0.0  ;;  %v16184_v22 = vld [vmem:[#allocation41_spill] sm:$0xff] }
 0x75f   :  { %v13339_v2 = vpop.permute.xlu0 %5456  ;;  %v5063_v27 = vsub.f32 %v16178_v37, %v13391_v53  ;;  %8944 = vpow2.f32 %v5236_v57  ;;  %v5067_v37 = vsub.f32 %v16183_v62, %v13391_v53  ;;  %v16185_v42 = vmax.f32 %v16184_v22, 0.0  ;;  %v16186_v11 = vld [vmem:[#allocation45_spill] sm:$0xff]  ;;  %v13465_v38 = vpop.eup %8940 }
 0x760   :  { %5582 = vperm.xlu0 %8021, %v13400_v12   ;;  %v5065_v12 = vsub.f32 %v16180_v5, %v13391_v53  ;;  %v5240_v20 = vmul.f32 1.442695, %v5061_v52  ;;  %v5687_v58 = vsel %vm4402_vm3, %v5686_v19, %v5682_v41  ;;  %v16187_v5 = vmax.f32 %v16186_v11, 0.0  ;;  %16188 = vst [vmem:[#allocation123_spill] sm:$0xff] %v13465_v38 }
 0x761   :  { %v5069_v30 = vsub.f32 %v16185_v42, %v13410_v18  ;;  %v5663_v52 = vsel %vm4409_vm4, %v5662_v10, %v5658_v13  ;;  %v5244_v22 = vmul.f32 1.442695, %v5063_v27  ;;  %v5744_v19 = vrot.slane %v13275_v33, %v12118_v21 }
 0x762   :  { %v13450_v57 = vsub.f32 %v16187_v5, %v13410_v18  ;;  %v5668_v41 = vsel %vm4416_vm5, %v5667_v35, %v5663_v52  ;;  %8946 = vpow2.f32 %v5240_v20  ;;  %v5248_v42 = vmul.f32 1.442695, %v5065_v12 }
 0x763   :  { %v13347_v55 = vpop.permute.xlu0 %5462  ;;  %v5692_v10 = vsel %vm4409_vm4, %v5691_v24, %v5687_v58  ;;  %v5706_v27 = vrot.slane %v13229_v56, %v12133_v51  ;;  %v5721_v35 = vsel %vm4409_vm4, %v5720_v44, %v5716_v0  ;;  %v5802_v45 = vrot.slane %v13339_v2, %v12118_v21 }
 0x764   :  { %5588 = vperm.xlu0 %8021, %v13436_v46   ;;  %v5697_v15 = vsel %vm4416_vm5, %v5696_v29, %v5692_v10  ;;  %v5252_v33 = vmul.f32 1.442695, %v5067_v37  ;;  %v16189_v20 = vrot.slane %v13155_v7, %v12130_v14  ;;  %v5726_v40 = vsel %vm4416_vm5, %v5725_v8, %v5721_v35 }
 0x765   :  { %v5256_v13 = vmul.f32 1.442695, %v5069_v30  ;;  %v16190_v0 = vrot.slane %v13184_v6, %v12114_v61  ;;  %v5754_v7 = vrot.slane %v13283_v31, %v12126_v60  ;;  %8948 = vpow2.f32 %v5244_v22  ;;  %v13497_v6 = vpop.eup %8942 }
 0x766   :  { %v5673_v24 = vsel %vm4423_vm6, %v16189_v20, %v5668_v41  ;;  %v16191_v44 = vrot.slane %v13175_v63, %v12130_v14  ;;  %v5783_v58 = vrot.slane %v13315_v9, %v12126_v60  ;;  %16193 = vst [vmem:[#allocation124_spill] sm:$0xff] %v13497_v6  ;;  %v16194_v31 = vrot.slane %v13182_v34, %v12130_v14 }
 0x767   :  { %v13383_v26 = vpop.permute.xlu0 %5468  ;;  %v5678_v56 = vsel %vm4430_vm7, %v5677_v59, %v5673_v24  ;;  %v5745_v2 = vsel %vm4402_vm3, %v5744_v19, %v16190_v0  ;;  %v16195_v63 = vrot.slane %v13253_v17, %v12114_v61  ;;  %v5735_v9 = vrot.slane %v13261_v50, %v12133_v51 }
 0x768   :  { %5594 = vperm.xlu0 %8021, %v13465_v38   ;;  %v5702_v37 = vsel %vm4423_vm6, %v16191_v44, %v5697_v15  ;;  %v5731_v5 = vsel %vm4423_vm6, %v16194_v31, %v5726_v40  ;;  %v16196_v8 = vrot.slane %v13188_v49, %v12123_v16  ;;  %v16197_v50 = vrot.slane %v13224_v36, %v12123_v16  ;;  %v5502_v40 = vpop.permute.xlu1 %5501  ;;  %v16299_v38 = vld [vmem:[#allocation68_spill] sm:$0xff] }
 0x769   :  { %v5707_v11 = vsel %vm4430_vm7, %v5706_v27, %v5702_v37  ;;  %v5803_v52 = vsel %vm4402_vm3, %v5802_v45, %v16195_v63  ;;  %8950 = vpow2.f32 %v5248_v42  ;;  %v5793_v10 = vrot.slane %v13325_v3, %v12133_v51  ;;  %v16205_v37 = vld [vmem:[#allocation120_spill] sm:$0xff] }
 0x76a   :  { %v5750_v22 = vsel %vm4409_vm4, %v16196_v8, %v5745_v2  ;;  %v5822_v36 = vrot.slane %v13383_v26, %v12133_v51  ;;  %v16200_v42 = vrot.slane %v13317_v28, %v12123_v16  ;;  %v16201_v3 = vrot.slane %v13357_v25, %v12114_v61  ;;  %v16211_v8 = vld [vmem:[#allocation57_spill] sm:$0xff] }
 0x76b   :  { %v5475_v4 = vpop.permute.xlu0 %5474  ;;  %v5755_v59 = vsel %vm4416_vm5, %v5754_v7, %v5750_v22  ;;  %v16202_v45 = vrot.slane %v13201_v47, %v12130_v14  ;;  %v16203_v0 = vrot.slane %v13240_v32, %v12130_v14  ;;  %8952 = vpow2.f32 %v5252_v33 }
 0x76c   :  { %v5831_v12 = vrot.slane %v5475_v4, %v12118_v21  ;;  %v16192_v4 = vrot.slane %v13215_v39, %v12114_v61  ;;  %v5812_v39 = vrot.slane %v13347_v55, %v12126_v60  ;;  %5600 = vperm.xlu0 %8021, %v13497_v6   ;;  %v5764_v55 = vrot.slane %v13293_v23, %v12133_v51  ;;  %v13534_v15 = vpop.eup %8944 }
 0x76d   :  { %16199 = vst [vmem:[#allocation14_spill] sm:$0xff] %v13534_v15  ;;  %v5760_v20 = vsel %vm4423_vm6, %v16202_v45, %v5755_v59  ;;  %v16204_v44 = vrot.slane %v13285_v54, %v12130_v14  ;;  %v16212_v22 = vmax.f32 %v16211_v8, 0.0  ;;  %8954 = vpow2.f32 %v5256_v13 }
 0x76e   :  { %v5774_v30 = vsel %vm4402_vm3, %v5773_v43, %v16192_v4  ;;  %v5832_v34 = vsel %vm4402_vm3, %v5831_v12, %v5827_v1  ;;  %v6114_v12 = vsel %vm4867_vm8, %v5707_v11, %v5678_v56  ;;  %v5765_v25 = vsel %vm4430_vm7, %v5764_v55, %v5760_v20  ;;  %v16208_v11 = vld [vmem:[#allocation62_spill] sm:$0xff] }
 0x76f   :  { %v5481_v62 = vpop.permute.xlu0 %5480  ;;  %v5779_v19 = vsel %vm4409_vm4, %v16197_v50, %v5774_v30  ;;  %v5837_v27 = vsel %vm4409_vm4, %v16200_v42, %v5832_v34  ;;  %v16206_v56 = vrot.slane %v16205_v37, %v12123_v16  ;;  %v13571_v30 = vpop.eup %8946  ;;  %v16209_v33 = vrot.slane %v16208_v11, %v12130_v14 }
 0x770   :  { %v5841_v41 = vrot.slane %v5481_v62, %v12126_v60  ;;  %v5784_v1 = vsel %vm4416_vm5, %v5783_v58, %v5779_v19  ;;  %v16198_v62 = vrot.slane %v13272_v48, %v12123_v16  ;;  %v5736_v48 = vsel %vm4430_vm7, %v5735_v9, %v5731_v5  ;;  %5606 = vperm.xlu0 %8021, %v13534_v15   ;;  %v16210_v9 = vld [vmem:[#allocation66_spill] sm:$0xff] }
 0x771   :  { %v5789_v2 = vsel %vm4423_vm6, %v16203_v0, %v5784_v1  ;;  %16207 = vst [vmem:[#allocation125_spill] sm:$0xff] %v13571_v30  ;;  %v6115_v32 = vsel %vm4869_vm9, %v5736_v48, %v6114_v12  ;;  %v5875_v5 = vrot.slane %v5502_v40, %v12130_v14  ;;  %v5026_v34 = vsub.f32 %v16212_v22, %v16210_v9  ;;  %v16219_v48 = vld [vmem:[#allocation85_spill] sm:$0xff]  ;;  %v16223_v40 = vld [vmem:[#allocation11_spill] sm:$0xff] }
 0x772   :  { %v5808_v43 = vsel %vm4409_vm4, %v16198_v62, %v5803_v52  ;;  %v5842_v24 = vsel %vm4416_vm5, %v5841_v41, %v5837_v27  ;;  %v5794_v7 = vsel %vm4430_vm7, %v5793_v10, %v5789_v2  ;;  %v6116_v63 = vsel %vm4871_vm10, %v5765_v25, %v6115_v32  ;;  %v16213_v41 = vld [vmem:[#allocation47_spill] sm:$0xff]  ;;  %v13595_v10 = vpop.eup %8948 }
 0x773   :  { %v5487_v29 = vpop.permute.xlu0 %5486  ;;  %v5813_v23 = vsel %vm4416_vm5, %v5812_v39, %v5808_v43  ;;  %v5847_v31 = vsel %vm4423_vm6, %v16209_v33, %v5842_v24  ;;  %v6117_v55 = vsel %vm4873_vm11, %v5794_v7, %v6116_v63  ;;  %v5260_v19 = vmul.f32 1.442695, %v13450_v57  ;;  %16215 = vst [vmem:[#allocation13_spill] sm:$0xff] %v13595_v10 }
 0x774   :  { %v5851_v28 = vrot.slane %v5487_v29, %v12133_v51  ;;  %v5818_v29 = vsel %vm4423_vm6, %v16204_v44, %v5813_v23  ;;  %5612 = vperm.xlu0 %8021, %v13571_v30   ;;  %v5170_v27 = vmul.f32 1.442695, %v5026_v34  ;;  %v16220_v45 = vmax.f32 %v16219_v48, 0.0  ;;  %v16249_v48 = vld [vmem:[#allocation65_spill] sm:$0xff] }
 0x775   :  { %v5823_v58 = vsel %vm4430_vm7, %v5822_v36, %v5818_v29  ;;  %v16216_v36 = vld [vmem:[#allocation79_spill] sm:$0xff]  ;;  %8956 = vpow2.f32 %v5260_v19  ;;  %v16224_v12 = vmax.f32 %v16223_v40, 0.0  ;;  %v16252_v40 = vld [vmem:[#allocation30_spill] sm:$0xff]  ;;  %v16298_v30 = vld [vmem:[#allocation109_spill] sm:$0xff] }
 0x776   :  { %v5852_v52 = vsel %vm4430_vm7, %v5851_v28, %v5847_v31  ;;  %v6118_v1 = vsel %vm4875_vm12, %v5823_v58, %v6117_v55  ;;  %v16217_v42 = vmax.f32 %v16216_v36, 0.0  ;;  %v5030_v20 = vsub.f32 %v16220_v45, %v16210_v9  ;;  %v16232_v31 = vld [vmem:[#allocation90_spill] sm:$0xff] }
 0x777   :  { %v5493_v17 = vpop.permute.xlu0 %5492  ;;  %v6119_v43 = vsel %vm4877_vm13, %v5852_v52, %v6118_v1  ;;  %8958 = vpow2.f32 %v5170_v27  ;;  %v16243_v1 = vld [vmem:[#allocation86_spill] sm:$0xff]  ;;  %v16250_v45 = vmax.f32 %v16249_v48, 0.0 }
 0x778   :  { %v5860_v49 = vrot.slane %v5493_v17, %v12118_v21  ;;  %v16214_v17 = vmax.f32 %v16213_v41, 0.0  ;;  %5618 = vperm.xlu0 %8021, %v13595_v10   ;;  %v5028_v13 = vsub.f32 %v16217_v42, %v16210_v9  ;;  %v5178_v0 = vmul.f32 1.442695, %v5030_v20  ;;  %v16236_v9 = vld [vmem:[#allocation63_spill] sm:$0xff]  ;;  %v16246_v42 = vld [vmem:[#allocation33_spill] sm:$0xff] }
 0x779   :  { %v16237_v8 = vmax.f32 %v16236_v9, 0.0  ;;  %v16263_v9 = vld [vmem:[#allocation43_spill] sm:$0xff] }
 0x77a   :  { %v5861_v35 = vsel %vm4402_vm3, %v5860_v49, %v16201_v3  ;;  %v5073_v59 = vsub.f32 %v16214_v17, %v13410_v18  ;;  %v5174_v24 = vmul.f32 1.442695, %v5028_v13  ;;  %v16239_v17 = vld [vmem:[#allocation106_spill] sm:$0xff]  ;;  %v16247_v13 = vmax.f32 %v16246_v42, 0.0 }
 0x77b   :  { %v5499_v26 = vpop.permute.xlu0 %5498  ;;  %v5866_v4 = vsel %vm4409_vm4, %v16206_v56, %v5861_v35  ;;  %v13605_v35 = vpop.eup %8950  ;;  %v16229_v56 = vld [vmem:[#allocation83_spill] sm:$0xff]  ;;  %v5040_v22 = vsub.f32 %v16237_v8, %v16232_v31  ;;  %v16264_v8 = vmax.f32 %v16263_v9, 0.0  ;;  %v16284_v9 = vld [vmem:[#allocation22_spill] sm:$0xff] }
 0x77c   :  { %v5870_v47 = vrot.slane %v5499_v26, %v12126_v60  ;;  %v5264_v3 = vmul.f32 1.442695, %v5073_v59  ;;  %16218 = vst [vmem:[#allocation16_spill] sm:$0xff] %v13605_v35  ;;  %5624 = vperm.xlu0 %8021, %v13605_v35   ;;  %v13611_v28 = vpop.eup %8952  ;;  %v16222_v26 = vld [vmem:[#allocation92_spill] sm:$0xff]  ;;  %v16240_v59 = vmax.f32 %v16239_v17, 0.0 }
 0x77d   :  { %16221 = vst [vmem:[#allocation126_spill] sm:$0xff] %v13611_v28  ;;  %v5032_v25 = vsub.f32 %v16224_v12, %v16222_v26  ;;  %v13617_v2 = vpop.eup %8954  ;;  %v16253_v12 = vld [vmem:[#allocation103_spill] sm:$0xff] }
 0x77e   :  { %v5871_v54 = vsel %vm4416_vm5, %v5870_v47, %v5866_v4  ;;  %8960 = vpow2.f32 %v5264_v3  ;;  %16225 = vst [vmem:[#allocation15_spill] sm:$0xff] %v13617_v2  ;;  %v16226_v47 = vld [vmem:[#allocation59_spill] sm:$0xff]  ;;  %v16230_v4 = vmax.f32 %v16229_v56, 0.0  ;;  %v5042_v55 = vsub.f32 %v16240_v59, %v16232_v31  ;;  %v16266_v59 = vld [vmem:[#allocation105_spill] sm:$0xff] }
 0x77f   :  { %v5505_v39 = vpop.permute.xlu0 %5504  ;;  %v5876_v49 = vsel %vm4423_vm6, %v5875_v5, %v5871_v54  ;;  %8962 = vpow2.f32 %v5174_v24  ;;  %v16227_v7 = vmax.f32 %v16226_v47, 0.0  ;;  %v5182_v29 = vmul.f32 1.442695, %v5032_v25  ;;  %v16233_v54 = vld [vmem:[#allocation61_spill] sm:$0xff] }
 0x780   :  { %v5880_v50 = vrot.slane %v5505_v39, %v12133_v51  ;;  %5630 = vperm.xlu0 %8021, %v13611_v28   ;;  %8964 = vpow2.f32 %v5178_v0  ;;  %v5036_v32 = vsub.f32 %v16230_v4, %v16222_v26  ;;  %v16234_v5 = vmax.f32 %v16233_v54, 0.0 }
 0x781   :  { %v5034_v44 = vsub.f32 %v16227_v7, %v16222_v26  ;;  %8966 = vpow2.f32 %v5182_v29  ;;  %v16254_v25 = vmax.f32 %v16253_v12, 0.0 }
 0x782   :  { %v5881_v62 = vsel %vm4430_vm7, %v5880_v50, %v5876_v49  ;;  %v13623_v37 = vpop.eup %8956  ;;  %v5038_v63 = vsub.f32 %v16234_v5, %v16232_v31  ;;  %v5190_v52 = vmul.f32 1.442695, %v5036_v32  ;;  %v5198_v50 = vmul.f32 1.442695, %v5040_v22  ;;  %v16242_v49 = vld [vmem:[#allocation117_spill] sm:$0xff] }
 0x783   :  { %v6120_v23 = vsel %vm4879_vm14, %v5881_v62, %v6119_v43  ;;  %16228 = vst [vmem:[#allocation27_spill] sm:$0xff] %v13623_v37  ;;  %v5186_v58 = vmul.f32 1.442695, %v5034_v44  ;;  %v16244_v62 = vmax.f32 %v16243_v1, 0.0  ;;  %v5046_v27 = vsub.f32 %v16247_v13, %v16242_v49  ;;  %v16256_v44 = vld [vmem:[#allocation39_spill] sm:$0xff] }
 0x784   :  { %v6130_v57 = vsel %vm1989_vm2, %v6120_v23, 0.0  ;;  %5636 = vperm.xlu0 %8021, %v13617_v2   ;;  %v13629_v11 = vpop.eup %8958  ;;  %v5194_v34 = vmul.f32 1.442695, %v5038_v63  ;;  %v5202_v23 = vmul.f32 1.442695, %v5042_v55  ;;  %v5048_v20 = vsub.f32 %v16250_v45, %v16242_v49 }
 0x785   :  { %6131 = vadd.xlane.f32.xlu1 %v6130_v57  ;;  %8968 = vpow2.f32 %v5186_v58  ;;  %v5044_v43 = vsub.f32 %v16244_v62, %v16242_v49  ;;  %v5210_v24 = vmul.f32 1.442695, %v5046_v27  ;;  %v5050_v0 = vsub.f32 %v16254_v25, %v16252_v40  ;;  %v16259_v58 = vld [vmem:[#allocation46_spill] sm:$0xff]  ;;  %v16269_v62 = vld [vmem:[#allocation127_spill] sm:$0xff]  ;;  %v16272_v27 = vld [vmem:[#allocation17_spill] sm:$0xff] }
 0x786   :  { %8970 = vpow2.f32 %v5190_v52  ;;  %v5214_v47 = vmul.f32 1.442695, %v5048_v20  ;;  %v16257_v29 = vmax.f32 %v16256_v44, 0.0  ;;  %v16260_v31 = vmax.f32 %v16259_v58, 0.0  ;;  %v16262_v52 = vld [vmem:[#allocation40_spill] sm:$0xff]  ;;  %v16281_v58 = vld [vmem:[#allocation51_spill] sm:$0xff] }
 0x787   :  { %8972 = vpow2.f32 %v5194_v34  ;;  %v5206_v57 = vmul.f32 1.442695, %v5044_v43  ;;  %v5218_v4 = vmul.f32 1.442695, %v5050_v0  ;;  %v5056_v22 = vsub.f32 %v16264_v8, %v16262_v52 }
 0x788   :  { %5642 = vperm.xlu0 %8021, %v13623_v37   ;;  %8974 = vpow2.f32 %v5198_v50  ;;  %v5052_v56 = vsub.f32 %v16257_v29, %v16252_v40  ;;  %v5054_v54 = vsub.f32 %v16260_v31, %v16252_v40  ;;  %v16267_v55 = vmax.f32 %v16266_v59, 0.0  ;;  %v16287_v59 = vld [vmem:[#allocation53_spill] sm:$0xff] }
 0x789   :  { %8976 = vpow2.f32 %v5202_v23  ;;  %v5230_v49 = vmul.f32 1.442695, %v5056_v22  ;;  %v16270_v43 = vmax.f32 %v16269_v62, 0.0  ;;  %v16282_v31 = vmax.f32 %v16281_v58, 0.0 }
 0x78a   :  { %8978 = vpow2.f32 %v5206_v57  ;;  %v5222_v5 = vmul.f32 1.442695, %v5052_v56  ;;  %v5226_v34 = vmul.f32 1.442695, %v5054_v54  ;;  %v5058_v50 = vsub.f32 %v16267_v55, %v16262_v52 }
 0x78b   :  { %v13631_v33 = vpop.eup %8960  ;;  %8980 = vpow2.f32 %v5210_v24  ;;  %v5060_v23 = vsub.f32 %v16270_v43, %v16262_v52  ;;  %v16273_v57 = vmax.f32 %v16272_v27, 0.0  ;;  %v16275_v24 = vld [vmem:[#allocation49_spill] sm:$0xff]  ;;  %v5068_v54 = vsub.f32 %v16282_v31, %v13410_v18 }
 0x78c   :  { %16231 = vst [vmem:[#allocation29_spill] sm:$0xff] %v13631_v33  ;;  %5648 = vperm.xlu0 %8021, %v13631_v33   ;;  %v13638_v39 = vpop.eup %8962  ;;  %8982 = vpow2.f32 %v5214_v47  ;;  %v5234_v42 = vmul.f32 1.442695, %v5058_v50  ;;  %v16276_v40 = vmax.f32 %v16275_v24, 0.0  ;;  %v16278_v47 = vld [vmem:[#allocation113_spill] sm:$0xff]  ;;  %v16285_v8 = vmax.f32 %v16284_v9, 0.0 }
 0x78d   :  { %16235 = vst [vmem:[#allocation31_spill] sm:$0xff] %v13638_v39  ;;  %v13644_v41 = vpop.eup %8964  ;;  %8984 = vpow2.f32 %v5218_v4  ;;  %v5062_v48 = vsub.f32 %v16273_v57, %v13391_v53  ;;  %v5238_v45 = vmul.f32 1.442695, %v5060_v23  ;;  %v16279_v44 = vmax.f32 %v16278_v47, 0.0 }
 0x78e   :  { %16238 = vst [vmem:[#allocation35_spill] sm:$0xff] %v13644_v41  ;;  %v13650_v19 = vpop.eup %8966  ;;  %8986 = vpow2.f32 %v5222_v5  ;;  %v5064_v12 = vsub.f32 %v16276_v40, %v13391_v53  ;;  %v5254_v22 = vmul.f32 1.442695, %v5068_v54  ;;  %v16288_v55 = vmax.f32 %v16287_v59, 0.0 }
 0x78f   :  { %16241 = vst [vmem:[#allocation37_spill] sm:$0xff] %v13650_v19  ;;  %8988 = vpow2.f32 %v5226_v34  ;;  %v5242_v25 = vmul.f32 1.442695, %v5062_v48  ;;  %v5066_v29 = vsub.f32 %v16279_v44, %v13391_v53  ;;  %v5070_v53 = vsub.f32 %v16285_v8, %v13410_v18  ;;  %v16295_v8 = vld [vmem:[#allocation67_spill] sm:$0xff] }
 0x790   :  { %8990 = vpow2.f32 %v5230_v49  ;;  %v5246_v56 = vmul.f32 1.442695, %v5064_v12  ;;  %v5072_v50 = vsub.f32 %v16288_v55, %v13410_v18  ;;  %v16296_v55 = vld [vmem:[#allocation55_spill] sm:$0xff] }
 0x791   :  { %8992 = vpow2.f32 %v5234_v42  ;;  %v5250_v5 = vmul.f32 1.442695, %v5066_v29  ;;  %v5258_v49 = vmul.f32 1.442695, %v5070_v53 }
 0x792   :  { %v13656_v36 = vpop.eup %8968  ;;  %8994 = vpow2.f32 %v5238_v45  ;;  %v5262_v43 = vmul.f32 1.442695, %v5072_v50 }
 0x793   :  { %16245 = vst [vmem:[#allocation41_spill] sm:$0xff] %v13656_v36  ;;  %v13662_v3 = vpop.eup %8970  ;;  %8996 = vpow2.f32 %v5242_v25 }
 0x794   :  { %16248 = vst [vmem:[#allocation45_spill] sm:$0xff] %v13662_v3  ;;  %v13668_v26 = vpop.eup %8972  ;;  %8998 = vpow2.f32 %v5246_v56 }
 0x795   :  { %16251 = vst [vmem:[#allocation120_spill] sm:$0xff] %v13668_v26  ;;  %v13674_v7 = vpop.eup %8974  ;;  %9000 = vpow2.f32 %v5250_v5 }
 0x796   :  { %5507 = vperm.xlu1 %8022, %v13629_v11   ;;  %16255 = vst [vmem:[#allocation62_spill] sm:$0xff] %v13674_v7  ;;  %v13680_v32 = vpop.eup %8976  ;;  %9002 = vpow2.f32 %v5254_v22 }
 0x797   :  { %16258 = vst [vmem:[#allocation66_spill] sm:$0xff] %v13680_v32  ;;  %v13686_v63 = vpop.eup %8978  ;;  %9004 = vpow2.f32 %v5258_v49 }
 0x798   :  { %16261 = vst [vmem:[#allocation57_spill] sm:$0xff] %v13686_v63  ;;  %v13692_v17 = vpop.eup %8980  ;;  %9006 = vpow2.f32 %v5262_v43  ;;  %v16297_v43 = vld [vmem:[#allocation21_spill] sm:$0xff] }
 0x799   :  { %16265 = vst [vmem:[#allocation47_spill] sm:$0xff] %v13692_v17  ;;  %v13698_v1 = vpop.eup %8982 }
 0x79a   :  { %5513 = vperm.xlu1 %8022, %v13638_v39   ;;  %16268 = vst [vmem:[#allocation79_spill] sm:$0xff] %v13698_v1  ;;  %v13704_v13 = vpop.eup %8984 }
 0x79b   :  { %16271 = vst [vmem:[#allocation85_spill] sm:$0xff] %v13704_v13  ;;  %v13710_v20 = vpop.eup %8986 }
 0x79c   :  { %16274 = vst [vmem:[#allocation92_spill] sm:$0xff] %v13710_v20  ;;  %v13716_v0 = vpop.eup %8988 }
 0x79d   :  { %16277 = vst [vmem:[#allocation11_spill] sm:$0xff] %v13716_v0  ;;  %v13722_v4 = vpop.eup %8990 }
 0x79e   :  { %5519 = vperm.xlu1 %8022, %v13644_v41   ;;  %16280 = vst [vmem:[#allocation59_spill] sm:$0xff] %v13722_v4  ;;  %v13728_v52 = vpop.eup %8992 }
 0x79f   :  { %16283 = vst [vmem:[#allocation83_spill] sm:$0xff] %v13728_v52  ;;  %v13734_v34 = vpop.eup %8994 }
 0x7a0   :  { %16286 = vst [vmem:[#allocation90_spill] sm:$0xff] %v13734_v34  ;;  %v13740_v62 = vpop.eup %8996 }
 0x7a1   :  { %16289 = vst [vmem:[#allocation61_spill] sm:$0xff] %v13740_v62  ;;  %v13743_v23 = vpop.eup %8998 }
 0x7a2   :  { %5525 = vperm.xlu1 %8022, %v13650_v19   ;;  %16290 = vst [vmem:[#allocation63_spill] sm:$0xff] %v13743_v23  ;;  %v13748_v27 = vpop.eup %9000 }
 0x7a3   :  { %16291 = vst [vmem:[#allocation106_spill] sm:$0xff] %v13748_v27  ;;  %v13751_v18 = vpop.eup %9002 }
 0x7a4   :  { %16292 = vst [vmem:[#allocation117_spill] sm:$0xff] %v13751_v18  ;;  %v13756_v48 = vpop.eup %9004 }
 0x7a5   :  { %16293 = vst [vmem:[#allocation86_spill] sm:$0xff] %v13756_v48  ;;  %v13761_v24 = vpop.eup %9006 }
 0x7a6   :  { %5531 = vperm.xlu1 %8022, %v13656_v36   ;;  %16294 = vst [vmem:[#allocation33_spill] sm:$0xff] %v13761_v24  ;;  %v16315_v36 = vld [vmem:[#allocation72_spill] sm:$0xff] }
 0x7aa   :  { %5537 = vperm.xlu1 %8022, %v13662_v3  }
 0x7ab   :  { %v13746_v42 = vpop.permute.xlu0 %5510 }
 0x7ae   :  { %5543 = vperm.xlu1 %8022, %v13668_v26  }
 0x7af   :  { %v13753_v57 = vpop.permute.xlu0 %5516 }
 0x7b2   :  { %5549 = vperm.xlu1 %8022, %v13674_v7  }
 0x7b3   :  { %v13759_v45 = vpop.permute.xlu0 %5522 }
 0x7b6   :  { %5555 = vperm.xlu1 %8022, %v13680_v32   ;;  %v16312_v32 = vld [vmem:[#allocation101_spill] sm:$0xff] }
 0x7b7   :  { %v13764_v40 = vpop.permute.xlu0 %5528 }
 0x7ba   :  { %5561 = vperm.xlu1 %8022, %v13686_v63   ;;  %v16311_v63 = vld [vmem:[#allocation71_spill] sm:$0xff] }
 0x7bb   :  { %v13766_v12 = vpop.permute.xlu0 %5534 }
 0x7be   :  { %5567 = vperm.xlu1 %8022, %v13692_v17  }
 0x7bf   :  { %v13768_v25 = vpop.permute.xlu0 %5540 }
 0x7c2   :  { %5573 = vperm.xlu1 %8022, %v13698_v1  }
 0x7c3   :  { %v13770_v47 = vpop.permute.xlu0 %5546 }
 0x7c6   :  { %5579 = vperm.xlu1 %8022, %v13704_v13  }
 0x7c7   :  { %v13772_v44 = vpop.permute.xlu0 %5552 }
 0x7ca   :  { %5585 = vperm.xlu1 %8022, %v13710_v20   ;;  %v16307_v20 = vld [vmem:[#allocation70_spill] sm:$0xff] }
 0x7cb   :  { %v13776_v58 = vpop.permute.xlu0 %5558 }
 0x7ce   :  { %5591 = vperm.xlu1 %8022, %v13716_v0  }
 0x7cf   :  { %v13780_v54 = vpop.permute.xlu0 %5564 }
 0x7d2   :  { %5597 = vperm.xlu1 %8022, %v13722_v4   ;;  %v16308_v4 = vld [vmem:[#allocation42_spill] sm:$0xff] }
 0x7d3   :  { %v13792_v59 = vpop.permute.xlu0 %5570 }
 0x7d6   :  { %5603 = vperm.xlu1 %8022, %v13728_v52  }
 0x7d7   :  { %v13800_v28 = vpop.permute.xlu0 %5576 }
 0x7da   :  { %5609 = vperm.xlu1 %8022, %v13734_v34   ;;  %v16300_v34 = vld [vmem:[#allocation95_spill] sm:$0xff] }
 0x7de   :  { %5615 = vperm.xlu1 %8022, %v13740_v62  }
 0x7e2   :  { %5621 = vperm.xlu1 %8022, %v13743_v23   ;;  %v16304_v23 = vld [vmem:[#allocation80_spill] sm:$0xff] }
 0x7e6   :  { %5627 = vperm.xlu1 %8022, %v13748_v27  }
 0x7ea   :  { %5633 = vperm.xlu1 %8022, %v13751_v18  }
 0x7ee   :  { %5639 = vperm.xlu1 %8022, %v13756_v48   ;;  %v16303_v48 = vld [vmem:[#allocation69_spill] sm:$0xff] }
 0x7f2   :  { %5645 = vperm.xlu1 %8022, %v13761_v24  }
 0x80e   :  { %v6132_v29 = vpop.xlane.xlu1 %6131 }
 0x80f   :  { %9008 = vrcp.f32 %v6132_v29 }
 0x812   :  { %v13774_v56 = vpop.permute.xlu1 %5507 }
 0x816   :  { %v13778_v31 = vpop.permute.xlu1 %5513 }
 0x81a   :  { %v13782_v5 = vpop.permute.xlu1 %5519 }
 0x81c   :  { %v13784_v9 = vpop.eup %9008 }
 0x81d   :  { %v13788_v53 = vrot.slane %v13784_v9, %v16295_v8  ;;  %v13808_v27 = vrot.slane %v13784_v9, %v16299_v38  ;;  %v13828_v46 = vrot.slane %v13784_v9, %v16303_v48  ;;  %v13848_v62 = vrot.slane %v13784_v9, %v16307_v20 }
 0x81e   :  { %v13790_v22 = vpop.permute.xlu1 %5525  ;;  %v13868_v20 = vrot.slane %v13784_v9, %v16311_v63  ;;  %v16314_v63 = vld [vmem:[#allocation104_spill] sm:$0xff] }
 0x81f   :  { %v6221_v50 = vmul.f32 %v16296_v55, %v13788_v53  ;;  %v6222_v29 = vmul.f32 %v16297_v43, %v13788_v53  ;;  %v6224_v24 = vmul.f32 %v16298_v30, %v13788_v53  ;;  %v6226_v43 = vmul.f32 %v16300_v34, %v13808_v27 }
 0x820   :  { %v6248_v3 = vmul.f32 %v16314_v63, %v13868_v20  ;;  %v5928_v63 = vrot.slane %v13766_v12, %v12126_v60 }
 0x821   :  { %6323 = vperm.xlu1 %8022, %v6221_v50   ;;  %v13812_v50 = vpop.permute.xlu0 %5582 }
 0x822   :  { %v13796_v49 = vpop.permute.xlu1 %5531 }
 0x825   :  { %6328 = vperm.xlu1 %8022, %v6222_v29   ;;  %v16301_v29 = vld [vmem:[#allocation23_spill] sm:$0xff]  ;;  %v13820_v35 = vpop.permute.xlu0 %5588 }
 0x826   :  { %v13802_v33 = vpop.permute.xlu1 %5537  ;;  %v6228_v0 = vmul.f32 %v16301_v29, %v13808_v27  ;;  %v6232_v29 = vmul.f32 %v16304_v23, %v13828_v46 }
 0x829   :  { %6338 = vperm.xlu1 %8022, %v6224_v24   ;;  %v16302_v24 = vld [vmem:[#allocation25_spill] sm:$0xff] }
 0x82a   :  { %v13810_v55 = vpop.permute.xlu1 %5543  ;;  %v6230_v15 = vmul.f32 %v16302_v24, %v13808_v27 }
 0x82d   :  { %6348 = vperm.xlu1 %8022, %v6226_v43   ;;  %v13832_v43 = vpop.permute.xlu0 %5594 }
 0x82e   :  { %v13816_v37 = vpop.permute.xlu1 %5549 }
 0x831   :  { %6358 = vperm.xlu1 %8022, %v6228_v0   ;;  %v16305_v0 = vld [vmem:[#allocation122_spill] sm:$0xff]  ;;  %v13840_v10 = vpop.permute.xlu0 %5600 }
 0x832   :  { %v13822_v30 = vpop.permute.xlu1 %5555  ;;  %v6234_v2 = vmul.f32 %v16305_v0, %v13828_v46  ;;  %v6238_v0 = vmul.f32 %v16308_v4, %v13848_v62 }
 0x835   :  { %6368 = vperm.xlu1 %8022, %v6230_v15   ;;  %v16306_v15 = vld [vmem:[#allocation32_spill] sm:$0xff] }
 0x836   :  { %v13830_v34 = vpop.permute.xlu1 %5561  ;;  %v6236_v52 = vmul.f32 %v16306_v15, %v13828_v46 }
 0x839   :  { %6378 = vperm.xlu1 %8022, %v6232_v29   ;;  %v13852_v29 = vpop.permute.xlu0 %5606 }
 0x83a   :  { %v13836_v18 = vpop.permute.xlu1 %5567 }
 0x83d   :  { %6388 = vperm.xlu1 %8022, %v6234_v2   ;;  %v16309_v2 = vld [vmem:[#allocation96_spill] sm:$0xff]  ;;  %v13860_v1 = vpop.permute.xlu0 %5612 }
 0x83e   :  { %v13842_v24 = vpop.permute.xlu1 %5573  ;;  %v6240_v13 = vmul.f32 %v16309_v2, %v13848_v62  ;;  %v6244_v2 = vmul.f32 %v16312_v32, %v13868_v20  ;;  %v13890_v32 = vrot.slane %v13784_v9, %v16315_v36 }
 0x841   :  { %6398 = vperm.xlu1 %8022, %v6236_v52   ;;  %v16310_v52 = vld [vmem:[#allocation97_spill] sm:$0xff] }
 0x842   :  { %v13850_v23 = vpop.permute.xlu1 %5579  ;;  %v6242_v17 = vmul.f32 %v16310_v52, %v13848_v62 }
 0x845   :  { %6408 = vperm.xlu1 %8022, %v6238_v0   ;;  %v13872_v0 = vpop.permute.xlu0 %5618 }
 0x846   :  { %v13856_v6 = vpop.permute.xlu1 %5585 }
 0x849   :  { %6418 = vperm.xlu1 %8022, %v6240_v13   ;;  %v16313_v13 = vld [vmem:[#allocation99_spill] sm:$0xff]  ;;  %v13880_v48 = vpop.permute.xlu0 %5624 }
 0x84a   :  { %v13862_v15 = vpop.permute.xlu1 %5591  ;;  %v6246_v26 = vmul.f32 %v16313_v13, %v13868_v20  ;;  %v5894_v13 = vrot.slane %v13778_v31, %v12123_v16  ;;  %v5957_v31 = vrot.slane %v13772_v44, %v12126_v60  ;;  %v16318_v44 = vld [vmem:[#allocation76_spill] sm:$0xff] }
 0x84b   :  { %v13960_v39 = vrot.slane %v13784_v9, %v16318_v44 }
 0x84d   :  { %6428 = vperm.xlu1 %8022, %v6242_v17   ;;  %v5885_v17 = vrot.slane %v13774_v56, %v12114_v61  ;;  %v5918_v56 = vrot.slane %v13764_v40, %v12118_v21  ;;  %v5976_v40 = vrot.slane %v13780_v54, %v12118_v21  ;;  %v13918_v12 = vpop.permute.xlu0 %5630  ;;  %v5914_v54 = vrot.slane %v13790_v22, %v12114_v61 }
 0x84e   :  { %v13870_v4 = vpop.permute.xlu1 %5597  ;;  %v6063_v22 = vrot.slane %v13872_v0, %v12118_v21 }
 0x84f   :  { %v5919_v0 = vsel %vm4402_vm3, %v5918_v56, %v5914_v54  ;;  %v6030_v54 = vrot.slane %v13870_v4, %v12114_v61 }
 0x851   :  { %6438 = vperm.xlu1 %8022, %v6244_v2   ;;  %v5889_v2 = vrot.slane %v13746_v42, %v12118_v21  ;;  %v5947_v42 = vrot.slane %v13770_v47, %v12118_v21  ;;  %v16316_v47 = vld [vmem:[#allocation102_spill] sm:$0xff] }
 0x852   :  { %v13876_v7 = vpop.permute.xlu1 %5603  ;;  %v6250_v41 = vmul.f32 %v16316_v47, %v13890_v32  ;;  %v5923_v47 = vrot.slane %v13796_v49, %v12123_v16  ;;  %v16317_v49 = vld [vmem:[#allocation108_spill] sm:$0xff] }
 0x853   :  { %v5890_v36 = vsel %vm4402_vm3, %v5889_v2, %v5885_v17  ;;  %v6034_v2 = vrot.slane %v13840_v10, %v12118_v21  ;;  %v6073_v10 = vrot.slane %v13880_v48, %v12126_v60  ;;  %v5637_v48 = vpop.permute.xlu0 %5636 }
 0x854   :  { %v5895_v38 = vsel %vm4409_vm4, %v5894_v13, %v5890_v36  ;;  %v5904_v36 = vrot.slane %v13782_v5, %v12130_v14  ;;  %v6001_v5 = vrot.slane %v13850_v23, %v12114_v61  ;;  %v6039_v23 = vrot.slane %v13876_v7, %v12123_v16 }
 0x855   :  { %6448 = vperm.xlu1 %8022, %v6246_v26   ;;  %v5899_v26 = vrot.slane %v13753_v57, %v12126_v60  ;;  %v6005_v57 = vrot.slane %v13812_v50, %v12118_v21  ;;  %v6044_v50 = vrot.slane %v13852_v29, %v12126_v60  ;;  %v6252_v29 = vmul.f32 %v16317_v49, %v13890_v32 }
 0x856   :  { %v13882_v52 = vpop.permute.xlu1 %5609 }
 0x857   :  { %v5900_v17 = vsel %vm4416_vm5, %v5899_v26, %v5895_v38  ;;  %v5924_v38 = vsel %vm4409_vm4, %v5923_v47, %v5919_v0  ;;  %v5981_v26 = vrot.slane %v13836_v18, %v12123_v16  ;;  %v16319_v47 = vld [vmem:[#allocation107_spill] sm:$0xff]  ;;  %v5962_v18 = vrot.slane %v13822_v30, %v12130_v14 }
 0x858   :  { %v6254_v0 = vmul.f32 %v16319_v47, %v13890_v32  ;;  %v5991_v30 = vrot.slane %v13842_v24, %v12130_v14  ;;  %v6006_v7 = vsel %vm4402_vm3, %v6005_v57, %v6001_v5  ;;  %v6049_v24 = vrot.slane %v13882_v52, %v12130_v14 }
 0x859   :  { %6458 = vperm.xlu1 %8022, %v6248_v3   ;;  %v5986_v3 = vrot.slane %v13792_v59, %v12126_v60  ;;  %v6015_v59 = vrot.slane %v13820_v35, %v12126_v60  ;;  %v5943_v35 = vrot.slane %v13810_v55, %v12114_v61  ;;  %v5972_v55 = vrot.slane %v13830_v34, %v12114_v61 }
 0x85a   :  { %v13912_v19 = vpop.permute.xlu1 %5615  ;;  %v6010_v34 = vrot.slane %v13856_v6, %v12123_v16  ;;  %v5929_v6 = vsel %vm4416_vm5, %v5928_v63, %v5924_v38  ;;  %v5643_v38 = vpop.permute.xlu0 %5642  ;;  %v16321_v52 = vrot.slane %v13768_v25, %v12133_v51 }
 0x85b   :  { %v5948_v56 = vsel %vm4402_vm3, %v5947_v42, %v5943_v35  ;;  %v6059_v42 = vrot.slane %v13912_v19, %v12114_v61  ;;  %v5977_v35 = vsel %vm4402_vm3, %v5976_v40, %v5972_v55  ;;  %v6020_v40 = vrot.slane %v13862_v15, %v12130_v14 }
 0x85c   :  { %v6011_v63 = vsel %vm4409_vm4, %v6010_v34, %v6006_v7 }
 0x85d   :  { %6468 = vperm.xlu1 %8022, %v6250_v41   ;;  %v5952_v41 = vrot.slane %v13816_v37, %v12123_v16  ;;  %v5933_v37 = vrot.slane %v13802_v33, %v12130_v14  ;;  %v6064_v57 = vsel %vm4402_vm3, %v6063_v22, %v6059_v42 }
 0x85e   :  { %v5622_v13 = vpop.permute.xlu1 %5621 }
 0x85f   :  { %v5953_v33 = vsel %vm4409_vm4, %v5952_v41, %v5948_v56  ;;  %v6068_v4 = vrot.slane %v5622_v13, %v12123_v16  ;;  %v5934_v41 = vsel %vm4423_vm6, %v5933_v37, %v5929_v6  ;;  %v5982_v56 = vsel %vm4409_vm4, %v5981_v26, %v5977_v35 }
 0x860   :  { %v5958_v19 = vsel %vm4416_vm5, %v5957_v31, %v5953_v33  ;;  %v6035_v13 = vsel %vm4402_vm3, %v6034_v2, %v6030_v54  ;;  %v5987_v31 = vsel %vm4416_vm5, %v5986_v3, %v5982_v56  ;;  %v6092_v2 = vrot.slane %v5637_v48, %v12118_v21 }
 0x861   :  { %6478 = vperm.xlu1 %8022, %v6252_v29   ;;  %v16320_v29 = vld [vmem:[#allocation19_spill] sm:$0xff]  ;;  %v5963_v37 = vsel %vm4423_vm6, %v5962_v18, %v5958_v19  ;;  %v6040_v26 = vsel %vm4409_vm4, %v6039_v23, %v6035_v13  ;;  %v6069_v5 = vsel %vm4409_vm4, %v6068_v4, %v6064_v57  ;;  %v5905_v54 = vsel %vm4423_vm6, %v5904_v36, %v5900_v17  ;;  %v16322_v23 = vld [vmem:[#allocation18_spill] sm:$0xff] }
 0x862   :  { %v5628_v49 = vpop.permute.xlu1 %5627  ;;  %v6256_v47 = vmul.f32 %v16320_v29, %v13960_v39  ;;  %v6016_v33 = vsel %vm4416_vm5, %v6015_v59, %v6011_v63  ;;  %v5939_v3 = vsel %vm4430_vm7, %v16321_v52, %v5934_v41  ;;  %v6258_v48 = vmul.f32 %v16322_v23, %v13960_v39  ;;  %v16334_v23 = vld [vmem:[#allocation77_spill] sm:$0xff] }
 0x863   :  { %v6078_v34 = vrot.slane %v5628_v49, %v12130_v14  ;;  %v6021_v22 = vsel %vm4423_vm6, %v6020_v40, %v6016_v33  ;;  %v6045_v49 = vsel %vm4416_vm5, %v6044_v50, %v6040_v26  ;;  %v16323_v17 = vrot.slane %v13776_v58, %v12133_v51  ;;  %v16328_v40 = vld [vmem:[#allocation12_spill] sm:$0xff] }
 0x864   :  { %v6050_v59 = vsel %vm4423_vm6, %v6049_v24, %v6045_v49  ;;  %v6074_v42 = vsel %vm4416_vm5, %v6073_v10, %v6069_v5  ;;  %v16324_v6 = vrot.slane %v13759_v45, %v12133_v51  ;;  %v16325_v35 = vrot.slane %v13800_v28, %v12133_v51  ;;  %v5649_v10 = vpop.permute.xlu0 %5648  ;;  %v16331_v33 = vld [vmem:[#allocation20_spill] sm:$0xff] }
 0x865   :  { %6488 = vperm.xlu1 %8022, %v6254_v0   ;;  %v5992_v0 = vsel %vm4423_vm6, %v5991_v30, %v5987_v31  ;;  %v5968_v36 = vsel %vm4430_vm7, %v16323_v17, %v5963_v37  ;;  %v6079_v58 = vsel %vm4423_vm6, %v6078_v34, %v6074_v42  ;;  %v16326_v45 = vrot.slane %v13832_v43, %v12133_v51  ;;  %v16329_v37 = vld [vmem:[#allocation82_spill] sm:$0xff]  ;;  %v16333_v49 = vld [vmem:[#allocation36_spill] sm:$0xff] }
 0x866   :  { %v5634_v55 = vpop.permute.xlu1 %5633  ;;  %v5910_v50 = vsel %vm4430_vm7, %v16324_v6, %v5905_v54  ;;  %v5997_v4 = vsel %vm4430_vm7, %v16325_v35, %v5992_v0  ;;  %v6102_v28 = vrot.slane %v5643_v38, %v12126_v60  ;;  %v16327_v19 = vrot.slane %v13860_v1, %v12133_v51  ;;  %v16335_v17 = vld [vmem:[#allocation56_spill] sm:$0xff] }
 0x867   :  { %v6088_v15 = vrot.slane %v5634_v55, %v12114_v61  ;;  %v6121_v41 = vsel %vm4867_vm8, %v5939_v3, %v5910_v50  ;;  %v6026_v56 = vsel %vm4430_vm7, %v16326_v45, %v6021_v22  ;;  %v14052_v13 = vrot.slane %v13784_v9, %v16328_v40  ;;  %v16332_v3 = vld [vmem:[#allocation44_spill] sm:$0xff] }
 0x868   :  { %v6122_v7 = vsel %vm4869_vm9, %v5968_v36, %v6121_v41  ;;  %v6260_v26 = vmul.f32 %v16329_v37, %v13960_v39  ;;  %v6112_v24 = vrot.slane %v5649_v10, %v12133_v51  ;;  %v6225_v36 = vmul.f32 %v16335_v17, %v13788_v53  ;;  %v16338_v50 = vld [vmem:[#allocation116_spill] sm:$0xff]  ;;  %v16342_v41 = vld [vmem:[#allocation73_spill] sm:$0xff] }
 0x869   :  { %6498 = vperm.xlu1 %8022, %v6256_v47   ;;  %v6093_v29 = vsel %vm4402_vm3, %v6092_v2, %v6088_v15  ;;  %v6083_v47 = vrot.slane %v13918_v12, %v12133_v51  ;;  %v6055_v12 = vsel %vm4430_vm7, %v16327_v19, %v6050_v59  ;;  %v6123_v43 = vsel %vm4871_vm10, %v5997_v4, %v6122_v7  ;;  %v16330_v15 = vld [vmem:[#allocation54_spill] sm:$0xff]  ;;  %v16339_v4 = vld [vmem:[#allocation111_spill] sm:$0xff]  ;;  %v16345_v7 = vld [vmem:[#allocation128_spill] sm:$0xff] }
 0x86a   :  { %v5640_v18 = vpop.permute.xlu1 %5639  ;;  %v6124_v57 = vsel %vm4873_vm11, %v6026_v56, %v6123_v43  ;;  %v6262_v2 = vmul.f32 %v16330_v15, %v14052_v13  ;;  %v6264_v52 = vmul.f32 %v16331_v33, %v14052_v13  ;;  %v6266_v22 = vmul.f32 %v16332_v3, %v14052_v13  ;;  %v16336_v59 = vld [vmem:[#allocation50_spill] sm:$0xff]  ;;  %v16356_v3 = vld [vmem:[#allocation91_spill] sm:$0xff] }
 0x86b   :  { %v6097_v25 = vrot.slane %v5640_v18, %v12123_v16  ;;  %v6084_v38 = vsel %vm4430_vm7, %v6083_v47, %v6079_v58  ;;  %v6125_v9 = vsel %vm4875_vm12, %v6055_v12, %v6124_v57  ;;  %v6220_v18 = vmul.f32 %v16333_v49, %v13788_v53  ;;  %v16341_v47 = vld [vmem:[#allocation28_spill] sm:$0xff]  ;;  %v16343_v56 = vld [vmem:[#allocation74_spill] sm:$0xff]  ;;  %v16351_v57 = vld [vmem:[#allocation89_spill] sm:$0xff] }
 0x86c   :  { %v6126_v34 = vsel %vm4877_vm13, %v6084_v38, %v6125_v9  ;;  %v6227_v42 = vmul.f32 %v16336_v59, %v13808_v27  ;;  %v6231_v35 = vmul.f32 %v16338_v50, %v13808_v27  ;;  %v6233_v58 = vmul.f32 %v16339_v4, %v13828_v46  ;;  %v16346_v12 = vld [vmem:[#allocation38_spill] sm:$0xff]  ;;  %v16350_v38 = vld [vmem:[#allocation84_spill] sm:$0xff] }
 0x86d   :  { %v6098_v30 = vsel %vm4409_vm4, %v6097_v25, %v6093_v29  ;;  %6508 = vperm.xlu1 %8022, %v6258_v48   ;;  %v6223_v48 = vmul.f32 %v16334_v23, %v13788_v53  ;;  %v16337_v25 = vld [vmem:[#allocation110_spill] sm:$0xff]  ;;  %v16340_v29 = vld [vmem:[#allocation60_spill] sm:$0xff]  ;;  %v6237_v10 = vmul.f32 %v16341_v47, %v13828_v46  ;;  %v6239_v45 = vmul.f32 %v16342_v41, %v13848_v62  ;;  %v9015_v41 = vld [vmem:[%s15099_s2 + $0x20] sm:$0xff] }
 0x86e   :  { %v5646_v63 = vpop.permute.xlu1 %5645  ;;  %v6103_v1 = vsel %vm4416_vm5, %v6102_v28, %v6098_v30  ;;  %v6229_v6 = vmul.f32 %v16337_v25, %v13808_v27  ;;  %v6235_v53 = vmul.f32 %v16340_v29, %v13828_v46  ;;  %v6241_v27 = vmul.f32 %v16343_v56, %v13848_v62  ;;  %v16344_v30 = vld [vmem:[#allocation81_spill] sm:$0xff] }
 0x86f   :  { %v6107_v55 = vrot.slane %v5646_v63, %v12130_v14  ;;  %v6243_v28 = vmul.f32 %v16344_v30, %v13848_v62  ;;  %v6245_v19 = vmul.f32 %v16345_v7, %v13868_v20  ;;  %v6247_v46 = vmul.f32 %v16346_v12, %v13868_v20  ;;  %v16347_v63 = vld [vmem:[#allocation119_spill] sm:$0xff]  ;;  %v9013_v25 = vld [vmem:[%s15099_s2 + $0x10] sm:$0xff]  ;;  %v9016_v7 = vld [vmem:[%s15099_s2 + $0x18] sm:$0xff] }
 0x870   :  { %v6249_v43 = vmul.f32 %v16347_v63, %v13868_v20  ;;  %v16352_v20 = vld [vmem:[#allocation100_spill] sm:$0xff] }
 0x871   :  { %v6108_v31 = vsel %vm4423_vm6, %v6107_v55, %v6103_v1  ;;  %6518 = vperm.xlu1 %8022, %v6260_v26   ;;  %v16348_v55 = vld [vmem:[#allocation98_spill] sm:$0xff]  ;;  %v16349_v26 = vld [vmem:[#allocation48_spill] sm:$0xff]  ;;  %v6259_v9 = vmul.f32 %v16352_v20, %v13960_v39 }
 0x872   :  { %v6113_v5 = vsel %vm4430_vm7, %v6112_v24, %v6108_v31  ;;  %v6251_v37 = vmul.f32 %v16348_v55, %v13890_v32  ;;  %v6253_v62 = vmul.f32 %v16349_v26, %v13890_v32  ;;  %v6255_v24 = vmul.f32 %v16350_v38, %v13890_v32  ;;  %v16355_v32 = vld [vmem:[#allocation88_spill] sm:$0xff] }
 0x873   :  { %v6127_v54 = vsel %vm4879_vm14, %v6113_v5, %v6126_v34  ;;  %v6257_v31 = vmul.f32 %v16351_v57, %v13960_v39  ;;  %v16353_v34 = vld [vmem:[#allocation26_spill] sm:$0xff]  ;;  %v6265_v33 = vmul.f32 %v16355_v32, %v14052_v13 }
 0x874   :  { %v6133_v0 = vsel %vm1989_vm2, %v6127_v54, 0.0  ;;  %v6261_v15 = vmul.f32 %v16353_v34, %v13960_v39  ;;  %v16354_v54 = vld [vmem:[#allocation87_spill] sm:$0xff] }
 0x875   :  { %6528 = vperm.xlu1 %8022, %v6262_v2   ;;  %6134 = vadd.xlane.f32.xlu0 %v6133_v0  ;;  %v6263_v0 = vmul.f32 %v16354_v54, %v14052_v13 }
 0x879   :  { %6538 = vperm.xlu1 %8022, %v6264_v52  }
 0x87d   :  { %6548 = vperm.xlu1 %8022, %v6266_v22   ;;  %v6267_v22 = vmul.f32 %v16356_v3, %v14052_v13 }
 0x88b   :  { %6318 = vperm.xlu0 %8021, %v6220_v18  }
 0x88f   :  { %6333 = vperm.xlu0 %8021, %v6223_v48  }
 0x893   :  { %6343 = vperm.xlu0 %8021, %v6225_v36   ;;  %v9012_v36 = vld [vmem:[%s15099_s2 + $0x8] sm:$0xff] }
 0x897   :  { %6353 = vperm.xlu0 %8021, %v6227_v42  }
 0x89b   :  { %6363 = vperm.xlu0 %8021, %v6229_v6  }
 0x89c   :  { %v6324_v1 = vpop.permute.xlu1 %6323 }
 0x89d   :  { %v6797_v59 = vmul.f32 %v9012_v36, %v6324_v1  ;;  %v7171_v13 = vrot.slane %v6324_v1, %v12118_v21 }
 0x89f   :  { %6373 = vperm.xlu0 %8021, %v6231_v35   ;;  %v9014_v35 = vld [vmem:[%s15099_s2] sm:$0xff] }
 0x8a0   :  { %v6329_v5 = vpop.permute.xlu1 %6328 }
 0x8a1   :  { %v6798_v6 = vmul.f32 %v9013_v25, %v6329_v5  ;;  %v7176_v29 = vrot.slane %v6329_v5, %v12123_v16  ;;  %v16357_v5 = vld [vmem:[#allocation93_spill] sm:$0xff]  ;;  %v16358_v25 = vld [vmem:[#allocation94_spill] sm:$0xff] }
 0x8a3   :  { %6383 = vperm.xlu0 %8021, %v6233_v58  }
 0x8a4   :  { %v6339_v2 = vpop.permute.xlu1 %6338 }
 0x8a5   :  { %v7186_v63 = vrot.slane %v6339_v2, %v12130_v14 }
 0x8a7   :  { %6393 = vperm.xlu0 %8021, %v6235_v53   ;;  %v6893_v53 = vsel %vm196_vm0, %v6797_v59, 0.0  ;;  %v9020_v59 = vld [vmem:[%s15099_s2 + $0x38] sm:$0xff] }
 0x8a8   :  { %v14120_v52 = vpop.permute.xlu1 %6348 }
 0x8ab   :  { %6403 = vperm.xlu0 %8021, %v6237_v10  }
 0x8ac   :  { %v14124_v49 = vpop.permute.xlu1 %6358 }
 0x8af   :  { %6413 = vperm.xlu0 %8021, %v6239_v45   ;;  %v6800_v45 = vmul.f32 %v9015_v41, %v6339_v2 }
 0x8b0   :  { %v14126_v18 = vpop.permute.xlu1 %6368 }
 0x8b1   :  { %v6899_v38 = vsel %vm196_vm0, %v6800_v45, 0.0 }
 0x8b3   :  { %6423 = vperm.xlu0 %8021, %v6241_v27  }
 0x8b4   :  { %v14128_v39 = vpop.permute.xlu1 %6378 }
 0x8b7   :  { %6433 = vperm.xlu0 %8021, %v6243_v28   ;;  %v6895_v28 = vsel %vm196_vm0, %v6798_v6, 0.0 }
 0x8b8   :  { %v14130_v23 = vpop.permute.xlu1 %6388 }
 0x8bb   :  { %6443 = vperm.xlu0 %8021, %v6245_v19  }
 0x8bc   :  { %v14132_v17 = vpop.permute.xlu1 %6398 }
 0x8bf   :  { %6453 = vperm.xlu0 %8021, %v6247_v46  }
 0x8c0   :  { %v14141_v50 = vpop.permute.xlu1 %6408 }
 0x8c3   :  { %6463 = vperm.xlu0 %8021, %v6249_v43  }
 0x8c4   :  { %v14163_v55 = vpop.permute.xlu1 %6418 }
 0x8c7   :  { %6473 = vperm.xlu0 %8021, %v6251_v37  }
 0x8c8   :  { %v14189_v36 = vpop.permute.xlu1 %6428 }
 0x8cb   :  { %6483 = vperm.xlu0 %8021, %v6253_v62  }
 0x8cf   :  { %6493 = vperm.xlu0 %8021, %v6255_v24  }
 0x8d3   :  { %6503 = vperm.xlu0 %8021, %v6257_v31   ;;  %v9017_v31 = vld [vmem:[%s15099_s2 + $0x28] sm:$0xff] }
 0x8d7   :  { %6513 = vperm.xlu0 %8021, %v6259_v9  }
 0x8db   :  { %6523 = vperm.xlu0 %8021, %v6261_v15  }
 0x8df   :  { %6533 = vperm.xlu0 %8021, %v6263_v0   ;;  %v9019_v0 = vld [vmem:[%s15099_s2 + $0x40] sm:$0xff] }
 0x8e0   :  { %v6804_v32 = vmul.f32 %v9019_v0, %v14124_v49  ;;  %v16364_v0 = vld [vmem:[#allocation37_spill] sm:$0xff] }
 0x8e3   :  { %6543 = vperm.xlu0 %8021, %v6265_v33  }
 0x8e7   :  { %6553 = vperm.xlu0 %8021, %v6267_v22  }
 0x8fe   :  { %v6135_v48 = vpop.xlane.xlu0 %6134 }
 0x8ff   :  { %9010 = vrcp.f32 %v6135_v48 }
 0x906   :  { %v6319_v42 = vpop.permute.xlu0 %6318 }
 0x907   :  { %v6796_v4 = vmul.f32 %v9014_v35, %v6319_v42  ;;  %v7167_v58 = vrot.slane %v6319_v42, %v12114_v61  ;;  %v16359_v35 = vld [vmem:[#allocation31_spill] sm:$0xff] }
 0x909   :  { %v6892_v47 = vsel %vm196_vm0, %v6796_v4, 0.0  ;;  %v7172_v10 = vsel %vm4402_vm3, %v7171_v13, %v7167_v58 }
 0x90a   :  { %v6894_v56 = vadd.f32 %v6893_v53, %v6892_v47  ;;  %v6334_v27 = vpop.permute.xlu0 %6333  ;;  %v7177_v30 = vsel %vm4409_vm4, %v7176_v29, %v7172_v10  ;;  %v6912_v29 = vsel %vm196_vm0, %v6804_v32, 0.0  ;;  %v9021_v53 = vld [vmem:[%s15099_s2 + $0x50] sm:$0xff] }
 0x90b   :  { %v6799_v19 = vmul.f32 %v9016_v7, %v6334_v27  ;;  %v7181_v12 = vrot.slane %v6334_v27, %v12126_v60  ;;  %v6806_v47 = vmul.f32 %v9021_v53, %v14126_v18  ;;  %v9022_v7 = vld [vmem:[%s15099_s2 + $0x48] sm:$0xff]  ;;  %v7234_v53 = vrot.slane %v14130_v23, %v12123_v16 }
 0x90c   :  { %v14160_v46 = vpop.eup %9010  ;;  %v6896_v43 = vadd.f32 %v6895_v28, %v6894_v56 }
 0x90d   :  { %v6897_v37 = vsel %vm196_vm0, %v6799_v19, 0.0  ;;  %v7182_v26 = vsel %vm4416_vm5, %v7181_v12, %v7177_v30  ;;  %v6175_v62 = vrot.slane %v14160_v46, %v16295_v8  ;;  %v9018_v8 = vld [vmem:[%s15099_s2 + $0x30] sm:$0xff] }
 0x90e   :  { %v6898_v24 = vadd.f32 %v6897_v37, %v6896_v43  ;;  %v6344_v1 = vpop.permute.xlu0 %6343  ;;  %v7187_v57 = vsel %vm4423_vm6, %v7186_v63, %v7182_v26  ;;  %v6802_v2 = vmul.f32 %v9018_v8, %v14120_v52  ;;  %v16361_v63 = vld [vmem:[#allocation52_spill] sm:$0xff]  ;;  %v16362_v37 = vld [vmem:[#allocation35_spill] sm:$0xff] }
 0x90f   :  { %v6801_v20 = vmul.f32 %v9017_v31, %v6344_v1  ;;  %v7191_v9 = vrot.slane %v6344_v1, %v12133_v51  ;;  %v6269_v34 = vmul.f32 %v16357_v5, %v6175_v62  ;;  %v6268_v15 = vmul.f32 %v13629_v11, %v6175_v62  ;;  %v14218_v1 = vpop.permute.xlu1 %6438 }
 0x910   :  { %v6900_v54 = vadd.f32 %v6899_v38, %v6898_v24  ;;  %v7196_v11 = vrot.slane %v14120_v52, %v12114_v61  ;;  %v6271_v6 = vmul.f32 %v16358_v25, %v6175_v62  ;;  %v6270_v4 = vmul.f32 %v16359_v35, %v6175_v62 }
 0x911   :  { %v6901_v33 = vsel %vm196_vm0, %v6801_v20, 0.0  ;;  %v7192_v3 = vsel %vm4430_vm7, %v7191_v9, %v7187_v57  ;;  %6563 = vperm.xlu0 %8021, %v6269_v34   ;;  %6558 = vperm.xlu1 %8022, %v6268_v15   ;;  %v6909_v58 = vsel %vm196_vm0, %v6802_v2, 0.0  ;;  %v7205_v52 = vrot.slane %v14124_v49, %v12123_v16  ;;  %v16360_v49 = vld [vmem:[#allocation68_spill] sm:$0xff] }
 0x912   :  { %v6902_v22 = vadd.f32 %v6901_v33, %v6900_v54  ;;  %v6354_v48 = vpop.permute.xlu0 %6353  ;;  %v6179_v28 = vrot.slane %v14160_v46, %v16360_v49  ;;  %v6273_v43 = vmul.f32 %v16361_v63, %v6175_v62  ;;  %v6272_v26 = vmul.f32 %v16362_v37, %v6175_v62  ;;  %v16363_v2 = vld [vmem:[#allocation112_spill] sm:$0xff] }
 0x913   :  { %v6803_v42 = vmul.f32 %v9020_v59, %v6354_v48  ;;  %v7200_v13 = vrot.slane %v6354_v48, %v12118_v21  ;;  %v7215_v38 = vrot.slane %v14126_v18, %v12130_v14  ;;  %v6916_v20 = vsel %vm196_vm0, %v6806_v47, 0.0  ;;  %v9023_v18 = vld [vmem:[%s15099_s2 + $0x58] sm:$0xff] }
 0x914   :  { %v6903_v45 = vrot.slane %v6902_v22, 4  ;;  %v6275_v54 = vmul.f32 %v16363_v2, %v6179_v28  ;;  %v6274_v32 = vmul.f32 %v16364_v0, %v6179_v28  ;;  %v7225_v25 = vrot.slane %v14128_v39, %v12114_v61 }
 0x915   :  { %v6910_v10 = vsel %vm196_vm0, %v6803_v42, 0.0  ;;  %v7201_v41 = vsel %vm4402_vm3, %v7200_v13, %v7196_v11  ;;  %6573 = vperm.xlu0 %8021, %v6271_v6   ;;  %6568 = vperm.xlu1 %8022, %v6270_v4   ;;  %v14237_v6 = vpop.permute.xlu1 %6448  ;;  %v16365_v4 = vld [vmem:[#allocation24_spill] sm:$0xff] }
 0x916   :  { %v6911_v56 = vadd.f32 %v6910_v10, %v6909_v58  ;;  %v6364_v27 = vpop.permute.xlu0 %6363  ;;  %v7206_v30 = vsel %vm4409_vm4, %v7205_v52, %v7201_v41  ;;  %v6904_v9 = vadd.f32 %v6903_v45, %v6902_v22  ;;  %v6277_v58 = vmul.f32 %v16365_v4, %v6179_v28  ;;  %v16366_v52 = vld [vmem:[#allocation41_spill] sm:$0xff] }
 0x917   :  { %v6805_v19 = vmul.f32 %v9022_v7, %v6364_v27  ;;  %v7210_v12 = vrot.slane %v6364_v27, %v12126_v60  ;;  %v16368_v7 = vld [vmem:[#allocation45_spill] sm:$0xff] }
 0x918   :  { %v6913_v24 = vadd.f32 %v6912_v29, %v6911_v56  ;;  %v6905_v48 = vrot.slane %v6904_v9, 2  ;;  %v6276_v29 = vmul.f32 %v16366_v52, %v6179_v28 }
 0x919   :  { %v6914_v57 = vsel %vm196_vm0, %v6805_v19, 0.0  ;;  %v7211_v31 = vsel %vm4416_vm5, %v7210_v12, %v7206_v30  ;;  %6583 = vperm.xlu0 %8021, %v6273_v43   ;;  %6578 = vperm.xlu1 %8022, %v6272_v26   ;;  %v16367_v30 = vld [vmem:[#allocation118_spill] sm:$0xff]  ;;  %v6278_v19 = vmul.f32 %v16368_v7, %v6179_v28  ;;  %v16369_v12 = vld [vmem:[#allocation69_spill] sm:$0xff]  ;;  %v7244_v43 = vrot.slane %v14132_v17, %v12130_v14  ;;  %v14257_v26 = vpop.permute.xlu1 %6458 }
 0x91a   :  { %v6915_v5 = vadd.f32 %v6914_v57, %v6913_v24  ;;  %v6374_v34 = vpop.permute.xlu0 %6373  ;;  %v7216_v15 = vsel %vm4423_vm6, %v7215_v38, %v7211_v31  ;;  %v6906_v10 = vadd.f32 %v6905_v48, %v6904_v9  ;;  %v6279_v49 = vmul.f32 %v16367_v30, %v6179_v28  ;;  %v16370_v9 = vld [vmem:[#allocation34_spill] sm:$0xff] }
 0x91b   :  { %v6807_v62 = vmul.f32 %v9023_v18, %v6374_v34  ;;  %v7220_v8 = vrot.slane %v6374_v34, %v12133_v51  ;;  %v6183_v63 = vrot.slane %v14160_v46, %v16369_v12  ;;  %v16371_v34 = vld [vmem:[#allocation120_spill] sm:$0xff]  ;;  %v16377_v12 = vld [vmem:[#allocation114_spill] sm:$0xff] }
 0x91c   :  { %v6917_v33 = vadd.f32 %v6916_v20, %v6915_v5  ;;  %v6907_v24 = vrot.slane %v6906_v10, 1 }
 0x91d   :  { %v6918_v11 = vsel %vm196_vm0, %v6807_v62, 0.0  ;;  %v7221_v22 = vsel %vm4430_vm7, %v7220_v8, %v7216_v15  ;;  %6593 = vperm.xlu0 %8021, %v6275_v54   ;;  %6588 = vperm.xlu1 %8022, %v6274_v32   ;;  %v6281_v5 = vmul.f32 %v16370_v9, %v6183_v63  ;;  %v6280_v15 = vmul.f32 %v16371_v34, %v6183_v63  ;;  %v16379_v9 = vld [vmem:[#allocation64_spill] sm:$0xff]  ;;  %v16380_v34 = vld [vmem:[#allocation47_spill] sm:$0xff] }
 0x91e   :  { %v6919_v59 = vadd.f32 %v6918_v11, %v6917_v33  ;;  %v7628_v42 = vsel %vm4867_vm8, %v7221_v22, %v7192_v3  ;;  %v14233_v13 = vpop.permute.xlu0 %6383  ;;  %v6908_v8 = vadd.f32 %v6907_v24, %v6906_v10  ;;  %v7254_v32 = vrot.slane %v14141_v50, %v12114_v61  ;;  %v14273_v33 = vpop.permute.xlu1 %6468  ;;  %v16372_v22 = vld [vmem:[#allocation115_spill] sm:$0xff]  ;;  %v16376_v10 = vld [vmem:[#allocation70_spill] sm:$0xff] }
 0x91f   :  { %v7229_v35 = vrot.slane %v14233_v13, %v12118_v21  ;;  %v6283_v48 = vmul.f32 %v16372_v22, %v6183_v63 }
 0x920   :  { %v6920_v47 = vrot.slane %v6919_v59, 4 }
 0x921   :  { %v7230_v3 = vsel %vm4402_vm3, %v7229_v35, %v7225_v25  ;;  %6603 = vperm.xlu0 %8021, %v6277_v58   ;;  %6598 = vperm.xlu1 %8022, %v6276_v29   ;;  %v16374_v29 = vld [vmem:[#allocation58_spill] sm:$0xff] }
 0x922   :  { %v6921_v41 = vadd.f32 %v6920_v47, %v6919_v59  ;;  %v14246_v45 = vpop.permute.xlu0 %6393  ;;  %v7235_v56 = vsel %vm4409_vm4, %v7234_v53, %v7230_v3  ;;  %v16373_v59 = vld [vmem:[#allocation62_spill] sm:$0xff]  ;;  %v6285_v53 = vmul.f32 %v16374_v29, %v6183_v63 }
 0x923   :  { %v7239_v27 = vrot.slane %v14246_v45, %v12126_v60  ;;  %v6282_v25 = vmul.f32 %v16373_v59, %v6183_v63  ;;  %v16375_v47 = vld [vmem:[#allocation66_spill] sm:$0xff] }
 0x924   :  { %v6922_v37 = vrot.slane %v6921_v41, 2  ;;  %v6284_v3 = vmul.f32 %v16375_v47, %v6183_v63 }
 0x925   :  { %v7240_v38 = vsel %vm4416_vm5, %v7239_v27, %v7235_v56  ;;  %6613 = vperm.xlu0 %8021, %v6279_v49   ;;  %6608 = vperm.xlu1 %8022, %v6278_v19   ;;  %v14294_v27 = vpop.permute.xlu1 %6478  ;;  %v7273_v49 = vrot.slane %v14189_v36, %v12130_v14 }
 0x926   :  { %v6923_v57 = vadd.f32 %v6922_v37, %v6921_v41  ;;  %v14260_v31 = vpop.permute.xlu0 %6403  ;;  %v7245_v20 = vsel %vm4423_vm6, %v7244_v43, %v7240_v38  ;;  %v6187_v41 = vrot.slane %v14160_v46, %v16376_v10  ;;  %v16378_v43 = vld [vmem:[#allocation57_spill] sm:$0xff] }
 0x927   :  { %v7249_v28 = vrot.slane %v14260_v31, %v12133_v51 }
 0x928   :  { %v6924_v18 = vrot.slane %v6923_v57, 1  ;;  %v6287_v63 = vmul.f32 %v16377_v12, %v6187_v41  ;;  %v6286_v37 = vmul.f32 %v16378_v43, %v6187_v41 }
 0x929   :  { %v7250_v62 = vsel %vm4430_vm7, %v7249_v28, %v7245_v20  ;;  %6623 = vperm.xlu0 %8021, %v6281_v5   ;;  %6618 = vperm.xlu1 %8022, %v6280_v15   ;;  %v14312_v28 = vpop.permute.xlu1 %6488  ;;  %v6289_v5 = vmul.f32 %v16379_v9, %v6187_v41  ;;  %v6288_v15 = vmul.f32 %v16380_v34, %v6187_v41 }
 0x92a   :  { %v6925_v2 = vadd.f32 %v6924_v18, %v6923_v57  ;;  %v7629_v54 = vsel %vm4869_vm9, %v7250_v62, %v7628_v42  ;;  %v14269_v0 = vpop.permute.xlu0 %6413  ;;  %v7263_v42 = vrot.slane %v14163_v55, %v12123_v16  ;;  %v16381_v62 = vld [vmem:[#allocation78_spill] sm:$0xff] }
 0x92b   :  { %v7258_v11 = vrot.slane %v14269_v0, %v12118_v21 }
 0x92c   :  { %v14280_v35 = vsel %vm4867_vm8, %v6925_v2, %v6908_v8  ;;  %v6291_v8 = vmul.f32 %v16381_v62, %v6187_v41  ;;  %v16382_v2 = vld [vmem:[#allocation79_spill] sm:$0xff]  ;;  %v9031_v62 = vld [vmem:[%s15099_s2 + $0x78] sm:$0xff] }
 0x92d   :  { %v7259_v4 = vsel %vm4402_vm3, %v7258_v11, %v7254_v32  ;;  %6633 = vperm.xlu0 %8021, %v6283_v48   ;;  %6628 = vperm.xlu1 %8022, %v6282_v25   ;;  %v6290_v32 = vmul.f32 %v16382_v2, %v6187_v41  ;;  %v16383_v11 = vld [vmem:[#allocation71_spill] sm:$0xff]  ;;  %v14324_v22 = vpop.permute.xlu1 %6498  ;;  %v9024_v48 = vld [vmem:[%s15099_s2 + $0x68] sm:$0xff] }
 0x92e   :  { %v14285_v58 = vpop.permute.xlu0 %6423  ;;  %v7264_v56 = vsel %vm4409_vm4, %v7263_v42, %v7259_v4  ;;  %v6809_v59 = vmul.f32 %v9024_v48, %v14233_v13  ;;  %v9025_v25 = vld [vmem:[%s15099_s2 + $0x60] sm:$0xff] }
 0x92f   :  { %v7268_v52 = vrot.slane %v14285_v58, %v12126_v60  ;;  %v6808_v4 = vmul.f32 %v9025_v25, %v14128_v39  ;;  %v9026_v39 = vld [vmem:[%s15099_s2 + $0x70] sm:$0xff] }
 0x930   :  { %v6927_v13 = vsel %vm196_vm0, %v6809_v59, 0.0 }
 0x931   :  { %v7269_v30 = vsel %vm4416_vm5, %v7268_v52, %v7264_v56  ;;  %6643 = vperm.xlu0 %8021, %v6285_v53   ;;  %6638 = vperm.xlu1 %8022, %v6284_v3   ;;  %v16384_v52 = vld [vmem:[#allocation75_spill] sm:$0xff]  ;;  %v16385_v53 = vld [vmem:[#allocation85_spill] sm:$0xff]  ;;  %v16386_v3 = vld [vmem:[#allocation72_spill] sm:$0xff]  ;;  %v6926_v41 = vsel %vm196_vm0, %v6808_v4, 0.0  ;;  %v6810_v56 = vmul.f32 %v9026_v39, %v14130_v23  ;;  %v14356_v12 = vpop.permute.xlu1 %6508 }
 0x932   :  { %v14299_v7 = vpop.permute.xlu0 %6433  ;;  %v7274_v38 = vsel %vm4423_vm6, %v7273_v49, %v7269_v30  ;;  %v14342_v10 = vrot.slane %v14160_v46, %v16386_v3  ;;  %v9027_v49 = vld [vmem:[%s15099_s2 + $0x80] sm:$0xff]  ;;  %v9028_v23 = vld [vmem:[%s15099_s2 + $0x90] sm:$0xff]  ;;  %v6928_v34 = vadd.f32 %v6927_v13, %v6926_v41 }
 0x933   :  { %v7278_v19 = vrot.slane %v14299_v7, %v12133_v51  ;;  %v6814_v9 = vmul.f32 %v9028_v23, %v14141_v50  ;;  %v9032_v50 = vld [vmem:[%s15099_s2 + $0xc8] sm:$0xff]  ;;  %v6929_v25 = vsel %vm196_vm0, %v6810_v56, 0.0 }
 0x934   :  { %v6930_v41 = vadd.f32 %v6929_v25, %v6928_v34 }
 0x935   :  { %v7279_v24 = vsel %vm4430_vm7, %v7278_v19, %v7274_v38  ;;  %6653 = vperm.xlu0 %8021, %v6287_v63   ;;  %6648 = vperm.xlu1 %8022, %v6286_v37   ;;  %v6812_v19 = vmul.f32 %v9027_v49, %v14132_v17  ;;  %v16387_v63 = vld [vmem:[#allocation124_spill] sm:$0xff]  ;;  %v16388_v37 = vld [vmem:[#allocation59_spill] sm:$0xff]  ;;  %v6943_v3 = vsel %vm196_vm0, %v6814_v9, 0.0  ;;  %v9036_v49 = vld [vmem:[%s15099_s2 + $0xb0] sm:$0xff] }
 0x936   :  { %v14308_v57 = vsel %vm4871_vm10, %v7279_v24, %v7629_v54  ;;  %v14310_v20 = vpop.permute.xlu0 %6443  ;;  %v14322_v54 = vrot.slane %v14160_v46, %v16383_v11  ;;  %v6299_v43 = vmul.f32 %v16387_v63, %v14342_v10  ;;  %v6298_v38 = vmul.f32 %v16388_v37, %v14342_v10  ;;  %v9029_v17 = vld [vmem:[%s15099_s2 + $0xa0] sm:$0xff]  ;;  %v9035_v11 = vld [vmem:[%s15099_s2 + $0xf8] sm:$0xff] }
 0x937   :  { %v14364_v24 = vrot.slane %v14160_v46, %v16318_v44  ;;  %v6821_v2 = vmul.f32 %v9032_v50, %v14310_v20  ;;  %v6933_v4 = vsel %vm196_vm0, %v6812_v19, 0.0  ;;  %v14413_v56 = vmul.f32 %v9036_v49, %v14189_v36  ;;  %v9037_v19 = vld [vmem:[%s15099_s2 + $0xd0] sm:$0xff]  ;;  %v9038_v36 = vld [vmem:[%s15099_s2 + $0x100] sm:$0xff] }
 0x938   :  { %v6293_v29 = vmul.f32 %v16384_v52, %v14322_v54  ;;  %v6292_v47 = vmul.f32 %v16385_v53, %v14322_v54  ;;  %v16389_v52 = vld [vmem:[#allocation61_spill] sm:$0xff]  ;;  %v16390_v53 = vld [vmem:[#allocation92_spill] sm:$0xff]  ;;  %v6822_v63 = vmul.f32 %v9037_v19, %v14237_v6 }
 0x939   :  { %6663 = vperm.xlu0 %8021, %v6289_v5   ;;  %6658 = vperm.xlu1 %8022, %v6288_v15   ;;  %v6816_v5 = vmul.f32 %v9029_v17, %v14163_v55  ;;  %v9030_v15 = vld [vmem:[%s15099_s2 + $0x98] sm:$0xff]  ;;  %v9033_v55 = vld [vmem:[%s15099_s2 + $0xc0] sm:$0xff]  ;;  %v6828_v17 = vmul.f32 %v9038_v36, %v14294_v27 }
 0x93a   :  { %v14316_v18 = vpop.permute.xlu0 %6453  ;;  %v6815_v44 = vmul.f32 %v9030_v15, %v14269_v0  ;;  %v6820_v0 = vmul.f32 %v9033_v55, %v14218_v1  ;;  %v9039_v55 = vld [vmem:[%s15099_s2 + $0x120] sm:$0xff]  ;;  %v6963_v25 = vsel %vm196_vm0, %v6822_v63, 0.0 }
 0x93b   :  { %v6946_v13 = vsel %vm196_vm0, %v6816_v5, 0.0 }
 0x93c   :  { %v6944_v39 = vsel %vm196_vm0, %v6815_v44, 0.0  ;;  %v6960_v23 = vsel %vm196_vm0, %v6820_v0, 0.0  ;;  %v16391_v44 = vld [vmem:[#allocation83_spill] sm:$0xff]  ;;  %v6832_v0 = vmul.f32 %v9039_v55, %v14324_v22 }
 0x93d   :  { %6673 = vperm.xlu0 %8021, %v6291_v8   ;;  %6668 = vperm.xlu1 %8022, %v6290_v32   ;;  %v6811_v8 = vmul.f32 %v9031_v62, %v14246_v45  ;;  %v9034_v32 = vld [vmem:[%s15099_s2 + $0xf0] sm:$0xff]  ;;  %v6945_v15 = vadd.f32 %v6944_v39, %v6943_v3  ;;  %v6300_v62 = vmul.f32 %v16391_v44, %v14342_v10  ;;  %v6980_v3 = vsel %vm196_vm0, %v6828_v17, 0.0  ;;  %v9045_v39 = vld [vmem:[%s15099_s2 + $0x108] sm:$0xff] }
 0x93e   :  { %v14334_v42 = vpop.permute.xlu0 %6463  ;;  %v6826_v45 = vmul.f32 %v9034_v32, %v14273_v33  ;;  %v16394_v17 = vld [vmem:[#allocation117_spill] sm:$0xff]  ;;  %v6994_v44 = vsel %vm196_vm0, %v6832_v0, 0.0 }
 0x93f   :  { %v6931_v37 = vsel %vm196_vm0, %v6811_v8, 0.0  ;;  %v16392_v8 = vld [vmem:[#allocation13_spill] sm:$0xff] }
 0x940   :  { %v6977_v9 = vsel %vm196_vm0, %v6826_v45, 0.0  ;;  %v6305_v50 = vmul.f32 %v16392_v8, %v14364_v24  ;;  %v6932_v32 = vadd.f32 %v6931_v37, %v6930_v41  ;;  %v9040_v45 = vld [vmem:[%s15099_s2 + $0xa8] sm:$0xff]  ;;  %v6947_v37 = vadd.f32 %v6946_v13, %v6945_v15 }
 0x941   :  { %6683 = vperm.xlu0 %8021, %v6293_v29   ;;  %6678 = vperm.xlu1 %8022, %v6292_v47   ;;  %v6304_v29 = vmul.f32 %v16389_v52, %v14364_v24  ;;  %v6294_v47 = vmul.f32 %v16390_v53, %v14322_v54  ;;  %v9042_v52 = vld [vmem:[%s15099_s2 + $0xd8] sm:$0xff] }
 0x942   :  { %v14350_v30 = vpop.permute.xlu0 %6473 }
 0x943   :  { %v6827_v48 = vmul.f32 %v9035_v11, %v14350_v30  ;;  %v6817_v11 = vmul.f32 %v9040_v45, %v14285_v58  ;;  %v9043_v58 = vld [vmem:[%s15099_s2 + $0xe0] sm:$0xff] }
 0x945   :  { %6713 = vperm.xlu0 %8021, %v6299_v43   ;;  %6708 = vperm.xlu1 %8022, %v6298_v38   ;;  %v14419_v43 = vpop.permute.xlu1 %6518  ;;  %v6961_v38 = vsel %vm196_vm0, %v6821_v2, 0.0  ;;  %v6978_v5 = vsel %vm196_vm0, %v6827_v48, 0.0  ;;  %v14438_v2 = vrot.slane %v14160_v46, %v16328_v40  ;;  %v9041_v40 = vld [vmem:[%s15099_s2 + $0x88] sm:$0xff]  ;;  %v6948_v8 = vsel %vm196_vm0, %v6817_v11, 0.0 }
 0x946   :  { %v14398_v59 = vpop.permute.xlu0 %6483  ;;  %v6962_v48 = vadd.f32 %v6961_v38, %v6960_v23  ;;  %v6813_v46 = vmul.f32 %v9041_v40, %v14260_v31  ;;  %v6979_v53 = vadd.f32 %v6978_v5, %v6977_v9  ;;  %v9044_v31 = vld [vmem:[%s15099_s2 + $0x130] sm:$0xff]  ;;  %v9046_v38 = vld [vmem:[%s15099_s2 + $0x128] sm:$0xff]  ;;  %v16393_v9 = vld [vmem:[#allocation15_spill] sm:$0xff] }
 0x947   :  { %v6834_v41 = vmul.f32 %v9044_v31, %v14356_v12  ;;  %v6829_v49 = vmul.f32 %v9045_v39, %v14398_v59  ;;  %v6311_v36 = vmul.f32 %v16393_v9, %v14438_v2  ;;  %v6310_v5 = vmul.f32 %v16394_v17, %v14438_v2  ;;  %v9047_v40 = vld [vmem:[%s15099_s2 + $0x110] sm:$0xff] }
 0x948   :  { %v6935_v13 = vsel %vm196_vm0, %v6813_v46, 0.0  ;;  %v6981_v55 = vadd.f32 %v6980_v3, %v6979_v53 }
 0x949   :  { %6738 = vperm.xlu0 %8021, %v6304_v29   ;;  %6688 = vperm.xlu1 %8022, %v6294_v47   ;;  %v6823_v29 = vmul.f32 %v9042_v52, %v14316_v18  ;;  %v6824_v47 = vmul.f32 %v9043_v58, %v14257_v26  ;;  %v14472_v63 = vpop.permute.xlu1 %6528  ;;  %v6830_v52 = vmul.f32 %v9047_v40, %v14312_v28  ;;  %v6982_v0 = vsel %vm196_vm0, %v6829_v49, 0.0  ;;  %v16396_v58 = vld [vmem:[#allocation121_spill] sm:$0xff] }
 0x94a   :  { %v14430_v34 = vpop.permute.xlu0 %6493  ;;  %v6295_v3 = vmul.f32 %v16396_v58, %v14322_v54 }
 0x94b   :  { %v6965_v15 = vsel %vm196_vm0, %v6823_v29, 0.0  ;;  %v16395_v29 = vld [vmem:[#allocation63_spill] sm:$0xff] }
 0x94c   :  { %v6306_v53 = vmul.f32 %v16395_v29, %v14364_v24 }
 0x94d   :  { %6718 = vperm.xlu0 %8021, %v6300_v62   ;;  %6743 = vperm.xlu1 %8022, %v6305_v50   ;;  %v6934_v62 = vadd.f32 %v6933_v4, %v6932_v32  ;;  %v6964_v50 = vadd.f32 %v6963_v25, %v6962_v48  ;;  %v6997_v4 = vsel %vm196_vm0, %v6834_v41, 0.0  ;;  %v6949_v48 = vadd.f32 %v6948_v8, %v6947_v37  ;;  %v9048_v25 = vld [vmem:[%s15099_s2 + $0x138] sm:$0xff]  ;;  %v14511_v9 = vpop.permute.xlu1 %6538 }
 0x94e   :  { %v14470_v19 = vpop.permute.xlu0 %6503  ;;  %v9049_v41 = vld [vmem:[%s15099_s2 + $0xb8] sm:$0xff] }
 0x94f   :  { %v6833_v23 = vmul.f32 %v9046_v38, %v14470_v19  ;;  %v6936_v31 = vadd.f32 %v6935_v13, %v6934_v62  ;;  %v6819_v39 = vmul.f32 %v9049_v41, %v14299_v7  ;;  %v6966_v49 = vadd.f32 %v6965_v15, %v6964_v50  ;;  %v9050_v38 = vld [vmem:[%s15099_s2 + $0x140] sm:$0xff]  ;;  %v9052_v8 = vld [vmem:[%s15099_s2 + $0x118] sm:$0xff] }
 0x950   :  { %v6950_v7 = vsel %vm196_vm0, %v14413_v56, 0.0  ;;  %v6967_v62 = vsel %vm196_vm0, %v6824_v47, 0.0  ;;  %v6831_v50 = vmul.f32 %v9052_v8, %v14430_v34  ;;  %v16397_v56 = vld [vmem:[#allocation86_spill] sm:$0xff]  ;;  %v16400_v8 = vld [vmem:[#allocation11_spill] sm:$0xff] }
 0x951   :  { %v6995_v45 = vsel %vm196_vm0, %v6833_v23, 0.0  ;;  %6773 = vperm.xlu0 %8021, %v6311_v36   ;;  %6768 = vperm.xlu1 %8022, %v6310_v5   ;;  %v6836_v23 = vmul.f32 %v9050_v38, %v14419_v43  ;;  %v9051_v36 = vld [vmem:[%s15099_s2 + $0xe8] sm:$0xff]  ;;  %v6983_v5 = vadd.f32 %v6982_v0, %v6981_v55  ;;  %v16398_v47 = vld [vmem:[#allocation14_spill] sm:$0xff]  ;;  %v6968_v29 = vadd.f32 %v6967_v62, %v6966_v49 }
 0x952   :  { %v6996_v32 = vadd.f32 %v6995_v45, %v6994_v44  ;;  %v14493_v11 = vpop.permute.xlu0 %6513  ;;  %v6825_v17 = vmul.f32 %v9051_v36, %v14334_v42  ;;  %v6951_v45 = vadd.f32 %v6950_v7, %v6949_v48  ;;  %v9053_v55 = vld [vmem:[%s15099_s2 + $0x148] sm:$0xff]  ;;  %v6301_v0 = vmul.f32 %v16398_v47, %v14342_v10  ;;  %v9056_v7 = vld [vmem:[%s15099_s2 + $0x158] sm:$0xff] }
 0x953   :  { %v6835_v46 = vmul.f32 %v9048_v25, %v14493_v11  ;;  %v6937_v25 = vrot.slane %v6936_v31, 4  ;;  %v7001_v48 = vsel %vm196_vm0, %v6836_v23, 0.0  ;;  %v6986_v49 = vsel %vm196_vm0, %v6831_v50, 0.0  ;;  %v16399_v23 = vld [vmem:[#allocation16_spill] sm:$0xff] }
 0x954   :  { %v6998_v37 = vadd.f32 %v6997_v4, %v6996_v32  ;;  %v6312_v4 = vmul.f32 %v16397_v56, %v14438_v2  ;;  %v6984_v32 = vsel %vm196_vm0, %v6830_v52, 0.0  ;;  %v9055_v52 = vld [vmem:[%s15099_s2 + $0x160] sm:$0xff]  ;;  %v6307_v36 = vmul.f32 %v16399_v23, %v14364_v24 }
 0x955   :  { %v6999_v44 = vsel %vm196_vm0, %v6835_v46, 0.0  ;;  %6748 = vperm.xlu0 %8021, %v6306_v53   ;;  %6693 = vperm.xlu1 %8022, %v6295_v3   ;;  %v6952_v46 = vsel %vm196_vm0, %v6819_v39, 0.0  ;;  %v9054_v53 = vld [vmem:[%s15099_s2 + $0x150] sm:$0xff]  ;;  %v6969_v3 = vsel %vm196_vm0, %v6825_v17, 0.0  ;;  %v6985_v41 = vadd.f32 %v6984_v32, %v6983_v5 }
 0x956   :  { %v7000_v13 = vadd.f32 %v6999_v44, %v6998_v37  ;;  %v14525_v15 = vpop.permute.xlu0 %6523  ;;  %v6838_v58 = vmul.f32 %v9054_v53, %v14472_v63  ;;  %v6840_v39 = vmul.f32 %v9055_v52, %v14511_v9  ;;  %v14552_v44 = vpop.permute.xlu1 %6548  ;;  %v6953_v17 = vadd.f32 %v6952_v46, %v6951_v45  ;;  %v16401_v53 = vld [vmem:[#allocation27_spill] sm:$0xff] }
 0x957   :  { %v6837_v40 = vmul.f32 %v9053_v55, %v14525_v15  ;;  %v6296_v50 = vmul.f32 %v16400_v8, %v14322_v54  ;;  %v6970_v55 = vadd.f32 %v6969_v3, %v6968_v29  ;;  %v16402_v3 = vld [vmem:[#allocation90_spill] sm:$0xff] }
 0x958   :  { %v7002_v37 = vadd.f32 %v7001_v48, %v7000_v13  ;;  %v6938_v13 = vadd.f32 %v6937_v25, %v6936_v31  ;;  %v7011_v56 = vsel %vm196_vm0, %v6838_v58, 0.0  ;;  %v7014_v45 = vsel %vm196_vm0, %v6840_v39, 0.0  ;;  %v9058_v25 = vld [vmem:[%s15099_s2 + $0x168] sm:$0xff] }
 0x959   :  { %6778 = vperm.xlu0 %8021, %v6312_v4   ;;  %6723 = vperm.xlu1 %8022, %v6301_v0   ;;  %v7003_v5 = vsel %vm196_vm0, %v6837_v40, 0.0  ;;  %v6987_v4 = vadd.f32 %v6986_v49, %v6985_v41  ;;  %v9057_v40 = vld [vmem:[%s15099_s2 + $0x170] sm:$0xff]  ;;  %v6954_v31 = vrot.slane %v6953_v17, 4  ;;  %v6313_v58 = vmul.f32 %v16401_v53, %v14438_v2 }
 0x95a   :  { %v14548_v38 = vpop.permute.xlu0 %6533  ;;  %v6842_v0 = vmul.f32 %v9057_v40, %v14552_v44  ;;  %v7004_v32 = vadd.f32 %v7003_v5, %v7002_v37  ;;  %v6302_v41 = vmul.f32 %v16402_v3, %v14342_v10  ;;  %v6939_v52 = vrot.slane %v6938_v13, 2  ;;  %v16404_v40 = vld [vmem:[#allocation123_spill] sm:$0xff] }
 0x95b   :  { %v6839_v62 = vmul.f32 %v9056_v7, %v14548_v38  ;;  %v6971_v39 = vrot.slane %v6970_v55, 4  ;;  %v6988_v37 = vrot.slane %v6987_v4, 4  ;;  %v6955_v8 = vadd.f32 %v6954_v31, %v6953_v17 }
 0x95c   :  { %v7005_v5 = vrot.slane %v7004_v32, 4  ;;  %v7283_v17 = vrot.slane %v14218_v1, %v12114_v61  ;;  %v7292_v31 = vrot.slane %v14237_v6, %v12123_v16  ;;  %v7321_v6 = vrot.slane %v14294_v27, %v12123_v16 }
 0x95d   :  { %v7012_v47 = vsel %vm196_vm0, %v6839_v62, 0.0  ;;  %6753 = vperm.xlu0 %8021, %v6307_v36   ;;  %6698 = vperm.xlu1 %8022, %v6296_v50   ;;  %v7018_v36 = vsel %vm196_vm0, %v6842_v0, 0.0  ;;  %v9059_v50 = vld [vmem:[%s15099_s2 + $0x178] sm:$0xff]  ;;  %v6989_v53 = vadd.f32 %v6988_v37, %v6987_v4  ;;  %v16406_v4 = vld [vmem:[#allocation125_spill] sm:$0xff]  ;;  %v7360_v27 = vrot.slane %v14419_v43, %v12130_v14 }
 0x95e   :  { %v7013_v46 = vadd.f32 %v7012_v47, %v7011_v56  ;;  %v14568_v48 = vpop.permute.xlu0 %6543  ;;  %v16403_v47 = vld [vmem:[#allocation106_spill] sm:$0xff]  ;;  %v7006_v3 = vadd.f32 %v7005_v5, %v7004_v32  ;;  %v7331_v32 = vrot.slane %v14312_v28, %v12130_v14  ;;  %v16407_v28 = vld [vmem:[#allocation29_spill] sm:$0xff]  ;;  %v7345_v43 = vrot.slane %v14470_v19, %v12118_v21 }
 0x95f   :  { %v6841_v29 = vmul.f32 %v9058_v25, %v14568_v48  ;;  %v6940_v25 = vadd.f32 %v6939_v52, %v6938_v13  ;;  %v16405_v13 = vld [vmem:[#allocation33_spill] sm:$0xff]  ;;  %v6303_v52 = vmul.f32 %v16406_v4, %v14342_v10  ;;  %v6990_v5 = vrot.slane %v6989_v53, 2 }
 0x960   :  { %v7015_v49 = vadd.f32 %v7014_v45, %v7013_v46  ;;  %v6308_v45 = vmul.f32 %v16403_v47, %v14364_v24  ;;  %v6297_v46 = vmul.f32 %v16404_v40, %v14322_v54  ;;  %v6956_v54 = vrot.slane %v6955_v8, 2 }
 0x961   :  { %v7016_v23 = vsel %vm196_vm0, %v6841_v29, 0.0  ;;  %6783 = vperm.xlu0 %8021, %v6313_v58   ;;  %6728 = vperm.xlu1 %8022, %v6302_v41   ;;  %v6972_v29 = vadd.f32 %v6971_v39, %v6970_v55  ;;  %v6314_v55 = vmul.f32 %v16405_v13, %v14438_v2  ;;  %v7312_v39 = vrot.slane %v14273_v33, %v12114_v61 }
 0x962   :  { %v7017_v7 = vadd.f32 %v7016_v23, %v7015_v49  ;;  %v14580_v62 = vpop.permute.xlu0 %6553  ;;  %v7302_v49 = vrot.slane %v14257_v26, %v12130_v14  ;;  %v6941_v37 = vrot.slane %v6940_v25, 1  ;;  %v7350_v10 = vrot.slane %v14356_v12, %v12123_v16 }
 0x963   :  { %v6843_v56 = vmul.f32 %v9059_v50, %v14580_v62  ;;  %v6973_v1 = vrot.slane %v6972_v29, 2  ;;  %v7287_v33 = vrot.slane %v14310_v20, %v12118_v21  ;;  %v6315_v47 = vmul.f32 %v16407_v28, %v14438_v2 }
 0x964   :  { %v7019_v0 = vadd.f32 %v7018_v36, %v7017_v7  ;;  %v7341_v36 = vrot.slane %v14324_v22, %v12114_v61  ;;  %v7007_v7 = vrot.slane %v7006_v3, 2  ;;  %v16408_v22 = vld [vmem:[#allocation126_spill] sm:$0xff]  ;;  %v6942_v40 = vadd.f32 %v6941_v37, %v6940_v25 }
 0x965   :  { %v7020_v58 = vsel %vm196_vm0, %v6843_v56, 0.0  ;;  %6758 = vperm.xlu0 %8021, %v6308_v45   ;;  %6703 = vperm.xlu1 %8022, %v6297_v46   ;;  %v6957_v56 = vadd.f32 %v6956_v54, %v6955_v8  ;;  %v6309_v45 = vmul.f32 %v16408_v22, %v14364_v24  ;;  %v6974_v46 = vadd.f32 %v6973_v1, %v6972_v29 }
 0x966   :  { %v7021_v41 = vadd.f32 %v7020_v58, %v7019_v0  ;;  %v7316_v12 = vrot.slane %v14350_v30, %v12118_v21  ;;  %v7370_v20 = vrot.slane %v14472_v63, %v12114_v61  ;;  %v6991_v58 = vadd.f32 %v6990_v5, %v6989_v53 }
 0x967   :  { %v7288_v2 = vsel %vm4402_vm3, %v7287_v33, %v7283_v17  ;;  %v7297_v24 = vrot.slane %v14316_v18, %v12126_v60  ;;  %v7008_v8 = vadd.f32 %v7007_v7, %v7006_v3  ;;  %v7374_v25 = vrot.slane %v14548_v38, %v12118_v21 }
 0x968   :  { %v7022_v23 = vrot.slane %v7021_v41, 4  ;;  %v7379_v30 = vrot.slane %v14511_v9, %v12123_v16  ;;  %v7389_v63 = vrot.slane %v14552_v44, %v12130_v14  ;;  %v6958_v29 = vrot.slane %v6957_v56, 1 }
 0x969   :  { %6788 = vperm.xlu0 %8021, %v6314_v55   ;;  %6733 = vperm.xlu1 %8022, %v6303_v52   ;;  %v7663_v19 = vsel %vm4869_vm9, %v6942_v40, %v14280_v35  ;;  %v7317_v17 = vsel %vm4402_vm3, %v7316_v12, %v7312_v39  ;;  %v7326_v18 = vrot.slane %v14398_v59, %v12126_v60  ;;  %v6992_v38 = vrot.slane %v6991_v58, 1 }
 0x96a   :  { %v7023_v50 = vadd.f32 %v7022_v23, %v7021_v41  ;;  %v6975_v41 = vrot.slane %v6974_v46, 1  ;;  %v7293_v3 = vsel %vm4409_vm4, %v7292_v31, %v7288_v2  ;;  %v7346_v54 = vsel %vm4402_vm3, %v7345_v43, %v7341_v36  ;;  %v9061_v2 = vld [vmem:[%s15099_s2 + $0x180] sm:$0xff] }
 0x96b   :  { %v7355_v9 = vrot.slane %v14493_v11, %v12126_v60  ;;  %v7298_v44 = vsel %vm4416_vm5, %v7297_v24, %v7293_v3  ;;  %v7009_v13 = vrot.slane %v7008_v8, 1  ;;  %v7375_v55 = vsel %vm4402_vm3, %v7374_v25, %v7370_v20  ;;  %v9063_v3 = vld [vmem:[%s15099_s2 + $0x190] sm:$0xff] }
 0x96c   :  { %v7024_v0 = vrot.slane %v7023_v50, 2  ;;  %v7384_v35 = vrot.slane %v14568_v48, %v12126_v60  ;;  %v6959_v4 = vadd.f32 %v6958_v29, %v6957_v56  ;;  %v7307_v59 = vrot.slane %v14334_v42, %v12133_v51 }
 0x96d   :  { %6793 = vperm.xlu0 %8021, %v6315_v47   ;;  %6763 = vperm.xlu1 %8022, %v6309_v45   ;;  %v7322_v31 = vsel %vm4409_vm4, %v7321_v6, %v7317_v17  ;;  %v6976_v39 = vadd.f32 %v6975_v41, %v6974_v46  ;;  %v7336_v11 = vrot.slane %v14430_v34, %v12133_v51  ;;  %v9062_v41 = vld [vmem:[%s15099_s2 + $0x198] sm:$0xff] }
 0x96e   :  { %v7025_v53 = vadd.f32 %v7024_v0, %v7023_v50  ;;  %v7327_v37 = vsel %vm4416_vm5, %v7326_v18, %v7322_v31  ;;  %v7351_v1 = vsel %vm4409_vm4, %v7350_v10, %v7346_v54  ;;  %v6993_v23 = vadd.f32 %v6992_v38, %v6991_v58  ;;  %v9064_v31 = vld [vmem:[%s15099_s2 + $0x1a8] sm:$0xff] }
 0x96f   :  { %v7356_v36 = vsel %vm4416_vm5, %v7355_v9, %v7351_v1  ;;  %v7365_v48 = vrot.slane %v14525_v15, %v12133_v51  ;;  %v7380_v5 = vsel %vm4409_vm4, %v7379_v30, %v7375_v55  ;;  %v7303_v42 = vsel %vm4423_vm6, %v7302_v49, %v7298_v44 }
 0x970   :  { %v7026_v52 = vrot.slane %v7025_v53, 1  ;;  %v7010_v6 = vadd.f32 %v7009_v13, %v7008_v8  ;;  %v7385_v33 = vsel %vm4416_vm5, %v7384_v35, %v7380_v5  ;;  %v7394_v34 = vrot.slane %v14580_v62, %v12133_v51 }
 0x971   :  { %v7664_v10 = vsel %vm4871_vm10, %v6959_v4, %v7663_v19  ;;  %v7308_v7 = vsel %vm4430_vm7, %v7307_v59, %v7303_v42  ;;  %v7332_v50 = vsel %vm4423_vm6, %v7331_v32, %v7327_v37  ;;  %v7361_v28 = vsel %vm4423_vm6, %v7360_v27, %v7356_v36  ;;  %v9065_v37 = vld [vmem:[%s15099_s2 + $0x1a0] sm:$0xff] }
 0x972   :  { %v7027_v15 = vadd.f32 %v7026_v52, %v7025_v53  ;;  %v7337_v56 = vsel %vm4430_vm7, %v7336_v11, %v7332_v50  ;;  %v7665_v26 = vsel %vm4873_vm11, %v6976_v39, %v7664_v10  ;;  %v7366_v49 = vsel %vm4430_vm7, %v7365_v48, %v7361_v28  ;;  %v9066_v10 = vld [vmem:[%s15099_s2 + $0x1b8] sm:$0xff] }
 0x973   :  { %v7390_v47 = vsel %vm4423_vm6, %v7389_v63, %v7385_v33  ;;  %v7666_v22 = vsel %vm4875_vm12, %v6993_v23, %v7665_v26  ;;  %v7631_v62 = vsel %vm4873_vm11, %v7308_v7, %v14308_v57  ;;  %v9060_v57 = vld [vmem:[%s15099_s2 + $0x188] sm:$0xff] }
 0x974   :  { %v7395_v45 = vsel %vm4430_vm7, %v7394_v34, %v7390_v47  ;;  %v7667_v32 = vsel %vm4877_vm13, %v7010_v6, %v7666_v22  ;;  %v7632_v40 = vsel %vm4875_vm12, %v7337_v56, %v7631_v62 }
 0x975   :  { %v7668_v46 = vsel %vm4879_vm14, %v7027_v15, %v7667_v32  ;;  %v7633_v27 = vsel %vm4877_vm13, %v7366_v49, %v7632_v40  ;;  %v9067_v15 = vld [vmem:[%s15099_s2 + $0x1b0] sm:$0xff]  ;;  %v9068_v40 = vld [vmem:[%s15099_s2 + $0x1c8] sm:$0xff] }
 0x976   :  { %7678 = vst.msk [vmem:[#allocation5] sm:$0xff] %vm196_vm0, %v7668_v46  ;;  %v7634_v12 = vsel %vm4879_vm14, %v7395_v45, %v7633_v27 }
 0x977   :  { %7644 = vst.msk [vmem:[#allocation6] sm:$0xff] %vm1989_vm2, %v7634_v12  ;;  %v9069_v12 = vld [vmem:[%s15099_s2 + $0x1c0] sm:$0xff] }
 0x98c   :  { %v6564_v0 = vpop.permute.xlu0 %6563  ;;  %v6559_v20 = vpop.permute.xlu1 %6558 }
 0x98d   :  { %v6845_v58 = vmul.f32 %v9060_v57, %v6564_v0  ;;  %v7403_v43 = vrot.slane %v6564_v0, %v12118_v21  ;;  %v6844_v24 = vmul.f32 %v9061_v2, %v6559_v20  ;;  %v7399_v8 = vrot.slane %v6559_v20, %v12114_v61 }
 0x98f   :  { %v7029_v25 = vsel %vm196_vm0, %v6845_v58, 0.0  ;;  %v7028_v30 = vsel %vm196_vm0, %v6844_v24, 0.0  ;;  %v7404_v63 = vsel %vm4402_vm3, %v7403_v43, %v7399_v8 }
 0x990   :  { %v7030_v29 = vadd.f32 %v7029_v25, %v7028_v30  ;;  %v6574_v53 = vpop.permute.xlu0 %6573  ;;  %v6569_v19 = vpop.permute.xlu1 %6568 }
 0x991   :  { %v6847_v17 = vmul.f32 %v9062_v41, %v6574_v53  ;;  %v7413_v18 = vrot.slane %v6574_v53, %v12126_v60  ;;  %v6846_v38 = vmul.f32 %v9063_v3, %v6569_v19  ;;  %v7408_v54 = vrot.slane %v6569_v19, %v12123_v16  ;;  %v9071_v19 = vld [vmem:[%s15099_s2 + $0x1d0] sm:$0xff] }
 0x993   :  { %v7031_v9 = vsel %vm196_vm0, %v6846_v38, 0.0  ;;  %v7409_v44 = vsel %vm4409_vm4, %v7408_v54, %v7404_v63  ;;  %v7033_v13 = vsel %vm196_vm0, %v6847_v17, 0.0  ;;  %v9070_v63 = vld [vmem:[%s15099_s2 + $0x1d8] sm:$0xff] }
 0x994   :  { %v7032_v55 = vadd.f32 %v7031_v9, %v7030_v29  ;;  %v6584_v35 = vpop.permute.xlu0 %6583  ;;  %v7414_v4 = vsel %vm4416_vm5, %v7413_v18, %v7409_v44  ;;  %v6579_v59 = vpop.permute.xlu1 %6578 }
 0x995   :  { %v6849_v52 = vmul.f32 %v9064_v31, %v6584_v35  ;;  %v7423_v39 = vrot.slane %v6584_v35, %v12133_v51  ;;  %v6848_v11 = vmul.f32 %v9065_v37, %v6579_v59  ;;  %v7418_v1 = vrot.slane %v6579_v59, %v12130_v14 }
 0x996   :  { %v7034_v23 = vadd.f32 %v7033_v13, %v7032_v55 }
 0x997   :  { %v7035_v36 = vsel %vm196_vm0, %v6848_v11, 0.0  ;;  %v7419_v48 = vsel %vm4423_vm6, %v7418_v1, %v7414_v4  ;;  %v7037_v5 = vsel %vm196_vm0, %v6849_v52, 0.0 }
 0x998   :  { %v7036_v42 = vadd.f32 %v7035_v36, %v7034_v23  ;;  %v7424_v6 = vsel %vm4430_vm7, %v7423_v39, %v7419_v48  ;;  %v6594_v33 = vpop.permute.xlu0 %6593  ;;  %v6589_v34 = vpop.permute.xlu1 %6588  ;;  %v9072_v23 = vld [vmem:[%s15099_s2 + $0x1e8] sm:$0xff]  ;;  %v9073_v48 = vld [vmem:[%s15099_s2 + $0x1e0] sm:$0xff] }
 0x999   :  { %v6851_v7 = vmul.f32 %v9066_v10, %v6594_v33  ;;  %v7432_v50 = vrot.slane %v6594_v33, %v12118_v21  ;;  %v6850_v56 = vmul.f32 %v9067_v15, %v6589_v34  ;;  %v7428_v28 = vrot.slane %v6589_v34, %v12114_v61  ;;  %v9074_v34 = vld [vmem:[%s15099_s2 + $0x1f0] sm:$0xff] }
 0x99a   :  { %v7038_v26 = vadd.f32 %v7037_v5, %v7036_v42 }
 0x99b   :  { %v7046_v49 = vsel %vm196_vm0, %v6851_v7, 0.0  ;;  %v7045_v47 = vsel %vm196_vm0, %v6850_v56, 0.0  ;;  %v7433_v22 = vsel %vm4402_vm3, %v7432_v50, %v7428_v28 }
 0x99c   :  { %v7047_v62 = vadd.f32 %v7046_v49, %v7045_v47  ;;  %v6604_v45 = vpop.permute.xlu0 %6603  ;;  %v6599_v32 = vpop.permute.xlu1 %6598  ;;  %v7039_v57 = vrot.slane %v7038_v26, 4 }
 0x99d   :  { %v6853_v46 = vmul.f32 %v9068_v40, %v6604_v45  ;;  %v7442_v27 = vrot.slane %v6604_v45, %v12126_v60  ;;  %v6852_v0 = vmul.f32 %v9069_v12, %v6599_v32  ;;  %v7437_v20 = vrot.slane %v6599_v32, %v12123_v16  ;;  %v9076_v45 = vld [vmem:[%s15099_s2 + $0x210] sm:$0xff]  ;;  %v9077_v12 = vld [vmem:[%s15099_s2 + $0x1f8] sm:$0xff] }
 0x99e   :  { %v7040_v18 = vadd.f32 %v7039_v57, %v7038_v26 }
 0x99f   :  { %v7048_v58 = vsel %vm196_vm0, %v6852_v0, 0.0  ;;  %v7438_v43 = vsel %vm4409_vm4, %v7437_v20, %v7433_v22  ;;  %v7050_v2 = vsel %vm196_vm0, %v6853_v46, 0.0  ;;  %v9075_v22 = vld [vmem:[%s15099_s2 + $0x218] sm:$0xff] }
 0x9a0   :  { %v7049_v24 = vadd.f32 %v7048_v58, %v7047_v62  ;;  %v6614_v8 = vpop.permute.xlu0 %6613  ;;  %v7443_v25 = vsel %vm4416_vm5, %v7442_v27, %v7438_v43  ;;  %v6609_v30 = vpop.permute.xlu1 %6608  ;;  %v7041_v59 = vrot.slane %v7040_v18, 2 }
 0x9a1   :  { %v6855_v29 = vmul.f32 %v9070_v63, %v6614_v8  ;;  %v7452_v53 = vrot.slane %v6614_v8, %v12133_v51  ;;  %v6854_v41 = vmul.f32 %v9071_v19, %v6609_v30  ;;  %v7447_v17 = vrot.slane %v6609_v30, %v12130_v14  ;;  %v9078_v8 = vld [vmem:[%s15099_s2 + $0x200] sm:$0xff] }
 0x9a2   :  { %v7051_v3 = vadd.f32 %v7050_v2, %v7049_v24  ;;  %v7042_v11 = vadd.f32 %v7041_v59, %v7040_v18  ;;  %v9079_v30 = vld [vmem:[%s15099_s2 + $0x220] sm:$0xff]  ;;  %v9082_v59 = vld [vmem:[%s15099_s2 + $0x208] sm:$0xff] }
 0x9a3   :  { %v7052_v38 = vsel %vm196_vm0, %v6854_v41, 0.0  ;;  %v7448_v54 = vsel %vm4423_vm6, %v7447_v17, %v7443_v25  ;;  %v7054_v35 = vsel %vm196_vm0, %v6855_v29, 0.0  ;;  %v9080_v17 = vld [vmem:[%s15099_s2 + $0x228] sm:$0xff] }
 0x9a4   :  { %v7053_v9 = vadd.f32 %v7052_v38, %v7051_v3  ;;  %v7453_v44 = vsel %vm4430_vm7, %v7452_v53, %v7448_v54  ;;  %v14753_v13 = vpop.permute.xlu0 %6623  ;;  %v14755_v55 = vpop.permute.xlu1 %6618  ;;  %v7043_v7 = vrot.slane %v7042_v11, 1 }
 0x9a5   :  { %v14759_v4 = vsel %vm4867_vm8, %v7453_v44, %v7424_v6  ;;  %v6857_v36 = vmul.f32 %v9072_v23, %v14753_v13  ;;  %v6856_v5 = vmul.f32 %v9073_v48, %v14755_v55  ;;  %v9081_v44 = vld [vmem:[%s15099_s2 + $0x230] sm:$0xff] }
 0x9a6   :  { %v7055_v31 = vadd.f32 %v7054_v35, %v7053_v9  ;;  %v7044_v40 = vadd.f32 %v7043_v7, %v7042_v11 }
 0x9a7   :  { %v7063_v15 = vsel %vm196_vm0, %v6857_v36, 0.0  ;;  %v7062_v56 = vsel %vm196_vm0, %v6856_v5, 0.0 }
 0x9a8   :  { %v7056_v52 = vrot.slane %v7055_v31, 4  ;;  %v14761_v39 = vpop.permute.xlu0 %6633  ;;  %v14763_v37 = vpop.permute.xlu1 %6628  ;;  %v7064_v27 = vadd.f32 %v7063_v15, %v7062_v56  ;;  %v7461_v15 = vrot.slane %v14753_v13, %v12118_v21  ;;  %v7457_v56 = vrot.slane %v14755_v55, %v12114_v61 }
 0x9a9   :  { %v6858_v10 = vmul.f32 %v9074_v34, %v14763_v37  ;;  %v6859_v0 = vmul.f32 %v9077_v12, %v14761_v39  ;;  %v9083_v34 = vld [vmem:[%s15099_s2 + $0x238] sm:$0xff] }
 0x9aa   :  { %v7057_v1 = vadd.f32 %v7056_v52, %v7055_v31  ;;  %v7462_v55 = vsel %vm4402_vm3, %v7461_v15, %v7457_v56 }
 0x9ab   :  { %v7065_v47 = vsel %vm196_vm0, %v6858_v10, 0.0  ;;  %v7067_v29 = vsel %vm196_vm0, %v6859_v0, 0.0 }
 0x9ac   :  { %v7058_v42 = vrot.slane %v7057_v1, 2  ;;  %v14773_v6 = vpop.permute.xlu0 %6643  ;;  %v14775_v33 = vpop.permute.xlu1 %6638  ;;  %v7066_v57 = vadd.f32 %v7065_v47, %v7064_v27  ;;  %v7466_v47 = vrot.slane %v14763_v37, %v12123_v16  ;;  %v7471_v37 = vrot.slane %v14761_v39, %v12126_v60 }
 0x9ad   :  { %v6860_v25 = vmul.f32 %v9078_v8, %v14775_v33  ;;  %v6861_v31 = vmul.f32 %v9082_v59, %v14773_v6  ;;  %v7481_v39 = vrot.slane %v14773_v6, %v12133_v51  ;;  %v9085_v6 = vld [vmem:[%s15099_s2 + $0x240] sm:$0xff] }
 0x9ae   :  { %v7059_v50 = vadd.f32 %v7058_v42, %v7057_v1  ;;  %v7068_v41 = vadd.f32 %v7067_v29, %v7066_v57 }
 0x9af   :  { %v7069_v54 = vsel %vm196_vm0, %v6860_v25, 0.0  ;;  %v7071_v5 = vsel %vm196_vm0, %v6861_v31, 0.0 }
 0x9b0   :  { %v7060_v28 = vrot.slane %v7059_v50, 1  ;;  %v14783_v26 = vpop.permute.xlu0 %6653  ;;  %v14785_v49 = vpop.permute.xlu1 %6648  ;;  %v7070_v52 = vadd.f32 %v7069_v54, %v7068_v41 }
 0x9b1   :  { %v6863_v62 = vmul.f32 %v9075_v22, %v14783_v26  ;;  %v6862_v32 = vmul.f32 %v9076_v45, %v14785_v49  ;;  %v7490_v22 = vrot.slane %v14783_v26, %v12118_v21  ;;  %v7467_v26 = vsel %vm4409_vm4, %v7466_v47, %v7462_v55  ;;  %v9089_v47 = vld [vmem:[%s15099_s2 + $0x2a0] sm:$0xff] }
 0x9b2   :  { %v7061_v46 = vadd.f32 %v7060_v28, %v7059_v50  ;;  %v7072_v42 = vadd.f32 %v7071_v5, %v7070_v52  ;;  %v7472_v25 = vsel %vm4416_vm5, %v7471_v37, %v7467_v26  ;;  %v9088_v5 = vld [vmem:[%s15099_s2 + $0x250] sm:$0xff] }
 0x9b3   :  { %v7080_v58 = vsel %vm196_vm0, %v6863_v62, 0.0  ;;  %v7079_v43 = vsel %vm196_vm0, %v6862_v32, 0.0  ;;  %v7486_v62 = vrot.slane %v14785_v49, %v12114_v61  ;;  %v7476_v49 = vrot.slane %v14775_v33, %v12130_v14 }
 0x9b4   :  { %v14801_v20 = vsel %vm4867_vm8, %v7061_v46, %v7044_v40  ;;  %v6664_v2 = vpop.permute.xlu0 %6663  ;;  %v6659_v24 = vpop.permute.xlu1 %6658  ;;  %v7081_v53 = vadd.f32 %v7080_v58, %v7079_v43  ;;  %v7073_v45 = vrot.slane %v7072_v42, 4 }
 0x9b5   :  { %v6864_v63 = vmul.f32 %v9079_v30, %v6659_v24  ;;  %v6865_v18 = vmul.f32 %v9080_v17, %v6664_v2  ;;  %v7495_v32 = vrot.slane %v6659_v24, %v12123_v16  ;;  %v7491_v12 = vsel %vm4402_vm3, %v7490_v22, %v7486_v62 }
 0x9b6   :  { %v7500_v0 = vrot.slane %v6664_v2, %v12126_v60  ;;  %v7074_v57 = vadd.f32 %v7073_v45, %v7072_v42  ;;  %v7477_v33 = vsel %vm4423_vm6, %v7476_v49, %v7472_v25  ;;  %v9090_v45 = vld [vmem:[%s15099_s2 + $0x280] sm:$0xff] }
 0x9b7   :  { %v7082_v19 = vsel %vm196_vm0, %v6864_v63, 0.0  ;;  %v7084_v11 = vsel %vm196_vm0, %v6865_v18, 0.0  ;;  %v7496_v58 = vsel %vm4409_vm4, %v7495_v32, %v7491_v12  ;;  %v9091_v12 = vld [vmem:[%s15099_s2 + $0x2a8] sm:$0xff] }
 0x9b8   :  { %v14817_v3 = vpop.permute.xlu0 %6673  ;;  %v6669_v38 = vpop.permute.xlu1 %6668  ;;  %v7083_v9 = vadd.f32 %v7082_v19, %v7081_v53  ;;  %v7501_v63 = vsel %vm4416_vm5, %v7500_v0, %v7496_v58  ;;  %v7075_v29 = vrot.slane %v7074_v57, 2  ;;  %v9084_v19 = vld [vmem:[%s15099_s2 + $0x248] sm:$0xff] }
 0x9b9   :  { %v6866_v35 = vmul.f32 %v9081_v44, %v6669_v38  ;;  %v6867_v10 = vmul.f32 %v9083_v34, %v14817_v3  ;;  %v7505_v43 = vrot.slane %v6669_v38, %v12130_v14  ;;  %v7510_v2 = vrot.slane %v14817_v3, %v12133_v51 }
 0x9ba   :  { %v7085_v36 = vadd.f32 %v7084_v11, %v7083_v9  ;;  %v7482_v38 = vsel %vm4430_vm7, %v7481_v39, %v7477_v33  ;;  %v9086_v9 = vld [vmem:[%s15099_s2 + $0x278] sm:$0xff]  ;;  %v14914_v34 = vadd.f32 %v7075_v29, %v7074_v57  ;;  %v9094_v29 = vld [vmem:[%s15099_s2 + $0x2b0] sm:$0xff] }
 0x9bb   :  { %v7086_v48 = vsel %vm196_vm0, %v6866_v35, 0.0  ;;  %v7088_v40 = vsel %vm196_vm0, %v6867_v10, 0.0  ;;  %v7506_v53 = vsel %vm4423_vm6, %v7505_v43, %v7501_v63  ;;  %v9087_v35 = vld [vmem:[%s15099_s2 + $0x270] sm:$0xff] }
 0x9bc   :  { %v14828_v1 = vpop.permute.xlu0 %6683  ;;  %v14830_v23 = vpop.permute.xlu1 %6678  ;;  %v7087_v28 = vadd.f32 %v7086_v48, %v7085_v36  ;;  %v7511_v11 = vsel %vm4430_vm7, %v7510_v2, %v7506_v53 }
 0x9bd   :  { %v6869_v41 = vmul.f32 %v9084_v19, %v14828_v1  ;;  %v6868_v17 = vmul.f32 %v9085_v6, %v14830_v23  ;;  %v7519_v31 = vrot.slane %v14828_v1, %v12118_v21  ;;  %v7515_v52 = vrot.slane %v14830_v23, %v12114_v61 }
 0x9be   :  { %v7089_v27 = vadd.f32 %v7088_v40, %v7087_v28  ;;  %v7636_v1 = vsel %vm4869_vm9, %v7482_v38, %v14759_v4 }
 0x9bf   :  { %v7097_v23 = vsel %vm196_vm0, %v6869_v41, 0.0  ;;  %v7096_v10 = vsel %vm196_vm0, %v6868_v17, 0.0  ;;  %v7520_v4 = vsel %vm4402_vm3, %v7519_v31, %v7515_v52  ;;  %v14938_v40 = vsel %vm4871_vm10, %v7511_v11, %v7636_v1  ;;  %v9095_v17 = vld [vmem:[%s15099_s2 + $0x258] sm:$0xff]  ;;  %v9097_v52 = vld [vmem:[%s15099_s2 + $0x288] sm:$0xff] }
 0x9c0   :  { %v14838_v7 = vpop.permute.xlu0 %6713  ;;  %v14840_v50 = vpop.permute.xlu1 %6708  ;;  %v7090_v30 = vrot.slane %v7089_v27, 4  ;;  %v7098_v55 = vadd.f32 %v7097_v23, %v7096_v10 }
 0x9c1   :  { %v6875_v44 = vmul.f32 %v9086_v9, %v14838_v7  ;;  %v6874_v59 = vmul.f32 %v9087_v35, %v14840_v50  ;;  %v7548_v36 = vrot.slane %v14838_v7, %v12118_v21  ;;  %v7544_v48 = vrot.slane %v14840_v50, %v12114_v61 }
 0x9c2   :  { %v7091_v54 = vadd.f32 %v7090_v30, %v7089_v27  ;;  %v9093_v30 = vld [vmem:[%s15099_s2 + $0x2d0] sm:$0xff] }
 0x9c3   :  { %v7114_v56 = vsel %vm196_vm0, %v6875_v44, 0.0  ;;  %v7113_v28 = vsel %vm196_vm0, %v6874_v59, 0.0  ;;  %v7549_v37 = vsel %vm4402_vm3, %v7548_v36, %v7544_v48  ;;  %v9096_v59 = vld [vmem:[%s15099_s2 + $0x2e0] sm:$0xff] }
 0x9c4   :  { %v14854_v46 = vpop.permute.xlu0 %6738  ;;  %v14856_v13 = vpop.permute.xlu1 %6688  ;;  %v7092_v50 = vrot.slane %v7091_v54, 2  ;;  %v7115_v49 = vadd.f32 %v7114_v56, %v7113_v28 }
 0x9c5   :  { %v6870_v42 = vmul.f32 %v9088_v5, %v14856_v13  ;;  %v6880_v22 = vmul.f32 %v9089_v47, %v14854_v46  ;;  %v7524_v62 = vrot.slane %v14856_v13, %v12123_v16  ;;  %v7573_v13 = vrot.slane %v14854_v46, %v12114_v61  ;;  %v9092_v46 = vld [vmem:[%s15099_s2 + $0x2d8] sm:$0xff] }
 0x9c6   :  { %v14954_v39 = vadd.f32 %v7092_v50, %v7091_v54 }
 0x9c7   :  { %v7099_v27 = vsel %vm196_vm0, %v6870_v42, 0.0  ;;  %v7525_v2 = vsel %vm4409_vm4, %v7524_v62, %v7520_v4  ;;  %v9098_v42 = vld [vmem:[%s15099_s2 + $0x2b8] sm:$0xff] }
 0x9c8   :  { %v14868_v24 = vpop.permute.xlu0 %6718  ;;  %v14870_v8 = vpop.permute.xlu1 %6743 }
 0x9c9   :  { %v6876_v32 = vmul.f32 %v9090_v45, %v14868_v24  ;;  %v7553_v26 = vrot.slane %v14868_v24, %v12123_v16  ;;  %v6881_v0 = vmul.f32 %v9091_v12, %v14870_v8  ;;  %v7577_v57 = vrot.slane %v14870_v8, %v12118_v21  ;;  %v9100_v12 = vld [vmem:[%s15099_s2 + $0x2e8] sm:$0xff] }
 0x9ca   :  { %v7130_v24 = vsel %vm196_vm0, %v6880_v22, 0.0  ;;  %v7100_v8 = vadd.f32 %v7099_v27, %v7098_v55 }
 0x9cb   :  { %v7116_v63 = vsel %vm196_vm0, %v6876_v32, 0.0  ;;  %v7554_v19 = vsel %vm4409_vm4, %v7553_v26, %v7549_v37  ;;  %v7131_v54 = vsel %vm196_vm0, %v6881_v0, 0.0  ;;  %v7578_v9 = vsel %vm4402_vm3, %v7577_v57, %v7573_v13 }
 0x9cc   :  { %v14888_v18 = vpop.permute.xlu0 %6773  ;;  %v14890_v3 = vpop.permute.xlu1 %6768  ;;  %v7117_v36 = vadd.f32 %v7116_v63, %v7115_v49  ;;  %v7132_v23 = vadd.f32 %v7131_v54, %v7130_v24  ;;  %v9102_v63 = vld [vmem:[%s15099_s2 + $0x2c0] sm:$0xff] }
 0x9cd   :  { %v6887_v25 = vmul.f32 %v9092_v46, %v14888_v18  ;;  %v6886_v33 = vmul.f32 %v9093_v30, %v14890_v3  ;;  %v7606_v41 = vrot.slane %v14888_v18, %v12118_v21  ;;  %v7602_v6 = vrot.slane %v14890_v3, %v12114_v61 }
 0x9cf   :  { %v7148_v61 = vsel %vm196_vm0, %v6887_v25, 0.0  ;;  %v7147_v3 = vsel %vm196_vm0, %v6886_v33, 0.0  ;;  %v7607_v10 = vsel %vm4402_vm3, %v7606_v41, %v7602_v6 }
 0x9d0   :  { %v14920_v15 = vpop.permute.xlu0 %6748  ;;  %v14922_v7 = vpop.permute.xlu1 %6693  ;;  %v7149_v56 = vadd.f32 %v7148_v61, %v7147_v3 }
 0x9d1   :  { %v6882_v53 = vmul.f32 %v9094_v29, %v14920_v15  ;;  %v6871_v38 = vmul.f32 %v9095_v17, %v14922_v7  ;;  %v7582_v44 = vrot.slane %v14920_v15, %v12123_v16  ;;  %v7529_v35 = vrot.slane %v14922_v7, %v12126_v60  ;;  %v9099_v7 = vld [vmem:[%s15099_s2 + $0x260] sm:$0xff]  ;;  %v9103_v29 = vld [vmem:[%s15099_s2 + $0x268] sm:$0xff] }
 0x9d3   :  { %v7133_v48 = vsel %vm196_vm0, %v6882_v53, 0.0  ;;  %v7101_v15 = vsel %vm196_vm0, %v6871_v38, 0.0  ;;  %v7583_v28 = vsel %vm4409_vm4, %v7582_v44, %v7578_v9 }
 0x9d4   :  { %v6779_v58 = vpop.permute.xlu0 %6778  ;;  %v14952_v43 = vpop.permute.xlu1 %6723  ;;  %v7134_v62 = vadd.f32 %v7133_v48, %v7132_v23  ;;  %v7102_v37 = vadd.f32 %v7101_v15, %v7100_v8  ;;  %v9105_v48 = vld [vmem:[%s15099_s2 + $0x298] sm:$0xff] }
 0x9d5   :  { %v6888_v31 = vmul.f32 %v9096_v59, %v6779_v58  ;;  %v6877_v11 = vmul.f32 %v9097_v52, %v14952_v43  ;;  %v7611_v5 = vrot.slane %v6779_v58, %v12123_v16  ;;  %v7530_v16 = vsel %vm4416_vm5, %v7529_v35, %v7525_v2  ;;  %v9101_v58 = vld [vmem:[%s15099_s2 + $0x290] sm:$0xff] }
 0x9d6   :  { %v7558_v47 = vrot.slane %v14952_v43, %v12126_v60  ;;  %v9104_v52 = vld [vmem:[%s15099_s2 + $0x2f0] sm:$0xff] }
 0x9d7   :  { %v7150_v45 = vsel %vm196_vm0, %v6888_v31, 0.0  ;;  %v7118_v32 = vsel %vm196_vm0, %v6877_v11, 0.0  ;;  %v7612_v27 = vsel %vm4409_vm4, %v7611_v5, %v7607_v10 }
 0x9d8   :  { %v6754_v21 = vpop.permute.xlu0 %6753  ;;  %v6699_v18 = vpop.permute.xlu1 %6698  ;;  %v7151_v24 = vadd.f32 %v7150_v45, %v7149_v56  ;;  %v7119_v46 = vadd.f32 %v7118_v32, %v7117_v36  ;;  %v7559_v25 = vsel %vm4416_vm5, %v7558_v47, %v7554_v19  ;;  %v9106_v45 = vld [vmem:[%s15099_s2 + $0x2f8] sm:$0xff] }
 0x9d9   :  { %v6883_v1 = vmul.f32 %v9098_v42, %v6754_v21  ;;  %v6872_v50 = vmul.f32 %v9099_v7, %v6699_v18  ;;  %v7587_v55 = vrot.slane %v6754_v21, %v12126_v60  ;;  %v7534_v49 = vrot.slane %v6699_v18, %v12130_v14 }
 0x9db   :  { %v7135_v26 = vsel %vm196_vm0, %v6883_v1, 0.0  ;;  %v7103_v13 = vsel %vm196_vm0, %v6872_v50, 0.0  ;;  %v7588_v2 = vsel %vm4416_vm5, %v7587_v55, %v7583_v28  ;;  %v7535_v17 = vsel %vm4423_vm6, %v7534_v49, %v7530_v16 }
 0x9dc   :  { %v6784_v22 = vpop.permute.xlu0 %6783  ;;  %v6729_v4 = vpop.permute.xlu1 %6728  ;;  %v7136_v6 = vadd.f32 %v7135_v26, %v7134_v62  ;;  %v7104_v19 = vadd.f32 %v7103_v13, %v7102_v37  ;;  %v9107_v37 = vld [vmem:[%s15099_s2 + $0x2c8] sm:$0xff]  ;;  %s9120_s2 = scalar_lea.vmem %s7698_s19, 256 }
 0x9dd   :  { %v6889_v0 = vmul.f32 %v9100_v12, %v6784_v22  ;;  %v7616_v57 = vrot.slane %v6784_v22, %v12126_v60  ;;  %v6878_v43 = vmul.f32 %v9101_v58, %v6729_v4  ;;  %v7563_v30 = vrot.slane %v6729_v4, %v12130_v14  ;;  %p9121_p5 = scmp.ne.s32.totalorder %s7698_s19, %s9120_s2  ;;  %p9126_p7 = scmp.lt.s32.totalorder %s9120_s2, %s9120_s2 }
 0x9df   :  { %v7152_v54 = vsel %vm196_vm0, %v6889_v0, 0.0  ;;  %v7617_v9 = vsel %vm4416_vm5, %v7616_v57, %v7612_v27  ;;  %v7120_v44 = vsel %vm196_vm0, %v6878_v43, 0.0  ;;  %v7564_v21 = vsel %vm4423_vm6, %v7563_v30, %v7559_v25  ;;  %p9127_p8 = por %p9126_p7, %p9125_p6 }
 0x9e0   :  { %v6759_v33 = vpop.permute.xlu0 %6758  ;;  %v6704_v8 = vpop.permute.xlu1 %6703  ;;  %v7153_v1 = vadd.f32 %v7152_v54, %v7151_v24  ;;  %v7121_v23 = vadd.f32 %v7120_v44, %v7119_v46 }
 0x9e1   :  { %v6884_v60 = vmul.f32 %v9102_v63, %v6759_v33  ;;  %v6873_v53 = vmul.f32 %v9103_v29, %v6704_v8  ;;  %v7539_v41 = vrot.slane %v6704_v8, %v12133_v51  ;;  %v7592_v38 = vrot.slane %v6759_v33, %v12130_v14  ;;  %p9128_p9 = pnand %p9127_p8, %p9121_p5 }
 0x9e2   :  { %v7077_v33 = vrot.slane %v14914_v34, 1 }
 0x9e3   :  { %v7105_v35 = vsel %vm196_vm0, %v6873_v53, 0.0  ;;  %v7137_v18 = vsel %vm196_vm0, %v6884_v60, 0.0  ;;  %v7540_v3 = vsel %vm4430_vm7, %v7539_v41, %v7535_v17  ;;  %v7593_v10 = vsel %vm4423_vm6, %v7592_v38, %v7588_v2 }
 0x9e4   :  { %v7106_v61 = vadd.f32 %v7105_v35, %v7104_v19  ;;  %v6789_v59 = vpop.permute.xlu0 %6788  ;;  %v6734_v31 = vpop.permute.xlu1 %6733  ;;  %v7138_v7 = vadd.f32 %v7137_v18, %v7136_v6  ;;  %v7638_v16 = vsel %vm4873_vm11, %v7540_v3, %v14938_v40  ;;  %v7094_v60 = vrot.slane %v14954_v39, 1 }
 0x9e5   :  { %v6890_v11 = vmul.f32 %v9104_v52, %v6789_v59  ;;  %v7621_v36 = vrot.slane %v6789_v59, %v12130_v14  ;;  %v6879_v5 = vmul.f32 %v9105_v48, %v6734_v31  ;;  %v7568_v42 = vrot.slane %v6734_v31, %v12133_v51 }
 0x9e6   :  { %v7107_v15 = vrot.slane %v7106_v61, 4 }
 0x9e7   :  { %v7154_v50 = vsel %vm196_vm0, %v6890_v11, 0.0  ;;  %v7122_v56 = vsel %vm196_vm0, %v6879_v5, 0.0  ;;  %v7569_v28 = vsel %vm4430_vm7, %v7568_v42, %v7564_v21  ;;  %v7622_v47 = vsel %vm4423_vm6, %v7621_v36, %v7617_v9 }
 0x9e8   :  { %v7108_v14 = vadd.f32 %v7107_v15, %v7106_v61  ;;  %v7123_v22 = vadd.f32 %v7122_v56, %v7121_v23  ;;  %v6794_v4 = vpop.permute.xlu0 %6793  ;;  %v6764_v62 = vpop.permute.xlu1 %6763  ;;  %v7155_v49 = vadd.f32 %v7154_v50, %v7153_v1  ;;  %v7639_v12 = vsel %vm4875_vm12, %v7569_v28, %v7638_v16 }
 0x9e9   :  { %v6891_v32 = vmul.f32 %v9106_v45, %v6794_v4  ;;  %v7626_v55 = vrot.slane %v6794_v4, %v12133_v51  ;;  %v6885_v27 = vmul.f32 %v9107_v37, %v6764_v62  ;;  %v7597_v26 = vrot.slane %v6764_v62, %v12133_v51 }
 0x9ea   :  { %v7109_v40 = vrot.slane %v7108_v14, 2  ;;  %v7124_v13 = vrot.slane %v7123_v22, 4 }
 0x9eb   :  { %v7156_v0 = vsel %vm196_vm0, %v6891_v32, 0.0  ;;  %v7627_v57 = vsel %vm4430_vm7, %v7626_v55, %v7622_v47  ;;  %v7139_v58 = vsel %vm196_vm0, %v6885_v27, 0.0  ;;  %v7598_v43 = vsel %vm4430_vm7, %v7597_v26, %v7593_v10 }
 0x9ec   :  { %v7110_v24 = vadd.f32 %v7109_v40, %v7108_v14  ;;  %v7125_v46 = vadd.f32 %v7124_v13, %v7123_v22  ;;  %v7157_v25 = vadd.f32 %v7156_v0, %v7155_v49  ;;  %v7140_v30 = vadd.f32 %v7139_v58, %v7138_v7 }
 0x9ed   :  { %v7640_v51 = vsel %vm4877_vm13, %v7598_v43, %v7639_v12 }
 0x9ee   :  { %v7126_v8 = vrot.slane %v7125_v46, 2  ;;  %v7158_v2 = vrot.slane %v7157_v25, 4  ;;  %v7141_v63 = vrot.slane %v7140_v30, 4  ;;  %v7641_v29 = vsel %vm4879_vm14, %v7627_v57, %v7640_v51 }
 0x9ef   :  { %v7111_v53 = vrot.slane %v7110_v24, 1  ;;  %7645 = vst.msk [vmem:[#allocation6 + $0x8] sm:$0xff] %vm1989_vm2, %v7641_v29 }
 0x9f0   :  { %v7127_v41 = vadd.f32 %v7126_v8, %v7125_v46  ;;  %v7159_v6 = vadd.f32 %v7158_v2, %v7157_v25  ;;  %v7142_v19 = vadd.f32 %v7141_v63, %v7140_v30 }
 0x9f1   :  { %9131 = shalt.err (!%p9128_p9)
}
 0x9f2   :  { %s9171_s20 = smov 128   ;;  %s9172_s1 = smov 8   ;;  %v7078_v17 = vadd.f32 %v7077_v33, %v14914_v34  ;;  %v7128_v38 = vrot.slane %v7127_v41, 1  ;;  %v7160_v54 = vrot.slane %v7159_v6, 2  ;;  %v7143_v9 = vrot.slane %v7142_v19, 2 }
 0x9f3   :  { %7703 = dma.vmem_to_hbm [thread:$0]  %s7698_s19, 256, %s15103_s6, [#allocation7], %s9171_s20, %s9171_s20, %s9172_s1   ;;  %v7095_v44 = vadd.f32 %v7094_v60, %v14954_v39  ;;  %v7112_v35 = vadd.f32 %v7111_v53, %v7110_v24 }
 0x9f4   :  { %v7161_v21 = vadd.f32 %v7160_v54, %v7159_v6  ;;  %v7144_v18 = vadd.f32 %v7143_v9, %v7142_v19  ;;  %v7129_v61 = vadd.f32 %v7128_v38, %v7127_v41  ;;  %v7670_v3 = vsel %vm4869_vm9, %v7078_v17, %v14801_v20  ;;  %s9173_s23 = smov [#allocation5]  }
 0x9f5   :  { %v7671_v52 = vsel %vm4871_vm10, %v7095_v44, %v7670_v3  ;;  %s7685_s6 = sshll.u32 %s9173_s23, 4  ;;  %s7686_s6 = int_to_ptr.vmem [resolvable:$true] %s7685_s6 }
 0x9f6   :  { %v7162_v59 = vrot.slane %v7161_v21, 1  ;;  %v7145_v31 = vrot.slane %v7144_v18, 1  ;;  %v7672_v36 = vsel %vm4873_vm11, %v7112_v35, %v7671_v52  ;;  %s9140_s24 = scalar_lea.vmem %s7686_s6, 256  ;;  %p9145_p11 = scmp.lt.s32.totalorder %s7686_s6, %s7686_s6 }
 0x9f7   :  { %v7673_v48 = vsel %vm4875_vm12, %v7129_v61, %v7672_v36  ;;  %p9141_p10 = scmp.ne.s32.totalorder %s7686_s6, %s9140_s24  ;;  %p9146_p12 = scmp.lt.s32.totalorder %s9140_s24, %s9140_s24 }
 0x9f8   :  { %v7163_v11 = vadd.f32 %v7162_v59, %v7161_v21  ;;  %v7146_v34 = vadd.f32 %v7145_v31, %v7144_v18 }
 0x9f9   :  { %p9147_p13 = por %p9146_p12, %p9145_p11 }
 0x9fa   :  { %v7674_v39 = vsel %vm4877_vm13, %v7146_v34, %v7673_v48 }
 0x9fb   :  { %v7675_v5 = vsel %vm4879_vm14, %v7163_v11, %v7674_v39  ;;  %p9148_p0 = pnand %p9147_p13, %p9141_p10 }
 0x9fc   :  { %7679 = vst.msk [vmem:[#allocation5 + $0x8] sm:$0xff] %vm196_vm0, %v7675_v5 }
 0x9fd   :  { %9151 = shalt.err (!%p9148_p0)
}
 0x9fe   :  { %7691 = dma.vmem_to_hbm [thread:$0]  %s7686_s6, 256, %s15102_s5, [#allocation3], %s9171_s20, %s9171_s20, %s9172_s1  }
 0x9ff   :  { %9162 = dma.done.wait [#allocation3], 256  }
 0xa00   :  { %9163 = vsyncadd [#allocation3], 4294967040 }
 0xa01   :  { %9164 = dma.done.wait [#allocation7], 256  }
 0xa02   :  { %9165 = vsyncadd [#allocation7], 4294967040 }
 0xa03   :  { %7710 = vsyncpa [#allocation3], 1 }
 0xa04   :  { %7711 = vsyncpa [#allocation7], 1 }
 0xa05   :  { %7712 = vsyncpa [#allocation4], 1 }

</bundles_post_ra>
